<compile_context>
chip_gen: v7x
topology: tpu7x:2x2x1
jax: 0.10.0
libtpu: 0.0.40
codegen_flags: <defaults>
</compile_context>

<pallas_src>
import functools

import jax
import jax.numpy as jnp
from jax import lax
from jax.experimental import pallas as pl
from jax.experimental.pallas import tpu as pltpu


# ----------------------------- Pallas kernels ------------------------------


def _matmul_bias_kernel(x_ref, w_ref, b_ref, o_ref, *, relu):
    """Single-K-tile matmul: bf16 inputs, f32 MXU accumulate, fused bias(+ReLU)."""
    y = jnp.dot(x_ref[...], w_ref[...], preferred_element_type=jnp.float32)
    y = y + b_ref[...]
    if relu:
        y = jnp.maximum(y, 0.0)
    o_ref[...] = y.astype(o_ref.dtype)


def _matmul_bias_relu_l2norm_kernel(x_ref, w_ref, b_ref, s_ref, o_ref, n_ref):
    """conv2 matmul with ReLU epilogue plus fused SSD L2Norm second output.

    Rows are (n, h, w) spatial locations, lanes are exactly the c_out channels
    (no channel padding), so the L2 normalization is a per-row lane reduction.
    """
    y = jnp.dot(x_ref[...], w_ref[...], preferred_element_type=jnp.float32)
    y = jnp.maximum(y + b_ref[...], 0.0)
    o_ref[...] = y.astype(o_ref.dtype)
    ss = jnp.sum(y * y, axis=-1, keepdims=True)
    inv = lax.rsqrt(ss + 1e-10)                       # single EUP op
    n_ref[...] = ((y * inv) * s_ref[...]).astype(n_ref.dtype)


def _matmul_bias_relu_then_1x1_kernel(x_ref, w1_ref, b1_ref, w2_ref, b2_ref,
                                      o1_ref, o2_ref):
    """3x3 conv matmul (+bias+ReLU) with a fused chained 1x1 reduce conv epilogue.

    Output 1 is the 3x3 conv feature (SSD feature level), output 2 is the 1x1
    reduce conv applied pointwise to it (input of the next extra layer).
    """
    y1 = jnp.dot(x_ref[...], w1_ref[...], preferred_element_type=jnp.float32)
    y1 = jnp.maximum(y1 + b1_ref[...], 0.0)
    o1_ref[...] = y1.astype(o1_ref.dtype)
    y2 = jnp.dot(y1.astype(jnp.bfloat16), w2_ref[...],
                 preferred_element_type=jnp.float32)
    y2 = jnp.maximum(y2 + b2_ref[...], 0.0)
    o2_ref[...] = y2.astype(o2_ref.dtype)


# ------------------------------- wrappers -----------------------------------


def _round_up(x, m):
    return (x + m - 1) // m * m


def _num_tensorcores():
    """2 TensorCores per chip on v7x (megacore grid sharding), else 1."""
    try:
        kind = jax.devices()[0].device_kind.lower()
    except Exception:  # pragma: no cover - defensive
        return 1
    return 2 if "v7" in kind else 1


_NUM_TC = _num_tensorcores()


def _m_tiling(M):
    """Return (Mp, TM).

    Single full-extent M block on 1-TC chips (grid steps are pure overhead on a
    serial grid); exactly two M blocks on v7x megacore when M is large enough.
    """
    if _NUM_TC >= 2 and M >= 256:
        Mp = _round_up(M, 16)       # TM = Mp/2 must be a multiple of 8
        return Mp, Mp // 2
    return M, M                      # full-extent block, no M padding at all


_CPARAMS = pltpu.CompilerParams(dimension_semantics=("parallel",))


def _pad_cols(x_cols, Mp, Kp):
    M, K = x_cols.shape
    if Mp == M and Kp == K:
        return x_cols
    return jnp.pad(x_cols, ((0, Mp - M), (0, Kp - K)))


def matmul_bias(x_cols, cw, *, relu, out_dtype, scale=None):
    """x_cols:(M,K) bf16 patches, cw["w"]:(Kp,N) bf16, cw["b"]:(1,N) f32.

    Single-K-tile, single-N-tile matmul with fused bias (+ReLU).  If `scale` is
    given, also returns the fused SSD-L2Norm output.
    """
    M, _ = x_cols.shape
    Kp, Np = cw["w"].shape
    Mp, TM = _m_tiling(M)
    xp = _pad_cols(x_cols, Mp, Kp)
    grid = (Mp // TM,)
    base_specs = [
        pl.BlockSpec((TM, Kp), lambda i: (i, 0)),
        pl.BlockSpec((Kp, Np), lambda i: (0, 0)),
        pl.BlockSpec((1, Np), lambda i: (0, 0)),
    ]

    if scale is None:
        out = pl.pallas_call(
            functools.partial(_matmul_bias_kernel, relu=relu),
            out_shape=jax.ShapeDtypeStruct((Mp, Np), out_dtype),
            grid_spec=pltpu.PrefetchScalarGridSpec(
                num_scalar_prefetch=0, grid=grid,
                in_specs=base_specs,
                out_specs=pl.BlockSpec((TM, Np), lambda i: (i, 0))),
            compiler_params=_CPARAMS,
        )(xp, cw["w"], cw["b"])
        return out[:M] if Mp > M else out

    out, normed = pl.pallas_call(
        _matmul_bias_relu_l2norm_kernel,
        out_shape=(jax.ShapeDtypeStruct((Mp, Np), out_dtype),
                   jax.ShapeDtypeStruct((Mp, Np), out_dtype)),
        grid_spec=pltpu.PrefetchScalarGridSpec(
            num_scalar_prefetch=0, grid=grid,
            in_specs=base_specs + [pl.BlockSpec((1, Np), lambda i: (0, 0))],
            out_specs=(pl.BlockSpec((TM, Np), lambda i: (i, 0)),
                       pl.BlockSpec((TM, Np), lambda i: (i, 0)))),
        compiler_params=_CPARAMS,
    )(xp, cw["w"], cw["b"], scale)
    if Mp > M:
        out, normed = out[:M], normed[:M]
    return out, normed


def fused_conv_then_1x1(x_cols, cw1, cw2, out_dtype=jnp.bfloat16):
    """3x3 conv matmul fused with the following 1x1 reduce conv (two outputs)."""
    M, _ = x_cols.shape
    Kp1, N1 = cw1["w"].shape
    K2, N2 = cw2["w"].shape                     # K2 == N1 (pointwise on output 1)
    Mp, TM = _m_tiling(M)
    xp = _pad_cols(x_cols, Mp, Kp1)
    grid = (Mp // TM,)
    o1, o2 = pl.pallas_call(
        _matmul_bias_relu_then_1x1_kernel,
        out_shape=(jax.ShapeDtypeStruct((Mp, N1), out_dtype),
                   jax.ShapeDtypeStruct((Mp, N2), out_dtype)),
        grid_spec=pltpu.PrefetchScalarGridSpec(
            num_scalar_prefetch=0, grid=grid,
            in_specs=[
                pl.BlockSpec((TM, Kp1), lambda i: (i, 0)),
                pl.BlockSpec((Kp1, N1), lambda i: (0, 0)),
                pl.BlockSpec((1, N1), lambda i: (0, 0)),
                pl.BlockSpec((K2, N2), lambda i: (0, 0)),
                pl.BlockSpec((1, N2), lambda i: (0, 0)),
            ],
            out_specs=(pl.BlockSpec((TM, N1), lambda i: (i, 0)),
                       pl.BlockSpec((TM, N2), lambda i: (i, 0)))),
        compiler_params=_CPARAMS,
    )(xp, cw1["w"], cw1["b"], cw2["w"], cw2["b"])
    if Mp > M:
        o1, o2 = o1[:M], o2[:M]
    return o1, o2


def im2col_nhwc(x, kh, kw, stride, pad):
    """x: (N,H,W,C) -> ((N*Ho*Wo, kh*kw*C), Ho, Wo).

    K ordering is (i,j)-major / channel-minor (lane-contiguous concatenate, no
    element-interleaving stack); the weight rows are permuted to match once in
    _prep_conv.
    """
    N, H, W, C = x.shape
    xp = jnp.pad(x, ((0, 0), (pad, pad), (pad, pad), (0, 0)))
    Ho = (H + 2 * pad - kh) // stride + 1
    Wo = (W + 2 * pad - kw) // stride + 1
    cols = [xp[:, i:i + stride * Ho:stride, j:j + stride * Wo:stride, :]
            for i in range(kh) for j in range(kw)]
    patches = jnp.concatenate(cols, axis=-1)          # (N, Ho, Wo, kh*kw*C)
    return patches.reshape(N * Ho * Wo, kh * kw * C), Ho, Wo


def conv2d_nhwc(x, cw, stride=1, pad=0, relu=False, out_dtype=jnp.bfloat16):
    """NHWC conv (PyTorch semantics) via im2col + Pallas matmul; returns NHWC."""
    N, H, W, C = x.shape
    kh, kw = cw["kh"], cw["kw"]
    if kh == 1 and kw == 1 and pad == 0 and stride == 1:
        cols, Ho, Wo = x.reshape(N * H * W, C), H, W   # 1x1 conv: no im2col
    else:
        cols, Ho, Wo = im2col_nhwc(x, kh, kw, stride, pad)
    out = matmul_bias(cols, cw, relu=relu, out_dtype=out_dtype)
    return out.reshape(N, Ho, Wo, cw["c_out"])


def maxpool2x2_nhwc(x):
    """2x2 stride-2 max pool on NHWC (glue; windows trivially small)."""
    N, H, W, C = x.shape
    x = x.reshape(N, H // 2, 2, W // 2, 2, C)
    return jnp.max(jnp.max(x, axis=4), axis=2)


# ---------------------- parameter init (deterministic) ----------------------


def _init_conv(key, c_out, c_in, kh, kw):
    kw_, kb_ = jax.random.split(key)
    w = jax.random.normal(kw_, (c_out, c_in, kh, kw), jnp.float32) * 0.05
    b = jax.random.normal(kb_, (c_out,), jnp.float32) * 0.01
    return w, b


def build_params(key, num_classes=5, num_anchors=(4, 4, 4, 4)):
    keys = jax.random.split(key, 32)
    p = {}
    # mini SSD-VGG backbone
    p["conv1"] = _init_conv(keys[0], 8, 3, 3, 3)
    p["conv2"] = _init_conv(keys[1], 16, 8, 3, 3)       # conv4_3-like feature
    p["conv3"] = _init_conv(keys[2], 32, 16, 3, 3)      # fc7-like feature
    # extra layers (1x1 reduce then 3x3 stride-2), as in extra_setting
    p["extra1a"] = _init_conv(keys[3], 16, 32, 1, 1)
    p["extra1b"] = _init_conv(keys[4], 32, 16, 3, 3)
    p["extra2a"] = _init_conv(keys[5], 16, 32, 1, 1)
    p["extra2b"] = _init_conv(keys[6], 32, 16, 3, 3)
    # L2Norm scale (SSD initializes it to 20)
    p["l2norm_scale"] = jnp.full((16,), 20.0, jnp.float32)
    # SSD head: one 3x3 cls conv and one 3x3 reg conv per feature level
    feat_channels = (16, 32, 32, 32)
    p["cls"] = [
        _init_conv(keys[8 + i], num_anchors[i] * num_classes, c, 3, 3)
        for i, c in enumerate(feat_channels)
    ]
    p["reg"] = [
        _init_conv(keys[16 + i], num_anchors[i] * 4, c, 3, 3)
        for i, c in enumerate(feat_channels)
    ]
    return p


def _prep_conv(w, b):
    """PyTorch (C_out,C_in,kh,kw) conv weight -> bf16 (Kp, C_out) matmul weight.

    Rows are permuted to (i,j)-major / channel-minor to match im2col_nhwc's
    concatenate ordering; K is rounded up only to the bf16 packing tile (16),
    and the output-channel (lane) dim is NOT padded.
    """
    c_out, c_in, kh, kw = w.shape
    k = c_in * kh * kw
    kp = _round_up(k, 16)
    w_mat = jnp.transpose(w, (0, 2, 3, 1)).reshape(c_out, k).T     # (K, C_out)
    w_pad = jnp.pad(w_mat, ((0, kp - k), (0, 0))).astype(jnp.bfloat16)
    b_row = b.reshape(1, c_out).astype(jnp.float32)
    return dict(w=w_pad, b=b_row, c_out=c_out, kh=kh, kw=kw)


def prepare_params(p, num_classes=5, num_anchors=(4, 4, 4, 4)):
    """One-time prep: permute/pad/cast weights, fuse cls+reg heads, batch lvls 1-3."""
    q = {}
    for name in ("conv1", "conv2", "conv3",
                 "extra1a", "extra1b", "extra2a", "extra2b"):
        q[name] = _prep_conv(*p[name])
    q["l2norm_scale"] = p["l2norm_scale"].reshape(1, -1).astype(jnp.float32)
    # fused cls+reg head, level 0 (feat channels = 16)
    w0 = jnp.concatenate([p["cls"][0][0], p["reg"][0][0]], axis=0)
    b0 = jnp.concatenate([p["cls"][0][1], p["reg"][0][1]], axis=0)
    q["head0"] = _prep_conv(w0, b0)
    # fused cls+reg heads, levels 1-3 (all feat channels = 32, same K=288):
    # concatenated along output channels into one (K, 3*36) weight matrix.
    ws, bs = [], []
    for lvl in (1, 2, 3):
        ws.append(jnp.concatenate([p["cls"][lvl][0], p["reg"][lvl][0]], axis=0))
        bs.append(jnp.concatenate([p["cls"][lvl][1], p["reg"][lvl][1]], axis=0))
    q["head123"] = _prep_conv(jnp.concatenate(ws, axis=0),
                              jnp.concatenate(bs, axis=0))
    q["nc_cls"] = num_anchors[0] * num_classes   # 20
    q["nc_reg"] = num_anchors[0] * 4             # 16
    return q


# ------------------------------ forward pass --------------------------------


def ssd_forward(img, q):
    """extract_feat + bbox_head forward: returns (cls_scores, bbox_preds) in NCHW."""
    ncls, nreg = q["nc_cls"], q["nc_reg"]
    nhead = ncls + nreg

    # NCHW -> NHWC and bf16, once; activations stay bf16 NHWC end-to-end.
    x = jnp.transpose(img, (0, 2, 3, 1)).astype(jnp.bfloat16)
    N = x.shape[0]

    # backbone
    x = conv2d_nhwc(x, q["conv1"], stride=1, pad=1, relu=True)
    x = maxpool2x2_nhwc(x)
    # conv2 with fused L2Norm epilogue: feat0 = L2Norm(relu(conv2(x)))
    cols2, Ho2, Wo2 = im2col_nhwc(x, 3, 3, 1, 1)
    out2, feat0_flat = matmul_bias(cols2, q["conv2"], relu=True,
                                   out_dtype=jnp.bfloat16,
                                   scale=q["l2norm_scale"])
    x = out2.reshape(N, Ho2, Wo2, q["conv2"]["c_out"])
    feat0 = feat0_flat.reshape(N, Ho2, Wo2, q["conv2"]["c_out"])
    x = maxpool2x2_nhwc(x)

    # conv3 (3x3) fused with extra1a (1x1 reduce): two outputs in one call
    cols3, Ho3, Wo3 = im2col_nhwc(x, 3, 3, 1, 1)
    feat1_flat, red1_flat = fused_conv_then_1x1(cols3, q["conv3"], q["extra1a"])
    feat1 = feat1_flat.reshape(N, Ho3, Wo3, q["conv3"]["c_out"])
    red1 = red1_flat.reshape(N, Ho3, Wo3, q["extra1a"]["c_out"])

    # extra1b (3x3 stride-2) fused with extra2a (1x1 reduce)
    cols1b, Hob, Wob = im2col_nhwc(red1, 3, 3, 2, 1)
    feat2_flat, red2_flat = fused_conv_then_1x1(cols1b, q["extra1b"],
                                                q["extra2a"])
    feat2 = feat2_flat.reshape(N, Hob, Wob, q["extra1b"]["c_out"])
    red2 = red2_flat.reshape(N, Hob, Wob, q["extra2a"]["c_out"])

    # extra2b (3x3 stride-2)
    feat3 = conv2d_nhwc(red2, q["extra2b"], stride=2, pad=1, relu=True)
    # TODO(synk): use_dropout/dropout_rate branch of SSDVGG omitted (identity at inference).

    # SSD head, level 0: one fused cls+reg matmul (f32 outputs)
    cols0, H0, W0 = im2col_nhwc(feat0, 3, 3, 1, 1)
    out0 = matmul_bias(cols0, q["head0"], relu=False, out_dtype=jnp.float32)
    cls0 = out0[:, :ncls].reshape(N, H0, W0, ncls)
    reg0 = out0[:, ncls:nhead].reshape(N, H0, W0, nreg)

    # SSD head, levels 1-3: batched into one matmul (shared K=288); per-level
    # weights live in disjoint output-channel blocks, sliced out afterwards.
    cols_l, dims_l = [], []
    for f in (feat1, feat2, feat3):
        c, h, w = im2col_nhwc(f, 3, 3, 1, 1)
        cols_l.append(c)
        dims_l.append((c.shape[0], h, w))
    out123 = matmul_bias(jnp.concatenate(cols_l, axis=0), q["head123"],
                         relu=False, out_dtype=jnp.float32)
    cls_scores, bbox_preds = [cls0], [reg0]
    row = 0
    for lvl, (m, h, w) in enumerate(dims_l):
        block = out123[row:row + m, lvl * nhead:(lvl + 1) * nhead]
        cls_scores.append(block[:, :ncls].reshape(N, h, w, ncls))
        bbox_preds.append(block[:, ncls:nhead].reshape(N, h, w, nreg))
        row += m

    # back to PyTorch NCHW layout for the module outputs
    to_nchw = lambda t: jnp.transpose(t, (0, 3, 1, 2))
    cls_scores = [to_nchw(t) for t in cls_scores]
    bbox_preds = [to_nchw(t) for t in bbox_preds]
    # TODO(synk): loss() / get_bboxes() (assigner, sampler, NMS, bbox2result) not implemented.
    return cls_scores, bbox_preds


# ---------------------------------- main -------------------------------------


if __name__ == "__main__":
    key = jax.random.PRNGKey(0)
    k_param, k_img = jax.random.split(key)
    raw_params = build_params(k_param)
    params = prepare_params(raw_params)
    img = jax.random.normal(k_img, (2, 3, 32, 32), jnp.float32)  # NCHW

    fwd = jax.jit(lambda im: ssd_forward(im, params))
    cls_scores, bbox_preds = fwd(img)
    for t in cls_scores + bbox_preds:
        jax.block_until_ready(t)

    # expected shapes: cls (2, 20, s, s) and reg (2, 16, s, s) for s in 16,8,4,2
    assert [c.shape for c in cls_scores] == [
        (2, 20, 16, 16), (2, 20, 8, 8), (2, 20, 4, 4), (2, 20, 2, 2)]
    assert [b.shape for b in bbox_preds] == [
        (2, 16, 16, 16), (2, 16, 8, 8), (2, 16, 4, 4), (2, 16, 2, 2)]
    print("KERNEL_OK")
</pallas_src>

<mosaic_0001>
module attributes {stable_mosaic.version = 11 : i64} {
  func.func @_matmul_bias_kernel(%arg0: i32, %arg1: memref<2048x32xbf16, #tpu.memory_space<vmem>>, %arg2: memref<32x8xbf16, #tpu.memory_space<vmem>>, %arg3: memref<1x8xf32, #tpu.memory_space<vmem>>, %arg4: memref<2048x8xbf16, #tpu.memory_space<vmem>>) attributes {dimension_semantics = [#tpu.dimension_semantics<parallel>], iteration_bounds = array<i64: 1>, scalar_prefetch = 0 : i64, scratch_operands = 0 : i64, tpu.core_type = #tpu.core_type<tc>, window_params = [{transform_indices = @transform_0, window_bounds = array<i64: 2048, 32>}, {pipeline_mode = #tpu.pipeline_mode<synchronous>, transform_indices = @transform_1, window_bounds = array<i64: 32, 8>}, {pipeline_mode = #tpu.pipeline_mode<synchronous>, transform_indices = @transform_2, window_bounds = array<i64: 1, 8>}, {transform_indices = @transform_3, window_bounds = array<i64: 2048, 8>}]} {
    %c0 = arith.constant 0 : index
    %c0_0 = arith.constant 0 : index
    %0 = vector.load %arg1[%c0, %c0_0] : memref<2048x32xbf16, #tpu.memory_space<vmem>>, vector<2048x32xbf16>
    %c0_1 = arith.constant 0 : index
    %c0_2 = arith.constant 0 : index
    %1 = vector.load %arg2[%c0_1, %c0_2] : memref<32x8xbf16, #tpu.memory_space<vmem>>, vector<32x8xbf16>
    %cst = arith.constant dense<0.000000e+00> : vector<2048x8xf32>
    %2 = tpu.matmul %0, %1, %cst {dimension_numbers = #tpu.dot_dimension_numbers<[1], [0], [0], [1], [0, 0, 1, 1], [], []>} : vector<2048x32xbf16>, vector<32x8xbf16>, vector<2048x8xf32> -> vector<2048x8xf32>
    %c0_3 = arith.constant 0 : index
    %c0_4 = arith.constant 0 : index
    %3 = vector.load %arg3[%c0_3, %c0_4] : memref<1x8xf32, #tpu.memory_space<vmem>>, vector<1x8xf32>
    %4 = vector.broadcast %3 : vector<1x8xf32> to vector<2048x8xf32>
    %5 = arith.addf %2, %4 : vector<2048x8xf32>
    %cst_5 = arith.constant 0.000000e+00 : f32
    %6 = vector.broadcast %cst_5 : f32 to vector<2048x8xf32>
    %7 = arith.maximumf %5, %6 : vector<2048x8xf32>
    %8 = arith.truncf %7 : vector<2048x8xf32> to vector<2048x8xbf16>
    %c0_6 = arith.constant 0 : index
    %c0_7 = arith.constant 0 : index
    %9 = vector.load %arg4[%c0_6, %c0_7] : memref<2048x8xbf16, #tpu.memory_space<vmem>>, vector<2048x8xbf16>
    tpu.vector_store %arg4[%c0_6, %c0_7], %8 {strides = array<i32>} : memref<2048x8xbf16, #tpu.memory_space<vmem>>, vector<2048x8xbf16>,
    return
  }
  func.func @transform_0(%arg0: i32) -> (i32, i32) {
    %c0_i32 = arith.constant 0 : i32
    %c0_i32_0 = arith.constant 0 : i32
    return %arg0, %c0_i32 : i32, i32
  }
  func.func @transform_1(%arg0: i32) -> (i32, i32) {
    %c0_i32 = arith.constant 0 : i32
    %c0_i32_0 = arith.constant 0 : i32
    %c0_i32_1 = arith.constant 0 : i32
    return %c0_i32, %c0_i32_0 : i32, i32
  }
  func.func @transform_2(%arg0: i32) -> (i32, i32) {
    %c0_i32 = arith.constant 0 : i32
    %c0_i32_0 = arith.constant 0 : i32
    %c0_i32_1 = arith.constant 0 : i32
    return %c0_i32, %c0_i32_0 : i32, i32
  }
  func.func @transform_3(%arg0: i32) -> (i32, i32) {
    %c0_i32 = arith.constant 0 : i32
    %c0_i32_0 = arith.constant 0 : i32
    return %arg0, %c0_i32 : i32, i32
  }
}

module attributes {stable_mosaic.version = 11 : i64} {
  func.func @_matmul_bias_relu_l2norm_kernel(%arg0: i32, %arg1: memref<512x80xbf16, #tpu.memory_space<vmem>>, %arg2: memref<80x16xbf16, #tpu.memory_space<vmem>>, %arg3: memref<1x16xf32, #tpu.memory_space<vmem>>, %arg4: memref<1x16xf32, #tpu.memory_space<vmem>>, %arg5: memref<512x16xbf16, #tpu.memory_space<vmem>>, %arg6: memref<512x16xbf16, #tpu.memory_space<vmem>>) attributes {dimension_semantics = [#tpu.dimension_semantics<parallel>], iteration_bounds = array<i64: 1>, scalar_prefetch = 0 : i64, scratch_operands = 0 : i64, tpu.core_type = #tpu.core_type<tc>, window_params = [{transform_indices = @transform_0, window_bounds = array<i64: 512, 80>}, {pipeline_mode = #tpu.pipeline_mode<synchronous>, transform_indices = @transform_1, window_bounds = array<i64: 80, 16>}, {pipeline_mode = #tpu.pipeline_mode<synchronous>, transform_indices = @transform_2, window_bounds = array<i64: 1, 16>}, {pipeline_mode = #tpu.pipeline_mode<synchronous>, transform_indices = @transform_3, window_bounds = array<i64: 1, 16>}, {transform_indices = @transform_4, window_bounds = array<i64: 512, 16>}, {transform_indices = @transform_5, window_bounds = array<i64: 512, 16>}]} {
    %c0 = arith.constant 0 : index
    %c0_0 = arith.constant 0 : index
    %0 = vector.load %arg1[%c0, %c0_0] : memref<512x80xbf16, #tpu.memory_space<vmem>>, vector<512x80xbf16>
    %c0_1 = arith.constant 0 : index
    %c0_2 = arith.constant 0 : index
    %1 = vector.load %arg2[%c0_1, %c0_2] : memref<80x16xbf16, #tpu.memory_space<vmem>>, vector<80x16xbf16>
    %cst = arith.constant dense<0.000000e+00> : vector<512x16xf32>
    %2 = tpu.matmul %0, %1, %cst {dimension_numbers = #tpu.dot_dimension_numbers<[1], [0], [0], [1], [0, 0, 1, 1], [], []>} : vector<512x80xbf16>, vector<80x16xbf16>, vector<512x16xf32> -> vector<512x16xf32>
    %c0_3 = arith.constant 0 : index
    %c0_4 = arith.constant 0 : index
    %3 = vector.load %arg3[%c0_3, %c0_4] : memref<1x16xf32, #tpu.memory_space<vmem>>, vector<1x16xf32>
    %4 = vector.broadcast %3 : vector<1x16xf32> to vector<512x16xf32>
    %5 = arith.addf %2, %4 : vector<512x16xf32>
    %cst_5 = arith.constant 0.000000e+00 : f32
    %6 = vector.broadcast %cst_5 : f32 to vector<512x16xf32>
    %7 = arith.maximumf %5, %6 : vector<512x16xf32>
    %8 = arith.truncf %7 : vector<512x16xf32> to vector<512x16xbf16>
    %c0_6 = arith.constant 0 : index
    %c0_7 = arith.constant 0 : index
    %9 = vector.load %arg5[%c0_6, %c0_7] : memref<512x16xbf16, #tpu.memory_space<vmem>>, vector<512x16xbf16>
    tpu.vector_store %arg5[%c0_6, %c0_7], %8 {strides = array<i32>} : memref<512x16xbf16, #tpu.memory_space<vmem>>, vector<512x16xbf16>,
    %10 = arith.mulf %7, %7 : vector<512x16xf32>
    %cst_8 = arith.constant dense<0.000000e+00> : vector<512xf32>
    %11 = vector.multi_reduction <add>, %10, %cst_8 [1] : vector<512x16xf32> to vector<512xf32>
    %12 = vector.shape_cast %11 : vector<512xf32> to vector<512x1xf32>
    %cst_9 = arith.constant 1.000000e-10 : f32
    %13 = vector.broadcast %cst_9 : f32 to vector<512x1xf32>
    %14 = arith.addf %12, %13 : vector<512x1xf32>
    %15 = math.rsqrt %14 : vector<512x1xf32>
    %16 = vector.broadcast %15 : vector<512x1xf32> to vector<512x16xf32>
    %17 = arith.mulf %7, %16 : vector<512x16xf32>
    %c0_10 = arith.constant 0 : index
    %c0_11 = arith.constant 0 : index
    %18 = vector.load %arg4[%c0_10, %c0_11] : memref<1x16xf32, #tpu.memory_space<vmem>>, vector<1x16xf32>
    %19 = vector.broadcast %18 : vector<1x16xf32> to vector<512x16xf32>
    %20 = arith.mulf %17, %19 : vector<512x16xf32>
    %21 = arith.truncf %20 : vector<512x16xf32> to vector<512x16xbf16>
    %c0_12 = arith.constant 0 : index
    %c0_13 = arith.constant 0 : index
    %22 = vector.load %arg6[%c0_12, %c0_13] : memref<512x16xbf16, #tpu.memory_space<vmem>>, vector<512x16xbf16>
    tpu.vector_store %arg6[%c0_12, %c0_13], %21 {strides = array<i32>} : memref<512x16xbf16, #tpu.memory_space<vmem>>, vector<512x16xbf16>,
    return
  }
  func.func @transform_0(%arg0: i32) -> (i32, i32) {
    %c0_i32 = arith.constant 0 : i32
    %c0_i32_0 = arith.constant 0 : i32
    return %arg0, %c0_i32 : i32, i32
  }
  func.func @transform_1(%arg0: i32) -> (i32, i32) {
    %c0_i32 = arith.constant 0 : i32
    %c0_i32_0 = arith.constant 0 : i32
    %c0_i32_1 = arith.constant 0 : i32
    return %c0_i32, %c0_i32_0 : i32, i32
  }
  func.func @transform_2(%arg0: i32) -> (i32, i32) {
    %c0_i32 = arith.constant 0 : i32
    %c0_i32_0 = arith.constant 0 : i32
    %c0_i32_1 = arith.constant 0 : i32
    return %c0_i32, %c0_i32_0 : i32, i32
  }
  func.func @transform_3(%arg0: i32) -> (i32, i32) {
    %c0_i32 = arith.constant 0 : i32
    %c0_i32_0 = arith.constant 0 : i32
    %c0_i32_1 = arith.constant 0 : i32
    return %c0_i32, %c0_i32_0 : i32, i32
  }
  func.func @transform_4(%arg0: i32) -> (i32, i32) {
    %c0_i32 = arith.constant 0 : i32
    %c0_i32_0 = arith.constant 0 : i32
    return %arg0, %c0_i32 : i32, i32
  }
  func.func @transform_5(%arg0: i32) -> (i32, i32) {
    %c0_i32 = arith.constant 0 : i32
    %c0_i32_0 = arith.constant 0 : i32
    return %arg0, %c0_i32 : i32, i32
  }
}

module attributes {stable_mosaic.version = 11 : i64} {
  func.func @_matmul_bias_kernel(%arg0: i32, %arg1: memref<512x144xbf16, #tpu.memory_space<vmem>>, %arg2: memref<144x36xbf16, #tpu.memory_space<vmem>>, %arg3: memref<1x36xf32, #tpu.memory_space<vmem>>, %arg4: memref<512x36xf32, #tpu.memory_space<vmem>>) attributes {dimension_semantics = [#tpu.dimension_semantics<parallel>], iteration_bounds = array<i64: 1>, scalar_prefetch = 0 : i64, scratch_operands = 0 : i64, tpu.core_type = #tpu.core_type<tc>, window_params = [{transform_indices = @transform_0, window_bounds = array<i64: 512, 144>}, {pipeline_mode = #tpu.pipeline_mode<synchronous>, transform_indices = @transform_1, window_bounds = array<i64: 144, 36>}, {pipeline_mode = #tpu.pipeline_mode<synchronous>, transform_indices = @transform_2, window_bounds = array<i64: 1, 36>}, {transform_indices = @transform_3, window_bounds = array<i64: 512, 36>}]} {
    %c0 = arith.constant 0 : index
    %c0_0 = arith.constant 0 : index
    %0 = vector.load %arg1[%c0, %c0_0] : memref<512x144xbf16, #tpu.memory_space<vmem>>, vector<512x144xbf16>
    %c0_1 = arith.constant 0 : index
    %c0_2 = arith.constant 0 : index
    %1 = vector.load %arg2[%c0_1, %c0_2] : memref<144x36xbf16, #tpu.memory_space<vmem>>, vector<144x36xbf16>
    %cst = arith.constant dense<0.000000e+00> : vector<512x36xf32>
    %2 = tpu.matmul %0, %1, %cst {dimension_numbers = #tpu.dot_dimension_numbers<[1], [0], [0], [1], [0, 0, 1, 1], [], []>} : vector<512x144xbf16>, vector<144x36xbf16>, vector<512x36xf32> -> vector<512x36xf32>
    %c0_3 = arith.constant 0 : index
    %c0_4 = arith.constant 0 : index
    %3 = vector.load %arg3[%c0_3, %c0_4] : memref<1x36xf32, #tpu.memory_space<vmem>>, vector<1x36xf32>
    %4 = vector.broadcast %3 : vector<1x36xf32> to vector<512x36xf32>
    %5 = arith.addf %2, %4 : vector<512x36xf32>
    %c0_5 = arith.constant 0 : index
    %c0_6 = arith.constant 0 : index
    %6 = vector.load %arg4[%c0_5, %c0_6] : memref<512x36xf32, #tpu.memory_space<vmem>>, vector<512x36xf32>
    tpu.vector_store %arg4[%c0_5, %c0_6], %5 {strides = array<i32>} : memref<512x36xf32, #tpu.memory_space<vmem>>, vector<512x36xf32>,
    return
  }
  func.func @transform_0(%arg0: i32) -> (i32, i32) {
    %c0_i32 = arith.constant 0 : i32
    %c0_i32_0 = arith.constant 0 : i32
    return %arg0, %c0_i32 : i32, i32
  }
  func.func @transform_1(%arg0: i32) -> (i32, i32) {
    %c0_i32 = arith.constant 0 : i32
    %c0_i32_0 = arith.constant 0 : i32
    %c0_i32_1 = arith.constant 0 : i32
    return %c0_i32, %c0_i32_0 : i32, i32
  }
  func.func @transform_2(%arg0: i32) -> (i32, i32) {
    %c0_i32 = arith.constant 0 : i32
    %c0_i32_0 = arith.constant 0 : i32
    %c0_i32_1 = arith.constant 0 : i32
    return %c0_i32, %c0_i32_0 : i32, i32
  }
  func.func @transform_3(%arg0: i32) -> (i32, i32) {
    %c0_i32 = arith.constant 0 : i32
    %c0_i32_0 = arith.constant 0 : i32
    return %arg0, %c0_i32 : i32, i32
  }
}

module attributes {stable_mosaic.version = 11 : i64} {
  func.func @_matmul_bias_relu_then_1x1_kernel(%arg0: i32, %arg1: memref<128x144xbf16, #tpu.memory_space<vmem>>, %arg2: memref<144x32xbf16, #tpu.memory_space<vmem>>, %arg3: memref<1x32xf32, #tpu.memory_space<vmem>>, %arg4: memref<32x16xbf16, #tpu.memory_space<vmem>>, %arg5: memref<1x16xf32, #tpu.memory_space<vmem>>, %arg6: memref<128x32xbf16, #tpu.memory_space<vmem>>, %arg7: memref<128x16xbf16, #tpu.memory_space<vmem>>) attributes {dimension_semantics = [#tpu.dimension_semantics<parallel>], iteration_bounds = array<i64: 1>, scalar_prefetch = 0 : i64, scratch_operands = 0 : i64, tpu.core_type = #tpu.core_type<tc>, window_params = [{transform_indices = @transform_0, window_bounds = array<i64: 128, 144>}, {pipeline_mode = #tpu.pipeline_mode<synchronous>, transform_indices = @transform_1, window_bounds = array<i64: 144, 32>}, {pipeline_mode = #tpu.pipeline_mode<synchronous>, transform_indices = @transform_2, window_bounds = array<i64: 1, 32>}, {pipeline_mode = #tpu.pipeline_mode<synchronous>, transform_indices = @transform_3, window_bounds = array<i64: 32, 16>}, {pipeline_mode = #tpu.pipeline_mode<synchronous>, transform_indices = @transform_4, window_bounds = array<i64: 1, 16>}, {transform_indices = @transform_5, window_bounds = array<i64: 128, 32>}, {transform_indices = @transform_6, window_bounds = array<i64: 128, 16>}]} {
    %c0 = arith.constant 0 : index
    %c0_0 = arith.constant 0 : index
    %0 = vector.load %arg1[%c0, %c0_0] : memref<128x144xbf16, #tpu.memory_space<vmem>>, vector<128x144xbf16>
    %c0_1 = arith.constant 0 : index
    %c0_2 = arith.constant 0 : index
    %1 = vector.load %arg2[%c0_1, %c0_2] : memref<144x32xbf16, #tpu.memory_space<vmem>>, vector<144x32xbf16>
    %cst = arith.constant dense<0.000000e+00> : vector<128x32xf32>
    %2 = tpu.matmul %0, %1, %cst {dimension_numbers = #tpu.dot_dimension_numbers<[1], [0], [0], [1], [0, 0, 1, 1], [], []>} : vector<128x144xbf16>, vector<144x32xbf16>, vector<128x32xf32> -> vector<128x32xf32>
    %c0_3 = arith.constant 0 : index
    %c0_4 = arith.constant 0 : index
    %3 = vector.load %arg3[%c0_3, %c0_4] : memref<1x32xf32, #tpu.memory_space<vmem>>, vector<1x32xf32>
    %4 = vector.broadcast %3 : vector<1x32xf32> to vector<128x32xf32>
    %5 = arith.addf %2, %4 : vector<128x32xf32>
    %cst_5 = arith.constant 0.000000e+00 : f32
    %6 = vector.broadcast %cst_5 : f32 to vector<128x32xf32>
    %7 = arith.maximumf %5, %6 : vector<128x32xf32>
    %8 = arith.truncf %7 : vector<128x32xf32> to vector<128x32xbf16>
    %c0_6 = arith.constant 0 : index
    %c0_7 = arith.constant 0 : index
    %9 = vector.load %arg6[%c0_6, %c0_7] : memref<128x32xbf16, #tpu.memory_space<vmem>>, vector<128x32xbf16>
    tpu.vector_store %arg6[%c0_6, %c0_7], %8 {strides = array<i32>} : memref<128x32xbf16, #tpu.memory_space<vmem>>, vector<128x32xbf16>,
    %10 = arith.truncf %7 : vector<128x32xf32> to vector<128x32xbf16>
    %c0_8 = arith.constant 0 : index
    %c0_9 = arith.constant 0 : index
    %11 = vector.load %arg4[%c0_8, %c0_9] : memref<32x16xbf16, #tpu.memory_space<vmem>>, vector<32x16xbf16>
    %cst_10 = arith.constant dense<0.000000e+00> : vector<128x16xf32>
    %12 = tpu.matmul %10, %11, %cst_10 {dimension_numbers = #tpu.dot_dimension_numbers<[1], [0], [0], [1], [0, 0, 1, 1], [], []>} : vector<128x32xbf16>, vector<32x16xbf16>, vector<128x16xf32> -> vector<128x16xf32>
    %c0_11 = arith.constant 0 : index
    %c0_12 = arith.constant 0 : index
    %13 = vector.load %arg5[%c0_11, %c0_12] : memref<1x16xf32, #tpu.memory_space<vmem>>, vector<1x16xf32>
    %14 = vector.broadcast %13 : vector<1x16xf32> to vector<128x16xf32>
    %15 = arith.addf %12, %14 : vector<128x16xf32>
    %cst_13 = arith.constant 0.000000e+00 : f32
    %16 = vector.broadcast %cst_13 : f32 to vector<128x16xf32>
    %17 = arith.maximumf %15, %16 : vector<128x16xf32>
    %18 = arith.truncf %17 : vector<128x16xf32> to vector<128x16xbf16>
    %c0_14 = arith.constant 0 : index
    %c0_15 = arith.constant 0 : index
    %19 = vector.load %arg7[%c0_14, %c0_15] : memref<128x16xbf16, #tpu.memory_space<vmem>>, vector<128x16xbf16>
    tpu.vector_store %arg7[%c0_14, %c0_15], %18 {strides = array<i32>} : memref<128x16xbf16, #tpu.memory_space<vmem>>, vector<128x16xbf16>,
    return
  }
  func.func @transform_0(%arg0: i32) -> (i32, i32) {
    %c0_i32 = arith.constant 0 : i32
    %c0_i32_0 = arith.constant 0 : i32
    return %arg0, %c0_i32 : i32, i32
  }
  func.func @transform_1(%arg0: i32) -> (i32, i32) {
    %c0_i32 = arith.constant 0 : i32
    %c0_i32_0 = arith.constant 0 : i32
    %c0_i32_1 = arith.constant 0 : i32
    return %c0_i32, %c0_i32_0 : i32, i32
  }
  func.func @transform_2(%arg0: i32) -> (i32, i32) {
    %c0_i32 = arith.constant 0 : i32
    %c0_i32_0 = arith.constant 0 : i32
    %c0_i32_1 = arith.constant 0 : i32
    return %c0_i32, %c0_i32_0 : i32, i32
  }
  func.func @transform_3(%arg0: i32) -> (i32, i32) {
    %c0_i32 = arith.constant 0 : i32
    %c0_i32_0 = arith.constant 0 : i32
    %c0_i32_1 = arith.constant 0 : i32
    return %c0_i32, %c0_i32_0 : i32, i32
  }
  func.func @transform_4(%arg0: i32) -> (i32, i32) {
    %c0_i32 = arith.constant 0 : i32
    %c0_i32_0 = arith.constant 0 : i32
    %c0_i32_1 = arith.constant 0 : i32
    return %c0_i32, %c0_i32_0 : i32, i32
  }
  func.func @transform_5(%arg0: i32) -> (i32, i32) {
    %c0_i32 = arith.constant 0 : i32
    %c0_i32_0 = arith.constant 0 : i32
    return %arg0, %c0_i32 : i32, i32
  }
  func.func @transform_6(%arg0: i32) -> (i32, i32) {
    %c0_i32 = arith.constant 0 : i32
    %c0_i32_0 = arith.constant 0 : i32
    return %arg0, %c0_i32 : i32, i32
  }
}

module attributes {stable_mosaic.version = 11 : i64} {
  func.func @_matmul_bias_relu_then_1x1_kernel(%arg0: i32, %arg1: memref<32x144xbf16, #tpu.memory_space<vmem>>, %arg2: memref<144x32xbf16, #tpu.memory_space<vmem>>, %arg3: memref<1x32xf32, #tpu.memory_space<vmem>>, %arg4: memref<32x16xbf16, #tpu.memory_space<vmem>>, %arg5: memref<1x16xf32, #tpu.memory_space<vmem>>, %arg6: memref<32x32xbf16, #tpu.memory_space<vmem>>, %arg7: memref<32x16xbf16, #tpu.memory_space<vmem>>) attributes {dimension_semantics = [#tpu.dimension_semantics<parallel>], iteration_bounds = array<i64: 1>, scalar_prefetch = 0 : i64, scratch_operands = 0 : i64, tpu.core_type = #tpu.core_type<tc>, window_params = [{transform_indices = @transform_0, window_bounds = array<i64: 32, 144>}, {pipeline_mode = #tpu.pipeline_mode<synchronous>, transform_indices = @transform_1, window_bounds = array<i64: 144, 32>}, {pipeline_mode = #tpu.pipeline_mode<synchronous>, transform_indices = @transform_2, window_bounds = array<i64: 1, 32>}, {pipeline_mode = #tpu.pipeline_mode<synchronous>, transform_indices = @transform_3, window_bounds = array<i64: 32, 16>}, {pipeline_mode = #tpu.pipeline_mode<synchronous>, transform_indices = @transform_4, window_bounds = array<i64: 1, 16>}, {transform_indices = @transform_5, window_bounds = array<i64: 32, 32>}, {transform_indices = @transform_6, window_bounds = array<i64: 32, 16>}]} {
    %c0 = arith.constant 0 : index
    %c0_0 = arith.constant 0 : index
    %0 = vector.load %arg1[%c0, %c0_0] : memref<32x144xbf16, #tpu.memory_space<vmem>>, vector<32x144xbf16>
    %c0_1 = arith.constant 0 : index
    %c0_2 = arith.constant 0 : index
    %1 = vector.load %arg2[%c0_1, %c0_2] : memref<144x32xbf16, #tpu.memory_space<vmem>>, vector<144x32xbf16>
    %cst = arith.constant dense<0.000000e+00> : vector<32x32xf32>
    %2 = tpu.matmul %0, %1, %cst {dimension_numbers = #tpu.dot_dimension_numbers<[1], [0], [0], [1], [0, 0, 1, 1], [], []>} : vector<32x144xbf16>, vector<144x32xbf16>, vector<32x32xf32> -> vector<32x32xf32>
    %c0_3 = arith.constant 0 : index
    %c0_4 = arith.constant 0 : index
    %3 = vector.load %arg3[%c0_3, %c0_4] : memref<1x32xf32, #tpu.memory_space<vmem>>, vector<1x32xf32>
    %4 = vector.broadcast %3 : vector<1x32xf32> to vector<32x32xf32>
    %5 = arith.addf %2, %4 : vector<32x32xf32>
    %cst_5 = arith.constant 0.000000e+00 : f32
    %6 = vector.broadcast %cst_5 : f32 to vector<32x32xf32>
    %7 = arith.maximumf %5, %6 : vector<32x32xf32>
    %8 = arith.truncf %7 : vector<32x32xf32> to vector<32x32xbf16>
    %c0_6 = arith.constant 0 : index
    %c0_7 = arith.constant 0 : index
    %9 = vector.load %arg6[%c0_6, %c0_7] : memref<32x32xbf16, #tpu.memory_space<vmem>>, vector<32x32xbf16>
    tpu.vector_store %arg6[%c0_6, %c0_7], %8 {strides = array<i32>} : memref<32x32xbf16, #tpu.memory_space<vmem>>, vector<32x32xbf16>,
    %10 = arith.truncf %7 : vector<32x32xf32> to vector<32x32xbf16>
    %c0_8 = arith.constant 0 : index
    %c0_9 = arith.constant 0 : index
    %11 = vector.load %arg4[%c0_8, %c0_9] : memref<32x16xbf16, #tpu.memory_space<vmem>>, vector<32x16xbf16>
    %cst_10 = arith.constant dense<0.000000e+00> : vector<32x16xf32>
    %12 = tpu.matmul %10, %11, %cst_10 {dimension_numbers = #tpu.dot_dimension_numbers<[1], [0], [0], [1], [0, 0, 1, 1], [], []>} : vector<32x32xbf16>, vector<32x16xbf16>, vector<32x16xf32> -> vector<32x16xf32>
    %c0_11 = arith.constant 0 : index
    %c0_12 = arith.constant 0 : index
    %13 = vector.load %arg5[%c0_11, %c0_12] : memref<1x16xf32, #tpu.memory_space<vmem>>, vector<1x16xf32>
    %14 = vector.broadcast %13 : vector<1x16xf32> to vector<32x16xf32>
    %15 = arith.addf %12, %14 : vector<32x16xf32>
    %cst_13 = arith.constant 0.000000e+00 : f32
    %16 = vector.broadcast %cst_13 : f32 to vector<32x16xf32>
    %17 = arith.maximumf %15, %16 : vector<32x16xf32>
    %18 = arith.truncf %17 : vector<32x16xf32> to vector<32x16xbf16>
    %c0_14 = arith.constant 0 : index
    %c0_15 = arith.constant 0 : index
    %19 = vector.load %arg7[%c0_14, %c0_15] : memref<32x16xbf16, #tpu.memory_space<vmem>>, vector<32x16xbf16>
    tpu.vector_store %arg7[%c0_14, %c0_15], %18 {strides = array<i32>} : memref<32x16xbf16, #tpu.memory_space<vmem>>, vector<32x16xbf16>,
    return
  }
  func.func @transform_0(%arg0: i32) -> (i32, i32) {
    %c0_i32 = arith.constant 0 : i32
    %c0_i32_0 = arith.constant 0 : i32
    return %arg0, %c0_i32 : i32, i32
  }
  func.func @transform_1(%arg0: i32) -> (i32, i32) {
    %c0_i32 = arith.constant 0 : i32
    %c0_i32_0 = arith.constant 0 : i32
    %c0_i32_1 = arith.constant 0 : i32
    return %c0_i32, %c0_i32_0 : i32, i32
  }
  func.func @transform_2(%arg0: i32) -> (i32, i32) {
    %c0_i32 = arith.constant 0 : i32
    %c0_i32_0 = arith.constant 0 : i32
    %c0_i32_1 = arith.constant 0 : i32
    return %c0_i32, %c0_i32_0 : i32, i32
  }
  func.func @transform_3(%arg0: i32) -> (i32, i32) {
    %c0_i32 = arith.constant 0 : i32
    %c0_i32_0 = arith.constant 0 : i32
    %c0_i32_1 = arith.constant 0 : i32
    return %c0_i32, %c0_i32_0 : i32, i32
  }
  func.func @transform_4(%arg0: i32) -> (i32, i32) {
    %c0_i32 = arith.constant 0 : i32
    %c0_i32_0 = arith.constant 0 : i32
    %c0_i32_1 = arith.constant 0 : i32
    return %c0_i32, %c0_i32_0 : i32, i32
  }
  func.func @transform_5(%arg0: i32) -> (i32, i32) {
    %c0_i32 = arith.constant 0 : i32
    %c0_i32_0 = arith.constant 0 : i32
    return %arg0, %c0_i32 : i32, i32
  }
  func.func @transform_6(%arg0: i32) -> (i32, i32) {
    %c0_i32 = arith.constant 0 : i32
    %c0_i32_0 = arith.constant 0 : i32
    return %arg0, %c0_i32 : i32, i32
  }
}

module attributes {stable_mosaic.version = 11 : i64} {
  func.func @_matmul_bias_kernel(%arg0: i32, %arg1: memref<8x144xbf16, #tpu.memory_space<vmem>>, %arg2: memref<144x32xbf16, #tpu.memory_space<vmem>>, %arg3: memref<1x32xf32, #tpu.memory_space<vmem>>, %arg4: memref<8x32xbf16, #tpu.memory_space<vmem>>) attributes {dimension_semantics = [#tpu.dimension_semantics<parallel>], iteration_bounds = array<i64: 1>, scalar_prefetch = 0 : i64, scratch_operands = 0 : i64, tpu.core_type = #tpu.core_type<tc>, window_params = [{transform_indices = @transform_0, window_bounds = array<i64: 8, 144>}, {pipeline_mode = #tpu.pipeline_mode<synchronous>, transform_indices = @transform_1, window_bounds = array<i64: 144, 32>}, {pipeline_mode = #tpu.pipeline_mode<synchronous>, transform_indices = @transform_2, window_bounds = array<i64: 1, 32>}, {transform_indices = @transform_3, window_bounds = array<i64: 8, 32>}]} {
    %c0 = arith.constant 0 : index
    %c0_0 = arith.constant 0 : index
    %0 = vector.load %arg1[%c0, %c0_0] : memref<8x144xbf16, #tpu.memory_space<vmem>>, vector<8x144xbf16>
    %c0_1 = arith.constant 0 : index
    %c0_2 = arith.constant 0 : index
    %1 = vector.load %arg2[%c0_1, %c0_2] : memref<144x32xbf16, #tpu.memory_space<vmem>>, vector<144x32xbf16>
    %cst = arith.constant dense<0.000000e+00> : vector<8x32xf32>
    %2 = tpu.matmul %0, %1, %cst {dimension_numbers = #tpu.dot_dimension_numbers<[1], [0], [0], [1], [0, 0, 1, 1], [], []>} : vector<8x144xbf16>, vector<144x32xbf16>, vector<8x32xf32> -> vector<8x32xf32>
    %c0_3 = arith.constant 0 : index
    %c0_4 = arith.constant 0 : index
    %3 = vector.load %arg3[%c0_3, %c0_4] : memref<1x32xf32, #tpu.memory_space<vmem>>, vector<1x32xf32>
    %4 = vector.broadcast %3 : vector<1x32xf32> to vector<8x32xf32>
    %5 = arith.addf %2, %4 : vector<8x32xf32>
    %cst_5 = arith.constant 0.000000e+00 : f32
    %6 = vector.broadcast %cst_5 : f32 to vector<8x32xf32>
    %7 = arith.maximumf %5, %6 : vector<8x32xf32>
    %8 = arith.truncf %7 : vector<8x32xf32> to vector<8x32xbf16>
    %c0_6 = arith.constant 0 : index
    %c0_7 = arith.constant 0 : index
    %9 = vector.load %arg4[%c0_6, %c0_7] : memref<8x32xbf16, #tpu.memory_space<vmem>>, vector<8x32xbf16>
    tpu.vector_store %arg4[%c0_6, %c0_7], %8 {strides = array<i32>} : memref<8x32xbf16, #tpu.memory_space<vmem>>, vector<8x32xbf16>,
    return
  }
  func.func @transform_0(%arg0: i32) -> (i32, i32) {
    %c0_i32 = arith.constant 0 : i32
    %c0_i32_0 = arith.constant 0 : i32
    return %arg0, %c0_i32 : i32, i32
  }
  func.func @transform_1(%arg0: i32) -> (i32, i32) {
    %c0_i32 = arith.constant 0 : i32
    %c0_i32_0 = arith.constant 0 : i32
    %c0_i32_1 = arith.constant 0 : i32
    return %c0_i32, %c0_i32_0 : i32, i32
  }
  func.func @transform_2(%arg0: i32) -> (i32, i32) {
    %c0_i32 = arith.constant 0 : i32
    %c0_i32_0 = arith.constant 0 : i32
    %c0_i32_1 = arith.constant 0 : i32
    return %c0_i32, %c0_i32_0 : i32, i32
  }
  func.func @transform_3(%arg0: i32) -> (i32, i32) {
    %c0_i32 = arith.constant 0 : i32
    %c0_i32_0 = arith.constant 0 : i32
    return %arg0, %c0_i32 : i32, i32
  }
}

module attributes {stable_mosaic.version = 11 : i64} {
  func.func @_matmul_bias_kernel(%arg0: i32, %arg1: memref<168x288xbf16, #tpu.memory_space<vmem>>, %arg2: memref<288x108xbf16, #tpu.memory_space<vmem>>, %arg3: memref<1x108xf32, #tpu.memory_space<vmem>>, %arg4: memref<168x108xf32, #tpu.memory_space<vmem>>) attributes {dimension_semantics = [#tpu.dimension_semantics<parallel>], iteration_bounds = array<i64: 1>, scalar_prefetch = 0 : i64, scratch_operands = 0 : i64, tpu.core_type = #tpu.core_type<tc>, window_params = [{transform_indices = @transform_0, window_bounds = array<i64: 168, 288>}, {pipeline_mode = #tpu.pipeline_mode<synchronous>, transform_indices = @transform_1, window_bounds = array<i64: 288, 108>}, {pipeline_mode = #tpu.pipeline_mode<synchronous>, transform_indices = @transform_2, window_bounds = array<i64: 1, 108>}, {transform_indices = @transform_3, window_bounds = array<i64: 168, 108>}]} {
    %c0 = arith.constant 0 : index
    %c0_0 = arith.constant 0 : index
    %0 = vector.load %arg1[%c0, %c0_0] : memref<168x288xbf16, #tpu.memory_space<vmem>>, vector<168x288xbf16>
    %c0_1 = arith.constant 0 : index
    %c0_2 = arith.constant 0 : index
    %1 = vector.load %arg2[%c0_1, %c0_2] : memref<288x108xbf16, #tpu.memory_space<vmem>>, vector<288x108xbf16>
    %cst = arith.constant dense<0.000000e+00> : vector<168x108xf32>
    %2 = tpu.matmul %0, %1, %cst {dimension_numbers = #tpu.dot_dimension_numbers<[1], [0], [0], [1], [0, 0, 1, 1], [], []>} : vector<168x288xbf16>, vector<288x108xbf16>, vector<168x108xf32> -> vector<168x108xf32>
    %c0_3 = arith.constant 0 : index
    %c0_4 = arith.constant 0 : index
    %3 = vector.load %arg3[%c0_3, %c0_4] : memref<1x108xf32, #tpu.memory_space<vmem>>, vector<1x108xf32>
    %4 = vector.broadcast %3 : vector<1x108xf32> to vector<168x108xf32>
    %5 = arith.addf %2, %4 : vector<168x108xf32>
    %c0_5 = arith.constant 0 : index
    %c0_6 = arith.constant 0 : index
    %6 = vector.load %arg4[%c0_5, %c0_6] : memref<168x108xf32, #tpu.memory_space<vmem>>, vector<168x108xf32>
    tpu.vector_store %arg4[%c0_5, %c0_6], %5 {strides = array<i32>} : memref<168x108xf32, #tpu.memory_space<vmem>>, vector<168x108xf32>,
    return
  }
  func.func @transform_0(%arg0: i32) -> (i32, i32) {
    %c0_i32 = arith.constant 0 : i32
    %c0_i32_0 = arith.constant 0 : i32
    return %arg0, %c0_i32 : i32, i32
  }
  func.func @transform_1(%arg0: i32) -> (i32, i32) {
    %c0_i32 = arith.constant 0 : i32
    %c0_i32_0 = arith.constant 0 : i32
    %c0_i32_1 = arith.constant 0 : i32
    return %c0_i32, %c0_i32_0 : i32, i32
  }
  func.func @transform_2(%arg0: i32) -> (i32, i32) {
    %c0_i32 = arith.constant 0 : i32
    %c0_i32_0 = arith.constant 0 : i32
    %c0_i32_1 = arith.constant 0 : i32
    return %c0_i32, %c0_i32_0 : i32, i32
  }
  func.func @transform_3(%arg0: i32) -> (i32, i32) {
    %c0_i32 = arith.constant 0 : i32
    %c0_i32_0 = arith.constant 0 : i32
    return %arg0, %c0_i32 : i32, i32
  }
}

</mosaic_0001>

<bundles_post_ra>
// kernel: _lambda_.7
= control target key start
LH: loop header
LB: loop body
LE: loop exit
PB: predicated region body
PF: predicated region fallthrough
CT: control target
= control target key end

     0   :  { %vm934_vm0 = vcmask 261120   ;;  %vm3656_vm1 = vcmask 60416   ;;  %s7047_s1 = inlined_call_operand.vmem [shape: bf16[32,8], index: 1, kind: input, shape index: {}]   ;;  %s7048_s0 = inlined_call_operand.vmem [shape: bf16[2048,32], index: 0, kind: input, shape index: {}]   ;;  %s7049_s2 = inlined_call_operand.vmem [shape: f32[1,8], index: 2, kind: input, shape index: {}]   ;;  %s7050_s3 = inlined_call_operand.vmem [shape: bf16[2048,8], index: 3, kind: output, shape index: {}]  }
   0x1   :  { %v5082_v0 = vld [vmem:[%s7047_s1] sm:$0xff]   ;;  %v5083_v1 = vld [vmem:[%s7047_s1 + $0x8] sm:$0xff]   ;;  %v5088_v6 = vld [vmem:[%s7048_s0 + $0x10] sm:$0xff]  }
   0x2   :  { %4818 = vmatprep.subr.bf16.mxu0 %v5082_v0  ;;  %5078 = vmatprep.subr.bf16.mxu1 %v5082_v0  ;;  %v5084_v2 = vld [vmem:[%s7048_s0] sm:$0xff]   ;;  %v5086_v4 = vld [vmem:[%s7048_s0 + $0x8] sm:$0xff]   ;;  %v5089_v7 = vld [vmem:[%s7048_s0 + $0x210] sm:$0xff]  }
   0x3   :  { %4819 = vmatpush3.bf16.msra.mxu0 %v5082_v0  ;;  %5080 = vmatpush3.bf16.msra.mxu1 %v5082_v0  ;;  %v5085_v3 = vld [vmem:[%s7048_s0 + $0x200] sm:$0xff]   ;;  %v5087_v5 = vld [vmem:[%s7048_s0 + $0x208] sm:$0xff]   ;;  %v5090_v8 = vld [vmem:[%s7048_s0 + $0x18] sm:$0xff]  }
   0x4   :  { %4820 = vmatprep.subr.bf16.mxu0 %v5083_v1  ;;  %5079 = vmatprep.subr.bf16.mxu1 %v5083_v1  ;;  %v5091_v9 = vld [vmem:[%s7048_s0 + $0x218] sm:$0xff]   ;;  %v5092_v10 = vld [vmem:[%s7048_s0 + $0x20] sm:$0xff]   ;;  %v5094_v12 = vld [vmem:[%s7048_s0 + $0x28] sm:$0xff]  }
   0x5   :  { %4822 = vmatprep.mubr.msk.bf16.mxu0 %vm934_vm0, %v5084_v2  ;;  %4950 = vmatprep.mubr.msk.bf16.mxu1 %vm934_vm0, %v5085_v3  ;;  %v5093_v11 = vld [vmem:[%s7048_s0 + $0x220] sm:$0xff]   ;;  %v5095_v13 = vld [vmem:[%s7048_s0 + $0x228] sm:$0xff]   ;;  %v5096_v14 = vld [vmem:[%s7048_s0 + $0x30] sm:$0xff]  }
   0x6   :  { %v5097_v15 = vld [vmem:[%s7048_s0 + $0x230] sm:$0xff]   ;;  %v5098_v16 = vld [vmem:[%s7048_s0 + $0x38] sm:$0xff]   ;;  %v5100_v18 = vld [vmem:[%s7048_s0 + $0x40] sm:$0xff]  }
   0x7   :  { %4821 = vmatpush3.bf16.msra.mxu0 %v5083_v1  ;;  %5081 = vmatpush3.bf16.msra.mxu1 %v5083_v1  ;;  %v5099_v17 = vld [vmem:[%s7048_s0 + $0x238] sm:$0xff]   ;;  %v5101_v19 = vld [vmem:[%s7048_s0 + $0x240] sm:$0xff]   ;;  %v5102_v20 = vld [vmem:[%s7048_s0 + $0x48] sm:$0xff]  }
   0x8   :  { %v5103_v21 = vld [vmem:[%s7048_s0 + $0x248] sm:$0xff]   ;;  %v5104_v22 = vld [vmem:[%s7048_s0 + $0x50] sm:$0xff]   ;;  %v5106_v24 = vld [vmem:[%s7048_s0 + $0x58] sm:$0xff]  }
   0x9   :  { %v5105_v23 = vld [vmem:[%s7048_s0 + $0x250] sm:$0xff]   ;;  %v5107_v25 = vld [vmem:[%s7048_s0 + $0x258] sm:$0xff]   ;;  %v5108_v26 = vld [vmem:[%s7048_s0 + $0x60] sm:$0xff]  }
   0xa   :  { %4823 = vmatmul.mubr.msk.bf16.vlgmr.msra.gmra.mrb[0].mxu0 %vm934_vm0, %v5086_v4  ;;  %4951 = vmatmul.mubr.msk.bf16.vlgmr.msra.gmra.mrb[0].mxu1 %vm934_vm0, %v5087_v5  ;;  %v5109_v27 = vld [vmem:[%s7048_s0 + $0x260] sm:$0xff]   ;;  %v5110_v28 = vld [vmem:[%s7048_s0 + $0x68] sm:$0xff]   ;;  %v5112_v30 = vld [vmem:[%s7048_s0 + $0x70] sm:$0xff]  }
   0xb   :  { %4826 = vmatprep.mubr.msk.bf16.mxu0 %vm934_vm0, %v5088_v6  ;;  %4954 = vmatprep.mubr.msk.bf16.mxu1 %vm934_vm0, %v5089_v7  ;;  %v5111_v29 = vld [vmem:[%s7048_s0 + $0x268] sm:$0xff]   ;;  %v5113_v31 = vld [vmem:[%s7048_s0 + $0x270] sm:$0xff]   ;;  %v5114_v32 = vld [vmem:[%s7048_s0 + $0x78] sm:$0xff]  }
   0xc   :  { %v5115_v33 = vld [vmem:[%s7048_s0 + $0x278] sm:$0xff]   ;;  %v5116_v34 = vld [vmem:[%s7048_s0 + $0x80] sm:$0xff]   ;;  %v5118_v36 = vld [vmem:[%s7048_s0 + $0x88] sm:$0xff]  }
   0xd   :  { %v5117_v35 = vld [vmem:[%s7048_s0 + $0x280] sm:$0xff]   ;;  %v5119_v37 = vld [vmem:[%s7048_s0 + $0x288] sm:$0xff]   ;;  %v5120_v38 = vld [vmem:[%s7048_s0 + $0x90] sm:$0xff]  }
   0xe   :  { %v5121_v39 = vld [vmem:[%s7048_s0 + $0x290] sm:$0xff]   ;;  %v5122_v40 = vld [vmem:[%s7048_s0 + $0x98] sm:$0xff]   ;;  %v5124_v42 = vld [vmem:[%s7048_s0 + $0xa0] sm:$0xff]  }
   0xf   :  { %v5123_v41 = vld [vmem:[%s7048_s0 + $0x298] sm:$0xff]   ;;  %v5125_v43 = vld [vmem:[%s7048_s0 + $0x2a0] sm:$0xff]   ;;  %v5126_v44 = vld [vmem:[%s7048_s0 + $0xa8] sm:$0xff]  }
  0x10   :  { %v5127_v45 = vld [vmem:[%s7048_s0 + $0x2a8] sm:$0xff]   ;;  %v5128_v46 = vld [vmem:[%s7048_s0 + $0xb0] sm:$0xff]   ;;  %v5130_v48 = vld [vmem:[%s7048_s0 + $0xb8] sm:$0xff]  }
  0x11   :  { %v5129_v47 = vld [vmem:[%s7048_s0 + $0x2b0] sm:$0xff]   ;;  %v5131_v49 = vld [vmem:[%s7048_s0 + $0x2b8] sm:$0xff]   ;;  %v5132_v50 = vld [vmem:[%s7048_s0 + $0xc0] sm:$0xff]  }
  0x12   :  { %4827 = vmatmul.mubr.msk.bf16.gmra.mrb[4].mxu0 %vm934_vm0, %v5090_v8  ;;  %4955 = vmatmul.mubr.msk.bf16.gmra.mrb[4].mxu1 %vm934_vm0, %v5091_v9  ;;  %v5133_v51 = vld [vmem:[%s7048_s0 + $0x2c0] sm:$0xff]   ;;  %v5134_v52 = vld [vmem:[%s7048_s0 + $0xc8] sm:$0xff]   ;;  %v5136_v54 = vld [vmem:[%s7048_s0 + $0xd0] sm:$0xff]  }
  0x13   :  { %4830 = vmatprep.mubr.msk.bf16.mxu0 %vm934_vm0, %v5092_v10  ;;  %4958 = vmatprep.mubr.msk.bf16.mxu1 %vm934_vm0, %v5093_v11  ;;  %v5135_v53 = vld [vmem:[%s7048_s0 + $0x2c8] sm:$0xff]   ;;  %v5137_v55 = vld [vmem:[%s7048_s0 + $0x2d0] sm:$0xff]   ;;  %v5138_v56 = vld [vmem:[%s7048_s0 + $0xd8] sm:$0xff]  }
  0x14   :  { %v5139_v57 = vld [vmem:[%s7048_s0 + $0x2d8] sm:$0xff]   ;;  %v5140_v58 = vld [vmem:[%s7048_s0 + $0xe0] sm:$0xff]   ;;  %v5142_v60 = vld [vmem:[%s7048_s0 + $0xe8] sm:$0xff]  }
  0x15   :  { %v5141_v59 = vld [vmem:[%s7048_s0 + $0x2e0] sm:$0xff]   ;;  %v5143_v61 = vld [vmem:[%s7048_s0 + $0x2e8] sm:$0xff]   ;;  %v5144_v62 = vld [vmem:[%s7048_s0 + $0xf0] sm:$0xff]  }
  0x16   :  { %v5145_v63 = vld [vmem:[%s7048_s0 + $0x2f0] sm:$0xff]   ;;  %v5146_v0 = vld [vmem:[%s7048_s0 + $0xf8] sm:$0xff]   ;;  %v5148_v2 = vld [vmem:[%s7048_s0 + $0x100] sm:$0xff]  }
  0x17   :  { %v5147_v1 = vld [vmem:[%s7048_s0 + $0x2f8] sm:$0xff]   ;;  %v5149_v3 = vld [vmem:[%s7048_s0 + $0x300] sm:$0xff]   ;;  %v5150_v4 = vld [vmem:[%s7048_s0 + $0x108] sm:$0xff]  }
  0x18   :  { %v5151_v5 = vld [vmem:[%s7048_s0 + $0x308] sm:$0xff]   ;;  %v5152_v6 = vld [vmem:[%s7048_s0 + $0x110] sm:$0xff]   ;;  %v5154_v8 = vld [vmem:[%s7048_s0 + $0x118] sm:$0xff]  }
  0x19   :  { %v5153_v7 = vld [vmem:[%s7048_s0 + $0x310] sm:$0xff]   ;;  %v5155_v9 = vld [vmem:[%s7048_s0 + $0x318] sm:$0xff]   ;;  %v5156_v10 = vld [vmem:[%s7048_s0 + $0x120] sm:$0xff]  }
  0x1a   :  { %4831 = vmatmul.mubr.msk.bf16.gmra.mrb[8].mxu0 %vm934_vm0, %v5094_v12  ;;  %4959 = vmatmul.mubr.msk.bf16.gmra.mrb[8].mxu1 %vm934_vm0, %v5095_v13  ;;  %v5157_v11 = vld [vmem:[%s7048_s0 + $0x320] sm:$0xff]   ;;  %v5158_v12 = vld [vmem:[%s7048_s0 + $0x128] sm:$0xff]  }
  0x1b   :  { %4834 = vmatprep.mubr.msk.bf16.mxu0 %vm934_vm0, %v5096_v14  ;;  %4962 = vmatprep.mubr.msk.bf16.mxu1 %vm934_vm0, %v5097_v15  ;;  %v5159_v13 = vld [vmem:[%s7048_s0 + $0x328] sm:$0xff]   ;;  %v5160_v14 = vld [vmem:[%s7048_s0 + $0x130] sm:$0xff]  }
  0x1c   :  { %v5161_v15 = vld [vmem:[%s7048_s0 + $0x330] sm:$0xff]  }
  0x22   :  { %4835 = vmatmul.mubr.msk.bf16.gmra.mrb[12].mxu0 %vm934_vm0, %v5098_v16  ;;  %4963 = vmatmul.mubr.msk.bf16.gmra.mrb[12].mxu1 %vm934_vm0, %v5099_v17  ;;  %v5162_v16 = vld [vmem:[%s7048_s0 + $0x138] sm:$0xff]  }
  0x23   :  { %4838 = vmatprep.mubr.msk.bf16.mxu0 %vm934_vm0, %v5100_v18  ;;  %4966 = vmatprep.mubr.msk.bf16.mxu1 %vm934_vm0, %v5101_v19  ;;  %v5163_v17 = vld [vmem:[%s7048_s0 + $0x338] sm:$0xff]   ;;  %v5164_v18 = vld [vmem:[%s7048_s0 + $0x140] sm:$0xff]  }
  0x24   :  { %v5165_v19 = vld [vmem:[%s7048_s0 + $0x340] sm:$0xff]  }
  0x2a   :  { %4839 = vmatmul.mubr.msk.bf16.gmra.mrb[16].mxu0 %vm934_vm0, %v5102_v20  ;;  %4967 = vmatmul.mubr.msk.bf16.gmra.mrb[16].mxu1 %vm934_vm0, %v5103_v21  ;;  %v5166_v20 = vld [vmem:[%s7048_s0 + $0x148] sm:$0xff]  }
  0x2b   :  { %4842 = vmatprep.mubr.msk.bf16.mxu0 %vm934_vm0, %v5104_v22  ;;  %4970 = vmatprep.mubr.msk.bf16.mxu1 %vm934_vm0, %v5105_v23  ;;  %v5167_v21 = vld [vmem:[%s7048_s0 + $0x348] sm:$0xff]   ;;  %v5168_v22 = vld [vmem:[%s7048_s0 + $0x150] sm:$0xff]  }
  0x2c   :  { %v5169_v23 = vld [vmem:[%s7048_s0 + $0x350] sm:$0xff]  }
  0x32   :  { %4843 = vmatmul.mubr.msk.bf16.gmra.mrb[20].mxu0 %vm934_vm0, %v5106_v24  ;;  %4971 = vmatmul.mubr.msk.bf16.gmra.mrb[20].mxu1 %vm934_vm0, %v5107_v25  ;;  %v5170_v24 = vld [vmem:[%s7048_s0 + $0x158] sm:$0xff]  }
  0x33   :  { %4846 = vmatprep.mubr.msk.bf16.mxu0 %vm934_vm0, %v5108_v26  ;;  %4974 = vmatprep.mubr.msk.bf16.mxu1 %vm934_vm0, %v5109_v27  ;;  %v5171_v25 = vld [vmem:[%s7048_s0 + $0x358] sm:$0xff]   ;;  %v5172_v26 = vld [vmem:[%s7048_s0 + $0x160] sm:$0xff]  }
  0x34   :  { %v5173_v27 = vld [vmem:[%s7048_s0 + $0x360] sm:$0xff]  }
  0x3a   :  { %4847 = vmatmul.mubr.msk.bf16.gmra.mrb[24].mxu0 %vm934_vm0, %v5110_v28  ;;  %4975 = vmatmul.mubr.msk.bf16.gmra.mrb[24].mxu1 %vm934_vm0, %v5111_v29  ;;  %v5174_v28 = vld [vmem:[%s7048_s0 + $0x168] sm:$0xff]  }
  0x3b   :  { %4850 = vmatprep.mubr.msk.bf16.mxu0 %vm934_vm0, %v5112_v30  ;;  %4978 = vmatprep.mubr.msk.bf16.mxu1 %vm934_vm0, %v5113_v31  ;;  %v5175_v29 = vld [vmem:[%s7048_s0 + $0x368] sm:$0xff]   ;;  %v5176_v30 = vld [vmem:[%s7048_s0 + $0x170] sm:$0xff]  }
  0x3c   :  { %v5177_v31 = vld [vmem:[%s7048_s0 + $0x370] sm:$0xff]  }
  0x42   :  { %4851 = vmatmul.mubr.msk.bf16.gmra.mrb[28].mxu0 %vm934_vm0, %v5114_v32  ;;  %4979 = vmatmul.mubr.msk.bf16.gmra.mrb[28].mxu1 %vm934_vm0, %v5115_v33  ;;  %v5178_v32 = vld [vmem:[%s7048_s0 + $0x178] sm:$0xff]  }
  0x43   :  { %4854 = vmatprep.mubr.msk.bf16.mxu0 %vm934_vm0, %v5116_v34  ;;  %4982 = vmatprep.mubr.msk.bf16.mxu1 %vm934_vm0, %v5117_v35  ;;  %v5179_v33 = vld [vmem:[%s7048_s0 + $0x378] sm:$0xff]   ;;  %v5180_v34 = vld [vmem:[%s7048_s0 + $0x180] sm:$0xff]  }
  0x44   :  { %v5181_v35 = vld [vmem:[%s7048_s0 + $0x380] sm:$0xff]  }
  0x4a   :  { %4855 = vmatmul.mubr.msk.bf16.gmra.mrb[32].mxu0 %vm934_vm0, %v5118_v36  ;;  %4983 = vmatmul.mubr.msk.bf16.gmra.mrb[32].mxu1 %vm934_vm0, %v5119_v37  ;;  %v5182_v36 = vld [vmem:[%s7048_s0 + $0x188] sm:$0xff]  }
  0x4b   :  { %4858 = vmatprep.mubr.msk.bf16.mxu0 %vm934_vm0, %v5120_v38  ;;  %4986 = vmatprep.mubr.msk.bf16.mxu1 %vm934_vm0, %v5121_v39  ;;  %v5183_v37 = vld [vmem:[%s7048_s0 + $0x388] sm:$0xff]   ;;  %v5184_v38 = vld [vmem:[%s7048_s0 + $0x190] sm:$0xff]  }
  0x4c   :  { %v5185_v39 = vld [vmem:[%s7048_s0 + $0x390] sm:$0xff]  }
  0x52   :  { %4859 = vmatmul.mubr.msk.bf16.gmra.mrb[36].mxu0 %vm934_vm0, %v5122_v40  ;;  %4987 = vmatmul.mubr.msk.bf16.gmra.mrb[36].mxu1 %vm934_vm0, %v5123_v41  ;;  %v5186_v40 = vld [vmem:[%s7048_s0 + $0x198] sm:$0xff]  }
  0x53   :  { %4862 = vmatprep.mubr.msk.bf16.mxu0 %vm934_vm0, %v5124_v42  ;;  %4990 = vmatprep.mubr.msk.bf16.mxu1 %vm934_vm0, %v5125_v43  ;;  %v5187_v41 = vld [vmem:[%s7048_s0 + $0x398] sm:$0xff]   ;;  %v5188_v42 = vld [vmem:[%s7048_s0 + $0x1a0] sm:$0xff]  }
  0x54   :  { %v5189_v43 = vld [vmem:[%s7048_s0 + $0x3a0] sm:$0xff]  }
  0x5a   :  { %4863 = vmatmul.mubr.msk.bf16.gmra.mrb[40].mxu0 %vm934_vm0, %v5126_v44  ;;  %4991 = vmatmul.mubr.msk.bf16.gmra.mrb[40].mxu1 %vm934_vm0, %v5127_v45  ;;  %v5190_v44 = vld [vmem:[%s7048_s0 + $0x1a8] sm:$0xff]  }
  0x5b   :  { %4866 = vmatprep.mubr.msk.bf16.mxu0 %vm934_vm0, %v5128_v46  ;;  %4994 = vmatprep.mubr.msk.bf16.mxu1 %vm934_vm0, %v5129_v47  ;;  %v5191_v45 = vld [vmem:[%s7048_s0 + $0x3a8] sm:$0xff]   ;;  %v5192_v46 = vld [vmem:[%s7048_s0 + $0x1b0] sm:$0xff]  }
  0x5c   :  { %v5193_v47 = vld [vmem:[%s7048_s0 + $0x3b0] sm:$0xff]  }
  0x62   :  { %4867 = vmatmul.mubr.msk.bf16.gmra.mrb[44].mxu0 %vm934_vm0, %v5130_v48  ;;  %4995 = vmatmul.mubr.msk.bf16.gmra.mrb[44].mxu1 %vm934_vm0, %v5131_v49  ;;  %v5681_v48 = vld [vmem:[%s7049_s2] ss:$0 sm:$0xff] }
  0x63   :  { %4870 = vmatprep.mubr.msk.bf16.mxu0 %vm934_vm0, %v5132_v50  ;;  %4998 = vmatprep.mubr.msk.bf16.mxu1 %vm934_vm0, %v5133_v51 }
  0x6a   :  { %4871 = vmatmul.mubr.msk.bf16.gmra.mrb[48].mxu0 %vm934_vm0, %v5134_v52  ;;  %4999 = vmatmul.mubr.msk.bf16.gmra.mrb[48].mxu1 %vm934_vm0, %v5135_v53 }
  0x6b   :  { %4874 = vmatprep.mubr.msk.bf16.mxu0 %vm934_vm0, %v5136_v54  ;;  %5002 = vmatprep.mubr.msk.bf16.mxu1 %vm934_vm0, %v5137_v55  ;;  %v5194_v55 = vld [vmem:[%s7048_s0 + $0x1b8] sm:$0xff]  }
  0x72   :  { %4875 = vmatmul.mubr.msk.bf16.gmra.mrb[52].mxu0 %vm934_vm0, %v5138_v56  ;;  %5003 = vmatmul.mubr.msk.bf16.gmra.mrb[52].mxu1 %vm934_vm0, %v5139_v57  ;;  %v5195_v56 = vld [vmem:[%s7048_s0 + $0x3b8] sm:$0xff]  }
  0x73   :  { %4878 = vmatprep.mubr.msk.bf16.mxu0 %vm934_vm0, %v5140_v58  ;;  %5006 = vmatprep.mubr.msk.bf16.mxu1 %vm934_vm0, %v5141_v59 }
  0x7a   :  { %4879 = vmatmul.mubr.msk.bf16.gmra.mrb[56].mxu0 %vm934_vm0, %v5142_v60  ;;  %5007 = vmatmul.mubr.msk.bf16.gmra.mrb[56].mxu1 %vm934_vm0, %v5143_v61  ;;  %v5196_v61 = vld [vmem:[%s7048_s0 + $0x1c0] sm:$0xff]  }
  0x7b   :  { %4882 = vmatprep.mubr.msk.bf16.mxu0 %vm934_vm0, %v5144_v62  ;;  %5010 = vmatprep.mubr.msk.bf16.mxu1 %vm934_vm0, %v5145_v63  ;;  %v5197_v62 = vld [vmem:[%s7048_s0 + $0x3c0] sm:$0xff]  }
  0x82   :  { %4883 = vmatmul.mubr.msk.bf16.gmra.mrb[60].mxu0 %vm934_vm0, %v5146_v0  ;;  %5011 = vmatmul.mubr.msk.bf16.gmra.mrb[60].mxu1 %vm934_vm0, %v5147_v1 }
  0x83   :  { %4886 = vmatprep.mubr.msk.bf16.mxu0 %vm934_vm0, %v5148_v2  ;;  %5014 = vmatprep.mubr.msk.bf16.mxu1 %vm934_vm0, %v5149_v3 }
  0x8a   :  { %4887 = vmatmul.mubr.msk.bf16.gmra.mrb[64].mxu0 %vm934_vm0, %v5150_v4  ;;  %5015 = vmatmul.mubr.msk.bf16.gmra.mrb[64].mxu1 %vm934_vm0, %v5151_v5 }
  0x8b   :  { %4890 = vmatprep.mubr.msk.bf16.mxu0 %vm934_vm0, %v5152_v6  ;;  %5018 = vmatprep.mubr.msk.bf16.mxu1 %vm934_vm0, %v5153_v7 }
  0x92   :  { %4891 = vmatmul.mubr.msk.bf16.gmra.mrb[68].mxu0 %vm934_vm0, %v5154_v8  ;;  %5019 = vmatmul.mubr.msk.bf16.gmra.mrb[68].mxu1 %vm934_vm0, %v5155_v9 }
  0x93   :  { %4894 = vmatprep.mubr.msk.bf16.mxu0 %vm934_vm0, %v5156_v10  ;;  %5022 = vmatprep.mubr.msk.bf16.mxu1 %vm934_vm0, %v5157_v11 }
  0x9a   :  { %4895 = vmatmul.mubr.msk.bf16.gmra.mrb[72].mxu0 %vm934_vm0, %v5158_v12  ;;  %5023 = vmatmul.mubr.msk.bf16.gmra.mrb[72].mxu1 %vm934_vm0, %v5159_v13 }
  0x9b   :  { %4898 = vmatprep.mubr.msk.bf16.mxu0 %vm934_vm0, %v5160_v14  ;;  %5026 = vmatprep.mubr.msk.bf16.mxu1 %vm934_vm0, %v5161_v15 }
  0xa2   :  { %4899 = vmatmul.mubr.msk.bf16.gmra.mrb[76].mxu0 %vm934_vm0, %v5162_v16  ;;  %5027 = vmatmul.mubr.msk.bf16.gmra.mrb[76].mxu1 %vm934_vm0, %v5163_v17 }
  0xa3   :  { %4902 = vmatprep.mubr.msk.bf16.mxu0 %vm934_vm0, %v5164_v18  ;;  %5030 = vmatprep.mubr.msk.bf16.mxu1 %vm934_vm0, %v5165_v19 }
  0xaa   :  { %4903 = vmatmul.mubr.msk.bf16.gmra.mrb[80].mxu0 %vm934_vm0, %v5166_v20  ;;  %5031 = vmatmul.mubr.msk.bf16.gmra.mrb[80].mxu1 %vm934_vm0, %v5167_v21 }
  0xab   :  { %4906 = vmatprep.mubr.msk.bf16.mxu0 %vm934_vm0, %v5168_v22  ;;  %5034 = vmatprep.mubr.msk.bf16.mxu1 %vm934_vm0, %v5169_v23 }
  0xb2   :  { %4907 = vmatmul.mubr.msk.bf16.gmra.mrb[84].mxu0 %vm934_vm0, %v5170_v24  ;;  %5035 = vmatmul.mubr.msk.bf16.gmra.mrb[84].mxu1 %vm934_vm0, %v5171_v25 }
  0xb3   :  { %4910 = vmatprep.mubr.msk.bf16.mxu0 %vm934_vm0, %v5172_v26  ;;  %5038 = vmatprep.mubr.msk.bf16.mxu1 %vm934_vm0, %v5173_v27  ;;  %v5198_v27 = vld [vmem:[%s7048_s0 + $0x1c8] sm:$0xff]  }
  0xba   :  { %4911 = vmatmul.mubr.msk.bf16.gmra.mrb[88].mxu0 %vm934_vm0, %v5174_v28  ;;  %5039 = vmatmul.mubr.msk.bf16.gmra.mrb[88].mxu1 %vm934_vm0, %v5175_v29  ;;  %v5199_v28 = vld [vmem:[%s7048_s0 + $0x3c8] sm:$0xff]  }
  0xbb   :  { %4914 = vmatprep.mubr.msk.bf16.mxu0 %vm934_vm0, %v5176_v30  ;;  %5042 = vmatprep.mubr.msk.bf16.mxu1 %vm934_vm0, %v5177_v31 }
  0xc2   :  { %4915 = vmatmul.mubr.msk.bf16.gmra.mrb[92].mxu0 %vm934_vm0, %v5178_v32  ;;  %5043 = vmatmul.mubr.msk.bf16.gmra.mrb[92].mxu1 %vm934_vm0, %v5179_v33  ;;  %v5200_v33 = vld [vmem:[%s7048_s0 + $0x1d0] sm:$0xff]  }
  0xc3   :  { %4918 = vmatprep.mubr.msk.bf16.mxu0 %vm934_vm0, %v5180_v34  ;;  %5046 = vmatprep.mubr.msk.bf16.mxu1 %vm934_vm0, %v5181_v35  ;;  %v5201_v34 = vld [vmem:[%s7048_s0 + $0x3d0] sm:$0xff]  }
  0xca   :  { %4919 = vmatmul.mubr.msk.bf16.gmra.mrb[96].mxu0 %vm934_vm0, %v5182_v36  ;;  %5047 = vmatmul.mubr.msk.bf16.gmra.mrb[96].mxu1 %vm934_vm0, %v5183_v37 }
  0xcb   :  { %4922 = vmatprep.mubr.msk.bf16.mxu0 %vm934_vm0, %v5184_v38  ;;  %5050 = vmatprep.mubr.msk.bf16.mxu1 %vm934_vm0, %v5185_v39 }
  0xd2   :  { %4923 = vmatmul.mubr.msk.bf16.gmra.mrb[100].mxu0 %vm934_vm0, %v5186_v40  ;;  %5051 = vmatmul.mubr.msk.bf16.gmra.mrb[100].mxu1 %vm934_vm0, %v5187_v41 }
  0xd3   :  { %4926 = vmatprep.mubr.msk.bf16.mxu0 %vm934_vm0, %v5188_v42  ;;  %5054 = vmatprep.mubr.msk.bf16.mxu1 %vm934_vm0, %v5189_v43 }
  0xda   :  { %4927 = vmatmul.mubr.msk.bf16.gmra.mrb[104].mxu0 %vm934_vm0, %v5190_v44  ;;  %5055 = vmatmul.mubr.msk.bf16.gmra.mrb[104].mxu1 %vm934_vm0, %v5191_v45 }
  0xdb   :  { %4930 = vmatprep.mubr.msk.bf16.mxu0 %vm934_vm0, %v5192_v46  ;;  %5058 = vmatprep.mubr.msk.bf16.mxu1 %vm934_vm0, %v5193_v47 }
  0xdd   :  { %v4824_v49 = vpop.f32.mrb[0].mxu0  ;;  %v4952_v50 = vpop.f32.mrb[0].mxu1 }
  0xde   :  { %v1362_v51 = vadd.f32 %v4824_v49, %v5681_v48  ;;  %v1874_v52 = vadd.f32 %v4952_v50, %v5681_v48  ;;  %v1353_v53 = vpop.f32.mrb[1].mxu0  ;;  %v1865_v54 = vpop.f32.mrb[1].mxu1 }
  0xdf   :  { %v1354_v57 = vadd.f32 %v5681_v48, %v1353_v53  ;;  %v1866_v58 = vadd.f32 %v5681_v48, %v1865_v54  ;;  %v4825_v59 = vpop.f32.mrb[2].mxu0  ;;  %v4953_v60 = vpop.f32.mrb[2].mxu1 }
  0xe0   :  { %v2378_v63 = vmax.f32 %v1362_v51, 0.0  ;;  %v2506_v0 = vmax.f32 %v1874_v52, 0.0  ;;  %v1365_v1 = vadd.f32 %v4825_v59, %v5681_v48  ;;  %v1877_v2 = vadd.f32 %v4953_v60, %v5681_v48  ;;  %v1356_v3 = vpop.f32.mrb[3].mxu0  ;;  %v1868_v4 = vpop.f32.mrb[3].mxu1 }
  0xe1   :  { %v2376_v5 = vmax.f32 %v1354_v57, 0.0  ;;  %v2504_v6 = vmax.f32 %v1866_v58, 0.0  ;;  %v1357_v7 = vadd.f32 %v5681_v48, %v1356_v3  ;;  %v1869_v8 = vadd.f32 %v5681_v48, %v1868_v4 }
  0xe2   :  { %v4434_v9 = vpack.c.bf16 %v2378_v63, %v2378_v63  ;;  %v4562_v10 = vpack.c.bf16 %v2506_v0, %v2506_v0  ;;  %v2379_v11 = vmax.f32 %v1365_v1, 0.0  ;;  %v2507_v12 = vmax.f32 %v1877_v2, 0.0  ;;  %4931 = vmatmul.mubr.msk.bf16.gmra.mrb[108].mxu0 %vm934_vm0, %v5194_v55  ;;  %5059 = vmatmul.mubr.msk.bf16.gmra.mrb[108].mxu1 %vm934_vm0, %v5195_v56  ;;  %v5202_v0 = vld [vmem:[%s7048_s0 + $0x1d8] sm:$0xff]  }
  0xe3   :  { %v4432_v13 = vpack.c.bf16 %v2376_v5, %v2376_v5  ;;  %v4560_v14 = vpack.c.bf16 %v2504_v6, %v2504_v6  ;;  %v2377_v15 = vmax.f32 %v1357_v7, 0.0  ;;  %v2505_v16 = vmax.f32 %v1869_v8, 0.0  ;;  %4934 = vmatprep.mubr.msk.bf16.mxu0 %vm934_vm0, %v5196_v61  ;;  %5062 = vmatprep.mubr.msk.bf16.mxu1 %vm934_vm0, %v5197_v62  ;;  %v5203_v1 = vld [vmem:[%s7048_s0 + $0x3d8] sm:$0xff]   ;;  %v5204_v6 = vld [vmem:[%s7048_s0 + $0x1e0] sm:$0xff]  }
  0xe4   :  { %3659 = vst.msk [vmem:[%s7050_s3 + $0x8] sm:$0xf] %vm3656_vm1, %v4434_v9  ;;  %3787 = vst.msk [vmem:[%s7050_s3 + $0x208] sm:$0xf] %vm3656_vm1, %v4562_v10  ;;  %v4435_v17 = vpack.c.bf16 %v2379_v11, %v2379_v11  ;;  %v4563_v18 = vpack.c.bf16 %v2507_v12, %v2507_v12  ;;  %v5205_v7 = vld [vmem:[%s7048_s0 + $0x3e0] sm:$0xff]  }
  0xe5   :  { %3657 = vst.msk [vmem:[%s7050_s3] sm:$0xf] %vm3656_vm1, %v4432_v13  ;;  %3785 = vst.msk [vmem:[%s7050_s3 + $0x200] sm:$0xf] %vm3656_vm1, %v4560_v14  ;;  %v4433_v19 = vpack.c.bf16 %v2377_v15, %v2377_v15  ;;  %v4561_v20 = vpack.c.bf16 %v2505_v16, %v2505_v16  ;;  %v4828_v21 = vpop.f32.mrb[4].mxu0  ;;  %v4956_v22 = vpop.f32.mrb[4].mxu1 }
  0xe6   :  { %3660 = vst.msk [vmem:[%s7050_s3 + $0xc] sm:$0xf] %vm3656_vm1, %v4435_v17  ;;  %3788 = vst.msk [vmem:[%s7050_s3 + $0x20c] sm:$0xf] %vm3656_vm1, %v4563_v18  ;;  %v1378_v23 = vadd.f32 %v4828_v21, %v5681_v48  ;;  %v1890_v24 = vadd.f32 %v4956_v22, %v5681_v48  ;;  %v1369_v25 = vpop.f32.mrb[5].mxu0  ;;  %v1881_v26 = vpop.f32.mrb[5].mxu1 }
  0xe7   :  { %3658 = vst.msk [vmem:[%s7050_s3 + $0x4] sm:$0xf] %vm3656_vm1, %v4433_v19  ;;  %3786 = vst.msk [vmem:[%s7050_s3 + $0x204] sm:$0xf] %vm3656_vm1, %v4561_v20  ;;  %v1370_v29 = vadd.f32 %v5681_v48, %v1369_v25  ;;  %v1882_v30 = vadd.f32 %v5681_v48, %v1881_v26  ;;  %v4829_v31 = vpop.f32.mrb[6].mxu0  ;;  %v4957_v32 = vpop.f32.mrb[6].mxu1 }
  0xe8   :  { %v2382_v35 = vmax.f32 %v1378_v23, 0.0  ;;  %v2510_v36 = vmax.f32 %v1890_v24, 0.0  ;;  %v1381_v37 = vadd.f32 %v4829_v31, %v5681_v48  ;;  %v1893_v38 = vadd.f32 %v4957_v32, %v5681_v48  ;;  %v1372_v39 = vpop.f32.mrb[7].mxu0  ;;  %v1884_v40 = vpop.f32.mrb[7].mxu1 }
  0xe9   :  { %v2380_v41 = vmax.f32 %v1370_v29, 0.0  ;;  %v2508_v42 = vmax.f32 %v1882_v30, 0.0  ;;  %v1373_v43 = vadd.f32 %v5681_v48, %v1372_v39  ;;  %v1885_v44 = vadd.f32 %v5681_v48, %v1884_v40 }
  0xea   :  { %v4438_v45 = vpack.c.bf16 %v2382_v35, %v2382_v35  ;;  %v4566_v46 = vpack.c.bf16 %v2510_v36, %v2510_v36  ;;  %v2383_v47 = vmax.f32 %v1381_v37, 0.0  ;;  %v2511_v49 = vmax.f32 %v1893_v38, 0.0  ;;  %4935 = vmatmul.mubr.msk.bf16.gmra.mrb[112].mxu0 %vm934_vm0, %v5198_v27  ;;  %5063 = vmatmul.mubr.msk.bf16.gmra.mrb[112].mxu1 %vm934_vm0, %v5199_v28  ;;  %v5206_v36 = vld [vmem:[%s7048_s0 + $0x1e8] sm:$0xff]  }
  0xeb   :  { %v4436_v50 = vpack.c.bf16 %v2380_v41, %v2380_v41  ;;  %v4564_v51 = vpack.c.bf16 %v2508_v42, %v2508_v42  ;;  %v2381_v52 = vmax.f32 %v1373_v43, 0.0  ;;  %v2509_v53 = vmax.f32 %v1885_v44, 0.0  ;;  %4938 = vmatprep.mubr.msk.bf16.mxu0 %vm934_vm0, %v5200_v33  ;;  %5066 = vmatprep.mubr.msk.bf16.mxu1 %vm934_vm0, %v5201_v34  ;;  %v5207_v37 = vld [vmem:[%s7048_s0 + $0x3e8] sm:$0xff]   ;;  %v5208_v42 = vld [vmem:[%s7048_s0 + $0x1f0] sm:$0xff]  }
  0xec   :  { %3663 = vst.msk [vmem:[%s7050_s3 + $0x18] sm:$0xf] %vm3656_vm1, %v4438_v45  ;;  %3791 = vst.msk [vmem:[%s7050_s3 + $0x218] sm:$0xf] %vm3656_vm1, %v4566_v46  ;;  %v4439_v54 = vpack.c.bf16 %v2383_v47, %v2383_v47  ;;  %v4567_v55 = vpack.c.bf16 %v2511_v49, %v2511_v49  ;;  %v5209_v43 = vld [vmem:[%s7048_s0 + $0x3f0] sm:$0xff]  }
  0xed   :  { %3661 = vst.msk [vmem:[%s7050_s3 + $0x10] sm:$0xf] %vm3656_vm1, %v4436_v50  ;;  %3789 = vst.msk [vmem:[%s7050_s3 + $0x210] sm:$0xf] %vm3656_vm1, %v4564_v51  ;;  %v4437_v56 = vpack.c.bf16 %v2381_v52, %v2381_v52  ;;  %v4565_v57 = vpack.c.bf16 %v2509_v53, %v2509_v53  ;;  %v4832_v58 = vpop.f32.mrb[8].mxu0  ;;  %v4960_v59 = vpop.f32.mrb[8].mxu1 }
  0xee   :  { %3664 = vst.msk [vmem:[%s7050_s3 + $0x1c] sm:$0xf] %vm3656_vm1, %v4439_v54  ;;  %3792 = vst.msk [vmem:[%s7050_s3 + $0x21c] sm:$0xf] %vm3656_vm1, %v4567_v55  ;;  %v1394_v60 = vadd.f32 %v4832_v58, %v5681_v48  ;;  %v1906_v61 = vadd.f32 %v4960_v59, %v5681_v48  ;;  %v1385_v62 = vpop.f32.mrb[9].mxu0  ;;  %v1897_v63 = vpop.f32.mrb[9].mxu1 }
  0xef   :  { %3662 = vst.msk [vmem:[%s7050_s3 + $0x14] sm:$0xf] %vm3656_vm1, %v4437_v56  ;;  %3790 = vst.msk [vmem:[%s7050_s3 + $0x214] sm:$0xf] %vm3656_vm1, %v4565_v57  ;;  %v1386_v2 = vadd.f32 %v5681_v48, %v1385_v62  ;;  %v1898_v3 = vadd.f32 %v5681_v48, %v1897_v63  ;;  %v4833_v4 = vpop.f32.mrb[10].mxu0  ;;  %v4961_v5 = vpop.f32.mrb[10].mxu1 }
  0xf0   :  { %v2386_v8 = vmax.f32 %v1394_v60, 0.0  ;;  %v2514_v9 = vmax.f32 %v1906_v61, 0.0  ;;  %v1397_v10 = vadd.f32 %v4833_v4, %v5681_v48  ;;  %v1909_v11 = vadd.f32 %v4961_v5, %v5681_v48  ;;  %v1388_v12 = vpop.f32.mrb[11].mxu0  ;;  %v1900_v13 = vpop.f32.mrb[11].mxu1 }
  0xf1   :  { %v2384_v14 = vmax.f32 %v1386_v2, 0.0  ;;  %v2512_v15 = vmax.f32 %v1898_v3, 0.0  ;;  %v1389_v16 = vadd.f32 %v5681_v48, %v1388_v12  ;;  %v1901_v17 = vadd.f32 %v5681_v48, %v1900_v13 }
  0xf2   :  { %v4442_v18 = vpack.c.bf16 %v2386_v8, %v2386_v8  ;;  %v4570_v19 = vpack.c.bf16 %v2514_v9, %v2514_v9  ;;  %v2387_v20 = vmax.f32 %v1397_v10, 0.0  ;;  %v2515_v21 = vmax.f32 %v1909_v11, 0.0  ;;  %4939 = vmatmul.mubr.msk.bf16.gmra.mrb[116].mxu0 %vm934_vm0, %v5202_v0  ;;  %5067 = vmatmul.mubr.msk.bf16.gmra.mrb[116].mxu1 %vm934_vm0, %v5203_v1  ;;  %v5210_v9 = vld [vmem:[%s7048_s0 + $0x1f8] sm:$0xff]  }
  0xf3   :  { %v4440_v22 = vpack.c.bf16 %v2384_v14, %v2384_v14  ;;  %v4568_v23 = vpack.c.bf16 %v2512_v15, %v2512_v15  ;;  %v2385_v24 = vmax.f32 %v1389_v16, 0.0  ;;  %v2513_v25 = vmax.f32 %v1901_v17, 0.0  ;;  %4942 = vmatprep.mubr.msk.bf16.mxu0 %vm934_vm0, %v5204_v6  ;;  %5070 = vmatprep.mubr.msk.bf16.mxu1 %vm934_vm0, %v5205_v7  ;;  %v5211_v10 = vld [vmem:[%s7048_s0 + $0x3f8] sm:$0xff]  }
  0xf4   :  { %3667 = vst.msk [vmem:[%s7050_s3 + $0x28] sm:$0xf] %vm3656_vm1, %v4442_v18  ;;  %3795 = vst.msk [vmem:[%s7050_s3 + $0x228] sm:$0xf] %vm3656_vm1, %v4570_v19  ;;  %v4443_v26 = vpack.c.bf16 %v2387_v20, %v2387_v20  ;;  %v4571_v27 = vpack.c.bf16 %v2515_v21, %v2515_v21 }
  0xf5   :  { %3665 = vst.msk [vmem:[%s7050_s3 + $0x20] sm:$0xf] %vm3656_vm1, %v4440_v22  ;;  %3793 = vst.msk [vmem:[%s7050_s3 + $0x220] sm:$0xf] %vm3656_vm1, %v4568_v23  ;;  %v4441_v28 = vpack.c.bf16 %v2385_v24, %v2385_v24  ;;  %v4569_v29 = vpack.c.bf16 %v2513_v25, %v2513_v25  ;;  %v4836_v30 = vpop.f32.mrb[12].mxu0  ;;  %v4964_v31 = vpop.f32.mrb[12].mxu1 }
  0xf6   :  { %3668 = vst.msk [vmem:[%s7050_s3 + $0x2c] sm:$0xf] %vm3656_vm1, %v4443_v26  ;;  %3796 = vst.msk [vmem:[%s7050_s3 + $0x22c] sm:$0xf] %vm3656_vm1, %v4571_v27  ;;  %v1410_v32 = vadd.f32 %v4836_v30, %v5681_v48  ;;  %v1922_v33 = vadd.f32 %v4964_v31, %v5681_v48  ;;  %v1401_v34 = vpop.f32.mrb[13].mxu0  ;;  %v1913_v35 = vpop.f32.mrb[13].mxu1 }
  0xf7   :  { %3666 = vst.msk [vmem:[%s7050_s3 + $0x24] sm:$0xf] %vm3656_vm1, %v4441_v28  ;;  %3794 = vst.msk [vmem:[%s7050_s3 + $0x224] sm:$0xf] %vm3656_vm1, %v4569_v29  ;;  %v1402_v38 = vadd.f32 %v5681_v48, %v1401_v34  ;;  %v1914_v39 = vadd.f32 %v5681_v48, %v1913_v35  ;;  %v4837_v40 = vpop.f32.mrb[14].mxu0  ;;  %v4965_v41 = vpop.f32.mrb[14].mxu1 }
  0xf8   :  { %v2390_v44 = vmax.f32 %v1410_v32, 0.0  ;;  %v2518_v45 = vmax.f32 %v1922_v33, 0.0  ;;  %v1413_v46 = vadd.f32 %v4837_v40, %v5681_v48  ;;  %v1925_v47 = vadd.f32 %v4965_v41, %v5681_v48  ;;  %v1404_v49 = vpop.f32.mrb[15].mxu0  ;;  %v1916_v50 = vpop.f32.mrb[15].mxu1 }
  0xf9   :  { %v2388_v51 = vmax.f32 %v1402_v38, 0.0  ;;  %v2516_v52 = vmax.f32 %v1914_v39, 0.0  ;;  %v1405_v53 = vadd.f32 %v5681_v48, %v1404_v49  ;;  %v1917_v54 = vadd.f32 %v5681_v48, %v1916_v50 }
  0xfa   :  { %v4446_v55 = vpack.c.bf16 %v2390_v44, %v2390_v44  ;;  %v4574_v56 = vpack.c.bf16 %v2518_v45, %v2518_v45  ;;  %v2391_v57 = vmax.f32 %v1413_v46, 0.0  ;;  %v2519_v58 = vmax.f32 %v1925_v47, 0.0  ;;  %4943 = vmatmul.mubr.msk.bf16.gmra.mrb[120].mxu0 %vm934_vm0, %v5206_v36  ;;  %5071 = vmatmul.mubr.msk.bf16.gmra.mrb[120].mxu1 %vm934_vm0, %v5207_v37 }
  0xfb   :  { %v4444_v59 = vpack.c.bf16 %v2388_v51, %v2388_v51  ;;  %v4572_v60 = vpack.c.bf16 %v2516_v52, %v2516_v52  ;;  %v2389_v61 = vmax.f32 %v1405_v53, 0.0  ;;  %v2517_v62 = vmax.f32 %v1917_v54, 0.0  ;;  %4946 = vmatprep.mubr.msk.bf16.mxu0 %vm934_vm0, %v5208_v42  ;;  %5074 = vmatprep.mubr.msk.bf16.mxu1 %vm934_vm0, %v5209_v43 }
  0xfc   :  { %3671 = vst.msk [vmem:[%s7050_s3 + $0x38] sm:$0xf] %vm3656_vm1, %v4446_v55  ;;  %3799 = vst.msk [vmem:[%s7050_s3 + $0x238] sm:$0xf] %vm3656_vm1, %v4574_v56  ;;  %v4447_v63 = vpack.c.bf16 %v2391_v57, %v2391_v57  ;;  %v4575_v0 = vpack.c.bf16 %v2519_v58, %v2519_v58 }
  0xfd   :  { %3669 = vst.msk [vmem:[%s7050_s3 + $0x30] sm:$0xf] %vm3656_vm1, %v4444_v59  ;;  %3797 = vst.msk [vmem:[%s7050_s3 + $0x230] sm:$0xf] %vm3656_vm1, %v4572_v60  ;;  %v4445_v1 = vpack.c.bf16 %v2389_v61, %v2389_v61  ;;  %v4573_v2 = vpack.c.bf16 %v2517_v62, %v2517_v62  ;;  %v4840_v3 = vpop.f32.mrb[16].mxu0  ;;  %v4968_v4 = vpop.f32.mrb[16].mxu1 }
  0xfe   :  { %3672 = vst.msk [vmem:[%s7050_s3 + $0x3c] sm:$0xf] %vm3656_vm1, %v4447_v63  ;;  %3800 = vst.msk [vmem:[%s7050_s3 + $0x23c] sm:$0xf] %vm3656_vm1, %v4575_v0  ;;  %v1426_v5 = vadd.f32 %v4840_v3, %v5681_v48  ;;  %v1938_v6 = vadd.f32 %v4968_v4, %v5681_v48  ;;  %v1417_v7 = vpop.f32.mrb[17].mxu0  ;;  %v1929_v8 = vpop.f32.mrb[17].mxu1 }
  0xff   :  { %3670 = vst.msk [vmem:[%s7050_s3 + $0x34] sm:$0xf] %vm3656_vm1, %v4445_v1  ;;  %3798 = vst.msk [vmem:[%s7050_s3 + $0x234] sm:$0xf] %vm3656_vm1, %v4573_v2  ;;  %v1418_v11 = vadd.f32 %v5681_v48, %v1417_v7  ;;  %v1930_v12 = vadd.f32 %v5681_v48, %v1929_v8  ;;  %v4841_v13 = vpop.f32.mrb[18].mxu0  ;;  %v4969_v14 = vpop.f32.mrb[18].mxu1 }
 0x100   :  { %v2394_v15 = vmax.f32 %v1426_v5, 0.0  ;;  %v2522_v16 = vmax.f32 %v1938_v6, 0.0  ;;  %v1429_v17 = vadd.f32 %v4841_v13, %v5681_v48  ;;  %v1941_v18 = vadd.f32 %v4969_v14, %v5681_v48  ;;  %v1420_v19 = vpop.f32.mrb[19].mxu0  ;;  %v1932_v20 = vpop.f32.mrb[19].mxu1 }
 0x101   :  { %v2392_v21 = vmax.f32 %v1418_v11, 0.0  ;;  %v2520_v22 = vmax.f32 %v1930_v12, 0.0  ;;  %v1421_v23 = vadd.f32 %v5681_v48, %v1420_v19  ;;  %v1933_v24 = vadd.f32 %v5681_v48, %v1932_v20 }
 0x102   :  { %v4450_v25 = vpack.c.bf16 %v2394_v15, %v2394_v15  ;;  %v4578_v26 = vpack.c.bf16 %v2522_v16, %v2522_v16  ;;  %v2395_v27 = vmax.f32 %v1429_v17, 0.0  ;;  %v2523_v28 = vmax.f32 %v1941_v18, 0.0  ;;  %4947 = vmatmul.mubr.msk.bf16.gmra.mrb[124].mxu0 %vm934_vm0, %v5210_v9  ;;  %5075 = vmatmul.mubr.msk.bf16.gmra.mrb[124].mxu1 %vm934_vm0, %v5211_v10 }
 0x103   :  { %v4448_v29 = vpack.c.bf16 %v2392_v21, %v2392_v21  ;;  %v4576_v30 = vpack.c.bf16 %v2520_v22, %v2520_v22  ;;  %v2393_v31 = vmax.f32 %v1421_v23, 0.0  ;;  %v2521_v32 = vmax.f32 %v1933_v24, 0.0 }
 0x104   :  { %3675 = vst.msk [vmem:[%s7050_s3 + $0x48] sm:$0xf] %vm3656_vm1, %v4450_v25  ;;  %3803 = vst.msk [vmem:[%s7050_s3 + $0x248] sm:$0xf] %vm3656_vm1, %v4578_v26  ;;  %v4451_v33 = vpack.c.bf16 %v2395_v27, %v2395_v27  ;;  %v4579_v34 = vpack.c.bf16 %v2523_v28, %v2523_v28 }
 0x105   :  { %3673 = vst.msk [vmem:[%s7050_s3 + $0x40] sm:$0xf] %vm3656_vm1, %v4448_v29  ;;  %3801 = vst.msk [vmem:[%s7050_s3 + $0x240] sm:$0xf] %vm3656_vm1, %v4576_v30  ;;  %v4449_v35 = vpack.c.bf16 %v2393_v31, %v2393_v31  ;;  %v4577_v36 = vpack.c.bf16 %v2521_v32, %v2521_v32  ;;  %v4844_v37 = vpop.f32.mrb[20].mxu0  ;;  %v4972_v38 = vpop.f32.mrb[20].mxu1 }
 0x106   :  { %3676 = vst.msk [vmem:[%s7050_s3 + $0x4c] sm:$0xf] %vm3656_vm1, %v4451_v33  ;;  %3804 = vst.msk [vmem:[%s7050_s3 + $0x24c] sm:$0xf] %vm3656_vm1, %v4579_v34  ;;  %v1442_v39 = vadd.f32 %v4844_v37, %v5681_v48  ;;  %v1954_v40 = vadd.f32 %v4972_v38, %v5681_v48  ;;  %v1433_v41 = vpop.f32.mrb[21].mxu0  ;;  %v1945_v42 = vpop.f32.mrb[21].mxu1 }
 0x107   :  { %3674 = vst.msk [vmem:[%s7050_s3 + $0x44] sm:$0xf] %vm3656_vm1, %v4449_v35  ;;  %3802 = vst.msk [vmem:[%s7050_s3 + $0x244] sm:$0xf] %vm3656_vm1, %v4577_v36  ;;  %v1434_v43 = vadd.f32 %v5681_v48, %v1433_v41  ;;  %v1946_v44 = vadd.f32 %v5681_v48, %v1945_v42  ;;  %v4845_v45 = vpop.f32.mrb[22].mxu0  ;;  %v4973_v46 = vpop.f32.mrb[22].mxu1 }
 0x108   :  { %v2398_v47 = vmax.f32 %v1442_v39, 0.0  ;;  %v2526_v49 = vmax.f32 %v1954_v40, 0.0  ;;  %v1445_v50 = vadd.f32 %v4845_v45, %v5681_v48  ;;  %v1957_v51 = vadd.f32 %v4973_v46, %v5681_v48  ;;  %v1436_v52 = vpop.f32.mrb[23].mxu0  ;;  %v1948_v53 = vpop.f32.mrb[23].mxu1 }
 0x109   :  { %v2396_v54 = vmax.f32 %v1434_v43, 0.0  ;;  %v2524_v55 = vmax.f32 %v1946_v44, 0.0  ;;  %v1437_v56 = vadd.f32 %v5681_v48, %v1436_v52  ;;  %v1949_v57 = vadd.f32 %v5681_v48, %v1948_v53 }
 0x10a   :  { %v4454_v58 = vpack.c.bf16 %v2398_v47, %v2398_v47  ;;  %v4582_v59 = vpack.c.bf16 %v2526_v49, %v2526_v49  ;;  %v2399_v60 = vmax.f32 %v1445_v50, 0.0  ;;  %v2527_v61 = vmax.f32 %v1957_v51, 0.0 }
 0x10b   :  { %v4452_v62 = vpack.c.bf16 %v2396_v54, %v2396_v54  ;;  %v4580_v63 = vpack.c.bf16 %v2524_v55, %v2524_v55  ;;  %v2397_v0 = vmax.f32 %v1437_v56, 0.0  ;;  %v2525_v1 = vmax.f32 %v1949_v57, 0.0 }
 0x10c   :  { %3679 = vst.msk [vmem:[%s7050_s3 + $0x58] sm:$0xf] %vm3656_vm1, %v4454_v58  ;;  %3807 = vst.msk [vmem:[%s7050_s3 + $0x258] sm:$0xf] %vm3656_vm1, %v4582_v59  ;;  %v4455_v2 = vpack.c.bf16 %v2399_v60, %v2399_v60  ;;  %v4583_v3 = vpack.c.bf16 %v2527_v61, %v2527_v61 }
 0x10d   :  { %3677 = vst.msk [vmem:[%s7050_s3 + $0x50] sm:$0xf] %vm3656_vm1, %v4452_v62  ;;  %3805 = vst.msk [vmem:[%s7050_s3 + $0x250] sm:$0xf] %vm3656_vm1, %v4580_v63  ;;  %v4453_v4 = vpack.c.bf16 %v2397_v0, %v2397_v0  ;;  %v4581_v5 = vpack.c.bf16 %v2525_v1, %v2525_v1  ;;  %v4848_v6 = vpop.f32.mrb[24].mxu0  ;;  %v4976_v7 = vpop.f32.mrb[24].mxu1 }
 0x10e   :  { %3680 = vst.msk [vmem:[%s7050_s3 + $0x5c] sm:$0xf] %vm3656_vm1, %v4455_v2  ;;  %3808 = vst.msk [vmem:[%s7050_s3 + $0x25c] sm:$0xf] %vm3656_vm1, %v4583_v3  ;;  %v1458_v8 = vadd.f32 %v4848_v6, %v5681_v48  ;;  %v1970_v9 = vadd.f32 %v4976_v7, %v5681_v48  ;;  %v1449_v10 = vpop.f32.mrb[25].mxu0  ;;  %v1961_v11 = vpop.f32.mrb[25].mxu1 }
 0x10f   :  { %3678 = vst.msk [vmem:[%s7050_s3 + $0x54] sm:$0xf] %vm3656_vm1, %v4453_v4  ;;  %3806 = vst.msk [vmem:[%s7050_s3 + $0x254] sm:$0xf] %vm3656_vm1, %v4581_v5  ;;  %v1450_v12 = vadd.f32 %v5681_v48, %v1449_v10  ;;  %v1962_v13 = vadd.f32 %v5681_v48, %v1961_v11  ;;  %v4849_v14 = vpop.f32.mrb[26].mxu0  ;;  %v4977_v15 = vpop.f32.mrb[26].mxu1 }
 0x110   :  { %v2402_v16 = vmax.f32 %v1458_v8, 0.0  ;;  %v2530_v17 = vmax.f32 %v1970_v9, 0.0  ;;  %v1461_v18 = vadd.f32 %v4849_v14, %v5681_v48  ;;  %v1973_v19 = vadd.f32 %v4977_v15, %v5681_v48  ;;  %v1452_v20 = vpop.f32.mrb[27].mxu0  ;;  %v1964_v21 = vpop.f32.mrb[27].mxu1 }
 0x111   :  { %v2400_v22 = vmax.f32 %v1450_v12, 0.0  ;;  %v2528_v23 = vmax.f32 %v1962_v13, 0.0  ;;  %v1453_v24 = vadd.f32 %v5681_v48, %v1452_v20  ;;  %v1965_v25 = vadd.f32 %v5681_v48, %v1964_v21 }
 0x112   :  { %v4458_v26 = vpack.c.bf16 %v2402_v16, %v2402_v16  ;;  %v4586_v27 = vpack.c.bf16 %v2530_v17, %v2530_v17  ;;  %v2403_v28 = vmax.f32 %v1461_v18, 0.0  ;;  %v2531_v29 = vmax.f32 %v1973_v19, 0.0 }
 0x113   :  { %v4456_v30 = vpack.c.bf16 %v2400_v22, %v2400_v22  ;;  %v4584_v31 = vpack.c.bf16 %v2528_v23, %v2528_v23  ;;  %v2401_v32 = vmax.f32 %v1453_v24, 0.0  ;;  %v2529_v33 = vmax.f32 %v1965_v25, 0.0 }
 0x114   :  { %3683 = vst.msk [vmem:[%s7050_s3 + $0x68] sm:$0xf] %vm3656_vm1, %v4458_v26  ;;  %3811 = vst.msk [vmem:[%s7050_s3 + $0x268] sm:$0xf] %vm3656_vm1, %v4586_v27  ;;  %v4459_v34 = vpack.c.bf16 %v2403_v28, %v2403_v28  ;;  %v4587_v35 = vpack.c.bf16 %v2531_v29, %v2531_v29 }
 0x115   :  { %3681 = vst.msk [vmem:[%s7050_s3 + $0x60] sm:$0xf] %vm3656_vm1, %v4456_v30  ;;  %3809 = vst.msk [vmem:[%s7050_s3 + $0x260] sm:$0xf] %vm3656_vm1, %v4584_v31  ;;  %v4457_v36 = vpack.c.bf16 %v2401_v32, %v2401_v32  ;;  %v4585_v37 = vpack.c.bf16 %v2529_v33, %v2529_v33  ;;  %v4852_v38 = vpop.f32.mrb[28].mxu0  ;;  %v4980_v39 = vpop.f32.mrb[28].mxu1 }
 0x116   :  { %3684 = vst.msk [vmem:[%s7050_s3 + $0x6c] sm:$0xf] %vm3656_vm1, %v4459_v34  ;;  %3812 = vst.msk [vmem:[%s7050_s3 + $0x26c] sm:$0xf] %vm3656_vm1, %v4587_v35  ;;  %v1474_v40 = vadd.f32 %v4852_v38, %v5681_v48  ;;  %v1986_v41 = vadd.f32 %v4980_v39, %v5681_v48  ;;  %v1465_v42 = vpop.f32.mrb[29].mxu0  ;;  %v1977_v43 = vpop.f32.mrb[29].mxu1 }
 0x117   :  { %3682 = vst.msk [vmem:[%s7050_s3 + $0x64] sm:$0xf] %vm3656_vm1, %v4457_v36  ;;  %3810 = vst.msk [vmem:[%s7050_s3 + $0x264] sm:$0xf] %vm3656_vm1, %v4585_v37  ;;  %v1466_v44 = vadd.f32 %v5681_v48, %v1465_v42  ;;  %v1978_v45 = vadd.f32 %v5681_v48, %v1977_v43  ;;  %v4853_v46 = vpop.f32.mrb[30].mxu0  ;;  %v4981_v47 = vpop.f32.mrb[30].mxu1 }
 0x118   :  { %v2406_v49 = vmax.f32 %v1474_v40, 0.0  ;;  %v2534_v50 = vmax.f32 %v1986_v41, 0.0  ;;  %v1477_v51 = vadd.f32 %v4853_v46, %v5681_v48  ;;  %v1989_v52 = vadd.f32 %v4981_v47, %v5681_v48  ;;  %v1468_v53 = vpop.f32.mrb[31].mxu0  ;;  %v1980_v54 = vpop.f32.mrb[31].mxu1 }
 0x119   :  { %v2404_v55 = vmax.f32 %v1466_v44, 0.0  ;;  %v2532_v56 = vmax.f32 %v1978_v45, 0.0  ;;  %v1469_v57 = vadd.f32 %v5681_v48, %v1468_v53  ;;  %v1981_v58 = vadd.f32 %v5681_v48, %v1980_v54 }
 0x11a   :  { %v4462_v59 = vpack.c.bf16 %v2406_v49, %v2406_v49  ;;  %v4590_v60 = vpack.c.bf16 %v2534_v50, %v2534_v50  ;;  %v2407_v61 = vmax.f32 %v1477_v51, 0.0  ;;  %v2535_v62 = vmax.f32 %v1989_v52, 0.0 }
 0x11b   :  { %v4460_v63 = vpack.c.bf16 %v2404_v55, %v2404_v55  ;;  %v4588_v0 = vpack.c.bf16 %v2532_v56, %v2532_v56  ;;  %v2405_v1 = vmax.f32 %v1469_v57, 0.0  ;;  %v2533_v2 = vmax.f32 %v1981_v58, 0.0 }
 0x11c   :  { %3687 = vst.msk [vmem:[%s7050_s3 + $0x78] sm:$0xf] %vm3656_vm1, %v4462_v59  ;;  %3815 = vst.msk [vmem:[%s7050_s3 + $0x278] sm:$0xf] %vm3656_vm1, %v4590_v60  ;;  %v4463_v3 = vpack.c.bf16 %v2407_v61, %v2407_v61  ;;  %v4591_v4 = vpack.c.bf16 %v2535_v62, %v2535_v62 }
 0x11d   :  { %3685 = vst.msk [vmem:[%s7050_s3 + $0x70] sm:$0xf] %vm3656_vm1, %v4460_v63  ;;  %3813 = vst.msk [vmem:[%s7050_s3 + $0x270] sm:$0xf] %vm3656_vm1, %v4588_v0  ;;  %v4461_v5 = vpack.c.bf16 %v2405_v1, %v2405_v1  ;;  %v4589_v6 = vpack.c.bf16 %v2533_v2, %v2533_v2  ;;  %v4856_v7 = vpop.f32.mrb[32].mxu0  ;;  %v4984_v8 = vpop.f32.mrb[32].mxu1 }
 0x11e   :  { %3688 = vst.msk [vmem:[%s7050_s3 + $0x7c] sm:$0xf] %vm3656_vm1, %v4463_v3  ;;  %3816 = vst.msk [vmem:[%s7050_s3 + $0x27c] sm:$0xf] %vm3656_vm1, %v4591_v4  ;;  %v1490_v9 = vadd.f32 %v4856_v7, %v5681_v48  ;;  %v2002_v10 = vadd.f32 %v4984_v8, %v5681_v48  ;;  %v1481_v11 = vpop.f32.mrb[33].mxu0  ;;  %v1993_v12 = vpop.f32.mrb[33].mxu1 }
 0x11f   :  { %3686 = vst.msk [vmem:[%s7050_s3 + $0x74] sm:$0xf] %vm3656_vm1, %v4461_v5  ;;  %3814 = vst.msk [vmem:[%s7050_s3 + $0x274] sm:$0xf] %vm3656_vm1, %v4589_v6  ;;  %v1482_v13 = vadd.f32 %v5681_v48, %v1481_v11  ;;  %v1994_v14 = vadd.f32 %v5681_v48, %v1993_v12  ;;  %v4857_v15 = vpop.f32.mrb[34].mxu0  ;;  %v4985_v16 = vpop.f32.mrb[34].mxu1 }
 0x120   :  { %v2410_v17 = vmax.f32 %v1490_v9, 0.0  ;;  %v2538_v18 = vmax.f32 %v2002_v10, 0.0  ;;  %v1493_v19 = vadd.f32 %v4857_v15, %v5681_v48  ;;  %v2005_v20 = vadd.f32 %v4985_v16, %v5681_v48  ;;  %v1484_v21 = vpop.f32.mrb[35].mxu0  ;;  %v1996_v22 = vpop.f32.mrb[35].mxu1 }
 0x121   :  { %v2408_v23 = vmax.f32 %v1482_v13, 0.0  ;;  %v2536_v24 = vmax.f32 %v1994_v14, 0.0  ;;  %v1485_v25 = vadd.f32 %v5681_v48, %v1484_v21  ;;  %v1997_v26 = vadd.f32 %v5681_v48, %v1996_v22 }
 0x122   :  { %v4466_v27 = vpack.c.bf16 %v2410_v17, %v2410_v17  ;;  %v4594_v28 = vpack.c.bf16 %v2538_v18, %v2538_v18  ;;  %v2411_v29 = vmax.f32 %v1493_v19, 0.0  ;;  %v2539_v30 = vmax.f32 %v2005_v20, 0.0 }
 0x123   :  { %v4464_v31 = vpack.c.bf16 %v2408_v23, %v2408_v23  ;;  %v4592_v32 = vpack.c.bf16 %v2536_v24, %v2536_v24  ;;  %v2409_v33 = vmax.f32 %v1485_v25, 0.0  ;;  %v2537_v34 = vmax.f32 %v1997_v26, 0.0 }
 0x124   :  { %3691 = vst.msk [vmem:[%s7050_s3 + $0x88] sm:$0xf] %vm3656_vm1, %v4466_v27  ;;  %3819 = vst.msk [vmem:[%s7050_s3 + $0x288] sm:$0xf] %vm3656_vm1, %v4594_v28  ;;  %v4467_v35 = vpack.c.bf16 %v2411_v29, %v2411_v29  ;;  %v4595_v36 = vpack.c.bf16 %v2539_v30, %v2539_v30 }
 0x125   :  { %3689 = vst.msk [vmem:[%s7050_s3 + $0x80] sm:$0xf] %vm3656_vm1, %v4464_v31  ;;  %3817 = vst.msk [vmem:[%s7050_s3 + $0x280] sm:$0xf] %vm3656_vm1, %v4592_v32  ;;  %v4465_v37 = vpack.c.bf16 %v2409_v33, %v2409_v33  ;;  %v4593_v38 = vpack.c.bf16 %v2537_v34, %v2537_v34  ;;  %v4860_v39 = vpop.f32.mrb[36].mxu0  ;;  %v4988_v40 = vpop.f32.mrb[36].mxu1 }
 0x126   :  { %3692 = vst.msk [vmem:[%s7050_s3 + $0x8c] sm:$0xf] %vm3656_vm1, %v4467_v35  ;;  %3820 = vst.msk [vmem:[%s7050_s3 + $0x28c] sm:$0xf] %vm3656_vm1, %v4595_v36  ;;  %v1506_v41 = vadd.f32 %v4860_v39, %v5681_v48  ;;  %v2018_v42 = vadd.f32 %v4988_v40, %v5681_v48  ;;  %v1497_v43 = vpop.f32.mrb[37].mxu0  ;;  %v2009_v44 = vpop.f32.mrb[37].mxu1 }
 0x127   :  { %3690 = vst.msk [vmem:[%s7050_s3 + $0x84] sm:$0xf] %vm3656_vm1, %v4465_v37  ;;  %3818 = vst.msk [vmem:[%s7050_s3 + $0x284] sm:$0xf] %vm3656_vm1, %v4593_v38  ;;  %v1498_v45 = vadd.f32 %v5681_v48, %v1497_v43  ;;  %v2010_v46 = vadd.f32 %v5681_v48, %v2009_v44  ;;  %v4861_v47 = vpop.f32.mrb[38].mxu0  ;;  %v4989_v49 = vpop.f32.mrb[38].mxu1 }
 0x128   :  { %v2414_v50 = vmax.f32 %v1506_v41, 0.0  ;;  %v2542_v51 = vmax.f32 %v2018_v42, 0.0  ;;  %v1509_v52 = vadd.f32 %v4861_v47, %v5681_v48  ;;  %v2021_v53 = vadd.f32 %v4989_v49, %v5681_v48  ;;  %v1500_v54 = vpop.f32.mrb[39].mxu0  ;;  %v2012_v55 = vpop.f32.mrb[39].mxu1 }
 0x129   :  { %v2412_v56 = vmax.f32 %v1498_v45, 0.0  ;;  %v2540_v57 = vmax.f32 %v2010_v46, 0.0  ;;  %v1501_v58 = vadd.f32 %v5681_v48, %v1500_v54  ;;  %v2013_v59 = vadd.f32 %v5681_v48, %v2012_v55 }
 0x12a   :  { %v4470_v60 = vpack.c.bf16 %v2414_v50, %v2414_v50  ;;  %v4598_v61 = vpack.c.bf16 %v2542_v51, %v2542_v51  ;;  %v2415_v62 = vmax.f32 %v1509_v52, 0.0  ;;  %v2543_v63 = vmax.f32 %v2021_v53, 0.0 }
 0x12b   :  { %v4468_v0 = vpack.c.bf16 %v2412_v56, %v2412_v56  ;;  %v4596_v1 = vpack.c.bf16 %v2540_v57, %v2540_v57  ;;  %v2413_v2 = vmax.f32 %v1501_v58, 0.0  ;;  %v2541_v3 = vmax.f32 %v2013_v59, 0.0 }
 0x12c   :  { %3695 = vst.msk [vmem:[%s7050_s3 + $0x98] sm:$0xf] %vm3656_vm1, %v4470_v60  ;;  %3823 = vst.msk [vmem:[%s7050_s3 + $0x298] sm:$0xf] %vm3656_vm1, %v4598_v61  ;;  %v4471_v4 = vpack.c.bf16 %v2415_v62, %v2415_v62  ;;  %v4599_v5 = vpack.c.bf16 %v2543_v63, %v2543_v63 }
 0x12d   :  { %3693 = vst.msk [vmem:[%s7050_s3 + $0x90] sm:$0xf] %vm3656_vm1, %v4468_v0  ;;  %3821 = vst.msk [vmem:[%s7050_s3 + $0x290] sm:$0xf] %vm3656_vm1, %v4596_v1  ;;  %v4469_v6 = vpack.c.bf16 %v2413_v2, %v2413_v2  ;;  %v4597_v7 = vpack.c.bf16 %v2541_v3, %v2541_v3  ;;  %v4864_v8 = vpop.f32.mrb[40].mxu0  ;;  %v4992_v9 = vpop.f32.mrb[40].mxu1 }
 0x12e   :  { %3696 = vst.msk [vmem:[%s7050_s3 + $0x9c] sm:$0xf] %vm3656_vm1, %v4471_v4  ;;  %3824 = vst.msk [vmem:[%s7050_s3 + $0x29c] sm:$0xf] %vm3656_vm1, %v4599_v5  ;;  %v1522_v10 = vadd.f32 %v4864_v8, %v5681_v48  ;;  %v2034_v11 = vadd.f32 %v4992_v9, %v5681_v48  ;;  %v1513_v12 = vpop.f32.mrb[41].mxu0  ;;  %v2025_v13 = vpop.f32.mrb[41].mxu1 }
 0x12f   :  { %3694 = vst.msk [vmem:[%s7050_s3 + $0x94] sm:$0xf] %vm3656_vm1, %v4469_v6  ;;  %3822 = vst.msk [vmem:[%s7050_s3 + $0x294] sm:$0xf] %vm3656_vm1, %v4597_v7  ;;  %v1514_v14 = vadd.f32 %v5681_v48, %v1513_v12  ;;  %v2026_v15 = vadd.f32 %v5681_v48, %v2025_v13  ;;  %v4865_v16 = vpop.f32.mrb[42].mxu0  ;;  %v4993_v17 = vpop.f32.mrb[42].mxu1 }
 0x130   :  { %v2418_v18 = vmax.f32 %v1522_v10, 0.0  ;;  %v2546_v19 = vmax.f32 %v2034_v11, 0.0  ;;  %v1525_v20 = vadd.f32 %v4865_v16, %v5681_v48  ;;  %v2037_v21 = vadd.f32 %v4993_v17, %v5681_v48  ;;  %v1516_v22 = vpop.f32.mrb[43].mxu0  ;;  %v2028_v23 = vpop.f32.mrb[43].mxu1  ;;  %v6232_v10 = vld [vmem:[%s7049_s2] ss:$0 sm:$0xff] }
 0x131   :  { %v2416_v24 = vmax.f32 %v1514_v14, 0.0  ;;  %v2544_v25 = vmax.f32 %v2026_v15, 0.0  ;;  %v1517_v26 = vadd.f32 %v5681_v48, %v1516_v22  ;;  %v2029_v27 = vadd.f32 %v5681_v48, %v2028_v23 }
 0x132   :  { %v4474_v28 = vpack.c.bf16 %v2418_v18, %v2418_v18  ;;  %v4602_v29 = vpack.c.bf16 %v2546_v19, %v2546_v19  ;;  %v2419_v30 = vmax.f32 %v1525_v20, 0.0  ;;  %v2547_v31 = vmax.f32 %v2037_v21, 0.0 }
 0x133   :  { %v4472_v32 = vpack.c.bf16 %v2416_v24, %v2416_v24  ;;  %v4600_v33 = vpack.c.bf16 %v2544_v25, %v2544_v25  ;;  %v2417_v34 = vmax.f32 %v1517_v26, 0.0  ;;  %v2545_v35 = vmax.f32 %v2029_v27, 0.0 }
 0x134   :  { %3699 = vst.msk [vmem:[%s7050_s3 + $0xa8] sm:$0xf] %vm3656_vm1, %v4474_v28  ;;  %3827 = vst.msk [vmem:[%s7050_s3 + $0x2a8] sm:$0xf] %vm3656_vm1, %v4602_v29  ;;  %v4475_v36 = vpack.c.bf16 %v2419_v30, %v2419_v30  ;;  %v4603_v37 = vpack.c.bf16 %v2547_v31, %v2547_v31 }
 0x135   :  { %3697 = vst.msk [vmem:[%s7050_s3 + $0xa0] sm:$0xf] %vm3656_vm1, %v4472_v32  ;;  %3825 = vst.msk [vmem:[%s7050_s3 + $0x2a0] sm:$0xf] %vm3656_vm1, %v4600_v33  ;;  %v4473_v38 = vpack.c.bf16 %v2417_v34, %v2417_v34  ;;  %v4601_v39 = vpack.c.bf16 %v2545_v35, %v2545_v35  ;;  %v4868_v40 = vpop.f32.mrb[44].mxu0  ;;  %v4996_v41 = vpop.f32.mrb[44].mxu1 }
 0x136   :  { %3700 = vst.msk [vmem:[%s7050_s3 + $0xac] sm:$0xf] %vm3656_vm1, %v4475_v36  ;;  %3828 = vst.msk [vmem:[%s7050_s3 + $0x2ac] sm:$0xf] %vm3656_vm1, %v4603_v37  ;;  %v1538_v42 = vadd.f32 %v4868_v40, %v5681_v48  ;;  %v2050_v43 = vadd.f32 %v4996_v41, %v5681_v48  ;;  %v1529_v44 = vpop.f32.mrb[45].mxu0  ;;  %v2041_v45 = vpop.f32.mrb[45].mxu1 }
 0x137   :  { %3698 = vst.msk [vmem:[%s7050_s3 + $0xa4] sm:$0xf] %vm3656_vm1, %v4473_v38  ;;  %3826 = vst.msk [vmem:[%s7050_s3 + $0x2a4] sm:$0xf] %vm3656_vm1, %v4601_v39  ;;  %v1530_v46 = vadd.f32 %v5681_v48, %v1529_v44  ;;  %v2042_v47 = vadd.f32 %v5681_v48, %v2041_v45  ;;  %v4869_v49 = vpop.f32.mrb[46].mxu0  ;;  %v4997_v50 = vpop.f32.mrb[46].mxu1 }
 0x138   :  { %v2422_v51 = vmax.f32 %v1538_v42, 0.0  ;;  %v2550_v52 = vmax.f32 %v2050_v43, 0.0  ;;  %v1541_v53 = vadd.f32 %v4869_v49, %v5681_v48  ;;  %v2053_v54 = vadd.f32 %v4997_v50, %v5681_v48  ;;  %v1532_v55 = vpop.f32.mrb[47].mxu0  ;;  %v2044_v56 = vpop.f32.mrb[47].mxu1 }
 0x139   :  { %v2420_v57 = vmax.f32 %v1530_v46, 0.0  ;;  %v2548_v58 = vmax.f32 %v2042_v47, 0.0  ;;  %v1533_v59 = vadd.f32 %v5681_v48, %v1532_v55  ;;  %v2045_v60 = vadd.f32 %v5681_v48, %v2044_v56 }
 0x13a   :  { %v4478_v61 = vpack.c.bf16 %v2422_v51, %v2422_v51  ;;  %v4606_v62 = vpack.c.bf16 %v2550_v52, %v2550_v52  ;;  %v2423_v63 = vmax.f32 %v1541_v53, 0.0  ;;  %v2551_v0 = vmax.f32 %v2053_v54, 0.0 }
 0x13b   :  { %v4476_v1 = vpack.c.bf16 %v2420_v57, %v2420_v57  ;;  %v4604_v2 = vpack.c.bf16 %v2548_v58, %v2548_v58  ;;  %v2421_v3 = vmax.f32 %v1533_v59, 0.0  ;;  %v2549_v4 = vmax.f32 %v2045_v60, 0.0 }
 0x13c   :  { %3703 = vst.msk [vmem:[%s7050_s3 + $0xb8] sm:$0xf] %vm3656_vm1, %v4478_v61  ;;  %3831 = vst.msk [vmem:[%s7050_s3 + $0x2b8] sm:$0xf] %vm3656_vm1, %v4606_v62  ;;  %v4479_v5 = vpack.c.bf16 %v2423_v63, %v2423_v63  ;;  %v4607_v48 = vpack.c.bf16 %v2551_v0, %v2551_v0 }
 0x13d   :  { %3701 = vst.msk [vmem:[%s7050_s3 + $0xb0] sm:$0xf] %vm3656_vm1, %v4476_v1  ;;  %3829 = vst.msk [vmem:[%s7050_s3 + $0x2b0] sm:$0xf] %vm3656_vm1, %v4604_v2  ;;  %v4477_v6 = vpack.c.bf16 %v2421_v3, %v2421_v3  ;;  %v4605_v7 = vpack.c.bf16 %v2549_v4, %v2549_v4  ;;  %v4872_v8 = vpop.f32.mrb[48].mxu0  ;;  %v5000_v9 = vpop.f32.mrb[48].mxu1 }
 0x13e   :  { %3704 = vst.msk [vmem:[%s7050_s3 + $0xbc] sm:$0xf] %vm3656_vm1, %v4479_v5  ;;  %3832 = vst.msk [vmem:[%s7050_s3 + $0x2bc] sm:$0xf] %vm3656_vm1, %v4607_v48  ;;  %v1554_v11 = vadd.f32 %v6232_v10, %v4872_v8  ;;  %v2066_v12 = vadd.f32 %v6232_v10, %v5000_v9  ;;  %v1545_v13 = vpop.f32.mrb[49].mxu0  ;;  %v2057_v14 = vpop.f32.mrb[49].mxu1 }
 0x13f   :  { %3702 = vst.msk [vmem:[%s7050_s3 + $0xb4] sm:$0xf] %vm3656_vm1, %v4477_v6  ;;  %3830 = vst.msk [vmem:[%s7050_s3 + $0x2b4] sm:$0xf] %vm3656_vm1, %v4605_v7  ;;  %v1546_v15 = vadd.f32 %v6232_v10, %v1545_v13  ;;  %v2058_v16 = vadd.f32 %v6232_v10, %v2057_v14  ;;  %v4873_v17 = vpop.f32.mrb[50].mxu0  ;;  %v5001_v18 = vpop.f32.mrb[50].mxu1 }
 0x140   :  { %v2426_v19 = vmax.f32 %v1554_v11, 0.0  ;;  %v2554_v20 = vmax.f32 %v2066_v12, 0.0  ;;  %v1557_v21 = vadd.f32 %v6232_v10, %v4873_v17  ;;  %v2069_v22 = vadd.f32 %v6232_v10, %v5001_v18  ;;  %v1548_v23 = vpop.f32.mrb[51].mxu0  ;;  %v2060_v24 = vpop.f32.mrb[51].mxu1 }
 0x141   :  { %v2424_v25 = vmax.f32 %v1546_v15, 0.0  ;;  %v2552_v26 = vmax.f32 %v2058_v16, 0.0  ;;  %v1549_v27 = vadd.f32 %v6232_v10, %v1548_v23  ;;  %v2061_v28 = vadd.f32 %v6232_v10, %v2060_v24 }
 0x142   :  { %v4482_v29 = vpack.c.bf16 %v2426_v19, %v2426_v19  ;;  %v4610_v30 = vpack.c.bf16 %v2554_v20, %v2554_v20  ;;  %v2427_v31 = vmax.f32 %v1557_v21, 0.0  ;;  %v2555_v32 = vmax.f32 %v2069_v22, 0.0 }
 0x143   :  { %v4480_v33 = vpack.c.bf16 %v2424_v25, %v2424_v25  ;;  %v4608_v34 = vpack.c.bf16 %v2552_v26, %v2552_v26  ;;  %v2425_v35 = vmax.f32 %v1549_v27, 0.0  ;;  %v2553_v36 = vmax.f32 %v2061_v28, 0.0 }
 0x144   :  { %3707 = vst.msk [vmem:[%s7050_s3 + $0xc8] sm:$0xf] %vm3656_vm1, %v4482_v29  ;;  %3835 = vst.msk [vmem:[%s7050_s3 + $0x2c8] sm:$0xf] %vm3656_vm1, %v4610_v30  ;;  %v4483_v37 = vpack.c.bf16 %v2427_v31, %v2427_v31  ;;  %v4611_v38 = vpack.c.bf16 %v2555_v32, %v2555_v32 }
 0x145   :  { %3705 = vst.msk [vmem:[%s7050_s3 + $0xc0] sm:$0xf] %vm3656_vm1, %v4480_v33  ;;  %3833 = vst.msk [vmem:[%s7050_s3 + $0x2c0] sm:$0xf] %vm3656_vm1, %v4608_v34  ;;  %v4481_v39 = vpack.c.bf16 %v2425_v35, %v2425_v35  ;;  %v4609_v40 = vpack.c.bf16 %v2553_v36, %v2553_v36  ;;  %v4876_v41 = vpop.f32.mrb[52].mxu0  ;;  %v5004_v42 = vpop.f32.mrb[52].mxu1 }
 0x146   :  { %3708 = vst.msk [vmem:[%s7050_s3 + $0xcc] sm:$0xf] %vm3656_vm1, %v4483_v37  ;;  %3836 = vst.msk [vmem:[%s7050_s3 + $0x2cc] sm:$0xf] %vm3656_vm1, %v4611_v38  ;;  %v1570_v43 = vadd.f32 %v6232_v10, %v4876_v41  ;;  %v2082_v44 = vadd.f32 %v6232_v10, %v5004_v42  ;;  %v1561_v45 = vpop.f32.mrb[53].mxu0  ;;  %v2073_v46 = vpop.f32.mrb[53].mxu1 }
 0x147   :  { %3706 = vst.msk [vmem:[%s7050_s3 + $0xc4] sm:$0xf] %vm3656_vm1, %v4481_v39  ;;  %3834 = vst.msk [vmem:[%s7050_s3 + $0x2c4] sm:$0xf] %vm3656_vm1, %v4609_v40  ;;  %v1562_v47 = vadd.f32 %v6232_v10, %v1561_v45  ;;  %v2074_v49 = vadd.f32 %v6232_v10, %v2073_v46  ;;  %v4877_v50 = vpop.f32.mrb[54].mxu0  ;;  %v5005_v51 = vpop.f32.mrb[54].mxu1 }
 0x148   :  { %v2430_v52 = vmax.f32 %v1570_v43, 0.0  ;;  %v2558_v53 = vmax.f32 %v2082_v44, 0.0  ;;  %v1573_v54 = vadd.f32 %v6232_v10, %v4877_v50  ;;  %v2085_v55 = vadd.f32 %v6232_v10, %v5005_v51  ;;  %v1564_v56 = vpop.f32.mrb[55].mxu0  ;;  %v2076_v57 = vpop.f32.mrb[55].mxu1 }
 0x149   :  { %v2428_v58 = vmax.f32 %v1562_v47, 0.0  ;;  %v2556_v59 = vmax.f32 %v2074_v49, 0.0  ;;  %v1565_v60 = vadd.f32 %v6232_v10, %v1564_v56  ;;  %v2077_v61 = vadd.f32 %v6232_v10, %v2076_v57 }
 0x14a   :  { %v4486_v62 = vpack.c.bf16 %v2430_v52, %v2430_v52  ;;  %v4614_v63 = vpack.c.bf16 %v2558_v53, %v2558_v53  ;;  %v2431_v0 = vmax.f32 %v1573_v54, 0.0  ;;  %v2559_v1 = vmax.f32 %v2085_v55, 0.0 }
 0x14b   :  { %v4484_v2 = vpack.c.bf16 %v2428_v58, %v2428_v58  ;;  %v4612_v3 = vpack.c.bf16 %v2556_v59, %v2556_v59  ;;  %v2429_v4 = vmax.f32 %v1565_v60, 0.0  ;;  %v2557_v5 = vmax.f32 %v2077_v61, 0.0 }
 0x14c   :  { %3711 = vst.msk [vmem:[%s7050_s3 + $0xd8] sm:$0xf] %vm3656_vm1, %v4486_v62  ;;  %3839 = vst.msk [vmem:[%s7050_s3 + $0x2d8] sm:$0xf] %vm3656_vm1, %v4614_v63  ;;  %v4487_v48 = vpack.c.bf16 %v2431_v0, %v2431_v0  ;;  %v4615_v6 = vpack.c.bf16 %v2559_v1, %v2559_v1 }
 0x14d   :  { %3709 = vst.msk [vmem:[%s7050_s3 + $0xd0] sm:$0xf] %vm3656_vm1, %v4484_v2  ;;  %3837 = vst.msk [vmem:[%s7050_s3 + $0x2d0] sm:$0xf] %vm3656_vm1, %v4612_v3  ;;  %v4485_v7 = vpack.c.bf16 %v2429_v4, %v2429_v4  ;;  %v4613_v8 = vpack.c.bf16 %v2557_v5, %v2557_v5  ;;  %v4880_v9 = vpop.f32.mrb[56].mxu0  ;;  %v5008_v11 = vpop.f32.mrb[56].mxu1 }
 0x14e   :  { %3712 = vst.msk [vmem:[%s7050_s3 + $0xdc] sm:$0xf] %vm3656_vm1, %v4487_v48  ;;  %3840 = vst.msk [vmem:[%s7050_s3 + $0x2dc] sm:$0xf] %vm3656_vm1, %v4615_v6  ;;  %v1586_v12 = vadd.f32 %v6232_v10, %v4880_v9  ;;  %v2098_v13 = vadd.f32 %v6232_v10, %v5008_v11  ;;  %v1577_v14 = vpop.f32.mrb[57].mxu0  ;;  %v2089_v15 = vpop.f32.mrb[57].mxu1 }
 0x14f   :  { %3710 = vst.msk [vmem:[%s7050_s3 + $0xd4] sm:$0xf] %vm3656_vm1, %v4485_v7  ;;  %3838 = vst.msk [vmem:[%s7050_s3 + $0x2d4] sm:$0xf] %vm3656_vm1, %v4613_v8  ;;  %v1578_v16 = vadd.f32 %v6232_v10, %v1577_v14  ;;  %v2090_v17 = vadd.f32 %v6232_v10, %v2089_v15  ;;  %v4881_v18 = vpop.f32.mrb[58].mxu0  ;;  %v5009_v19 = vpop.f32.mrb[58].mxu1 }
 0x150   :  { %v2434_v20 = vmax.f32 %v1586_v12, 0.0  ;;  %v2562_v21 = vmax.f32 %v2098_v13, 0.0  ;;  %v1589_v22 = vadd.f32 %v6232_v10, %v4881_v18  ;;  %v2101_v23 = vadd.f32 %v6232_v10, %v5009_v19  ;;  %v1580_v24 = vpop.f32.mrb[59].mxu0  ;;  %v2092_v25 = vpop.f32.mrb[59].mxu1 }
 0x151   :  { %v2432_v26 = vmax.f32 %v1578_v16, 0.0  ;;  %v2560_v27 = vmax.f32 %v2090_v17, 0.0  ;;  %v1581_v28 = vadd.f32 %v6232_v10, %v1580_v24  ;;  %v2093_v29 = vadd.f32 %v6232_v10, %v2092_v25 }
 0x152   :  { %v4490_v30 = vpack.c.bf16 %v2434_v20, %v2434_v20  ;;  %v4618_v31 = vpack.c.bf16 %v2562_v21, %v2562_v21  ;;  %v2435_v32 = vmax.f32 %v1589_v22, 0.0  ;;  %v2563_v33 = vmax.f32 %v2101_v23, 0.0 }
 0x153   :  { %v4488_v34 = vpack.c.bf16 %v2432_v26, %v2432_v26  ;;  %v4616_v35 = vpack.c.bf16 %v2560_v27, %v2560_v27  ;;  %v2433_v36 = vmax.f32 %v1581_v28, 0.0  ;;  %v2561_v37 = vmax.f32 %v2093_v29, 0.0 }
 0x154   :  { %3715 = vst.msk [vmem:[%s7050_s3 + $0xe8] sm:$0xf] %vm3656_vm1, %v4490_v30  ;;  %3843 = vst.msk [vmem:[%s7050_s3 + $0x2e8] sm:$0xf] %vm3656_vm1, %v4618_v31  ;;  %v4491_v38 = vpack.c.bf16 %v2435_v32, %v2435_v32  ;;  %v4619_v39 = vpack.c.bf16 %v2563_v33, %v2563_v33 }
 0x155   :  { %3713 = vst.msk [vmem:[%s7050_s3 + $0xe0] sm:$0xf] %vm3656_vm1, %v4488_v34  ;;  %3841 = vst.msk [vmem:[%s7050_s3 + $0x2e0] sm:$0xf] %vm3656_vm1, %v4616_v35  ;;  %v4489_v40 = vpack.c.bf16 %v2433_v36, %v2433_v36  ;;  %v4617_v41 = vpack.c.bf16 %v2561_v37, %v2561_v37  ;;  %v4884_v42 = vpop.f32.mrb[60].mxu0  ;;  %v5012_v43 = vpop.f32.mrb[60].mxu1 }
 0x156   :  { %3716 = vst.msk [vmem:[%s7050_s3 + $0xec] sm:$0xf] %vm3656_vm1, %v4491_v38  ;;  %3844 = vst.msk [vmem:[%s7050_s3 + $0x2ec] sm:$0xf] %vm3656_vm1, %v4619_v39  ;;  %v1602_v44 = vadd.f32 %v6232_v10, %v4884_v42  ;;  %v2114_v45 = vadd.f32 %v6232_v10, %v5012_v43  ;;  %v1593_v46 = vpop.f32.mrb[61].mxu0  ;;  %v2105_v47 = vpop.f32.mrb[61].mxu1 }
 0x157   :  { %3714 = vst.msk [vmem:[%s7050_s3 + $0xe4] sm:$0xf] %vm3656_vm1, %v4489_v40  ;;  %3842 = vst.msk [vmem:[%s7050_s3 + $0x2e4] sm:$0xf] %vm3656_vm1, %v4617_v41  ;;  %v1594_v49 = vadd.f32 %v6232_v10, %v1593_v46  ;;  %v2106_v50 = vadd.f32 %v6232_v10, %v2105_v47  ;;  %v4885_v51 = vpop.f32.mrb[62].mxu0  ;;  %v5013_v52 = vpop.f32.mrb[62].mxu1 }
 0x158   :  { %v2438_v53 = vmax.f32 %v1602_v44, 0.0  ;;  %v2566_v54 = vmax.f32 %v2114_v45, 0.0  ;;  %v1605_v55 = vadd.f32 %v6232_v10, %v4885_v51  ;;  %v2117_v56 = vadd.f32 %v6232_v10, %v5013_v52  ;;  %v1596_v57 = vpop.f32.mrb[63].mxu0  ;;  %v2108_v58 = vpop.f32.mrb[63].mxu1 }
 0x159   :  { %v2436_v59 = vmax.f32 %v1594_v49, 0.0  ;;  %v2564_v60 = vmax.f32 %v2106_v50, 0.0  ;;  %v1597_v61 = vadd.f32 %v6232_v10, %v1596_v57  ;;  %v2109_v62 = vadd.f32 %v6232_v10, %v2108_v58 }
 0x15a   :  { %v4494_v63 = vpack.c.bf16 %v2438_v53, %v2438_v53  ;;  %v4622_v0 = vpack.c.bf16 %v2566_v54, %v2566_v54  ;;  %v2439_v1 = vmax.f32 %v1605_v55, 0.0  ;;  %v2567_v2 = vmax.f32 %v2117_v56, 0.0 }
 0x15b   :  { %v4492_v3 = vpack.c.bf16 %v2436_v59, %v2436_v59  ;;  %v4620_v4 = vpack.c.bf16 %v2564_v60, %v2564_v60  ;;  %v2437_v5 = vmax.f32 %v1597_v61, 0.0  ;;  %v2565_v48 = vmax.f32 %v2109_v62, 0.0 }
 0x15c   :  { %3719 = vst.msk [vmem:[%s7050_s3 + $0xf8] sm:$0xf] %vm3656_vm1, %v4494_v63  ;;  %3847 = vst.msk [vmem:[%s7050_s3 + $0x2f8] sm:$0xf] %vm3656_vm1, %v4622_v0  ;;  %v4495_v6 = vpack.c.bf16 %v2439_v1, %v2439_v1  ;;  %v4623_v7 = vpack.c.bf16 %v2567_v2, %v2567_v2 }
 0x15d   :  { %3717 = vst.msk [vmem:[%s7050_s3 + $0xf0] sm:$0xf] %vm3656_vm1, %v4492_v3  ;;  %3845 = vst.msk [vmem:[%s7050_s3 + $0x2f0] sm:$0xf] %vm3656_vm1, %v4620_v4  ;;  %v4493_v8 = vpack.c.bf16 %v2437_v5, %v2437_v5  ;;  %v4621_v9 = vpack.c.bf16 %v2565_v48, %v2565_v48  ;;  %v4888_v11 = vpop.f32.mrb[64].mxu0  ;;  %v5016_v12 = vpop.f32.mrb[64].mxu1 }
 0x15e   :  { %3720 = vst.msk [vmem:[%s7050_s3 + $0xfc] sm:$0xf] %vm3656_vm1, %v4495_v6  ;;  %3848 = vst.msk [vmem:[%s7050_s3 + $0x2fc] sm:$0xf] %vm3656_vm1, %v4623_v7  ;;  %v1618_v13 = vadd.f32 %v6232_v10, %v4888_v11  ;;  %v2130_v14 = vadd.f32 %v6232_v10, %v5016_v12  ;;  %v1609_v15 = vpop.f32.mrb[65].mxu0  ;;  %v2121_v16 = vpop.f32.mrb[65].mxu1 }
 0x15f   :  { %3718 = vst.msk [vmem:[%s7050_s3 + $0xf4] sm:$0xf] %vm3656_vm1, %v4493_v8  ;;  %3846 = vst.msk [vmem:[%s7050_s3 + $0x2f4] sm:$0xf] %vm3656_vm1, %v4621_v9  ;;  %v1610_v17 = vadd.f32 %v6232_v10, %v1609_v15  ;;  %v2122_v18 = vadd.f32 %v6232_v10, %v2121_v16  ;;  %v4889_v19 = vpop.f32.mrb[66].mxu0  ;;  %v5017_v20 = vpop.f32.mrb[66].mxu1 }
 0x160   :  { %v2442_v21 = vmax.f32 %v1618_v13, 0.0  ;;  %v2570_v22 = vmax.f32 %v2130_v14, 0.0  ;;  %v1621_v23 = vadd.f32 %v6232_v10, %v4889_v19  ;;  %v2133_v24 = vadd.f32 %v6232_v10, %v5017_v20  ;;  %v1612_v25 = vpop.f32.mrb[67].mxu0  ;;  %v2124_v26 = vpop.f32.mrb[67].mxu1 }
 0x161   :  { %v2440_v27 = vmax.f32 %v1610_v17, 0.0  ;;  %v2568_v28 = vmax.f32 %v2122_v18, 0.0  ;;  %v1613_v29 = vadd.f32 %v6232_v10, %v1612_v25  ;;  %v2125_v30 = vadd.f32 %v6232_v10, %v2124_v26 }
 0x162   :  { %v4498_v31 = vpack.c.bf16 %v2442_v21, %v2442_v21  ;;  %v4626_v32 = vpack.c.bf16 %v2570_v22, %v2570_v22  ;;  %v2443_v33 = vmax.f32 %v1621_v23, 0.0  ;;  %v2571_v34 = vmax.f32 %v2133_v24, 0.0 }
 0x163   :  { %v4496_v35 = vpack.c.bf16 %v2440_v27, %v2440_v27  ;;  %v4624_v36 = vpack.c.bf16 %v2568_v28, %v2568_v28  ;;  %v2441_v37 = vmax.f32 %v1613_v29, 0.0  ;;  %v2569_v38 = vmax.f32 %v2125_v30, 0.0 }
 0x164   :  { %3723 = vst.msk [vmem:[%s7050_s3 + $0x108] sm:$0xf] %vm3656_vm1, %v4498_v31  ;;  %3851 = vst.msk [vmem:[%s7050_s3 + $0x308] sm:$0xf] %vm3656_vm1, %v4626_v32  ;;  %v4499_v39 = vpack.c.bf16 %v2443_v33, %v2443_v33  ;;  %v4627_v40 = vpack.c.bf16 %v2571_v34, %v2571_v34 }
 0x165   :  { %3721 = vst.msk [vmem:[%s7050_s3 + $0x100] sm:$0xf] %vm3656_vm1, %v4496_v35  ;;  %3849 = vst.msk [vmem:[%s7050_s3 + $0x300] sm:$0xf] %vm3656_vm1, %v4624_v36  ;;  %v4497_v41 = vpack.c.bf16 %v2441_v37, %v2441_v37  ;;  %v4625_v42 = vpack.c.bf16 %v2569_v38, %v2569_v38  ;;  %v4892_v43 = vpop.f32.mrb[68].mxu0  ;;  %v5020_v44 = vpop.f32.mrb[68].mxu1 }
 0x166   :  { %3724 = vst.msk [vmem:[%s7050_s3 + $0x10c] sm:$0xf] %vm3656_vm1, %v4499_v39  ;;  %3852 = vst.msk [vmem:[%s7050_s3 + $0x30c] sm:$0xf] %vm3656_vm1, %v4627_v40  ;;  %v1634_v45 = vadd.f32 %v6232_v10, %v4892_v43  ;;  %v2146_v46 = vadd.f32 %v6232_v10, %v5020_v44  ;;  %v1625_v47 = vpop.f32.mrb[69].mxu0  ;;  %v2137_v49 = vpop.f32.mrb[69].mxu1 }
 0x167   :  { %3722 = vst.msk [vmem:[%s7050_s3 + $0x104] sm:$0xf] %vm3656_vm1, %v4497_v41  ;;  %3850 = vst.msk [vmem:[%s7050_s3 + $0x304] sm:$0xf] %vm3656_vm1, %v4625_v42  ;;  %v1626_v50 = vadd.f32 %v6232_v10, %v1625_v47  ;;  %v2138_v51 = vadd.f32 %v6232_v10, %v2137_v49  ;;  %v4893_v52 = vpop.f32.mrb[70].mxu0  ;;  %v5021_v53 = vpop.f32.mrb[70].mxu1 }
 0x168   :  { %v2446_v54 = vmax.f32 %v1634_v45, 0.0  ;;  %v2574_v55 = vmax.f32 %v2146_v46, 0.0  ;;  %v1637_v56 = vadd.f32 %v6232_v10, %v4893_v52  ;;  %v2149_v57 = vadd.f32 %v6232_v10, %v5021_v53  ;;  %v1628_v58 = vpop.f32.mrb[71].mxu0  ;;  %v2140_v59 = vpop.f32.mrb[71].mxu1 }
 0x169   :  { %v2444_v60 = vmax.f32 %v1626_v50, 0.0  ;;  %v2572_v61 = vmax.f32 %v2138_v51, 0.0  ;;  %v1629_v62 = vadd.f32 %v6232_v10, %v1628_v58  ;;  %v2141_v63 = vadd.f32 %v6232_v10, %v2140_v59 }
 0x16a   :  { %v4502_v0 = vpack.c.bf16 %v2446_v54, %v2446_v54  ;;  %v4630_v1 = vpack.c.bf16 %v2574_v55, %v2574_v55  ;;  %v2447_v2 = vmax.f32 %v1637_v56, 0.0  ;;  %v2575_v3 = vmax.f32 %v2149_v57, 0.0 }
 0x16b   :  { %v4500_v4 = vpack.c.bf16 %v2444_v60, %v2444_v60  ;;  %v4628_v5 = vpack.c.bf16 %v2572_v61, %v2572_v61  ;;  %v2445_v48 = vmax.f32 %v1629_v62, 0.0  ;;  %v2573_v6 = vmax.f32 %v2141_v63, 0.0 }
 0x16c   :  { %3727 = vst.msk [vmem:[%s7050_s3 + $0x118] sm:$0xf] %vm3656_vm1, %v4502_v0  ;;  %3855 = vst.msk [vmem:[%s7050_s3 + $0x318] sm:$0xf] %vm3656_vm1, %v4630_v1  ;;  %v4503_v7 = vpack.c.bf16 %v2447_v2, %v2447_v2  ;;  %v4631_v8 = vpack.c.bf16 %v2575_v3, %v2575_v3 }
 0x16d   :  { %3725 = vst.msk [vmem:[%s7050_s3 + $0x110] sm:$0xf] %vm3656_vm1, %v4500_v4  ;;  %3853 = vst.msk [vmem:[%s7050_s3 + $0x310] sm:$0xf] %vm3656_vm1, %v4628_v5  ;;  %v4501_v9 = vpack.c.bf16 %v2445_v48, %v2445_v48  ;;  %v4629_v11 = vpack.c.bf16 %v2573_v6, %v2573_v6  ;;  %v4896_v12 = vpop.f32.mrb[72].mxu0  ;;  %v5024_v13 = vpop.f32.mrb[72].mxu1 }
 0x16e   :  { %3728 = vst.msk [vmem:[%s7050_s3 + $0x11c] sm:$0xf] %vm3656_vm1, %v4503_v7  ;;  %3856 = vst.msk [vmem:[%s7050_s3 + $0x31c] sm:$0xf] %vm3656_vm1, %v4631_v8  ;;  %v1650_v14 = vadd.f32 %v6232_v10, %v4896_v12  ;;  %v2162_v15 = vadd.f32 %v6232_v10, %v5024_v13  ;;  %v1641_v16 = vpop.f32.mrb[73].mxu0  ;;  %v2153_v17 = vpop.f32.mrb[73].mxu1 }
 0x16f   :  { %3726 = vst.msk [vmem:[%s7050_s3 + $0x114] sm:$0xf] %vm3656_vm1, %v4501_v9  ;;  %3854 = vst.msk [vmem:[%s7050_s3 + $0x314] sm:$0xf] %vm3656_vm1, %v4629_v11  ;;  %v1642_v18 = vadd.f32 %v6232_v10, %v1641_v16  ;;  %v2154_v19 = vadd.f32 %v6232_v10, %v2153_v17  ;;  %v4897_v20 = vpop.f32.mrb[74].mxu0  ;;  %v5025_v21 = vpop.f32.mrb[74].mxu1 }
 0x170   :  { %v2450_v22 = vmax.f32 %v1650_v14, 0.0  ;;  %v2578_v23 = vmax.f32 %v2162_v15, 0.0  ;;  %v1653_v24 = vadd.f32 %v6232_v10, %v4897_v20  ;;  %v2165_v25 = vadd.f32 %v6232_v10, %v5025_v21  ;;  %v1644_v26 = vpop.f32.mrb[75].mxu0  ;;  %v2156_v27 = vpop.f32.mrb[75].mxu1 }
 0x171   :  { %v2448_v28 = vmax.f32 %v1642_v18, 0.0  ;;  %v2576_v29 = vmax.f32 %v2154_v19, 0.0  ;;  %v1645_v30 = vadd.f32 %v6232_v10, %v1644_v26  ;;  %v2157_v31 = vadd.f32 %v6232_v10, %v2156_v27 }
 0x172   :  { %v4506_v32 = vpack.c.bf16 %v2450_v22, %v2450_v22  ;;  %v4634_v33 = vpack.c.bf16 %v2578_v23, %v2578_v23  ;;  %v2451_v34 = vmax.f32 %v1653_v24, 0.0  ;;  %v2579_v35 = vmax.f32 %v2165_v25, 0.0 }
 0x173   :  { %v4504_v36 = vpack.c.bf16 %v2448_v28, %v2448_v28  ;;  %v4632_v37 = vpack.c.bf16 %v2576_v29, %v2576_v29  ;;  %v2449_v38 = vmax.f32 %v1645_v30, 0.0  ;;  %v2577_v39 = vmax.f32 %v2157_v31, 0.0 }
 0x174   :  { %3731 = vst.msk [vmem:[%s7050_s3 + $0x128] sm:$0xf] %vm3656_vm1, %v4506_v32  ;;  %3859 = vst.msk [vmem:[%s7050_s3 + $0x328] sm:$0xf] %vm3656_vm1, %v4634_v33  ;;  %v4507_v40 = vpack.c.bf16 %v2451_v34, %v2451_v34  ;;  %v4635_v41 = vpack.c.bf16 %v2579_v35, %v2579_v35 }
 0x175   :  { %3729 = vst.msk [vmem:[%s7050_s3 + $0x120] sm:$0xf] %vm3656_vm1, %v4504_v36  ;;  %3857 = vst.msk [vmem:[%s7050_s3 + $0x320] sm:$0xf] %vm3656_vm1, %v4632_v37  ;;  %v4505_v42 = vpack.c.bf16 %v2449_v38, %v2449_v38  ;;  %v4633_v43 = vpack.c.bf16 %v2577_v39, %v2577_v39  ;;  %v4900_v44 = vpop.f32.mrb[76].mxu0  ;;  %v5028_v45 = vpop.f32.mrb[76].mxu1 }
 0x176   :  { %3732 = vst.msk [vmem:[%s7050_s3 + $0x12c] sm:$0xf] %vm3656_vm1, %v4507_v40  ;;  %3860 = vst.msk [vmem:[%s7050_s3 + $0x32c] sm:$0xf] %vm3656_vm1, %v4635_v41  ;;  %v1666_v46 = vadd.f32 %v6232_v10, %v4900_v44  ;;  %v2178_v47 = vadd.f32 %v6232_v10, %v5028_v45  ;;  %v1657_v49 = vpop.f32.mrb[77].mxu0  ;;  %v2169_v50 = vpop.f32.mrb[77].mxu1 }
 0x177   :  { %3730 = vst.msk [vmem:[%s7050_s3 + $0x124] sm:$0xf] %vm3656_vm1, %v4505_v42  ;;  %3858 = vst.msk [vmem:[%s7050_s3 + $0x324] sm:$0xf] %vm3656_vm1, %v4633_v43  ;;  %v1658_v51 = vadd.f32 %v6232_v10, %v1657_v49  ;;  %v2170_v52 = vadd.f32 %v6232_v10, %v2169_v50  ;;  %v4901_v53 = vpop.f32.mrb[78].mxu0  ;;  %v5029_v54 = vpop.f32.mrb[78].mxu1 }
 0x178   :  { %v2454_v55 = vmax.f32 %v1666_v46, 0.0  ;;  %v2582_v56 = vmax.f32 %v2178_v47, 0.0  ;;  %v1669_v57 = vadd.f32 %v6232_v10, %v4901_v53  ;;  %v2181_v58 = vadd.f32 %v6232_v10, %v5029_v54  ;;  %v1660_v59 = vpop.f32.mrb[79].mxu0  ;;  %v2172_v60 = vpop.f32.mrb[79].mxu1 }
 0x179   :  { %v2452_v61 = vmax.f32 %v1658_v51, 0.0  ;;  %v2580_v62 = vmax.f32 %v2170_v52, 0.0  ;;  %v1661_v63 = vadd.f32 %v6232_v10, %v1660_v59  ;;  %v2173_v0 = vadd.f32 %v6232_v10, %v2172_v60 }
 0x17a   :  { %v4510_v1 = vpack.c.bf16 %v2454_v55, %v2454_v55  ;;  %v4638_v2 = vpack.c.bf16 %v2582_v56, %v2582_v56  ;;  %v2455_v3 = vmax.f32 %v1669_v57, 0.0  ;;  %v2583_v4 = vmax.f32 %v2181_v58, 0.0 }
 0x17b   :  { %v4508_v5 = vpack.c.bf16 %v2452_v61, %v2452_v61  ;;  %v4636_v48 = vpack.c.bf16 %v2580_v62, %v2580_v62  ;;  %v2453_v6 = vmax.f32 %v1661_v63, 0.0  ;;  %v2581_v7 = vmax.f32 %v2173_v0, 0.0 }
 0x17c   :  { %3735 = vst.msk [vmem:[%s7050_s3 + $0x138] sm:$0xf] %vm3656_vm1, %v4510_v1  ;;  %3863 = vst.msk [vmem:[%s7050_s3 + $0x338] sm:$0xf] %vm3656_vm1, %v4638_v2  ;;  %v4511_v8 = vpack.c.bf16 %v2455_v3, %v2455_v3  ;;  %v4639_v9 = vpack.c.bf16 %v2583_v4, %v2583_v4 }
 0x17d   :  { %3733 = vst.msk [vmem:[%s7050_s3 + $0x130] sm:$0xf] %vm3656_vm1, %v4508_v5  ;;  %3861 = vst.msk [vmem:[%s7050_s3 + $0x330] sm:$0xf] %vm3656_vm1, %v4636_v48  ;;  %v4509_v11 = vpack.c.bf16 %v2453_v6, %v2453_v6  ;;  %v4637_v12 = vpack.c.bf16 %v2581_v7, %v2581_v7  ;;  %v4904_v13 = vpop.f32.mrb[80].mxu0  ;;  %v5032_v14 = vpop.f32.mrb[80].mxu1 }
 0x17e   :  { %3736 = vst.msk [vmem:[%s7050_s3 + $0x13c] sm:$0xf] %vm3656_vm1, %v4511_v8  ;;  %3864 = vst.msk [vmem:[%s7050_s3 + $0x33c] sm:$0xf] %vm3656_vm1, %v4639_v9  ;;  %v1682_v15 = vadd.f32 %v6232_v10, %v4904_v13  ;;  %v2194_v16 = vadd.f32 %v6232_v10, %v5032_v14  ;;  %v1673_v17 = vpop.f32.mrb[81].mxu0  ;;  %v2185_v18 = vpop.f32.mrb[81].mxu1 }
 0x17f   :  { %3734 = vst.msk [vmem:[%s7050_s3 + $0x134] sm:$0xf] %vm3656_vm1, %v4509_v11  ;;  %3862 = vst.msk [vmem:[%s7050_s3 + $0x334] sm:$0xf] %vm3656_vm1, %v4637_v12  ;;  %v1674_v19 = vadd.f32 %v6232_v10, %v1673_v17  ;;  %v2186_v20 = vadd.f32 %v6232_v10, %v2185_v18  ;;  %v4905_v21 = vpop.f32.mrb[82].mxu0  ;;  %v5033_v22 = vpop.f32.mrb[82].mxu1 }
 0x180   :  { %v2458_v23 = vmax.f32 %v1682_v15, 0.0  ;;  %v2586_v24 = vmax.f32 %v2194_v16, 0.0  ;;  %v1685_v25 = vadd.f32 %v6232_v10, %v4905_v21  ;;  %v2197_v26 = vadd.f32 %v6232_v10, %v5033_v22  ;;  %v1676_v27 = vpop.f32.mrb[83].mxu0  ;;  %v2188_v28 = vpop.f32.mrb[83].mxu1 }
 0x181   :  { %v2456_v29 = vmax.f32 %v1674_v19, 0.0  ;;  %v2584_v30 = vmax.f32 %v2186_v20, 0.0  ;;  %v1677_v31 = vadd.f32 %v6232_v10, %v1676_v27  ;;  %v2189_v32 = vadd.f32 %v6232_v10, %v2188_v28 }
 0x182   :  { %v4514_v33 = vpack.c.bf16 %v2458_v23, %v2458_v23  ;;  %v4642_v34 = vpack.c.bf16 %v2586_v24, %v2586_v24  ;;  %v2459_v35 = vmax.f32 %v1685_v25, 0.0  ;;  %v2587_v36 = vmax.f32 %v2197_v26, 0.0 }
 0x183   :  { %v4512_v37 = vpack.c.bf16 %v2456_v29, %v2456_v29  ;;  %v4640_v38 = vpack.c.bf16 %v2584_v30, %v2584_v30  ;;  %v2457_v39 = vmax.f32 %v1677_v31, 0.0  ;;  %v2585_v40 = vmax.f32 %v2189_v32, 0.0 }
 0x184   :  { %3739 = vst.msk [vmem:[%s7050_s3 + $0x148] sm:$0xf] %vm3656_vm1, %v4514_v33  ;;  %3867 = vst.msk [vmem:[%s7050_s3 + $0x348] sm:$0xf] %vm3656_vm1, %v4642_v34  ;;  %v4515_v41 = vpack.c.bf16 %v2459_v35, %v2459_v35  ;;  %v4643_v42 = vpack.c.bf16 %v2587_v36, %v2587_v36 }
 0x185   :  { %3737 = vst.msk [vmem:[%s7050_s3 + $0x140] sm:$0xf] %vm3656_vm1, %v4512_v37  ;;  %3865 = vst.msk [vmem:[%s7050_s3 + $0x340] sm:$0xf] %vm3656_vm1, %v4640_v38  ;;  %v4513_v43 = vpack.c.bf16 %v2457_v39, %v2457_v39  ;;  %v4641_v44 = vpack.c.bf16 %v2585_v40, %v2585_v40  ;;  %v4908_v45 = vpop.f32.mrb[84].mxu0  ;;  %v5036_v46 = vpop.f32.mrb[84].mxu1 }
 0x186   :  { %3740 = vst.msk [vmem:[%s7050_s3 + $0x14c] sm:$0xf] %vm3656_vm1, %v4515_v41  ;;  %3868 = vst.msk [vmem:[%s7050_s3 + $0x34c] sm:$0xf] %vm3656_vm1, %v4643_v42  ;;  %v1698_v47 = vadd.f32 %v6232_v10, %v4908_v45  ;;  %v2210_v49 = vadd.f32 %v6232_v10, %v5036_v46  ;;  %v1689_v50 = vpop.f32.mrb[85].mxu0  ;;  %v2201_v51 = vpop.f32.mrb[85].mxu1 }
 0x187   :  { %3738 = vst.msk [vmem:[%s7050_s3 + $0x144] sm:$0xf] %vm3656_vm1, %v4513_v43  ;;  %3866 = vst.msk [vmem:[%s7050_s3 + $0x344] sm:$0xf] %vm3656_vm1, %v4641_v44  ;;  %v1690_v52 = vadd.f32 %v6232_v10, %v1689_v50  ;;  %v2202_v53 = vadd.f32 %v6232_v10, %v2201_v51  ;;  %v4909_v54 = vpop.f32.mrb[86].mxu0  ;;  %v5037_v55 = vpop.f32.mrb[86].mxu1 }
 0x188   :  { %v2462_v56 = vmax.f32 %v1698_v47, 0.0  ;;  %v2590_v57 = vmax.f32 %v2210_v49, 0.0  ;;  %v1701_v58 = vadd.f32 %v6232_v10, %v4909_v54  ;;  %v2213_v59 = vadd.f32 %v6232_v10, %v5037_v55  ;;  %v1692_v60 = vpop.f32.mrb[87].mxu0  ;;  %v2204_v61 = vpop.f32.mrb[87].mxu1 }
 0x189   :  { %v2460_v62 = vmax.f32 %v1690_v52, 0.0  ;;  %v2588_v63 = vmax.f32 %v2202_v53, 0.0  ;;  %v1693_v0 = vadd.f32 %v6232_v10, %v1692_v60  ;;  %v2205_v1 = vadd.f32 %v6232_v10, %v2204_v61 }
 0x18a   :  { %v4518_v2 = vpack.c.bf16 %v2462_v56, %v2462_v56  ;;  %v4646_v3 = vpack.c.bf16 %v2590_v57, %v2590_v57  ;;  %v2463_v4 = vmax.f32 %v1701_v58, 0.0  ;;  %v2591_v5 = vmax.f32 %v2213_v59, 0.0 }
 0x18b   :  { %v4516_v48 = vpack.c.bf16 %v2460_v62, %v2460_v62  ;;  %v4644_v6 = vpack.c.bf16 %v2588_v63, %v2588_v63  ;;  %v2461_v7 = vmax.f32 %v1693_v0, 0.0  ;;  %v2589_v8 = vmax.f32 %v2205_v1, 0.0 }
 0x18c   :  { %3743 = vst.msk [vmem:[%s7050_s3 + $0x158] sm:$0xf] %vm3656_vm1, %v4518_v2  ;;  %3871 = vst.msk [vmem:[%s7050_s3 + $0x358] sm:$0xf] %vm3656_vm1, %v4646_v3  ;;  %v4519_v9 = vpack.c.bf16 %v2463_v4, %v2463_v4  ;;  %v4647_v11 = vpack.c.bf16 %v2591_v5, %v2591_v5 }
 0x18d   :  { %3741 = vst.msk [vmem:[%s7050_s3 + $0x150] sm:$0xf] %vm3656_vm1, %v4516_v48  ;;  %3869 = vst.msk [vmem:[%s7050_s3 + $0x350] sm:$0xf] %vm3656_vm1, %v4644_v6  ;;  %v4517_v12 = vpack.c.bf16 %v2461_v7, %v2461_v7  ;;  %v4645_v13 = vpack.c.bf16 %v2589_v8, %v2589_v8  ;;  %v4912_v14 = vpop.f32.mrb[88].mxu0  ;;  %v5040_v15 = vpop.f32.mrb[88].mxu1 }
 0x18e   :  { %3744 = vst.msk [vmem:[%s7050_s3 + $0x15c] sm:$0xf] %vm3656_vm1, %v4519_v9  ;;  %3872 = vst.msk [vmem:[%s7050_s3 + $0x35c] sm:$0xf] %vm3656_vm1, %v4647_v11  ;;  %v1714_v16 = vadd.f32 %v6232_v10, %v4912_v14  ;;  %v2226_v17 = vadd.f32 %v6232_v10, %v5040_v15  ;;  %v1705_v18 = vpop.f32.mrb[89].mxu0  ;;  %v2217_v19 = vpop.f32.mrb[89].mxu1 }
 0x18f   :  { %3742 = vst.msk [vmem:[%s7050_s3 + $0x154] sm:$0xf] %vm3656_vm1, %v4517_v12  ;;  %3870 = vst.msk [vmem:[%s7050_s3 + $0x354] sm:$0xf] %vm3656_vm1, %v4645_v13  ;;  %v1706_v20 = vadd.f32 %v6232_v10, %v1705_v18  ;;  %v2218_v21 = vadd.f32 %v6232_v10, %v2217_v19  ;;  %v4913_v22 = vpop.f32.mrb[90].mxu0  ;;  %v5041_v23 = vpop.f32.mrb[90].mxu1 }
 0x190   :  { %v2466_v24 = vmax.f32 %v1714_v16, 0.0  ;;  %v2594_v25 = vmax.f32 %v2226_v17, 0.0  ;;  %v1717_v26 = vadd.f32 %v6232_v10, %v4913_v22  ;;  %v2229_v27 = vadd.f32 %v6232_v10, %v5041_v23  ;;  %v1708_v28 = vpop.f32.mrb[91].mxu0  ;;  %v2220_v29 = vpop.f32.mrb[91].mxu1 }
 0x191   :  { %v2464_v30 = vmax.f32 %v1706_v20, 0.0  ;;  %v2592_v31 = vmax.f32 %v2218_v21, 0.0  ;;  %v1709_v32 = vadd.f32 %v6232_v10, %v1708_v28  ;;  %v2221_v33 = vadd.f32 %v6232_v10, %v2220_v29 }
 0x192   :  { %v4522_v34 = vpack.c.bf16 %v2466_v24, %v2466_v24  ;;  %v4650_v35 = vpack.c.bf16 %v2594_v25, %v2594_v25  ;;  %v2467_v36 = vmax.f32 %v1717_v26, 0.0  ;;  %v2595_v37 = vmax.f32 %v2229_v27, 0.0 }
 0x193   :  { %v4520_v38 = vpack.c.bf16 %v2464_v30, %v2464_v30  ;;  %v4648_v39 = vpack.c.bf16 %v2592_v31, %v2592_v31  ;;  %v2465_v40 = vmax.f32 %v1709_v32, 0.0  ;;  %v2593_v41 = vmax.f32 %v2221_v33, 0.0 }
 0x194   :  { %3747 = vst.msk [vmem:[%s7050_s3 + $0x168] sm:$0xf] %vm3656_vm1, %v4522_v34  ;;  %3875 = vst.msk [vmem:[%s7050_s3 + $0x368] sm:$0xf] %vm3656_vm1, %v4650_v35  ;;  %v4523_v42 = vpack.c.bf16 %v2467_v36, %v2467_v36  ;;  %v4651_v43 = vpack.c.bf16 %v2595_v37, %v2595_v37 }
 0x195   :  { %3745 = vst.msk [vmem:[%s7050_s3 + $0x160] sm:$0xf] %vm3656_vm1, %v4520_v38  ;;  %3873 = vst.msk [vmem:[%s7050_s3 + $0x360] sm:$0xf] %vm3656_vm1, %v4648_v39  ;;  %v4521_v44 = vpack.c.bf16 %v2465_v40, %v2465_v40  ;;  %v4649_v45 = vpack.c.bf16 %v2593_v41, %v2593_v41  ;;  %v4916_v46 = vpop.f32.mrb[92].mxu0  ;;  %v5044_v47 = vpop.f32.mrb[92].mxu1 }
 0x196   :  { %3748 = vst.msk [vmem:[%s7050_s3 + $0x16c] sm:$0xf] %vm3656_vm1, %v4523_v42  ;;  %3876 = vst.msk [vmem:[%s7050_s3 + $0x36c] sm:$0xf] %vm3656_vm1, %v4651_v43  ;;  %v1730_v49 = vadd.f32 %v6232_v10, %v4916_v46  ;;  %v2242_v50 = vadd.f32 %v6232_v10, %v5044_v47  ;;  %v1721_v51 = vpop.f32.mrb[93].mxu0  ;;  %v2233_v52 = vpop.f32.mrb[93].mxu1 }
 0x197   :  { %3746 = vst.msk [vmem:[%s7050_s3 + $0x164] sm:$0xf] %vm3656_vm1, %v4521_v44  ;;  %3874 = vst.msk [vmem:[%s7050_s3 + $0x364] sm:$0xf] %vm3656_vm1, %v4649_v45  ;;  %v1722_v53 = vadd.f32 %v6232_v10, %v1721_v51  ;;  %v2234_v54 = vadd.f32 %v6232_v10, %v2233_v52  ;;  %v4917_v55 = vpop.f32.mrb[94].mxu0  ;;  %v5045_v56 = vpop.f32.mrb[94].mxu1 }
 0x198   :  { %v2470_v57 = vmax.f32 %v1730_v49, 0.0  ;;  %v2598_v58 = vmax.f32 %v2242_v50, 0.0  ;;  %v1733_v59 = vadd.f32 %v6232_v10, %v4917_v55  ;;  %v2245_v60 = vadd.f32 %v6232_v10, %v5045_v56  ;;  %v1724_v61 = vpop.f32.mrb[95].mxu0  ;;  %v2236_v62 = vpop.f32.mrb[95].mxu1  ;;  %v6757_v49 = vld [vmem:[%s7049_s2] ss:$0 sm:$0xff] }
 0x199   :  { %v2468_v63 = vmax.f32 %v1722_v53, 0.0  ;;  %v2596_v0 = vmax.f32 %v2234_v54, 0.0  ;;  %v1725_v1 = vadd.f32 %v6232_v10, %v1724_v61  ;;  %v2237_v2 = vadd.f32 %v6232_v10, %v2236_v62 }
 0x19a   :  { %v4526_v3 = vpack.c.bf16 %v2470_v57, %v2470_v57  ;;  %v4654_v4 = vpack.c.bf16 %v2598_v58, %v2598_v58  ;;  %v2471_v5 = vmax.f32 %v1733_v59, 0.0  ;;  %v2599_v48 = vmax.f32 %v2245_v60, 0.0 }
 0x19b   :  { %v4524_v6 = vpack.c.bf16 %v2468_v63, %v2468_v63  ;;  %v4652_v7 = vpack.c.bf16 %v2596_v0, %v2596_v0  ;;  %v2469_v8 = vmax.f32 %v1725_v1, 0.0  ;;  %v2597_v9 = vmax.f32 %v2237_v2, 0.0 }
 0x19c   :  { %3751 = vst.msk [vmem:[%s7050_s3 + $0x178] sm:$0xf] %vm3656_vm1, %v4526_v3  ;;  %3879 = vst.msk [vmem:[%s7050_s3 + $0x378] sm:$0xf] %vm3656_vm1, %v4654_v4  ;;  %v4527_v11 = vpack.c.bf16 %v2471_v5, %v2471_v5  ;;  %v4655_v12 = vpack.c.bf16 %v2599_v48, %v2599_v48 }
 0x19d   :  { %3749 = vst.msk [vmem:[%s7050_s3 + $0x170] sm:$0xf] %vm3656_vm1, %v4524_v6  ;;  %3877 = vst.msk [vmem:[%s7050_s3 + $0x370] sm:$0xf] %vm3656_vm1, %v4652_v7  ;;  %v4525_v13 = vpack.c.bf16 %v2469_v8, %v2469_v8  ;;  %v4653_v14 = vpack.c.bf16 %v2597_v9, %v2597_v9  ;;  %v4920_v15 = vpop.f32.mrb[96].mxu0  ;;  %v5048_v16 = vpop.f32.mrb[96].mxu1 }
 0x19e   :  { %3752 = vst.msk [vmem:[%s7050_s3 + $0x17c] sm:$0xf] %vm3656_vm1, %v4527_v11  ;;  %3880 = vst.msk [vmem:[%s7050_s3 + $0x37c] sm:$0xf] %vm3656_vm1, %v4655_v12  ;;  %v1746_v17 = vadd.f32 %v6232_v10, %v4920_v15  ;;  %v2258_v18 = vadd.f32 %v6232_v10, %v5048_v16  ;;  %v1737_v19 = vpop.f32.mrb[97].mxu0  ;;  %v2249_v20 = vpop.f32.mrb[97].mxu1 }
 0x19f   :  { %3750 = vst.msk [vmem:[%s7050_s3 + $0x174] sm:$0xf] %vm3656_vm1, %v4525_v13  ;;  %3878 = vst.msk [vmem:[%s7050_s3 + $0x374] sm:$0xf] %vm3656_vm1, %v4653_v14  ;;  %v1738_v21 = vadd.f32 %v6232_v10, %v1737_v19  ;;  %v2250_v22 = vadd.f32 %v6232_v10, %v2249_v20  ;;  %v4921_v23 = vpop.f32.mrb[98].mxu0  ;;  %v5049_v24 = vpop.f32.mrb[98].mxu1 }
 0x1a0   :  { %v2474_v25 = vmax.f32 %v1746_v17, 0.0  ;;  %v2602_v26 = vmax.f32 %v2258_v18, 0.0  ;;  %v1749_v27 = vadd.f32 %v6232_v10, %v4921_v23  ;;  %v2261_v28 = vadd.f32 %v6232_v10, %v5049_v24  ;;  %v1740_v29 = vpop.f32.mrb[99].mxu0  ;;  %v2252_v30 = vpop.f32.mrb[99].mxu1 }
 0x1a1   :  { %v2472_v31 = vmax.f32 %v1738_v21, 0.0  ;;  %v2600_v32 = vmax.f32 %v2250_v22, 0.0  ;;  %v1741_v33 = vadd.f32 %v6232_v10, %v1740_v29  ;;  %v2253_v34 = vadd.f32 %v6232_v10, %v2252_v30 }
 0x1a2   :  { %v4530_v35 = vpack.c.bf16 %v2474_v25, %v2474_v25  ;;  %v4658_v36 = vpack.c.bf16 %v2602_v26, %v2602_v26  ;;  %v2475_v37 = vmax.f32 %v1749_v27, 0.0  ;;  %v2603_v38 = vmax.f32 %v2261_v28, 0.0 }
 0x1a3   :  { %v4528_v39 = vpack.c.bf16 %v2472_v31, %v2472_v31  ;;  %v4656_v40 = vpack.c.bf16 %v2600_v32, %v2600_v32  ;;  %v2473_v41 = vmax.f32 %v1741_v33, 0.0  ;;  %v2601_v42 = vmax.f32 %v2253_v34, 0.0 }
 0x1a4   :  { %3755 = vst.msk [vmem:[%s7050_s3 + $0x188] sm:$0xf] %vm3656_vm1, %v4530_v35  ;;  %3883 = vst.msk [vmem:[%s7050_s3 + $0x388] sm:$0xf] %vm3656_vm1, %v4658_v36  ;;  %v4531_v43 = vpack.c.bf16 %v2475_v37, %v2475_v37  ;;  %v4659_v10 = vpack.c.bf16 %v2603_v38, %v2603_v38 }
 0x1a5   :  { %3753 = vst.msk [vmem:[%s7050_s3 + $0x180] sm:$0xf] %vm3656_vm1, %v4528_v39  ;;  %3881 = vst.msk [vmem:[%s7050_s3 + $0x380] sm:$0xf] %vm3656_vm1, %v4656_v40  ;;  %v4529_v44 = vpack.c.bf16 %v2473_v41, %v2473_v41  ;;  %v4657_v45 = vpack.c.bf16 %v2601_v42, %v2601_v42  ;;  %v4924_v46 = vpop.f32.mrb[100].mxu0  ;;  %v5052_v47 = vpop.f32.mrb[100].mxu1 }
 0x1a6   :  { %3756 = vst.msk [vmem:[%s7050_s3 + $0x18c] sm:$0xf] %vm3656_vm1, %v4531_v43  ;;  %3884 = vst.msk [vmem:[%s7050_s3 + $0x38c] sm:$0xf] %vm3656_vm1, %v4659_v10  ;;  %v1762_v50 = vadd.f32 %v6757_v49, %v4924_v46  ;;  %v2274_v51 = vadd.f32 %v6757_v49, %v5052_v47  ;;  %v1753_v52 = vpop.f32.mrb[101].mxu0  ;;  %v2265_v53 = vpop.f32.mrb[101].mxu1 }
 0x1a7   :  { %3754 = vst.msk [vmem:[%s7050_s3 + $0x184] sm:$0xf] %vm3656_vm1, %v4529_v44  ;;  %3882 = vst.msk [vmem:[%s7050_s3 + $0x384] sm:$0xf] %vm3656_vm1, %v4657_v45  ;;  %v1754_v54 = vadd.f32 %v6757_v49, %v1753_v52  ;;  %v2266_v55 = vadd.f32 %v6757_v49, %v2265_v53  ;;  %v4925_v56 = vpop.f32.mrb[102].mxu0  ;;  %v5053_v57 = vpop.f32.mrb[102].mxu1 }
 0x1a8   :  { %v2478_v58 = vmax.f32 %v1762_v50, 0.0  ;;  %v2606_v59 = vmax.f32 %v2274_v51, 0.0  ;;  %v1765_v60 = vadd.f32 %v6757_v49, %v4925_v56  ;;  %v2277_v61 = vadd.f32 %v6757_v49, %v5053_v57  ;;  %v1756_v62 = vpop.f32.mrb[103].mxu0  ;;  %v2268_v63 = vpop.f32.mrb[103].mxu1 }
 0x1a9   :  { %v2476_v0 = vmax.f32 %v1754_v54, 0.0  ;;  %v2604_v1 = vmax.f32 %v2266_v55, 0.0  ;;  %v1757_v2 = vadd.f32 %v6757_v49, %v1756_v62  ;;  %v2269_v3 = vadd.f32 %v6757_v49, %v2268_v63 }
 0x1aa   :  { %v4534_v4 = vpack.c.bf16 %v2478_v58, %v2478_v58  ;;  %v4662_v5 = vpack.c.bf16 %v2606_v59, %v2606_v59  ;;  %v2479_v48 = vmax.f32 %v1765_v60, 0.0  ;;  %v2607_v6 = vmax.f32 %v2277_v61, 0.0 }
 0x1ab   :  { %v4532_v7 = vpack.c.bf16 %v2476_v0, %v2476_v0  ;;  %v4660_v8 = vpack.c.bf16 %v2604_v1, %v2604_v1  ;;  %v2477_v9 = vmax.f32 %v1757_v2, 0.0  ;;  %v2605_v11 = vmax.f32 %v2269_v3, 0.0 }
 0x1ac   :  { %3759 = vst.msk [vmem:[%s7050_s3 + $0x198] sm:$0xf] %vm3656_vm1, %v4534_v4  ;;  %3887 = vst.msk [vmem:[%s7050_s3 + $0x398] sm:$0xf] %vm3656_vm1, %v4662_v5  ;;  %v4535_v12 = vpack.c.bf16 %v2479_v48, %v2479_v48  ;;  %v4663_v13 = vpack.c.bf16 %v2607_v6, %v2607_v6 }
 0x1ad   :  { %3757 = vst.msk [vmem:[%s7050_s3 + $0x190] sm:$0xf] %vm3656_vm1, %v4532_v7  ;;  %3885 = vst.msk [vmem:[%s7050_s3 + $0x390] sm:$0xf] %vm3656_vm1, %v4660_v8  ;;  %v4533_v14 = vpack.c.bf16 %v2477_v9, %v2477_v9  ;;  %v4661_v15 = vpack.c.bf16 %v2605_v11, %v2605_v11  ;;  %v4928_v16 = vpop.f32.mrb[104].mxu0  ;;  %v5056_v17 = vpop.f32.mrb[104].mxu1 }
 0x1ae   :  { %3760 = vst.msk [vmem:[%s7050_s3 + $0x19c] sm:$0xf] %vm3656_vm1, %v4535_v12  ;;  %3888 = vst.msk [vmem:[%s7050_s3 + $0x39c] sm:$0xf] %vm3656_vm1, %v4663_v13  ;;  %v1778_v18 = vadd.f32 %v6757_v49, %v4928_v16  ;;  %v2290_v19 = vadd.f32 %v6757_v49, %v5056_v17  ;;  %v1769_v20 = vpop.f32.mrb[105].mxu0  ;;  %v2281_v21 = vpop.f32.mrb[105].mxu1 }
 0x1af   :  { %3758 = vst.msk [vmem:[%s7050_s3 + $0x194] sm:$0xf] %vm3656_vm1, %v4533_v14  ;;  %3886 = vst.msk [vmem:[%s7050_s3 + $0x394] sm:$0xf] %vm3656_vm1, %v4661_v15  ;;  %v1770_v22 = vadd.f32 %v6757_v49, %v1769_v20  ;;  %v2282_v23 = vadd.f32 %v6757_v49, %v2281_v21  ;;  %v4929_v24 = vpop.f32.mrb[106].mxu0  ;;  %v5057_v25 = vpop.f32.mrb[106].mxu1 }
 0x1b0   :  { %v2482_v26 = vmax.f32 %v1778_v18, 0.0  ;;  %v2610_v27 = vmax.f32 %v2290_v19, 0.0  ;;  %v1781_v28 = vadd.f32 %v6757_v49, %v4929_v24  ;;  %v2293_v29 = vadd.f32 %v6757_v49, %v5057_v25  ;;  %v1772_v30 = vpop.f32.mrb[107].mxu0  ;;  %v2284_v31 = vpop.f32.mrb[107].mxu1 }
 0x1b1   :  { %v2480_v32 = vmax.f32 %v1770_v22, 0.0  ;;  %v2608_v33 = vmax.f32 %v2282_v23, 0.0  ;;  %v1773_v34 = vadd.f32 %v6757_v49, %v1772_v30  ;;  %v2285_v35 = vadd.f32 %v6757_v49, %v2284_v31 }
 0x1b2   :  { %v4538_v36 = vpack.c.bf16 %v2482_v26, %v2482_v26  ;;  %v4666_v37 = vpack.c.bf16 %v2610_v27, %v2610_v27  ;;  %v2483_v38 = vmax.f32 %v1781_v28, 0.0  ;;  %v2611_v39 = vmax.f32 %v2293_v29, 0.0 }
 0x1b3   :  { %v4536_v40 = vpack.c.bf16 %v2480_v32, %v2480_v32  ;;  %v4664_v41 = vpack.c.bf16 %v2608_v33, %v2608_v33  ;;  %v2481_v42 = vmax.f32 %v1773_v34, 0.0  ;;  %v2609_v43 = vmax.f32 %v2285_v35, 0.0 }
 0x1b4   :  { %3763 = vst.msk [vmem:[%s7050_s3 + $0x1a8] sm:$0xf] %vm3656_vm1, %v4538_v36  ;;  %3891 = vst.msk [vmem:[%s7050_s3 + $0x3a8] sm:$0xf] %vm3656_vm1, %v4666_v37  ;;  %v4539_v10 = vpack.c.bf16 %v2483_v38, %v2483_v38  ;;  %v4667_v44 = vpack.c.bf16 %v2611_v39, %v2611_v39 }
 0x1b5   :  { %3761 = vst.msk [vmem:[%s7050_s3 + $0x1a0] sm:$0xf] %vm3656_vm1, %v4536_v40  ;;  %3889 = vst.msk [vmem:[%s7050_s3 + $0x3a0] sm:$0xf] %vm3656_vm1, %v4664_v41  ;;  %v4537_v45 = vpack.c.bf16 %v2481_v42, %v2481_v42  ;;  %v4665_v46 = vpack.c.bf16 %v2609_v43, %v2609_v43  ;;  %v4932_v47 = vpop.f32.mrb[108].mxu0  ;;  %v5060_v50 = vpop.f32.mrb[108].mxu1 }
 0x1b6   :  { %3764 = vst.msk [vmem:[%s7050_s3 + $0x1ac] sm:$0xf] %vm3656_vm1, %v4539_v10  ;;  %3892 = vst.msk [vmem:[%s7050_s3 + $0x3ac] sm:$0xf] %vm3656_vm1, %v4667_v44  ;;  %v1794_v51 = vadd.f32 %v6757_v49, %v4932_v47  ;;  %v2306_v52 = vadd.f32 %v6757_v49, %v5060_v50  ;;  %v1785_v53 = vpop.f32.mrb[109].mxu0  ;;  %v2297_v54 = vpop.f32.mrb[109].mxu1 }
 0x1b7   :  { %3762 = vst.msk [vmem:[%s7050_s3 + $0x1a4] sm:$0xf] %vm3656_vm1, %v4537_v45  ;;  %3890 = vst.msk [vmem:[%s7050_s3 + $0x3a4] sm:$0xf] %vm3656_vm1, %v4665_v46  ;;  %v1786_v55 = vadd.f32 %v6757_v49, %v1785_v53  ;;  %v2298_v56 = vadd.f32 %v6757_v49, %v2297_v54  ;;  %v4933_v57 = vpop.f32.mrb[110].mxu0  ;;  %v5061_v58 = vpop.f32.mrb[110].mxu1 }
 0x1b8   :  { %v2486_v59 = vmax.f32 %v1794_v51, 0.0  ;;  %v2614_v60 = vmax.f32 %v2306_v52, 0.0  ;;  %v1797_v61 = vadd.f32 %v6757_v49, %v4933_v57  ;;  %v2309_v62 = vadd.f32 %v6757_v49, %v5061_v58  ;;  %v1788_v63 = vpop.f32.mrb[111].mxu0  ;;  %v2300_v0 = vpop.f32.mrb[111].mxu1 }
 0x1b9   :  { %v2484_v1 = vmax.f32 %v1786_v55, 0.0  ;;  %v2612_v2 = vmax.f32 %v2298_v56, 0.0  ;;  %v1789_v3 = vadd.f32 %v6757_v49, %v1788_v63  ;;  %v2301_v4 = vadd.f32 %v6757_v49, %v2300_v0 }
 0x1ba   :  { %v4542_v5 = vpack.c.bf16 %v2486_v59, %v2486_v59  ;;  %v4670_v48 = vpack.c.bf16 %v2614_v60, %v2614_v60  ;;  %v2487_v6 = vmax.f32 %v1797_v61, 0.0  ;;  %v2615_v7 = vmax.f32 %v2309_v62, 0.0 }
 0x1bb   :  { %v4540_v8 = vpack.c.bf16 %v2484_v1, %v2484_v1  ;;  %v4668_v9 = vpack.c.bf16 %v2612_v2, %v2612_v2  ;;  %v2485_v11 = vmax.f32 %v1789_v3, 0.0  ;;  %v2613_v12 = vmax.f32 %v2301_v4, 0.0 }
 0x1bc   :  { %3767 = vst.msk [vmem:[%s7050_s3 + $0x1b8] sm:$0xf] %vm3656_vm1, %v4542_v5  ;;  %3895 = vst.msk [vmem:[%s7050_s3 + $0x3b8] sm:$0xf] %vm3656_vm1, %v4670_v48  ;;  %v4543_v13 = vpack.c.bf16 %v2487_v6, %v2487_v6  ;;  %v4671_v14 = vpack.c.bf16 %v2615_v7, %v2615_v7 }
 0x1bd   :  { %3765 = vst.msk [vmem:[%s7050_s3 + $0x1b0] sm:$0xf] %vm3656_vm1, %v4540_v8  ;;  %3893 = vst.msk [vmem:[%s7050_s3 + $0x3b0] sm:$0xf] %vm3656_vm1, %v4668_v9  ;;  %v4541_v15 = vpack.c.bf16 %v2485_v11, %v2485_v11  ;;  %v4669_v16 = vpack.c.bf16 %v2613_v12, %v2613_v12  ;;  %v4936_v17 = vpop.f32.mrb[112].mxu0  ;;  %v5064_v18 = vpop.f32.mrb[112].mxu1 }
 0x1be   :  { %3768 = vst.msk [vmem:[%s7050_s3 + $0x1bc] sm:$0xf] %vm3656_vm1, %v4543_v13  ;;  %3896 = vst.msk [vmem:[%s7050_s3 + $0x3bc] sm:$0xf] %vm3656_vm1, %v4671_v14  ;;  %v1810_v19 = vadd.f32 %v6757_v49, %v4936_v17  ;;  %v2322_v20 = vadd.f32 %v6757_v49, %v5064_v18  ;;  %v1801_v21 = vpop.f32.mrb[113].mxu0  ;;  %v2313_v22 = vpop.f32.mrb[113].mxu1 }
 0x1bf   :  { %3766 = vst.msk [vmem:[%s7050_s3 + $0x1b4] sm:$0xf] %vm3656_vm1, %v4541_v15  ;;  %3894 = vst.msk [vmem:[%s7050_s3 + $0x3b4] sm:$0xf] %vm3656_vm1, %v4669_v16  ;;  %v1802_v23 = vadd.f32 %v6757_v49, %v1801_v21  ;;  %v2314_v24 = vadd.f32 %v6757_v49, %v2313_v22  ;;  %v4937_v25 = vpop.f32.mrb[114].mxu0  ;;  %v5065_v26 = vpop.f32.mrb[114].mxu1 }
 0x1c0   :  { %v2490_v27 = vmax.f32 %v1810_v19, 0.0  ;;  %v2618_v28 = vmax.f32 %v2322_v20, 0.0  ;;  %v1813_v29 = vadd.f32 %v6757_v49, %v4937_v25  ;;  %v2325_v30 = vadd.f32 %v6757_v49, %v5065_v26  ;;  %v1804_v31 = vpop.f32.mrb[115].mxu0  ;;  %v2316_v32 = vpop.f32.mrb[115].mxu1 }
 0x1c1   :  { %v2488_v33 = vmax.f32 %v1802_v23, 0.0  ;;  %v2616_v34 = vmax.f32 %v2314_v24, 0.0  ;;  %v1805_v35 = vadd.f32 %v6757_v49, %v1804_v31  ;;  %v2317_v36 = vadd.f32 %v6757_v49, %v2316_v32 }
 0x1c2   :  { %v4546_v37 = vpack.c.bf16 %v2490_v27, %v2490_v27  ;;  %v4674_v38 = vpack.c.bf16 %v2618_v28, %v2618_v28  ;;  %v2491_v39 = vmax.f32 %v1813_v29, 0.0  ;;  %v2619_v40 = vmax.f32 %v2325_v30, 0.0 }
 0x1c3   :  { %v4544_v41 = vpack.c.bf16 %v2488_v33, %v2488_v33  ;;  %v4672_v42 = vpack.c.bf16 %v2616_v34, %v2616_v34  ;;  %v2489_v43 = vmax.f32 %v1805_v35, 0.0  ;;  %v2617_v10 = vmax.f32 %v2317_v36, 0.0 }
 0x1c4   :  { %3771 = vst.msk [vmem:[%s7050_s3 + $0x1c8] sm:$0xf] %vm3656_vm1, %v4546_v37  ;;  %3899 = vst.msk [vmem:[%s7050_s3 + $0x3c8] sm:$0xf] %vm3656_vm1, %v4674_v38  ;;  %v4547_v44 = vpack.c.bf16 %v2491_v39, %v2491_v39  ;;  %v4675_v45 = vpack.c.bf16 %v2619_v40, %v2619_v40 }
 0x1c5   :  { %3769 = vst.msk [vmem:[%s7050_s3 + $0x1c0] sm:$0xf] %vm3656_vm1, %v4544_v41  ;;  %3897 = vst.msk [vmem:[%s7050_s3 + $0x3c0] sm:$0xf] %vm3656_vm1, %v4672_v42  ;;  %v4545_v46 = vpack.c.bf16 %v2489_v43, %v2489_v43  ;;  %v4673_v47 = vpack.c.bf16 %v2617_v10, %v2617_v10  ;;  %v4940_v50 = vpop.f32.mrb[116].mxu0  ;;  %v5068_v51 = vpop.f32.mrb[116].mxu1 }
 0x1c6   :  { %3772 = vst.msk [vmem:[%s7050_s3 + $0x1cc] sm:$0xf] %vm3656_vm1, %v4547_v44  ;;  %3900 = vst.msk [vmem:[%s7050_s3 + $0x3cc] sm:$0xf] %vm3656_vm1, %v4675_v45  ;;  %v1826_v52 = vadd.f32 %v6757_v49, %v4940_v50  ;;  %v2338_v53 = vadd.f32 %v6757_v49, %v5068_v51  ;;  %v1817_v54 = vpop.f32.mrb[117].mxu0  ;;  %v2329_v55 = vpop.f32.mrb[117].mxu1 }
 0x1c7   :  { %3770 = vst.msk [vmem:[%s7050_s3 + $0x1c4] sm:$0xf] %vm3656_vm1, %v4545_v46  ;;  %3898 = vst.msk [vmem:[%s7050_s3 + $0x3c4] sm:$0xf] %vm3656_vm1, %v4673_v47  ;;  %v1818_v56 = vadd.f32 %v6757_v49, %v1817_v54  ;;  %v2330_v57 = vadd.f32 %v6757_v49, %v2329_v55  ;;  %v4941_v58 = vpop.f32.mrb[118].mxu0  ;;  %v5069_v59 = vpop.f32.mrb[118].mxu1 }
 0x1c8   :  { %v2494_v60 = vmax.f32 %v1826_v52, 0.0  ;;  %v2622_v61 = vmax.f32 %v2338_v53, 0.0  ;;  %v1829_v62 = vadd.f32 %v6757_v49, %v4941_v58  ;;  %v2341_v63 = vadd.f32 %v6757_v49, %v5069_v59  ;;  %v1820_v0 = vpop.f32.mrb[119].mxu0  ;;  %v2332_v1 = vpop.f32.mrb[119].mxu1 }
 0x1c9   :  { %v2492_v2 = vmax.f32 %v1818_v56, 0.0  ;;  %v2620_v3 = vmax.f32 %v2330_v57, 0.0  ;;  %v1821_v4 = vadd.f32 %v6757_v49, %v1820_v0  ;;  %v2333_v5 = vadd.f32 %v6757_v49, %v2332_v1 }
 0x1ca   :  { %v4550_v48 = vpack.c.bf16 %v2494_v60, %v2494_v60  ;;  %v4678_v6 = vpack.c.bf16 %v2622_v61, %v2622_v61  ;;  %v2495_v7 = vmax.f32 %v1829_v62, 0.0  ;;  %v2623_v8 = vmax.f32 %v2341_v63, 0.0 }
 0x1cb   :  { %v4548_v9 = vpack.c.bf16 %v2492_v2, %v2492_v2  ;;  %v4676_v11 = vpack.c.bf16 %v2620_v3, %v2620_v3  ;;  %v2493_v12 = vmax.f32 %v1821_v4, 0.0  ;;  %v2621_v13 = vmax.f32 %v2333_v5, 0.0 }
 0x1cc   :  { %3775 = vst.msk [vmem:[%s7050_s3 + $0x1d8] sm:$0xf] %vm3656_vm1, %v4550_v48  ;;  %3903 = vst.msk [vmem:[%s7050_s3 + $0x3d8] sm:$0xf] %vm3656_vm1, %v4678_v6  ;;  %v4551_v14 = vpack.c.bf16 %v2495_v7, %v2495_v7  ;;  %v4679_v15 = vpack.c.bf16 %v2623_v8, %v2623_v8 }
 0x1cd   :  { %3773 = vst.msk [vmem:[%s7050_s3 + $0x1d0] sm:$0xf] %vm3656_vm1, %v4548_v9  ;;  %3901 = vst.msk [vmem:[%s7050_s3 + $0x3d0] sm:$0xf] %vm3656_vm1, %v4676_v11  ;;  %v4549_v16 = vpack.c.bf16 %v2493_v12, %v2493_v12  ;;  %v4677_v17 = vpack.c.bf16 %v2621_v13, %v2621_v13  ;;  %v4944_v18 = vpop.f32.mrb[120].mxu0  ;;  %v5072_v19 = vpop.f32.mrb[120].mxu1 }
 0x1ce   :  { %3776 = vst.msk [vmem:[%s7050_s3 + $0x1dc] sm:$0xf] %vm3656_vm1, %v4551_v14  ;;  %3904 = vst.msk [vmem:[%s7050_s3 + $0x3dc] sm:$0xf] %vm3656_vm1, %v4679_v15  ;;  %v1842_v20 = vadd.f32 %v6757_v49, %v4944_v18  ;;  %v2354_v21 = vadd.f32 %v6757_v49, %v5072_v19  ;;  %v1833_v22 = vpop.f32.mrb[121].mxu0  ;;  %v2345_v23 = vpop.f32.mrb[121].mxu1 }
 0x1cf   :  { %3774 = vst.msk [vmem:[%s7050_s3 + $0x1d4] sm:$0xf] %vm3656_vm1, %v4549_v16  ;;  %3902 = vst.msk [vmem:[%s7050_s3 + $0x3d4] sm:$0xf] %vm3656_vm1, %v4677_v17  ;;  %v1834_v24 = vadd.f32 %v6757_v49, %v1833_v22  ;;  %v2346_v25 = vadd.f32 %v6757_v49, %v2345_v23  ;;  %v4945_v26 = vpop.f32.mrb[122].mxu0  ;;  %v5073_v27 = vpop.f32.mrb[122].mxu1 }
 0x1d0   :  { %v2498_v28 = vmax.f32 %v1842_v20, 0.0  ;;  %v2626_v29 = vmax.f32 %v2354_v21, 0.0  ;;  %v1845_v30 = vadd.f32 %v6757_v49, %v4945_v26  ;;  %v2357_v31 = vadd.f32 %v6757_v49, %v5073_v27  ;;  %v1836_v32 = vpop.f32.mrb[123].mxu0  ;;  %v2348_v33 = vpop.f32.mrb[123].mxu1 }
 0x1d1   :  { %v2496_v34 = vmax.f32 %v1834_v24, 0.0  ;;  %v2624_v35 = vmax.f32 %v2346_v25, 0.0  ;;  %v1837_v36 = vadd.f32 %v6757_v49, %v1836_v32  ;;  %v2349_v37 = vadd.f32 %v6757_v49, %v2348_v33 }
 0x1d2   :  { %v4554_v38 = vpack.c.bf16 %v2498_v28, %v2498_v28  ;;  %v4682_v39 = vpack.c.bf16 %v2626_v29, %v2626_v29  ;;  %v2499_v40 = vmax.f32 %v1845_v30, 0.0  ;;  %v2627_v41 = vmax.f32 %v2357_v31, 0.0 }
 0x1d3   :  { %v4552_v42 = vpack.c.bf16 %v2496_v34, %v2496_v34  ;;  %v4680_v43 = vpack.c.bf16 %v2624_v35, %v2624_v35  ;;  %v2497_v10 = vmax.f32 %v1837_v36, 0.0  ;;  %v2625_v44 = vmax.f32 %v2349_v37, 0.0 }
 0x1d4   :  { %3779 = vst.msk [vmem:[%s7050_s3 + $0x1e8] sm:$0xf] %vm3656_vm1, %v4554_v38  ;;  %3907 = vst.msk [vmem:[%s7050_s3 + $0x3e8] sm:$0xf] %vm3656_vm1, %v4682_v39  ;;  %v4555_v45 = vpack.c.bf16 %v2499_v40, %v2499_v40  ;;  %v4683_v46 = vpack.c.bf16 %v2627_v41, %v2627_v41 }
 0x1d5   :  { %3777 = vst.msk [vmem:[%s7050_s3 + $0x1e0] sm:$0xf] %vm3656_vm1, %v4552_v42  ;;  %3905 = vst.msk [vmem:[%s7050_s3 + $0x3e0] sm:$0xf] %vm3656_vm1, %v4680_v43  ;;  %v4553_v47 = vpack.c.bf16 %v2497_v10, %v2497_v10  ;;  %v4681_v50 = vpack.c.bf16 %v2625_v44, %v2625_v44  ;;  %v4948_v51 = vpop.f32.mrb[124].mxu0  ;;  %v5076_v52 = vpop.f32.mrb[124].mxu1 }
 0x1d6   :  { %3780 = vst.msk [vmem:[%s7050_s3 + $0x1ec] sm:$0xf] %vm3656_vm1, %v4555_v45  ;;  %3908 = vst.msk [vmem:[%s7050_s3 + $0x3ec] sm:$0xf] %vm3656_vm1, %v4683_v46  ;;  %v1858_v53 = vadd.f32 %v6757_v49, %v4948_v51  ;;  %v2370_v54 = vadd.f32 %v6757_v49, %v5076_v52  ;;  %v1849_v55 = vpop.f32.mrb[125].mxu0  ;;  %v2361_v56 = vpop.f32.mrb[125].mxu1 }
 0x1d7   :  { %3778 = vst.msk [vmem:[%s7050_s3 + $0x1e4] sm:$0xf] %vm3656_vm1, %v4553_v47  ;;  %3906 = vst.msk [vmem:[%s7050_s3 + $0x3e4] sm:$0xf] %vm3656_vm1, %v4681_v50  ;;  %v1850_v57 = vadd.f32 %v6757_v49, %v1849_v55  ;;  %v2362_v58 = vadd.f32 %v6757_v49, %v2361_v56  ;;  %v4949_v59 = vpop.f32.mrb[126].mxu0  ;;  %v5077_v60 = vpop.f32.mrb[126].mxu1 }
 0x1d8   :  { %v2502_v61 = vmax.f32 %v1858_v53, 0.0  ;;  %v2630_v62 = vmax.f32 %v2370_v54, 0.0  ;;  %v1861_v63 = vadd.f32 %v6757_v49, %v4949_v59  ;;  %v2373_v0 = vadd.f32 %v6757_v49, %v5077_v60  ;;  %v1852_v1 = vpop.f32.mrb[127].mxu0  ;;  %v2364_v2 = vpop.f32.mrb[127].mxu1 }
 0x1d9   :  { %v2500_v3 = vmax.f32 %v1850_v57, 0.0  ;;  %v2628_v4 = vmax.f32 %v2362_v58, 0.0  ;;  %v1853_v5 = vadd.f32 %v6757_v49, %v1852_v1  ;;  %v2365_v48 = vadd.f32 %v6757_v49, %v2364_v2 }
 0x1da   :  { %v4558_v6 = vpack.c.bf16 %v2502_v61, %v2502_v61  ;;  %v4686_v7 = vpack.c.bf16 %v2630_v62, %v2630_v62  ;;  %v2503_v8 = vmax.f32 %v1861_v63, 0.0  ;;  %v2631_v9 = vmax.f32 %v2373_v0, 0.0 }
 0x1db   :  { %v4556_v11 = vpack.c.bf16 %v2500_v3, %v2500_v3  ;;  %v4684_v12 = vpack.c.bf16 %v2628_v4, %v2628_v4  ;;  %v2501_v13 = vmax.f32 %v1853_v5, 0.0  ;;  %v2629_v14 = vmax.f32 %v2365_v48, 0.0 }
 0x1dc   :  { %3783 = vst.msk [vmem:[%s7050_s3 + $0x1f8] sm:$0xf] %vm3656_vm1, %v4558_v6  ;;  %3911 = vst.msk [vmem:[%s7050_s3 + $0x3f8] sm:$0xf] %vm3656_vm1, %v4686_v7  ;;  %v4559_v15 = vpack.c.bf16 %v2503_v8, %v2503_v8  ;;  %v4687_v49 = vpack.c.bf16 %v2631_v9, %v2631_v9 }
 0x1dd   :  { %3781 = vst.msk [vmem:[%s7050_s3 + $0x1f0] sm:$0xf] %vm3656_vm1, %v4556_v11  ;;  %3909 = vst.msk [vmem:[%s7050_s3 + $0x3f0] sm:$0xf] %vm3656_vm1, %v4684_v12  ;;  %v4557_v16 = vpack.c.bf16 %v2501_v13, %v2501_v13  ;;  %v4685_v17 = vpack.c.bf16 %v2629_v14, %v2629_v14 }
 0x1de   :  { %3784 = vst.msk [vmem:[%s7050_s3 + $0x1fc] sm:$0xf] %vm3656_vm1, %v4559_v15  ;;  %3912 = vst.msk [vmem:[%s7050_s3 + $0x3fc] sm:$0xf] %vm3656_vm1, %v4687_v49 }
 0x1df   :  { %3782 = vst.msk [vmem:[%s7050_s3 + $0x1f4] sm:$0xf] %vm3656_vm1, %v4557_v16  ;;  %3910 = vst.msk [vmem:[%s7050_s3 + $0x3f4] sm:$0xf] %vm3656_vm1, %v4685_v17 }

// kernel: _lambda_.8
= control target key start
LH: loop header
LB: loop body
LE: loop exit
PB: predicated region body
PF: predicated region fallthrough
CT: control target
= control target key end

     0   :  { %vm291_vm0 = vcmask 654336   ;;  %vm997_vm1 = vcmask 125952   ;;  %vm1126_vm2 = vcmask 130048   ;;  %s3891_s1 = inlined_call_operand.vmem [shape: bf16[80,16], index: 1, kind: input, shape index: {}]   ;;  %s3892_s0 = inlined_call_operand.vmem [shape: bf16[512,80], index: 0, kind: input, shape index: {}]   ;;  %s3893_s2 = inlined_call_operand.vmem [shape: f32[1,16], index: 2, kind: input, shape index: {}]   ;;  %s3894_s4 = inlined_call_operand.vmem [shape: bf16[512,16], index: 4, kind: output, shape index: {0}]   ;;  %s3895_s3 = inlined_call_operand.vmem [shape: f32[1,16], index: 3, kind: input, shape index: {}]   ;;  %s3896_s5 = inlined_call_operand.vmem [shape: bf16[512,16], index: 5, kind: output, shape index: {1}]  }
   0x1   :  { %v2358_v0 = vld [vmem:[%s3891_s1] sm:$0xff]   ;;  %v2359_v1 = vld [vmem:[%s3891_s1 + $0x8] sm:$0xff]   ;;  %v2360_v2 = vld [vmem:[%s3891_s1 + $0x10] sm:$0xff]  }
   0x2   :  { %2274 = vmatprep.subr.bf16.mxu0 %v2358_v0  ;;  %2348 = vmatprep.subr.bf16.mxu1 %v2358_v0  ;;  %v2363_v3 = vld [vmem:[%s3892_s0] sm:$0xff]   ;;  %v2361_v5 = vld [vmem:[%s3891_s1 + $0x18] sm:$0xff]   ;;  %v2365_v7 = vld [vmem:[%s3892_s0 + $0x8] sm:$0xff]  }
   0x3   :  { %2275 = vmatpush3.bf16.msra.mxu0 %v2358_v0  ;;  %2353 = vmatpush3.bf16.msra.mxu1 %v2358_v0  ;;  %v2364_v4 = vld [vmem:[%s3892_s0 + $0x80] sm:$0xff]   ;;  %v2366_v8 = vld [vmem:[%s3892_s0 + $0x88] sm:$0xff]   ;;  %v2367_v9 = vld [vmem:[%s3892_s0 + $0x10] sm:$0xff]  }
   0x4   :  { %2276 = vmatprep.subr.bf16.mxu0 %v2359_v1  ;;  %2349 = vmatprep.subr.bf16.mxu1 %v2359_v1  ;;  %v2362_v6 = vld [vmem:[%s3891_s1 + $0x20] sm:$0xff]   ;;  %v2369_v10 = vld [vmem:[%s3892_s0 + $0x90] sm:$0xff]   ;;  %v2368_v11 = vld [vmem:[%s3892_s0 + $0x18] sm:$0xff]  }
   0x5   :  { %2284 = vmatprep.mubr.msk.bf16.mxu0 %vm291_vm0, %v2363_v3  ;;  %2316 = vmatprep.mubr.msk.bf16.mxu1 %vm291_vm0, %v2364_v4  ;;  %v2370_v12 = vld [vmem:[%s3892_s0 + $0x98] sm:$0xff]   ;;  %v2371_v13 = vld [vmem:[%s3892_s0 + $0x20] sm:$0xff]   ;;  %v2372_v15 = vld [vmem:[%s3892_s0 + $0x28] sm:$0xff]  }
   0x6   :  { %v2373_v14 = vld [vmem:[%s3892_s0 + $0xa0] sm:$0xff]   ;;  %v2374_v16 = vld [vmem:[%s3892_s0 + $0xa8] sm:$0xff]   ;;  %v2375_v17 = vld [vmem:[%s3892_s0 + $0x30] sm:$0xff]  }
   0x7   :  { %2277 = vmatpush3.bf16.msra.mxu0 %v2359_v1  ;;  %2354 = vmatpush3.bf16.msra.mxu1 %v2359_v1  ;;  %v2377_v18 = vld [vmem:[%s3892_s0 + $0xb0] sm:$0xff]   ;;  %v2376_v19 = vld [vmem:[%s3892_s0 + $0x38] sm:$0xff]   ;;  %v2379_v21 = vld [vmem:[%s3892_s0 + $0x40] sm:$0xff]  }
   0x8   :  { %2278 = vmatprep.subr.bf16.mxu0 %v2360_v2  ;;  %2350 = vmatprep.subr.bf16.mxu1 %v2360_v2  ;;  %v2378_v20 = vld [vmem:[%s3892_s0 + $0xb8] sm:$0xff]   ;;  %v2381_v22 = vld [vmem:[%s3892_s0 + $0xc0] sm:$0xff]   ;;  %v2380_v23 = vld [vmem:[%s3892_s0 + $0x48] sm:$0xff]  }
   0x9   :  { %v2382_v24 = vld [vmem:[%s3892_s0 + $0xc8] sm:$0xff]   ;;  %v2383_v25 = vld [vmem:[%s3892_s0 + $0x50] sm:$0xff]   ;;  %v2384_v27 = vld [vmem:[%s3892_s0 + $0x58] sm:$0xff]  }
   0xa   :  { %v2385_v26 = vld [vmem:[%s3892_s0 + $0xd0] sm:$0xff]   ;;  %v2386_v28 = vld [vmem:[%s3892_s0 + $0xd8] sm:$0xff]   ;;  %v2387_v29 = vld [vmem:[%s3892_s0 + $0x60] sm:$0xff]  }
   0xb   :  { %2279 = vmatpush3.bf16.msra.mxu0 %v2360_v2  ;;  %2355 = vmatpush3.bf16.msra.mxu1 %v2360_v2  ;;  %v2389_v30 = vld [vmem:[%s3892_s0 + $0xe0] sm:$0xff]   ;;  %v2388_v31 = vld [vmem:[%s3892_s0 + $0x68] sm:$0xff]   ;;  %v2391_v33 = vld [vmem:[%s3892_s0 + $0x70] sm:$0xff]  }
   0xc   :  { %2280 = vmatprep.subr.bf16.mxu0 %v2361_v5  ;;  %2351 = vmatprep.subr.bf16.mxu1 %v2361_v5  ;;  %v2390_v32 = vld [vmem:[%s3892_s0 + $0xe8] sm:$0xff]   ;;  %v2393_v34 = vld [vmem:[%s3892_s0 + $0xf0] sm:$0xff]   ;;  %v2392_v35 = vld [vmem:[%s3892_s0 + $0x78] sm:$0xff]  }
   0xd   :  { %v2394_v36 = vld [vmem:[%s3892_s0 + $0xf8] sm:$0xff]   ;;  %v2699_v37 = vld [vmem:[%s3893_s2] ss:$0 sm:$0xff] }
   0xf   :  { %2281 = vmatpush3.bf16.msra.mxu0 %v2361_v5  ;;  %2356 = vmatpush3.bf16.msra.mxu1 %v2361_v5 }
  0x10   :  { %2282 = vmatprep.subr.bf16.mxu0 %v2362_v6  ;;  %2352 = vmatprep.subr.bf16.mxu1 %v2362_v6 }
  0x13   :  { %2283 = vmatpush3.bf16.msra.mxu0 %v2362_v6  ;;  %2357 = vmatpush3.bf16.msra.mxu1 %v2362_v6 }
  0x16   :  { %2285 = vmatmul.mubr.msk.bf16.vlgmr.msra.gmra.mrb[0].mxu0 %vm291_vm0, %v2365_v7  ;;  %2317 = vmatmul.mubr.msk.bf16.vlgmr.msra.gmra.mrb[0].mxu1 %vm291_vm0, %v2366_v8 }
  0x17   :  { %2288 = vmatprep.mubr.msk.bf16.mxu0 %vm291_vm0, %v2367_v9  ;;  %2320 = vmatprep.mubr.msk.bf16.mxu1 %vm291_vm0, %v2369_v10 }
  0x1e   :  { %2289 = vmatmul.mubr.msk.bf16.gmra.mrb[4].mxu0 %vm291_vm0, %v2368_v11  ;;  %2321 = vmatmul.mubr.msk.bf16.gmra.mrb[4].mxu1 %vm291_vm0, %v2370_v12 }
  0x1f   :  { %2292 = vmatprep.mubr.msk.bf16.mxu0 %vm291_vm0, %v2371_v13  ;;  %2324 = vmatprep.mubr.msk.bf16.mxu1 %vm291_vm0, %v2373_v14 }
  0x26   :  { %2293 = vmatmul.mubr.msk.bf16.gmra.mrb[8].mxu0 %vm291_vm0, %v2372_v15  ;;  %2325 = vmatmul.mubr.msk.bf16.gmra.mrb[8].mxu1 %vm291_vm0, %v2374_v16 }
  0x27   :  { %2296 = vmatprep.mubr.msk.bf16.mxu0 %vm291_vm0, %v2375_v17  ;;  %2328 = vmatprep.mubr.msk.bf16.mxu1 %vm291_vm0, %v2377_v18 }
  0x2e   :  { %2297 = vmatmul.mubr.msk.bf16.gmra.mrb[12].mxu0 %vm291_vm0, %v2376_v19  ;;  %2329 = vmatmul.mubr.msk.bf16.gmra.mrb[12].mxu1 %vm291_vm0, %v2378_v20 }
  0x2f   :  { %2300 = vmatprep.mubr.msk.bf16.mxu0 %vm291_vm0, %v2379_v21  ;;  %2332 = vmatprep.mubr.msk.bf16.mxu1 %vm291_vm0, %v2381_v22 }
  0x36   :  { %2301 = vmatmul.mubr.msk.bf16.gmra.mrb[16].mxu0 %vm291_vm0, %v2380_v23  ;;  %2333 = vmatmul.mubr.msk.bf16.gmra.mrb[16].mxu1 %vm291_vm0, %v2382_v24 }
  0x37   :  { %2304 = vmatprep.mubr.msk.bf16.mxu0 %vm291_vm0, %v2383_v25  ;;  %2336 = vmatprep.mubr.msk.bf16.mxu1 %vm291_vm0, %v2385_v26 }
  0x3e   :  { %2305 = vmatmul.mubr.msk.bf16.gmra.mrb[20].mxu0 %vm291_vm0, %v2384_v27  ;;  %2337 = vmatmul.mubr.msk.bf16.gmra.mrb[20].mxu1 %vm291_vm0, %v2386_v28 }
  0x3f   :  { %2308 = vmatprep.mubr.msk.bf16.mxu0 %vm291_vm0, %v2387_v29  ;;  %2340 = vmatprep.mubr.msk.bf16.mxu1 %vm291_vm0, %v2389_v30 }
  0x46   :  { %2309 = vmatmul.mubr.msk.bf16.gmra.mrb[24].mxu0 %vm291_vm0, %v2388_v31  ;;  %2341 = vmatmul.mubr.msk.bf16.gmra.mrb[24].mxu1 %vm291_vm0, %v2390_v32 }
  0x47   :  { %2312 = vmatprep.mubr.msk.bf16.mxu0 %vm291_vm0, %v2391_v33  ;;  %2344 = vmatprep.mubr.msk.bf16.mxu1 %vm291_vm0, %v2393_v34 }
  0x4e   :  { %2313 = vmatmul.mubr.msk.bf16.gmra.mrb[28].mxu0 %vm291_vm0, %v2392_v35  ;;  %2345 = vmatmul.mubr.msk.bf16.gmra.mrb[28].mxu1 %vm291_vm0, %v2394_v36 }
  0xe9   :  { %v2286_v38 = vpop.f32.mrb[0].mxu0  ;;  %v2318_v39 = vpop.f32.mrb[0].mxu1 }
  0xea   :  { %v431_v40 = vadd.f32 %v2286_v38, %v2699_v37  ;;  %v559_v41 = vadd.f32 %v2318_v39, %v2699_v37  ;;  %v422_v42 = vpop.f32.mrb[1].mxu0  ;;  %v550_v43 = vpop.f32.mrb[1].mxu1 }
  0xeb   :  { %v423_v44 = vadd.f32 %v2699_v37, %v422_v42  ;;  %v551_v45 = vadd.f32 %v2699_v37, %v550_v43  ;;  %v2287_v46 = vpop.f32.mrb[2].mxu0  ;;  %v2319_v47 = vpop.f32.mrb[2].mxu1 }
  0xec   :  { %v2705_v48 = vmax.f32 %v431_v40, 0.0  ;;  %v2707_v49 = vmax.f32 %v559_v41, 0.0  ;;  %v434_v50 = vadd.f32 %v2287_v46, %v2699_v37  ;;  %v562_v51 = vadd.f32 %v2319_v47, %v2699_v37  ;;  %v425_v52 = vpop.f32.mrb[3].mxu0  ;;  %v553_v53 = vpop.f32.mrb[3].mxu1 }
  0xed   :  { %v2711_v54 = vmax.f32 %v423_v44, 0.0  ;;  %v2713_v55 = vmax.f32 %v551_v45, 0.0  ;;  %v426_v56 = vadd.f32 %v2699_v37, %v425_v52  ;;  %v554_v57 = vadd.f32 %v2699_v37, %v553_v53 }
  0xee   :  { %v2111_v58 = vpack.c.bf16 %v2705_v48, %v2705_v48  ;;  %v2143_v59 = vpack.c.bf16 %v2707_v49, %v2707_v49  ;;  %v2721_v60 = vmax.f32 %v434_v50, 0.0  ;;  %v2723_v61 = vmax.f32 %v562_v51, 0.0 }
  0xef   :  { %v2109_v62 = vpack.c.bf16 %v2711_v54, %v2711_v54  ;;  %v2141_v63 = vpack.c.bf16 %v2713_v55, %v2713_v55  ;;  %v2729_v0 = vmax.f32 %v426_v56, 0.0  ;;  %v2731_v1 = vmax.f32 %v554_v57, 0.0 }
  0xf0   :  { %1000 = vst.msk [vmem:[%s3894_s4 + $0x8] sm:$0xf] %vm997_vm1, %v2111_v58  ;;  %1032 = vst.msk [vmem:[%s3894_s4 + $0x88] sm:$0xf] %vm997_vm1, %v2143_v59  ;;  %v2112_v2 = vpack.c.bf16 %v2721_v60, %v2721_v60  ;;  %v2144_v3 = vpack.c.bf16 %v2723_v61, %v2723_v61  ;;  %v1096_v4 = vmul.f32 %v2707_v49, %v2707_v49 }
  0xf1   :  { %v1064_v5 = vmul.f32 %v2705_v48, %v2705_v48  ;;  %998 = vst.msk [vmem:[%s3894_s4] sm:$0xf] %vm997_vm1, %v2109_v62  ;;  %1030 = vst.msk [vmem:[%s3894_s4 + $0x80] sm:$0xf] %vm997_vm1, %v2141_v63  ;;  %v2110_v6 = vpack.c.bf16 %v2729_v0, %v2729_v0  ;;  %v2142_v7 = vpack.c.bf16 %v2731_v1, %v2731_v1  ;;  %v2290_v8 = vpop.f32.mrb[4].mxu0  ;;  %v2322_v11 = vpop.f32.mrb[4].mxu1 }
  0xf2   :  { %v1065_v9 = vmul.f32 %v2721_v60, %v2721_v60  ;;  %v1062_v10 = vmul.f32 %v2711_v54, %v2711_v54  ;;  %1001 = vst.msk [vmem:[%s3894_s4 + $0xc] sm:$0xf] %vm997_vm1, %v2112_v2  ;;  %1033 = vst.msk [vmem:[%s3894_s4 + $0x8c] sm:$0xf] %vm997_vm1, %v2144_v3  ;;  %v1229_v12 = vsel %vm1126_vm2, %v1096_v4, 0.0  ;;  %v447_v14 = vadd.f32 %v2290_v8, %v2699_v37  ;;  %v438_v15 = vpop.f32.mrb[5].mxu0 }
  0xf3   :  { %v1133_v13 = vsel %vm1126_vm2, %v1064_v5, 0.0  ;;  %v575_v16 = vadd.f32 %v2322_v11, %v2699_v37  ;;  %v566_v17 = vpop.f32.mrb[5].mxu1  ;;  %999 = vst.msk [vmem:[%s3894_s4 + $0x4] sm:$0xf] %vm997_vm1, %v2110_v6  ;;  %1031 = vst.msk [vmem:[%s3894_s4 + $0x84] sm:$0xf] %vm997_vm1, %v2142_v7  ;;  %1230 = vadd.xlane.f32.xlu0 %v1229_v12  ;;  %v439_v19 = vadd.f32 %v2699_v37, %v438_v15 }
  0xf4   :  { %1134 = vadd.xlane.f32.xlu1 %v1133_v13  ;;  %v1136_v18 = vsel %vm1126_vm2, %v1065_v9, 0.0  ;;  %v2291_v20 = vpop.f32.mrb[6].mxu0  ;;  %v567_v21 = vadd.f32 %v2699_v37, %v566_v17  ;;  %v2323_v22 = vpop.f32.mrb[6].mxu1  ;;  %v2788_v23 = vmax.f32 %v447_v14, 0.0  ;;  %v1097_v27 = vmul.f32 %v2723_v61, %v2723_v61 }
  0xf5   :  { %v450_v24 = vadd.f32 %v2291_v20, %v2699_v37  ;;  %v441_v25 = vpop.f32.mrb[7].mxu0  ;;  %v2791_v26 = vmax.f32 %v575_v16, 0.0  ;;  %v569_v28 = vpop.f32.mrb[7].mxu1  ;;  %v2795_v29 = vmax.f32 %v439_v19, 0.0  ;;  %v1094_v32 = vmul.f32 %v2713_v55, %v2713_v55 }
  0xf6   :  { %v442_v30 = vadd.f32 %v2699_v37, %v441_v25  ;;  %v2798_v31 = vmax.f32 %v567_v21, 0.0  ;;  %v2115_v33 = vpack.c.bf16 %v2788_v23, %v2788_v23  ;;  %v1127_v34 = vsel %vm1126_vm2, %v1062_v10, 0.0 }
  0xf7   :  { %v2805_v35 = vmax.f32 %v450_v24, 0.0  ;;  %v2147_v36 = vpack.c.bf16 %v2791_v26, %v2791_v26  ;;  %v2113_v38 = vpack.c.bf16 %v2795_v29, %v2795_v29  ;;  %1128 = vadd.xlane.f32.xlu0 %v1127_v34  ;;  %v578_v42 = vadd.f32 %v2323_v22, %v2699_v37 }
  0xf8   :  { %1137 = vadd.xlane.f32.xlu1 %v1136_v18  ;;  %v2811_v39 = vmax.f32 %v442_v30, 0.0  ;;  %v2145_v40 = vpack.c.bf16 %v2798_v31, %v2798_v31  ;;  %1004 = vst.msk [vmem:[%s3894_s4 + $0x18] sm:$0xf] %vm997_vm1, %v2115_v33  ;;  %v570_v43 = vadd.f32 %v2699_v37, %v569_v28  ;;  %v1232_v45 = vsel %vm1126_vm2, %v1097_v27, 0.0 }
  0xf9   :  { %v2116_v41 = vpack.c.bf16 %v2805_v35, %v2805_v35  ;;  %1036 = vst.msk [vmem:[%s3894_s4 + $0x98] sm:$0xf] %vm997_vm1, %v2147_v36  ;;  %1002 = vst.msk [vmem:[%s3894_s4 + $0x10] sm:$0xf] %vm997_vm1, %v2113_v38  ;;  %v1223_v46 = vsel %vm1126_vm2, %v1094_v32, 0.0  ;;  %v1095_v47 = vmul.f32 %v2731_v1, %v2731_v1  ;;  %v2294_v50 = vpop.f32.mrb[8].mxu0  ;;  %v1063_v56 = vmul.f32 %v2729_v0, %v2729_v0 }
  0xfa   :  { %v2114_v44 = vpack.c.bf16 %v2811_v39, %v2811_v39  ;;  %1034 = vst.msk [vmem:[%s3894_s4 + $0x90] sm:$0xf] %vm997_vm1, %v2145_v40  ;;  %v2326_v51 = vpop.f32.mrb[8].mxu1  ;;  %v2845_v52 = vmax.f32 %v578_v42, 0.0  ;;  %v2847_v53 = vmax.f32 %v570_v43, 0.0  ;;  %v463_v57 = vadd.f32 %v2294_v50, %v2699_v37  ;;  %v454_v58 = vpop.f32.mrb[9].mxu0 }
  0xfb   :  { %1005 = vst.msk [vmem:[%s3894_s4 + $0x1c] sm:$0xf] %vm997_vm1, %v2116_v41  ;;  %v582_v59 = vpop.f32.mrb[9].mxu1  ;;  %1224 = vadd.xlane.f32.xlu0 %v1223_v46  ;;  %v1069_v62 = vmul.f32 %v2805_v35, %v2805_v35  ;;  %v455_v63 = vadd.f32 %v2699_v37, %v454_v58  ;;  %v2295_v2 = vpop.f32.mrb[10].mxu0  ;;  %v1068_v6 = vmul.f32 %v2788_v23, %v2788_v23  ;;  %v1226_v10 = vsel %vm1126_vm2, %v1095_v47, 0.0 }
  0xfc   :  { %1003 = vst.msk [vmem:[%s3894_s4 + $0x14] sm:$0xf] %vm997_vm1, %v2114_v44  ;;  %1233 = vadd.xlane.f32.xlu1 %v1232_v45  ;;  %v2327_v3 = vpop.f32.mrb[10].mxu1  ;;  %v2148_v4 = vpack.c.bf16 %v2845_v52, %v2845_v52  ;;  %v2146_v5 = vpack.c.bf16 %v2847_v53, %v2847_v53  ;;  %v2865_v7 = vmax.f32 %v463_v57, 0.0  ;;  %v457_v8 = vpop.f32.mrb[11].mxu0  ;;  %v466_v12 = vadd.f32 %v2295_v2, %v2699_v37 }
  0xfd   :  { %v585_v9 = vpop.f32.mrb[11].mxu1  ;;  %v2868_v11 = vmax.f32 %v455_v63, 0.0  ;;  %v458_v13 = vadd.f32 %v2699_v37, %v457_v8  ;;  %v1130_v14 = vsel %vm1126_vm2, %v1063_v56, 0.0  ;;  %v591_v16 = vadd.f32 %v2326_v51, %v2699_v37 }
  0xfe   :  { %3915 = vst [vmem:[#allocation2_spill] sm:$0xff] %v2865_v7  ;;  %1037 = vst.msk [vmem:[%s3894_s4 + $0x9c] sm:$0xf] %vm997_vm1, %v2148_v4  ;;  %v2119_v15 = vpack.c.bf16 %v2865_v7, %v2865_v7  ;;  %v583_v17 = vadd.f32 %v2699_v37, %v582_v59  ;;  %v2887_v19 = vmax.f32 %v466_v12, 0.0  ;;  %v1148_v21 = vsel %vm1126_vm2, %v1069_v62, 0.0 }
  0xff   :  { %3916 = vst [vmem:[#allocation3_spill] sm:$0xff] %v2868_v11  ;;  %1035 = vst.msk [vmem:[%s3894_s4 + $0x94] sm:$0xf] %vm997_vm1, %v2146_v5  ;;  %1131 = vadd.xlane.f32.xlu0 %v1130_v14  ;;  %v2117_v18 = vpack.c.bf16 %v2868_v11, %v2868_v11  ;;  %v2889_v20 = vmax.f32 %v458_v13, 0.0  ;;  %v1145_v22 = vsel %vm1126_vm2, %v1068_v6, 0.0  ;;  %v2897_v24 = vmax.f32 %v591_v16, 0.0 }
 0x100   :  { %1227 = vadd.xlane.f32.xlu1 %v1226_v10  ;;  %1008 = vst.msk [vmem:[%s3894_s4 + $0x28] sm:$0xf] %vm997_vm1, %v2119_v15  ;;  %v2899_v25 = vmax.f32 %v583_v17, 0.0  ;;  %v2120_v27 = vpack.c.bf16 %v2887_v19, %v2887_v19  ;;  %v594_v30 = vadd.f32 %v2327_v3, %v2699_v37  ;;  %v586_v32 = vadd.f32 %v2699_v37, %v585_v9 }
 0x101   :  { %3917 = vst [vmem:[#allocation4_spill] sm:$0xff] %v2889_v20  ;;  %3918 = vst [vmem:[#allocation5_spill] sm:$0xff] %v2897_v24  ;;  %v2118_v28 = vpack.c.bf16 %v2889_v20, %v2889_v20  ;;  %v2298_v33 = vpop.f32.mrb[12].mxu0  ;;  %v2330_v34 = vpop.f32.mrb[12].mxu1  ;;  %v1101_v36 = vmul.f32 %v2845_v52, %v2845_v52  ;;  %v1100_v38 = vmul.f32 %v2791_v26, %v2791_v26 }
 0x102   :  { %3919 = vst [vmem:[#allocation6_spill] sm:$0xff] %v2899_v25  ;;  %1006 = vst.msk [vmem:[%s3894_s4 + $0x20] sm:$0xf] %vm997_vm1, %v2117_v18  ;;  %v2151_v40 = vpack.c.bf16 %v2897_v24, %v2897_v24  ;;  %v2149_v41 = vpack.c.bf16 %v2899_v25, %v2899_v25  ;;  %v470_v42 = vpop.f32.mrb[13].mxu0  ;;  %v598_v43 = vpop.f32.mrb[13].mxu1  ;;  %v2927_v44 = vmax.f32 %v594_v30, 0.0  ;;  %v479_v50 = vadd.f32 %v2298_v33, %v2699_v37 }
 0x103   :  { %1146 = vadd.xlane.f32.xlu0 %v1145_v22  ;;  %1009 = vst.msk [vmem:[%s3894_s4 + $0x2c] sm:$0xf] %vm997_vm1, %v2120_v27  ;;  %1007 = vst.msk [vmem:[%s3894_s4 + $0x24] sm:$0xf] %vm997_vm1, %v2118_v28  ;;  %v2929_v45 = vmax.f32 %v586_v32, 0.0  ;;  %v2299_v46 = vpop.f32.mrb[14].mxu0  ;;  %v471_v51 = vadd.f32 %v2699_v37, %v470_v42  ;;  %v1067_v58 = vmul.f32 %v2811_v39, %v2811_v39 }
 0x104   :  { %1149 = vadd.xlane.f32.xlu1 %v1148_v21  ;;  %3920 = vst [vmem:[#allocation7_spill] sm:$0xff] %v2927_v44  ;;  %v2331_v47 = vpop.f32.mrb[14].mxu1  ;;  %1040 = vst.msk [vmem:[%s3894_s4 + $0xa8] sm:$0xf] %vm997_vm1, %v2151_v40  ;;  %v473_v56 = vpop.f32.mrb[15].mxu0  ;;  %v1066_v59 = vmul.f32 %v2795_v29, %v2795_v29  ;;  %v2152_v62 = vpack.c.bf16 %v2927_v44, %v2927_v44  ;;  %v1244_v2 = vsel %vm1126_vm2, %v1101_v36, 0.0 }
 0x105   :  { %3921 = vst [vmem:[#allocation8_spill] sm:$0xff] %v2929_v45  ;;  %1038 = vst.msk [vmem:[%s3894_s4 + $0xa0] sm:$0xf] %vm997_vm1, %v2149_v41  ;;  %v601_v57 = vpop.f32.mrb[15].mxu1  ;;  %v2150_v63 = vpack.c.bf16 %v2929_v45, %v2929_v45  ;;  %v1241_v3 = vsel %vm1126_vm2, %v1100_v38, 0.0  ;;  %v2951_v4 = vmax.f32 %v479_v50, 0.0  ;;  %v482_v6 = vadd.f32 %v2299_v46, %v2699_v37 }
 0x106   :  { %v2953_v5 = vmax.f32 %v471_v51, 0.0  ;;  %1041 = vst.msk [vmem:[%s3894_s4 + $0xac] sm:$0xf] %vm997_vm1, %v2152_v62  ;;  %v474_v10 = vadd.f32 %v2699_v37, %v473_v56  ;;  %v607_v12 = vadd.f32 %v2330_v34, %v2699_v37  ;;  %v1142_v13 = vsel %vm1126_vm2, %v1067_v58, 0.0 }
 0x107   :  { %3922 = vst [vmem:[#allocation9_spill] sm:$0xff] %v2951_v4  ;;  %1242 = vadd.xlane.f32.xlu0 %v1241_v3  ;;  %1039 = vst.msk [vmem:[%s3894_s4 + $0xa4] sm:$0xf] %vm997_vm1, %v2150_v63  ;;  %v2123_v8 = vpack.c.bf16 %v2951_v4, %v2951_v4  ;;  %v1139_v14 = vsel %vm1126_vm2, %v1066_v59, 0.0  ;;  %v2972_v15 = vmax.f32 %v482_v6, 0.0  ;;  %v599_v16 = vadd.f32 %v2699_v37, %v598_v43 }
 0x108   :  { %3923 = vst [vmem:[#allocation10_spill] sm:$0xff] %v2953_v5  ;;  %1245 = vadd.xlane.f32.xlu1 %v1244_v2  ;;  %v2121_v9 = vpack.c.bf16 %v2953_v5, %v2953_v5  ;;  %v1099_v21 = vmul.f32 %v2847_v53, %v2847_v53  ;;  %v1098_v22 = vmul.f32 %v2798_v31, %v2798_v31  ;;  %v2987_v27 = vmax.f32 %v474_v10, 0.0 }
 0x109   :  { %3924 = vst [vmem:[#allocation11_spill] sm:$0xff] %v2972_v15  ;;  %v2302_v17 = vpop.f32.mrb[16].mxu0  ;;  %v2334_v18 = vpop.f32.mrb[16].mxu1  ;;  %1012 = vst.msk [vmem:[%s3894_s4 + $0x38] sm:$0xf] %vm997_vm1, %v2123_v8  ;;  %v2989_v28 = vmax.f32 %v607_v12, 0.0  ;;  %v2124_v33 = vpack.c.bf16 %v2972_v15, %v2972_v15  ;;  %v610_v36 = vadd.f32 %v2331_v47, %v2699_v37  ;;  %v602_v38 = vadd.f32 %v2699_v37, %v601_v57 }
 0x10a   :  { %1010 = vst.msk [vmem:[%s3894_s4 + $0x30] sm:$0xf] %vm997_vm1, %v2121_v9  ;;  %3925 = vst [vmem:[#allocation12_spill] sm:$0xff] %v2987_v27  ;;  %v486_v30 = vpop.f32.mrb[17].mxu0  ;;  %v614_v32 = vpop.f32.mrb[17].mxu1  ;;  %v2993_v34 = vmax.f32 %v599_v16, 0.0  ;;  %v1073_v42 = vmul.f32 %v2887_v19, %v2887_v19  ;;  %v2122_v43 = vpack.c.bf16 %v2987_v27, %v2987_v27  ;;  %v1072_v56 = vmul.f32 %v2865_v7, %v2865_v7 }
 0x10b   :  { %3926 = vst [vmem:[#allocation13_spill] sm:$0xff] %v2989_v28  ;;  %1140 = vadd.xlane.f32.xlu0 %v1139_v14  ;;  %v2303_v40 = vpop.f32.mrb[18].mxu0  ;;  %v2335_v41 = vpop.f32.mrb[18].mxu1  ;;  %v2155_v46 = vpack.c.bf16 %v2989_v28, %v2989_v28  ;;  %1013 = vst.msk [vmem:[%s3894_s4 + $0x3c] sm:$0xf] %vm997_vm1, %v2124_v33  ;;  %v3011_v57 = vmax.f32 %v610_v36, 0.0  ;;  %v1105_v63 = vmul.f32 %v2927_v44, %v2927_v44 }
 0x10c   :  { %1143 = vadd.xlane.f32.xlu1 %v1142_v13  ;;  %v489_v50 = vpop.f32.mrb[19].mxu0  ;;  %v617_v51 = vpop.f32.mrb[19].mxu1  ;;  %v2153_v47 = vpack.c.bf16 %v2993_v34, %v2993_v34  ;;  %v3013_v58 = vmax.f32 %v602_v38, 0.0  ;;  %v1238_v59 = vsel %vm1126_vm2, %v1099_v21, 0.0  ;;  %v1235_v62 = vsel %vm1126_vm2, %v1098_v22, 0.0 }
 0x10d   :  { %3927 = vst [vmem:[#allocation14_spill] sm:$0xff] %v3011_v57  ;;  %1011 = vst.msk [vmem:[%s3894_s4 + $0x34] sm:$0xf] %vm997_vm1, %v2122_v43  ;;  %v495_v2 = vadd.f32 %v2302_v17, %v2699_v37  ;;  %v2156_v3 = vpack.c.bf16 %v3011_v57, %v3011_v57  ;;  %v487_v8 = vadd.f32 %v2699_v37, %v486_v30  ;;  %v1160_v12 = vsel %vm1126_vm2, %v1073_v42, 0.0 }
 0x10e   :  { %1044 = vst.msk [vmem:[%s3894_s4 + $0xb8] sm:$0xf] %vm997_vm1, %v2155_v46  ;;  %1042 = vst.msk [vmem:[%s3894_s4 + $0xb0] sm:$0xf] %vm997_vm1, %v2153_v47  ;;  %v2154_v6 = vpack.c.bf16 %v3013_v58, %v3013_v58  ;;  %v1104_v9 = vmul.f32 %v2897_v24, %v2897_v24  ;;  %v1157_v13 = vsel %vm1126_vm2, %v1072_v56, 0.0  ;;  %v498_v16 = vadd.f32 %v2303_v40, %v2699_v37 }
 0x10f   :  { %1236 = vadd.xlane.f32.xlu0 %v1235_v62  ;;  %v3039_v10 = vmax.f32 %v495_v2, 0.0  ;;  %1045 = vst.msk [vmem:[%s3894_s4 + $0xbc] sm:$0xf] %vm997_vm1, %v2156_v3  ;;  %v3051_v14 = vmax.f32 %v487_v8, 0.0  ;;  %v490_v30 = vadd.f32 %v2699_v37, %v489_v50  ;;  %v623_v33 = vadd.f32 %v2334_v18, %v2699_v37 }
 0x110   :  { %1239 = vadd.xlane.f32.xlu1 %v1238_v59  ;;  %1043 = vst.msk [vmem:[%s3894_s4 + $0xb4] sm:$0xf] %vm997_vm1, %v2154_v6  ;;  %v615_v36 = vadd.f32 %v2699_v37, %v614_v32  ;;  %v1256_v43 = vsel %vm1126_vm2, %v1105_v63, 0.0  ;;  %v3062_v46 = vmax.f32 %v498_v16, 0.0  ;;  %v1253_v50 = vsel %vm1126_vm2, %v1104_v9, 0.0 }
 0x111   :  { %v2306_v17 = vpop.f32.mrb[20].mxu0  ;;  %v2338_v21 = vpop.f32.mrb[20].mxu1  ;;  %v2127_v22 = vpack.c.bf16 %v3039_v10, %v3039_v10  ;;  %v2125_v40 = vpack.c.bf16 %v3051_v14, %v3051_v14  ;;  %v3071_v18 = vmax.f32 %v490_v30, 0.0  ;;  %v3073_v32 = vmax.f32 %v623_v33, 0.0 }
 0x112   :  { %v502_v38 = vpop.f32.mrb[21].mxu0  ;;  %v630_v42 = vpop.f32.mrb[21].mxu1  ;;  %v3075_v59 = vmax.f32 %v615_v36, 0.0  ;;  %v1071_v2 = vmul.f32 %v2889_v20, %v2889_v20  ;;  %v2128_v3 = vpack.c.bf16 %v3062_v46, %v3062_v46  ;;  %v626_v6 = vadd.f32 %v2335_v41, %v2699_v37 }
 0x113   :  { %1158 = vadd.xlane.f32.xlu0 %v1157_v13  ;;  %v2307_v56 = vpop.f32.mrb[22].mxu0  ;;  %v3064_v47 = vpop.f32.mrb[22].mxu1  ;;  %1016 = vst.msk [vmem:[%s3894_s4 + $0x48] sm:$0xf] %vm997_vm1, %v2127_v22  ;;  %1014 = vst.msk [vmem:[%s3894_s4 + $0x40] sm:$0xf] %vm997_vm1, %v2125_v40  ;;  %v618_v8 = vadd.f32 %v2699_v37, %v617_v51  ;;  %v1070_v9 = vmul.f32 %v2868_v11, %v2868_v11  ;;  %v2159_v13 = vpack.c.bf16 %v3073_v32, %v3073_v32 }
 0x114   :  { %1161 = vadd.xlane.f32.xlu1 %v1160_v12  ;;  %v505_v62 = vpop.f32.mrb[23].mxu0  ;;  %v3077_v63 = vpop.f32.mrb[23].mxu1  ;;  %v2126_v12 = vpack.c.bf16 %v3071_v18, %v3071_v18  ;;  %v2157_v16 = vpack.c.bf16 %v3075_v59, %v3075_v59  ;;  %1017 = vst.msk [vmem:[%s3894_s4 + $0x4c] sm:$0xf] %vm997_vm1, %v2128_v3  ;;  %v3101_v41 = vmax.f32 %v626_v6, 0.0  ;;  %v511_v22 = vadd.f32 %v2306_v17, %v2699_v37 }
 0x115   :  { %v3103_v51 = vmax.f32 %v618_v8, 0.0  ;;  %1048 = vst.msk [vmem:[%s3894_s4 + $0xc8] sm:$0xf] %vm997_vm1, %v2159_v13  ;;  %v1103_v30 = vmul.f32 %v2929_v45, %v2929_v45  ;;  %v1154_v3 = vsel %vm1126_vm2, %v1071_v2, 0.0  ;;  %v1151_v6 = vsel %vm1126_vm2, %v1070_v9, 0.0 }
 0x116   :  { %1015 = vst.msk [vmem:[%s3894_s4 + $0x44] sm:$0xf] %vm997_vm1, %v2126_v12  ;;  %1046 = vst.msk [vmem:[%s3894_s4 + $0xc0] sm:$0xf] %vm997_vm1, %v2157_v16  ;;  %v2160_v33 = vpack.c.bf16 %v3101_v41, %v3101_v41  ;;  %v1102_v17 = vmul.f32 %v2899_v25, %v2899_v25  ;;  %v3131_v8 = vmax.f32 %v511_v22, 0.0  ;;  %v514_v9 = vadd.f32 %v2307_v56, %v2699_v37 }
 0x117   :  { %1254 = vadd.xlane.f32.xlu0 %v1253_v50  ;;  %v2158_v36 = vpack.c.bf16 %v3103_v51, %v3103_v51  ;;  %v1076_v56 = vmul.f32 %v2951_v4, %v2951_v4 }
 0x118   :  { %1257 = vadd.xlane.f32.xlu1 %v1256_v43  ;;  %v503_v43 = vadd.f32 %v2699_v37, %v502_v38  ;;  %v1077_v38 = vmul.f32 %v2972_v15, %v2972_v15  ;;  %1049 = vst.msk [vmem:[%s3894_s4 + $0xcc] sm:$0xf] %vm997_vm1, %v2160_v33  ;;  %v639_v15 = vadd.f32 %v2338_v21, %v2699_v37  ;;  %v3162_v11 = vmax.f32 %v514_v9, 0.0 }
 0x119   :  { %v2310_v40 = vpop.f32.mrb[24].mxu0  ;;  %v3125_v50 = vpop.f32.mrb[24].mxu1  ;;  %1047 = vst.msk [vmem:[%s3894_s4 + $0xc4] sm:$0xf] %vm997_vm1, %v2158_v36  ;;  %v631_v33 = vadd.f32 %v2699_v37, %v630_v42  ;;  %v1250_v36 = vsel %vm1126_vm2, %v1103_v30, 0.0  ;;  %v1247_v20 = vsel %vm1126_vm2, %v1102_v17, 0.0  ;;  %v642_v17 = vadd.f32 %v3064_v47, %v2699_v37 }
 0x11a   :  { %v518_v12 = vpop.f32.mrb[25].mxu0  ;;  %v3133_v13 = vpop.f32.mrb[25].mxu1  ;;  %v3145_v2 = vmax.f32 %v503_v43, 0.0  ;;  %v3171_v42 = vmax.f32 %v639_v15, 0.0  ;;  %v2132_v30 = vpack.c.bf16 %v3162_v11, %v3162_v11  ;;  %v1172_v4 = vsel %vm1126_vm2, %v1077_v38, 0.0 }
 0x11b   :  { %1152 = vadd.xlane.f32.xlu0 %v1151_v6  ;;  %v2311_v16 = vpop.f32.mrb[26].mxu0  ;;  %v3148_v22 = vpop.f32.mrb[26].mxu1  ;;  %v506_v6 = vadd.f32 %v2699_v37, %v505_v62  ;;  %v3173_v62 = vmax.f32 %v631_v33, 0.0  ;;  %v3197_v47 = vmax.f32 %v642_v17, 0.0  ;;  %v634_v33 = vadd.f32 %v2699_v37, %v3077_v63 }
 0x11c   :  { %1155 = vadd.xlane.f32.xlu1 %v1154_v3  ;;  %v2131_v3 = vpack.c.bf16 %v3131_v8, %v3131_v8  ;;  %v521_v25 = vpop.f32.mrb[27].mxu0  ;;  %v3155_v45 = vpop.f32.mrb[27].mxu1  ;;  %v2129_v43 = vpack.c.bf16 %v3145_v2, %v3145_v2  ;;  %v2163_v15 = vpack.c.bf16 %v3171_v42, %v3171_v42  ;;  %1021 = vst.msk [vmem:[%s3894_s4 + $0x5c] sm:$0xf] %vm997_vm1, %v2132_v30 }
 0x11d   :  { %v3169_v21 = vmax.f32 %v506_v6, 0.0  ;;  %v1108_v6 = vmul.f32 %v2989_v28, %v2989_v28  ;;  %v527_v63 = vadd.f32 %v2310_v40, %v2699_v37  ;;  %v2164_v17 = vpack.c.bf16 %v3197_v47, %v3197_v47 }
 0x11e   :  { %1020 = vst.msk [vmem:[%s3894_s4 + $0x58] sm:$0xf] %vm997_vm1, %v2131_v3  ;;  %1018 = vst.msk [vmem:[%s3894_s4 + $0x50] sm:$0xf] %vm997_vm1, %v2129_v43  ;;  %v1109_v3 = vmul.f32 %v3011_v57, %v3011_v57  ;;  %v1169_v57 = vsel %vm1126_vm2, %v1076_v56, 0.0  ;;  %v1075_v56 = vmul.f32 %v2987_v27, %v2987_v27  ;;  %v1074_v40 = vmul.f32 %v2953_v5, %v2953_v5 }
 0x11f   :  { %1248 = vadd.xlane.f32.xlu0 %v1247_v20  ;;  %v2130_v9 = vpack.c.bf16 %v3169_v21, %v3169_v21  ;;  %v2161_v20 = vpack.c.bf16 %v3173_v62, %v3173_v62  ;;  %1052 = vst.msk [vmem:[%s3894_s4 + $0xd8] sm:$0xf] %vm997_vm1, %v2163_v15  ;;  %v519_v15 = vadd.f32 %v2699_v37, %v518_v12  ;;  %v1265_v44 = vsel %vm1126_vm2, %v1108_v6, 0.0 }
 0x120   :  { %1251 = vadd.xlane.f32.xlu1 %v1250_v36  ;;  %v1268_v27 = vsel %vm1126_vm2, %v1109_v3, 0.0  ;;  %1053 = vst.msk [vmem:[%s3894_s4 + $0xdc] sm:$0xf] %vm997_vm1, %v2164_v17  ;;  %v530_v5 = vadd.f32 %v2311_v16, %v2699_v37  ;;  %v522_v7 = vadd.f32 %v2699_v37, %v521_v25  ;;  %v655_v3 = vadd.f32 %v3125_v50, %v2699_v37 }
 0x121   :  { %v3201_v36 = vpop.f32.mrb[28].mxu0  ;;  %v3203_v43 = vpop.f32.mrb[28].mxu1  ;;  %1019 = vst.msk [vmem:[%s3894_s4 + $0x54] sm:$0xf] %vm997_vm1, %v2130_v9  ;;  %1050 = vst.msk [vmem:[%s3894_s4 + $0xd0] sm:$0xf] %vm997_vm1, %v2161_v20  ;;  %v647_v16 = vadd.f32 %v2699_v37, %v3133_v13 }
 0x122   :  { %v534_v38 = vpop.f32.mrb[29].mxu0  ;;  %v3220_v30 = vpop.f32.mrb[29].mxu1  ;;  %v3226_v9 = vmax.f32 %v634_v33, 0.0  ;;  %v3233_v20 = vmax.f32 %v527_v63, 0.0  ;;  %v3245_v33 = vmax.f32 %v519_v15, 0.0  ;;  %v1166_v6 = vsel %vm1126_vm2, %v1075_v56, 0.0 }
 0x123   :  { %1170 = vadd.xlane.f32.xlu0 %v1169_v57  ;;  %v2315_v28 = vpop.f32.mrb[30].mxu0  ;;  %v3229_v24 = vpop.f32.mrb[30].mxu1  ;;  %v1163_v25 = vsel %vm1126_vm2, %v1074_v40, 0.0  ;;  %v3271_v50 = vmax.f32 %v655_v3, 0.0  ;;  %v1107_v56 = vmul.f32 %v3013_v58, %v3013_v58  ;;  %v3279_v13 = vmax.f32 %v647_v16, 0.0 }
 0x124   :  { %1173 = vadd.xlane.f32.xlu1 %v1172_v4  ;;  %v537_v4 = vpop.f32.mrb[31].mxu0  ;;  %v3235_v57 = vpop.f32.mrb[31].mxu1  ;;  %v2162_v12 = vpack.c.bf16 %v3226_v9, %v3226_v9  ;;  %v2135_v63 = vpack.c.bf16 %v3233_v20, %v3233_v20  ;;  %v2133_v17 = vpack.c.bf16 %v3245_v33, %v3245_v33  ;;  %v658_v15 = vadd.f32 %v3148_v22, %v2699_v37 }
 0x125   :  { %v2165_v22 = vpack.c.bf16 %v3279_v13, %v3279_v13  ;;  %v1080_v16 = vmul.f32 %v3039_v10, %v3039_v10 }
 0x126   :  { %1051 = vst.msk [vmem:[%s3894_s4 + $0xd4] sm:$0xf] %vm997_vm1, %v2162_v12  ;;  %1024 = vst.msk [vmem:[%s3894_s4 + $0x68] sm:$0xf] %vm997_vm1, %v2135_v63  ;;  %v2167_v63 = vpack.c.bf16 %v3271_v50, %v3271_v50  ;;  %v3295_v3 = vmax.f32 %v658_v15, 0.0  ;;  %v543_v15 = vadd.f32 %v3201_v36, %v2699_v37 }
 0x127   :  { %1266 = vadd.xlane.f32.xlu0 %v1265_v44  ;;  %v3267_v44 = vmax.f32 %v530_v5, 0.0  ;;  %1022 = vst.msk [vmem:[%s3894_s4 + $0x60] sm:$0xf] %vm997_vm1, %v2133_v17  ;;  %v650_v5 = vadd.f32 %v2699_v37, %v3155_v45  ;;  %v1081_v17 = vmul.f32 %v3062_v46, %v3062_v46  ;;  %1054 = vst.msk [vmem:[%s3894_s4 + $0xe0] sm:$0xf] %vm997_vm1, %v2165_v22  ;;  %v1181_v22 = vsel %vm1126_vm2, %v1080_v16, 0.0 }
 0x128   :  { %1269 = vadd.xlane.f32.xlu1 %v1268_v27  ;;  %v3269_v27 = vmax.f32 %v522_v7, 0.0  ;;  %v1106_v7 = vmul.f32 %v2993_v34, %v2993_v34  ;;  %1056 = vst.msk [vmem:[%s3894_s4 + $0xe8] sm:$0xf] %vm997_vm1, %v2167_v63  ;;  %v3336_v63 = vmax.f32 %v543_v15, 0.0  ;;  %v1112_v15 = vmul.f32 %v3073_v32, %v3073_v32 }
 0x129   :  { %v2136_v40 = vpack.c.bf16 %v3267_v44, %v3267_v44  ;;  %v3297_v45 = vmax.f32 %v650_v5, 0.0  ;;  %v535_v5 = vadd.f32 %v2699_v37, %v534_v38  ;;  %v546_v38 = vadd.f32 %v2315_v28, %v2699_v37 }
 0x12a   :  { %v2134_v12 = vpack.c.bf16 %v3269_v27, %v3269_v27  ;;  %v674_v16 = vadd.f32 %v3229_v24, %v2699_v37  ;;  %v1079_v24 = vmul.f32 %v3071_v18, %v3071_v18 }
 0x12b   :  { %1164 = vadd.xlane.f32.xlu0 %v1163_v25  ;;  %1025 = vst.msk [vmem:[%s3894_s4 + $0x6c] sm:$0xf] %vm997_vm1, %v2136_v40  ;;  %v2166_v25 = vpack.c.bf16 %v3297_v45, %v3297_v45  ;;  %v1262_v40 = vsel %vm1126_vm2, %v1107_v56, 0.0  ;;  %v3338_v36 = vmax.f32 %v535_v5, 0.0  ;;  %v538_v56 = vadd.f32 %v2699_v37, %v537_v4 }
 0x12c   :  { %1167 = vadd.xlane.f32.xlu1 %v1166_v6  ;;  %1023 = vst.msk [vmem:[%s3894_s4 + $0x64] sm:$0xf] %vm997_vm1, %v2134_v12  ;;  %v2168_v6 = vpack.c.bf16 %v3295_v3, %v3295_v3  ;;  %v1259_v12 = vsel %vm1126_vm2, %v1106_v7, 0.0  ;;  %v1184_v7 = vsel %vm1126_vm2, %v1081_v17, 0.0  ;;  %v3352_v5 = vmax.f32 %v546_v38, 0.0 }
 0x12d   :  { %1055 = vst.msk [vmem:[%s3894_s4 + $0xe4] sm:$0xf] %vm997_vm1, %v2166_v25  ;;  %3928 = vst [vmem:[#allocation15_spill] sm:$0xff] %v3338_v36  ;;  %v1113_v25 = vmul.f32 %v3101_v41, %v3101_v41  ;;  %v3354_v28 = vmax.f32 %v538_v56, 0.0  ;;  %v671_v4 = vadd.f32 %v3203_v43, %v2699_v37  ;;  %v663_v17 = vadd.f32 %v2699_v37, %v3220_v30 }
 0x12e   :  { %1057 = vst.msk [vmem:[%s3894_s4 + $0xec] sm:$0xf] %vm997_vm1, %v2168_v6  ;;  %v2139_v6 = vpack.c.bf16 %v3336_v63, %v3336_v63  ;;  %v666_v43 = vadd.f32 %v2699_v37, %v3235_v57 }
 0x12f   :  { %1260 = vadd.xlane.f32.xlu0 %v1259_v12  ;;  %v2140_v12 = vpack.c.bf16 %v3352_v5, %v3352_v5  ;;  %v2138_v38 = vpack.c.bf16 %v3354_v28, %v3354_v28  ;;  %v3374_v56 = vmax.f32 %v671_v4, 0.0  ;;  %v1280_v30 = vsel %vm1126_vm2, %v1113_v25, 0.0 }
 0x130   :  { %1263 = vadd.xlane.f32.xlu1 %v1262_v40  ;;  %v2137_v40 = vpack.c.bf16 %v3338_v36, %v3338_v36  ;;  %1028 = vst.msk [vmem:[%s3894_s4 + $0x78] sm:$0xf] %vm997_vm1, %v2139_v6  ;;  %v1277_v6 = vsel %vm1126_vm2, %v1112_v15, 0.0  ;;  %v3402_v15 = vmax.f32 %v666_v43, 0.0 }
 0x131   :  { %3929 = vst [vmem:[#allocation16_spill] sm:$0xff] %v3374_v56  ;;  %1029 = vst.msk [vmem:[%s3894_s4 + $0x7c] sm:$0xf] %vm997_vm1, %v2140_v12  ;;  %v2171_v37 = vpack.c.bf16 %v3374_v56, %v3374_v56  ;;  %v1111_v12 = vmul.f32 %v3103_v51, %v3103_v51 }
 0x132   :  { %1026 = vst.msk [vmem:[%s3894_s4 + $0x70] sm:$0xf] %vm997_vm1, %v2137_v40  ;;  %v1078_v40 = vmul.f32 %v3051_v14, %v3051_v14  ;;  %1027 = vst.msk [vmem:[%s3894_s4 + $0x74] sm:$0xf] %vm997_vm1, %v2138_v38  ;;  %v2170_v4 = vpack.c.bf16 %v3402_v15, %v3402_v15  ;;  %v1110_v38 = vmul.f32 %v3075_v59, %v3075_v59 }
 0x133   :  { %1182 = vadd.xlane.f32.xlu0 %v1181_v22  ;;  %v3378_v22 = vmax.f32 %v674_v16, 0.0  ;;  %3932 = vst [vmem:[#allocation19_spill] sm:$0xff] %v3402_v15  ;;  %1060 = vst.msk [vmem:[%s3894_s4 + $0xf8] sm:$0xf] %vm997_vm1, %v2171_v37  ;;  %v1274_v43 = vsel %vm1126_vm2, %v1111_v12, 0.0  ;;  %v1082_v12 = vmul.f32 %v3145_v2, %v3145_v2 }
 0x134   :  { %1185 = vadd.xlane.f32.xlu1 %v1184_v7  ;;  %v3376_v7 = vmax.f32 %v663_v17, 0.0  ;;  %v1178_v17 = vsel %vm1126_vm2, %v1079_v24, 0.0  ;;  %v1175_v16 = vsel %vm1126_vm2, %v1078_v40, 0.0  ;;  %1059 = vst.msk [vmem:[%s3894_s4 + $0xf4] sm:$0xf] %vm997_vm1, %v2170_v4  ;;  %v1084_v24 = vmul.f32 %v3131_v8, %v3131_v8 }
 0x135   :  { %3931 = vst [vmem:[#allocation18_spill] sm:$0xff] %v3378_v22  ;;  %v2172_v25 = vpack.c.bf16 %v3378_v22, %v3378_v22 }
 0x136   :  { %3930 = vst [vmem:[#allocation17_spill] sm:$0xff] %v3376_v7  ;;  %v2169_v57 = vpack.c.bf16 %v3376_v7, %v3376_v7  ;;  %v1193_v37 = vsel %vm1126_vm2, %v1084_v24, 0.0 }
 0x137   :  { %1278 = vadd.xlane.f32.xlu0 %v1277_v6  ;;  %1061 = vst.msk [vmem:[%s3894_s4 + $0xfc] sm:$0xf] %vm997_vm1, %v2172_v25  ;;  %v1085_v6 = vmul.f32 %v3162_v11, %v3162_v11  ;;  %v1116_v25 = vmul.f32 %v3171_v42, %v3171_v42 }
 0x138   :  { %1281 = vadd.xlane.f32.xlu1 %v1280_v30  ;;  %1058 = vst.msk [vmem:[%s3894_s4 + $0xf0] sm:$0xf] %vm997_vm1, %v2169_v57  ;;  %v1271_v30 = vsel %vm1126_vm2, %v1110_v38, 0.0  ;;  %v1117_v57 = vmul.f32 %v3197_v47, %v3197_v47 }
 0x139   :  { %v1196_v40 = vsel %vm1126_vm2, %v1085_v6, 0.0  ;;  %v1114_v6 = vmul.f32 %v3173_v62, %v3173_v62 }
 0x13a   :  { %v1292_v4 = vsel %vm1126_vm2, %v1117_v57, 0.0  ;;  %v1088_v57 = vmul.f32 %v3233_v20, %v3233_v20 }
 0x13b   :  { %1176 = vadd.xlane.f32.xlu0 %v1175_v16  ;;  %v1083_v16 = vmul.f32 %v3169_v21, %v3169_v21 }
 0x13c   :  { %1179 = vadd.xlane.f32.xlu1 %v1178_v17  ;;  %v1289_v17 = vsel %vm1126_vm2, %v1116_v25, 0.0 }
 0x13d   :  { %v1190_v38 = vsel %vm1126_vm2, %v1083_v16, 0.0  ;;  %v1120_v16 = vmul.f32 %v3271_v50, %v3271_v50 }
 0x13f   :  { %1272 = vadd.xlane.f32.xlu0 %v1271_v30  ;;  %v1115_v30 = vmul.f32 %v3226_v9, %v3226_v9 }
 0x140   :  { %1275 = vadd.xlane.f32.xlu1 %v1274_v43  ;;  %v1187_v43 = vsel %vm1126_vm2, %v1082_v12, 0.0 }
 0x141   :  { %v1286_v24 = vsel %vm1126_vm2, %v1115_v30, 0.0  ;;  %v1086_v30 = vmul.f32 %v3245_v33, %v3245_v33 }
 0x143   :  { %1194 = vadd.xlane.f32.xlu0 %v1193_v37  ;;  %v1089_v37 = vmul.f32 %v3267_v44, %v3267_v44 }
 0x144   :  { %1197 = vadd.xlane.f32.xlu1 %v1196_v40  ;;  %v1283_v40 = vsel %vm1126_vm2, %v1114_v6, 0.0 }
 0x145   :  { %v1208_v25 = vsel %vm1126_vm2, %v1089_v37, 0.0  ;;  %v1118_v37 = vmul.f32 %v3279_v13, %v3279_v13 }
 0x147   :  { %1290 = vadd.xlane.f32.xlu0 %v1289_v17  ;;  %v1121_v17 = vmul.f32 %v3295_v3, %v3295_v3 }
 0x148   :  { %1293 = vadd.xlane.f32.xlu1 %v1292_v4  ;;  %v1205_v4 = vsel %vm1126_vm2, %v1088_v57, 0.0 }
 0x149   :  { %v1304_v12 = vsel %vm1126_vm2, %v1121_v17, 0.0  ;;  %v1092_v17 = vmul.f32 %v3336_v63, %v3336_v63 }
 0x14b   :  { %1188 = vadd.xlane.f32.xlu0 %v1187_v43  ;;  %v1087_v43 = vmul.f32 %v3269_v27, %v3269_v27 }
 0x14c   :  { %1191 = vadd.xlane.f32.xlu1 %v1190_v38  ;;  %v1301_v38 = vsel %vm1126_vm2, %v1120_v16, 0.0 }
 0x14d   :  { %v1202_v6 = vsel %vm1126_vm2, %v1087_v43, 0.0  ;;  %v1090_v43 = vmul.f32 %v3338_v36, %v3338_v36 }
 0x14f   :  { %1284 = vadd.xlane.f32.xlu0 %v1283_v40  ;;  %v1119_v40 = vmul.f32 %v3297_v45, %v3297_v45 }
 0x150   :  { %1287 = vadd.xlane.f32.xlu1 %v1286_v24  ;;  %v1199_v24 = vsel %vm1126_vm2, %v1086_v30, 0.0 }
 0x151   :  { %v1298_v57 = vsel %vm1126_vm2, %v1119_v40, 0.0  ;;  %v1122_v40 = vmul.f32 %v3376_v7, %v3376_v7 }
 0x153   :  { %1206 = vadd.xlane.f32.xlu0 %v1205_v4  ;;  %v1093_v4 = vmul.f32 %v3352_v5, %v3352_v5 }
 0x154   :  { %1209 = vadd.xlane.f32.xlu1 %v1208_v25  ;;  %v1295_v25 = vsel %vm1126_vm2, %v1118_v37, 0.0 }
 0x155   :  { %v1220_v16 = vsel %vm1126_vm2, %v1093_v4, 0.0  ;;  %v1124_v4 = vmul.f32 %v3374_v56, %v3374_v56 }
 0x157   :  { %1302 = vadd.xlane.f32.xlu0 %v1301_v38  ;;  %v1091_v38 = vmul.f32 %v3354_v28, %v3354_v28 }
 0x158   :  { %1305 = vadd.xlane.f32.xlu1 %v1304_v12  ;;  %v1217_v12 = vsel %vm1126_vm2, %v1092_v17, 0.0 }
 0x159   :  { %v1214_v30 = vsel %vm1126_vm2, %v1091_v38, 0.0 }
 0x15b   :  { %1200 = vadd.xlane.f32.xlu0 %v1199_v24  ;;  %v1123_v24 = vmul.f32 %v3402_v15, %v3402_v15 }
 0x15c   :  { %1203 = vadd.xlane.f32.xlu1 %v1202_v6  ;;  %v1211_v6 = vsel %vm1126_vm2, %v1090_v43, 0.0 }
 0x15d   :  { %v1310_v37 = vsel %vm1126_vm2, %v1123_v24, 0.0 }
 0x15f   :  { %1296 = vadd.xlane.f32.xlu0 %v1295_v25  ;;  %v1125_v25 = vmul.f32 %v3378_v22, %v3378_v22 }
 0x160   :  { %1299 = vadd.xlane.f32.xlu1 %v1298_v57  ;;  %v1307_v57 = vsel %vm1126_vm2, %v1122_v40, 0.0 }
 0x161   :  { %v1316_v17 = vsel %vm1126_vm2, %v1125_v25, 0.0 }
 0x163   :  { %1218 = vadd.xlane.f32.xlu0 %v1217_v12 }
 0x164   :  { %1221 = vadd.xlane.f32.xlu1 %v1220_v16  ;;  %v1313_v16 = vsel %vm1126_vm2, %v1124_v4, 0.0 }
 0x167   :  { %1212 = vadd.xlane.f32.xlu0 %v1211_v6 }
 0x168   :  { %1215 = vadd.xlane.f32.xlu1 %v1214_v30 }
 0x16b   :  { %1308 = vadd.xlane.f32.xlu0 %v1307_v57 }
 0x16c   :  { %1311 = vadd.xlane.f32.xlu1 %v1310_v37 }
 0x16f   :  { %1314 = vadd.xlane.f32.xlu0 %v1313_v16 }
 0x170   :  { %1317 = vadd.xlane.f32.xlu1 %v1316_v17 }
 0x180   :  { %v1231_v12 = vpop.xlane.xlu0 %1230 }
 0x181   :  { %v1135_v38 = vpop.xlane.xlu1 %1134  ;;  %v1353_v43 = vadd.f32 1e-10, %v1231_v12  ;;  %v3505_v12 = vld [vmem:[%s3895_s3] ss:$0 sm:$0xff] }
 0x182   :  { %v1321_v30 = vadd.f32 1e-10, %v1135_v38 }
 0x183   :  { %2395 = vrsqrt.f32 %v1353_v43 }
 0x184   :  { %2397 = vrsqrt.f32 %v1321_v30  ;;  %v1129_v24 = vpop.xlane.xlu0 %1128 }
 0x185   :  { %v1138_v6 = vpop.xlane.xlu1 %1137  ;;  %v1319_v22 = vadd.f32 1e-10, %v1129_v24 }
 0x186   :  { %v1322_v40 = vadd.f32 1e-10, %v1138_v6 }
 0x188   :  { %2399 = vrsqrt.f32 %v1322_v40  ;;  %v1225_v57 = vpop.xlane.xlu0 %1224 }
 0x189   :  { %2401 = vrsqrt.f32 %v1319_v22  ;;  %v1234_v37 = vpop.xlane.xlu1 %1233  ;;  %v1351_v25 = vadd.f32 1e-10, %v1225_v57 }
 0x18a   :  { %v1354_v56 = vadd.f32 1e-10, %v1234_v37 }
 0x18c   :  { %2403 = vrsqrt.f32 %v1354_v56  ;;  %v1132_v17 = vpop.xlane.xlu0 %1131 }
 0x18d   :  { %2405 = vrsqrt.f32 %v1351_v25  ;;  %v1228_v4 = vpop.xlane.xlu1 %1227  ;;  %v2396_v16 = vpop.eup %2395  ;;  %v1320_v43 = vadd.f32 1e-10, %v1132_v17 }
 0x18e   :  { %v1352_v38 = vadd.f32 1e-10, %v1228_v4  ;;  %v2398_v30 = vpop.eup %2397  ;;  %v1481_v6 = vmul.f32 %v2396_v16, %v2707_v49 }
 0x18f   :  { %v1449_v22 = vmul.f32 %v2398_v30, %v2705_v48 }
 0x190   :  { %2407 = vrsqrt.f32 %v1352_v38  ;;  %v1552_v24 = vmul.f32 %v3505_v12, %v1481_v6  ;;  %v1147_v40 = vpop.xlane.xlu0 %1146 }
 0x191   :  { %2409 = vrsqrt.f32 %v1320_v43  ;;  %v1150_v56 = vpop.xlane.xlu1 %1149  ;;  %v1520_v57 = vmul.f32 %v3505_v12, %v1449_v22  ;;  %v1325_v7 = vadd.f32 1e-10, %v1147_v40 }
 0x192   :  { %v2400_v37 = vpop.eup %2399  ;;  %v1326_v25 = vadd.f32 1e-10, %v1150_v56  ;;  %v2207_v36 = vpack.c.bf16 %v1552_v24, %v1552_v24 }
 0x193   :  { %v2402_v15 = vpop.eup %2401  ;;  %v1450_v4 = vmul.f32 %v2400_v37, %v2721_v60  ;;  %v2175_v17 = vpack.c.bf16 %v1520_v57, %v1520_v57 }
 0x194   :  { %v1447_v49 = vmul.f32 %v2402_v15, %v2711_v54  ;;  %2411 = vrsqrt.f32 %v1326_v25  ;;  %1872 = vst.msk [vmem:[%s3896_s5 + $0x88] sm:$0xf] %vm997_vm1, %v2207_v36  ;;  %v1243_v38 = vpop.xlane.xlu0 %1242 }
 0x195   :  { %v1521_v48 = vmul.f32 %v3505_v12, %v1450_v4  ;;  %2413 = vrsqrt.f32 %v1325_v7  ;;  %v1246_v16 = vpop.xlane.xlu1 %1245  ;;  %1840 = vst.msk [vmem:[%s3896_s5 + $0x8] sm:$0xf] %vm997_vm1, %v2175_v17  ;;  %v1357_v15 = vadd.f32 1e-10, %v1243_v38 }
 0x196   :  { %v2404_v43 = vpop.eup %2403  ;;  %v1518_v60 = vmul.f32 %v3505_v12, %v1447_v49  ;;  %v1358_v54 = vadd.f32 1e-10, %v1246_v16 }
 0x197   :  { %v2406_v30 = vpop.eup %2405  ;;  %v2176_v6 = vpack.c.bf16 %v1521_v48, %v1521_v48  ;;  %v1482_v22 = vmul.f32 %v2404_v43, %v2723_v61 }
 0x198   :  { %v2173_v36 = vpack.c.bf16 %v1518_v60, %v1518_v60  ;;  %v1479_v24 = vmul.f32 %v2406_v30, %v2713_v55  ;;  %2415 = vrsqrt.f32 %v1358_v54  ;;  %v1141_v40 = vpop.xlane.xlu0 %1140 }
 0x199   :  { %1841 = vst.msk [vmem:[%s3896_s5 + $0xc] sm:$0xf] %vm997_vm1, %v2176_v6  ;;  %v1553_v7 = vmul.f32 %v3505_v12, %v1482_v22  ;;  %2417 = vrsqrt.f32 %v1357_v15  ;;  %v1144_v56 = vpop.xlane.xlu1 %1143  ;;  %v1323_v57 = vadd.f32 1e-10, %v1141_v40 }
 0x19a   :  { %v2408_v37 = vpop.eup %2407  ;;  %1838 = vst.msk [vmem:[%s3896_s5] sm:$0xf] %vm997_vm1, %v2173_v36  ;;  %v1550_v61 = vmul.f32 %v3505_v12, %v1479_v24  ;;  %v1324_v55 = vadd.f32 1e-10, %v1144_v56 }
 0x19b   :  { %v2410_v25 = vpop.eup %2409  ;;  %v2208_v4 = vpack.c.bf16 %v1553_v7, %v1553_v7  ;;  %v1480_v17 = vmul.f32 %v2408_v37, %v2731_v1 }
 0x19c   :  { %v2205_v49 = vpack.c.bf16 %v1550_v61, %v1550_v61  ;;  %v1448_v48 = vmul.f32 %v2410_v25, %v2729_v0  ;;  %2419 = vrsqrt.f32 %v1324_v55  ;;  %v1237_v43 = vpop.xlane.xlu0 %1236 }
 0x19d   :  { %1873 = vst.msk [vmem:[%s3896_s5 + $0x8c] sm:$0xf] %vm997_vm1, %v2208_v4  ;;  %v1551_v16 = vmul.f32 %v3505_v12, %v1480_v17  ;;  %2421 = vrsqrt.f32 %v1323_v57  ;;  %v1240_v38 = vpop.xlane.xlu1 %1239  ;;  %v1355_v54 = vadd.f32 1e-10, %v1237_v43 }
 0x19e   :  { %v2412_v60 = vpop.eup %2411  ;;  %1870 = vst.msk [vmem:[%s3896_s5 + $0x80] sm:$0xf] %vm997_vm1, %v2205_v49  ;;  %v1519_v1 = vmul.f32 %v3505_v12, %v1448_v48  ;;  %v1356_v0 = vadd.f32 1e-10, %v1240_v38 }
 0x19f   :  { %v2414_v15 = vpop.eup %2413  ;;  %v2206_v30 = vpack.c.bf16 %v1551_v16, %v1551_v16  ;;  %v1454_v6 = vmul.f32 %v2412_v60, %v2805_v35 }
 0x1a0   :  { %v2174_v22 = vpack.c.bf16 %v1519_v1, %v1519_v1  ;;  %v1453_v36 = vmul.f32 %v2414_v15, %v2788_v23  ;;  %2423 = vrsqrt.f32 %v1356_v0  ;;  %v1159_v56 = vpop.xlane.xlu0 %1158 }
 0x1a1   :  { %1871 = vst.msk [vmem:[%s3896_s5 + $0x84] sm:$0xf] %vm997_vm1, %v2206_v30  ;;  %v1525_v24 = vmul.f32 %v3505_v12, %v1454_v6  ;;  %2425 = vrsqrt.f32 %v1355_v54  ;;  %v1162_v7 = vpop.xlane.xlu1 %1161  ;;  %v1329_v37 = vadd.f32 1e-10, %v1159_v56 }
 0x1a2   :  { %v2416_v40 = vpop.eup %2415  ;;  %1839 = vst.msk [vmem:[%s3896_s5 + $0x4] sm:$0xf] %vm997_vm1, %v2174_v22  ;;  %v1524_v35 = vmul.f32 %v3505_v12, %v1453_v36  ;;  %v1330_v23 = vadd.f32 1e-10, %v1162_v7 }
 0x1a3   :  { %v2418_v61 = vpop.eup %2417  ;;  %v2180_v55 = vpack.c.bf16 %v1525_v24, %v1525_v24  ;;  %v1486_v57 = vmul.f32 %v2416_v40, %v2845_v52 }
 0x1a4   :  { %v2179_v25 = vpack.c.bf16 %v1524_v35, %v1524_v35  ;;  %v1485_v4 = vmul.f32 %v2418_v61, %v2791_v26  ;;  %2427 = vrsqrt.f32 %v1330_v23  ;;  %v1255_v48 = vpop.xlane.xlu0 %1254 }
 0x1a5   :  { %1845 = vst.msk [vmem:[%s3896_s5 + $0x1c] sm:$0xf] %vm997_vm1, %v2180_v55  ;;  %v1557_v17 = vmul.f32 %v3505_v12, %v1486_v57  ;;  %2429 = vrsqrt.f32 %v1329_v37  ;;  %v1258_v49 = vpop.xlane.xlu1 %1257  ;;  %v1361_v38 = vadd.f32 1e-10, %v1255_v48  ;;  %v3933_v48 = vld [vmem:[#allocation2_spill] sm:$0xff] }
 0x1a6   :  { %v2420_v16 = vpop.eup %2419  ;;  %1844 = vst.msk [vmem:[%s3896_s5 + $0x18] sm:$0xf] %vm997_vm1, %v2179_v25  ;;  %v1556_v52 = vmul.f32 %v3505_v12, %v1485_v4  ;;  %v1362_v26 = vadd.f32 1e-10, %v1258_v49 }
 0x1a7   :  { %v2422_v43 = vpop.eup %2421  ;;  %v2212_v60 = vpack.c.bf16 %v1557_v17, %v1557_v17  ;;  %v1452_v1 = vmul.f32 %v2420_v16, %v2811_v39 }
 0x1a8   :  { %v2211_v0 = vpack.c.bf16 %v1556_v52, %v1556_v52  ;;  %v1451_v54 = vmul.f32 %v2422_v43, %v2795_v29  ;;  %2431 = vrsqrt.f32 %v1362_v26  ;;  %v1153_v6 = vpop.xlane.xlu0 %1152 }
 0x1a9   :  { %1877 = vst.msk [vmem:[%s3896_s5 + $0x9c] sm:$0xf] %vm997_vm1, %v2212_v60  ;;  %v1523_v15 = vmul.f32 %v3505_v12, %v1452_v1  ;;  %2433 = vrsqrt.f32 %v1361_v38  ;;  %v1156_v30 = vpop.xlane.xlu1 %1155  ;;  %v1327_v36 = vadd.f32 1e-10, %v1153_v6 }
 0x1aa   :  { %v2424_v22 = vpop.eup %2423  ;;  %1876 = vst.msk [vmem:[%s3896_s5 + $0x98] sm:$0xf] %vm997_vm1, %v2211_v0  ;;  %v1522_v39 = vmul.f32 %v3505_v12, %v1451_v54  ;;  %v1328_v29 = vadd.f32 1e-10, %v1156_v30 }
 0x1ab   :  { %v2426_v24 = vpop.eup %2425  ;;  %v2178_v7 = vpack.c.bf16 %v1523_v15, %v1523_v15  ;;  %v1484_v56 = vmul.f32 %v2424_v22, %v2847_v53  ;;  %v3934_v15 = vld [vmem:[#allocation7_spill] sm:$0xff]  ;;  %v3935_v22 = vld [vmem:[#allocation5_spill] sm:$0xff] }
 0x1ac   :  { %v2177_v40 = vpack.c.bf16 %v1522_v39, %v1522_v39  ;;  %v1483_v35 = vmul.f32 %v2426_v24, %v2798_v31  ;;  %2435 = vrsqrt.f32 %v1328_v29  ;;  %v1249_v61 = vpop.xlane.xlu0 %1248 }
 0x1ad   :  { %1843 = vst.msk [vmem:[%s3896_s5 + $0x14] sm:$0xf] %vm997_vm1, %v2178_v7  ;;  %v1555_v23 = vmul.f32 %v3505_v12, %v1484_v56  ;;  %2437 = vrsqrt.f32 %v1327_v36  ;;  %v1252_v37 = vpop.xlane.xlu1 %1251  ;;  %v1359_v57 = vadd.f32 1e-10, %v1249_v61  ;;  %v3936_v61 = vld [vmem:[#allocation4_spill] sm:$0xff] }
 0x1ae   :  { %v2428_v55 = vpop.eup %2427  ;;  %1842 = vst.msk [vmem:[%s3896_s5 + $0x10] sm:$0xf] %vm997_vm1, %v2177_v40  ;;  %v1554_v53 = vmul.f32 %v3505_v12, %v1483_v35  ;;  %v1360_v31 = vadd.f32 1e-10, %v1252_v37 }
 0x1af   :  { %v2430_v25 = vpop.eup %2429  ;;  %v2210_v4 = vpack.c.bf16 %v1555_v23, %v1555_v23  ;;  %v1458_v17 = vmul.f32 %v2428_v55, %v2887_v19 }
 0x1b0   :  { %v2209_v49 = vpack.c.bf16 %v1554_v53, %v1554_v53  ;;  %v1457_v16 = vmul.f32 %v2430_v25, %v3933_v48  ;;  %2439 = vrsqrt.f32 %v1360_v31  ;;  %v1171_v38 = vpop.xlane.xlu0 %1170  ;;  %v3937_v31 = vld [vmem:[#allocation3_spill] sm:$0xff] }
 0x1b1   :  { %1875 = vst.msk [vmem:[%s3896_s5 + $0x94] sm:$0xf] %vm997_vm1, %v2210_v4  ;;  %v1529_v52 = vmul.f32 %v3505_v12, %v1458_v17  ;;  %2441 = vrsqrt.f32 %v1359_v57  ;;  %v1174_v26 = vpop.xlane.xlu1 %1173  ;;  %v1333_v1 = vadd.f32 1e-10, %v1171_v38 }
 0x1b2   :  { %v2432_v43 = vpop.eup %2431  ;;  %1874 = vst.msk [vmem:[%s3896_s5 + $0x90] sm:$0xf] %vm997_vm1, %v2209_v49  ;;  %v1528_v19 = vmul.f32 %v3505_v12, %v1457_v16  ;;  %v1334_v60 = vadd.f32 1e-10, %v1174_v26 }
 0x1b3   :  { %v2434_v0 = vpop.eup %2433  ;;  %v2184_v54 = vpack.c.bf16 %v1529_v52, %v1529_v52  ;;  %v1490_v30 = vmul.f32 %v2432_v43, %v3934_v15  ;;  %v3938_v43 = vld [vmem:[#allocation8_spill] sm:$0xff] }
 0x1b4   :  { %v2183_v6 = vpack.c.bf16 %v1528_v19, %v1528_v19  ;;  %v1489_v39 = vmul.f32 %v2434_v0, %v3935_v22  ;;  %2443 = vrsqrt.f32 %v1334_v60  ;;  %v1267_v24 = vpop.xlane.xlu0 %1266 }
 0x1b5   :  { %1849 = vst.msk [vmem:[%s3896_s5 + $0x2c] sm:$0xf] %vm997_vm1, %v2184_v54  ;;  %v1561_v29 = vmul.f32 %v3505_v12, %v1490_v30  ;;  %2445 = vrsqrt.f32 %v1333_v1  ;;  %v1270_v36 = vpop.xlane.xlu1 %1269  ;;  %v1365_v35 = vadd.f32 1e-10, %v1267_v24  ;;  %v3939_v1 = vld [vmem:[#allocation6_spill] sm:$0xff] }
 0x1b6   :  { %v2436_v7 = vpop.eup %2435  ;;  %1848 = vst.msk [vmem:[%s3896_s5 + $0x28] sm:$0xf] %vm997_vm1, %v2183_v6  ;;  %v1560_v56 = vmul.f32 %v3505_v12, %v1489_v39  ;;  %v1366_v40 = vadd.f32 1e-10, %v1270_v36 }
 0x1b7   :  { %v2438_v23 = vpop.eup %2437  ;;  %v2216_v37 = vpack.c.bf16 %v1561_v29, %v1561_v29  ;;  %v1456_v55 = vmul.f32 %v2436_v7, %v3936_v61  ;;  %v3940_v7 = vld [vmem:[#allocation11_spill] sm:$0xff] }
 0x1b8   :  { %v2215_v53 = vpack.c.bf16 %v1560_v56, %v1560_v56  ;;  %v1455_v57 = vmul.f32 %v2438_v23, %v3937_v31  ;;  %2447 = vrsqrt.f32 %v1366_v40  ;;  %v1165_v17 = vpop.xlane.xlu0 %1164 }
 0x1b9   :  { %1881 = vst.msk [vmem:[%s3896_s5 + $0xac] sm:$0xf] %vm997_vm1, %v2216_v37  ;;  %v1527_v25 = vmul.f32 %v3505_v12, %v1456_v55  ;;  %2449 = vrsqrt.f32 %v1365_v35  ;;  %v1168_v4 = vpop.xlane.xlu1 %1167  ;;  %v1331_v52 = vadd.f32 1e-10, %v1165_v17  ;;  %v3941_v35 = vld [vmem:[#allocation9_spill] sm:$0xff] }
 0x1ba   :  { %v2440_v49 = vpop.eup %2439  ;;  %1880 = vst.msk [vmem:[%s3896_s5 + $0xa8] sm:$0xf] %vm997_vm1, %v2215_v53  ;;  %v1526_v48 = vmul.f32 %v3505_v12, %v1455_v57  ;;  %v1332_v16 = vadd.f32 1e-10, %v1168_v4 }
 0x1bb   :  { %v2442_v26 = vpop.eup %2441  ;;  %v2182_v38 = vpack.c.bf16 %v1527_v25, %v1527_v25  ;;  %v1488_v19 = vmul.f32 %v2440_v49, %v3938_v43  ;;  %v3942_v49 = vld [vmem:[#allocation14_spill] sm:$0xff] }
 0x1bc   :  { %v2181_v60 = vpack.c.bf16 %v1526_v48, %v1526_v48  ;;  %v1487_v0 = vmul.f32 %v2442_v26, %v3939_v1  ;;  %2451 = vrsqrt.f32 %v1332_v16  ;;  %v1261_v30 = vpop.xlane.xlu0 %1260 }
 0x1bd   :  { %1847 = vst.msk [vmem:[%s3896_s5 + $0x24] sm:$0xf] %vm997_vm1, %v2182_v38  ;;  %v1559_v54 = vmul.f32 %v3505_v12, %v1488_v19  ;;  %2453 = vrsqrt.f32 %v1331_v52  ;;  %v1264_v15 = vpop.xlane.xlu1 %1263  ;;  %v1363_v29 = vadd.f32 1e-10, %v1261_v30  ;;  %v3943_v52 = vld [vmem:[#allocation13_spill] sm:$0xff] }
 0x1be   :  { %v2444_v6 = vpop.eup %2443  ;;  %1846 = vst.msk [vmem:[%s3896_s5 + $0x20] sm:$0xf] %vm997_vm1, %v2181_v60  ;;  %v1558_v22 = vmul.f32 %v3505_v12, %v1487_v0  ;;  %v1364_v39 = vadd.f32 1e-10, %v1264_v15 }
 0x1bf   :  { %v2446_v36 = vpop.eup %2445  ;;  %v2214_v24 = vpack.c.bf16 %v1559_v54, %v1559_v54  ;;  %v1462_v56 = vmul.f32 %v2444_v6, %v3940_v7  ;;  %v3944_v6 = vld [vmem:[#allocation12_spill] sm:$0xff] }
 0x1c0   :  { %v2213_v40 = vpack.c.bf16 %v1558_v22, %v1558_v22  ;;  %v1461_v23 = vmul.f32 %v2446_v36, %v3941_v35  ;;  %2455 = vrsqrt.f32 %v1364_v39  ;;  %v1183_v55 = vpop.xlane.xlu0 %1182 }
 0x1c1   :  { %1879 = vst.msk [vmem:[%s3896_s5 + $0xa4] sm:$0xf] %vm997_vm1, %v2214_v24  ;;  %v1533_v37 = vmul.f32 %v3505_v12, %v1462_v56  ;;  %2457 = vrsqrt.f32 %v1363_v29  ;;  %v1186_v61 = vpop.xlane.xlu1 %1185  ;;  %v1337_v25 = vadd.f32 1e-10, %v1183_v55  ;;  %v3945_v29 = vld [vmem:[#allocation10_spill] sm:$0xff] }
 0x1c2   :  { %v2448_v53 = vpop.eup %2447  ;;  %1878 = vst.msk [vmem:[%s3896_s5 + $0xa0] sm:$0xf] %vm997_vm1, %v2213_v40  ;;  %v1532_v31 = vmul.f32 %v3505_v12, %v1461_v23  ;;  %v1338_v57 = vadd.f32 1e-10, %v1186_v61 }
 0x1c3   :  { %v2450_v4 = vpop.eup %2449  ;;  %v2188_v17 = vpack.c.bf16 %v1533_v37, %v1533_v37  ;;  %v1494_v48 = vmul.f32 %v2448_v53, %v3942_v49 }
 0x1c4   :  { %v2187_v16 = vpack.c.bf16 %v1532_v31, %v1532_v31  ;;  %v1493_v26 = vmul.f32 %v2450_v4, %v3943_v52  ;;  %2459 = vrsqrt.f32 %v1338_v57  ;;  %v1279_v19 = vpop.xlane.xlu0 %1278 }
 0x1c5   :  { %1853 = vst.msk [vmem:[%s3896_s5 + $0x3c] sm:$0xf] %vm997_vm1, %v2188_v17  ;;  %v1565_v38 = vmul.f32 %v3505_v12, %v1494_v48  ;;  %2461 = vrsqrt.f32 %v1337_v25  ;;  %v1282_v43 = vpop.xlane.xlu1 %1281  ;;  %v1369_v54 = vadd.f32 1e-10, %v1279_v19 }
 0x1c6   :  { %v2452_v60 = vpop.eup %2451  ;;  %1852 = vst.msk [vmem:[%s3896_s5 + $0x38] sm:$0xf] %vm997_vm1, %v2187_v16  ;;  %v1564_v1 = vmul.f32 %v3505_v12, %v1493_v26  ;;  %v1370_v0 = vadd.f32 1e-10, %v1282_v43 }
 0x1c7   :  { %v2454_v15 = vpop.eup %2453  ;;  %v2220_v30 = vpack.c.bf16 %v1565_v38, %v1565_v38  ;;  %v1460_v22 = vmul.f32 %v2452_v60, %v3944_v6 }
 0x1c8   :  { %v2219_v39 = vpack.c.bf16 %v1564_v1, %v1564_v1  ;;  %v1459_v36 = vmul.f32 %v2454_v15, %v3945_v29  ;;  %2463 = vrsqrt.f32 %v1370_v0  ;;  %v1177_v56 = vpop.xlane.xlu0 %1176 }
 0x1c9   :  { %1885 = vst.msk [vmem:[%s3896_s5 + $0xbc] sm:$0xf] %vm997_vm1, %v2220_v30  ;;  %v1531_v24 = vmul.f32 %v3505_v12, %v1460_v22  ;;  %2465 = vrsqrt.f32 %v1369_v54  ;;  %v1180_v7 = vpop.xlane.xlu1 %1179  ;;  %v1335_v37 = vadd.f32 1e-10, %v1177_v56 }
 0x1ca   :  { %v2456_v40 = vpop.eup %2455  ;;  %1884 = vst.msk [vmem:[%s3896_s5 + $0xb8] sm:$0xf] %vm997_vm1, %v2219_v39  ;;  %v1530_v35 = vmul.f32 %v3505_v12, %v1459_v36  ;;  %v1336_v23 = vadd.f32 1e-10, %v1180_v7 }
 0x1cb   :  { %v2458_v61 = vpop.eup %2457  ;;  %v2186_v55 = vpack.c.bf16 %v1531_v24, %v1531_v24  ;;  %v1492_v53 = vmul.f32 %v2456_v40, %v3013_v58 }
 0x1cc   :  { %v2185_v31 = vpack.c.bf16 %v1530_v35, %v1530_v35  ;;  %v1491_v57 = vmul.f32 %v2458_v61, %v2993_v34  ;;  %2467 = vrsqrt.f32 %v1336_v23  ;;  %v1273_v17 = vpop.xlane.xlu0 %1272 }
 0x1cd   :  { %1851 = vst.msk [vmem:[%s3896_s5 + $0x34] sm:$0xf] %vm997_vm1, %v2186_v55  ;;  %v1563_v25 = vmul.f32 %v3505_v12, %v1492_v53  ;;  %2469 = vrsqrt.f32 %v1335_v37  ;;  %v1276_v4 = vpop.xlane.xlu1 %1275  ;;  %v1367_v48 = vadd.f32 1e-10, %v1273_v17 }
 0x1ce   :  { %v2460_v49 = vpop.eup %2459  ;;  %1850 = vst.msk [vmem:[%s3896_s5 + $0x30] sm:$0xf] %vm997_vm1, %v2185_v31  ;;  %v1562_v58 = vmul.f32 %v3505_v12, %v1491_v57  ;;  %v1368_v34 = vadd.f32 1e-10, %v1276_v4 }
 0x1cf   :  { %v2462_v16 = vpop.eup %2461  ;;  %v2218_v52 = vpack.c.bf16 %v1563_v25, %v1563_v25  ;;  %v1466_v26 = vmul.f32 %v2460_v49, %v3062_v46 }
 0x1d0   :  { %v2217_v38 = vpack.c.bf16 %v1562_v58, %v1562_v58  ;;  %v1465_v43 = vmul.f32 %v2462_v16, %v3039_v10  ;;  %2471 = vrsqrt.f32 %v1368_v34  ;;  %v1195_v1 = vpop.xlane.xlu0 %1194 }
 0x1d1   :  { %1883 = vst.msk [vmem:[%s3896_s5 + $0xb4] sm:$0xf] %vm997_vm1, %v2218_v52  ;;  %v1537_v19 = vmul.f32 %v3505_v12, %v1466_v26  ;;  %2473 = vrsqrt.f32 %v1367_v48  ;;  %v1198_v60 = vpop.xlane.xlu1 %1197  ;;  %v1341_v54 = vadd.f32 1e-10, %v1195_v1 }
 0x1d2   :  { %v2464_v0 = vpop.eup %2463  ;;  %1882 = vst.msk [vmem:[%s3896_s5 + $0xb0] sm:$0xf] %vm997_vm1, %v2217_v38  ;;  %v1536_v46 = vmul.f32 %v3505_v12, %v1465_v43  ;;  %v1342_v10 = vadd.f32 1e-10, %v1198_v60 }
 0x1d3   :  { %v2466_v15 = vpop.eup %2465  ;;  %v2192_v30 = vpack.c.bf16 %v1537_v19, %v1537_v19  ;;  %v1498_v6 = vmul.f32 %v2464_v0, %v3101_v41 }
 0x1d4   :  { %v2191_v22 = vpack.c.bf16 %v1536_v46, %v1536_v46  ;;  %v1497_v39 = vmul.f32 %v2466_v15, %v3073_v32  ;;  %2475 = vrsqrt.f32 %v1342_v10  ;;  %v1291_v24 = vpop.xlane.xlu0 %1290 }
 0x1d5   :  { %1857 = vst.msk [vmem:[%s3896_s5 + $0x4c] sm:$0xf] %vm997_vm1, %v2192_v30  ;;  %v1569_v29 = vmul.f32 %v3505_v12, %v1498_v6  ;;  %2477 = vrsqrt.f32 %v1341_v54  ;;  %v1294_v36 = vpop.xlane.xlu1 %1293  ;;  %v1373_v56 = vadd.f32 1e-10, %v1291_v24 }
 0x1d6   :  { %v2468_v7 = vpop.eup %2467  ;;  %1856 = vst.msk [vmem:[%s3896_s5 + $0x48] sm:$0xf] %vm997_vm1, %v2191_v22  ;;  %v1568_v41 = vmul.f32 %v3505_v12, %v1497_v39  ;;  %v1374_v32 = vadd.f32 1e-10, %v1294_v36 }
 0x1d7   :  { %v2470_v40 = vpop.eup %2469  ;;  %v2224_v35 = vpack.c.bf16 %v1569_v29, %v1569_v29  ;;  %v1464_v23 = vmul.f32 %v2468_v7, %v3071_v18 }
 0x1d8   :  { %v2223_v37 = vpack.c.bf16 %v1568_v41, %v1568_v41  ;;  %v1463_v61 = vmul.f32 %v2470_v40, %v3051_v14  ;;  %2479 = vrsqrt.f32 %v1374_v32  ;;  %v1189_v31 = vpop.xlane.xlu0 %1188 }
 0x1d9   :  { %1889 = vst.msk [vmem:[%s3896_s5 + $0xcc] sm:$0xf] %vm997_vm1, %v2224_v35  ;;  %v1535_v55 = vmul.f32 %v3505_v12, %v1464_v23  ;;  %2481 = vrsqrt.f32 %v1373_v56  ;;  %v1192_v53 = vpop.xlane.xlu1 %1191  ;;  %v1339_v25 = vadd.f32 1e-10, %v1189_v31 }
 0x1da   :  { %v2472_v57 = vpop.eup %2471  ;;  %1888 = vst.msk [vmem:[%s3896_s5 + $0xc8] sm:$0xf] %vm997_vm1, %v2223_v37  ;;  %v1534_v18 = vmul.f32 %v3505_v12, %v1463_v61  ;;  %v1340_v14 = vadd.f32 1e-10, %v1192_v53 }
 0x1db   :  { %v2474_v4 = vpop.eup %2473  ;;  %v2190_v17 = vpack.c.bf16 %v1535_v55, %v1535_v55  ;;  %v1496_v49 = vmul.f32 %v2472_v57, %v3103_v51 }
 0x1dc   :  { %v2189_v58 = vpack.c.bf16 %v1534_v18, %v1534_v18  ;;  %v1495_v34 = vmul.f32 %v2474_v4, %v3075_v59  ;;  %2483 = vrsqrt.f32 %v1340_v14  ;;  %v1285_v52 = vpop.xlane.xlu0 %1284 }
 0x1dd   :  { %1855 = vst.msk [vmem:[%s3896_s5 + $0x44] sm:$0xf] %vm997_vm1, %v2190_v17  ;;  %v1567_v48 = vmul.f32 %v3505_v12, %v1496_v49  ;;  %2485 = vrsqrt.f32 %v1339_v25  ;;  %v1288_v16 = vpop.xlane.xlu1 %1287  ;;  %v1371_v38 = vadd.f32 1e-10, %v1285_v52 }
 0x1de   :  { %v2476_v26 = vpop.eup %2475  ;;  %1854 = vst.msk [vmem:[%s3896_s5 + $0x40] sm:$0xf] %vm997_vm1, %v2189_v58  ;;  %v1566_v51 = vmul.f32 %v3505_v12, %v1495_v34  ;;  %v1372_v59 = vadd.f32 1e-10, %v1288_v16 }
 0x1df   :  { %v2478_v43 = vpop.eup %2477  ;;  %v2222_v19 = vpack.c.bf16 %v1567_v48, %v1567_v48  ;;  %v1470_v60 = vmul.f32 %v2476_v26, %v3162_v11 }
 0x1e0   :  { %v2221_v1 = vpack.c.bf16 %v1566_v51, %v1566_v51  ;;  %v1469_v0 = vmul.f32 %v2478_v43, %v3131_v8  ;;  %2487 = vrsqrt.f32 %v1372_v59  ;;  %v1207_v54 = vpop.xlane.xlu0 %1206 }
 0x1e1   :  { %1887 = vst.msk [vmem:[%s3896_s5 + $0xc4] sm:$0xf] %vm997_vm1, %v2222_v19  ;;  %v1541_v46 = vmul.f32 %v3505_v12, %v1470_v60  ;;  %2489 = vrsqrt.f32 %v1371_v38  ;;  %v1210_v10 = vpop.xlane.xlu1 %1209  ;;  %v1345_v30 = vadd.f32 1e-10, %v1207_v54 }
 0x1e2   :  { %v2480_v15 = vpop.eup %2479  ;;  %1886 = vst.msk [vmem:[%s3896_s5 + $0xc0] sm:$0xf] %vm997_vm1, %v2221_v1  ;;  %v1540_v11 = vmul.f32 %v3505_v12, %v1469_v0  ;;  %v1346_v8 = vadd.f32 1e-10, %v1210_v10 }
 0x1e3   :  { %v2482_v6 = vpop.eup %2481  ;;  %v2196_v22 = vpack.c.bf16 %v1541_v46, %v1541_v46  ;;  %v1502_v39 = vmul.f32 %v2480_v15, %v3197_v47 }
 0x1e4   :  { %v2195_v29 = vpack.c.bf16 %v1540_v11, %v1540_v11  ;;  %v1501_v36 = vmul.f32 %v2482_v6, %v3171_v42  ;;  %2491 = vrsqrt.f32 %v1346_v8  ;;  %v1303_v41 = vpop.xlane.xlu0 %1302 }
 0x1e5   :  { %1861 = vst.msk [vmem:[%s3896_s5 + $0x5c] sm:$0xf] %vm997_vm1, %v2196_v22  ;;  %v1573_v24 = vmul.f32 %v3505_v12, %v1502_v39  ;;  %2493 = vrsqrt.f32 %v1345_v30  ;;  %v1306_v7 = vpop.xlane.xlu1 %1305  ;;  %v1377_v56 = vadd.f32 1e-10, %v1303_v41 }
 0x1e6   :  { %v2484_v32 = vpop.eup %2483  ;;  %1860 = vst.msk [vmem:[%s3896_s5 + $0x58] sm:$0xf] %vm997_vm1, %v2195_v29  ;;  %v1572_v47 = vmul.f32 %v3505_v12, %v1501_v36  ;;  %v1378_v42 = vadd.f32 1e-10, %v1306_v7 }
 0x1e7   :  { %v2486_v40 = vpop.eup %2485  ;;  %v2228_v35 = vpack.c.bf16 %v1573_v24, %v1573_v24  ;;  %v1468_v23 = vmul.f32 %v2484_v32, %v3169_v21 }
 0x1e8   :  { %v2227_v37 = vpack.c.bf16 %v1572_v47, %v1572_v47  ;;  %v1467_v61 = vmul.f32 %v2486_v40, %v3145_v2  ;;  %2495 = vrsqrt.f32 %v1378_v42  ;;  %v1201_v31 = vpop.xlane.xlu0 %1200 }
 0x1e9   :  { %1893 = vst.msk [vmem:[%s3896_s5 + $0xdc] sm:$0xf] %vm997_vm1, %v2228_v35  ;;  %v1539_v55 = vmul.f32 %v3505_v12, %v1468_v23  ;;  %2497 = vrsqrt.f32 %v1377_v56  ;;  %v1204_v53 = vpop.xlane.xlu1 %1203  ;;  %v1343_v18 = vadd.f32 1e-10, %v1201_v31 }
 0x1ea   :  { %v2488_v57 = vpop.eup %2487  ;;  %1892 = vst.msk [vmem:[%s3896_s5 + $0xd8] sm:$0xf] %vm997_vm1, %v2227_v37  ;;  %v1538_v21 = vmul.f32 %v3505_v12, %v1467_v61  ;;  %v1344_v2 = vadd.f32 1e-10, %v1204_v53 }
 0x1eb   :  { %v2490_v14 = vpop.eup %2489  ;;  %v2194_v25 = vpack.c.bf16 %v1539_v55, %v1539_v55  ;;  %v1500_v4 = vmul.f32 %v2488_v57, %v3226_v9 }
 0x1ec   :  { %v2193_v17 = vpack.c.bf16 %v1538_v21, %v1538_v21  ;;  %v1499_v49 = vmul.f32 %v2490_v14, %v3173_v62  ;;  %2499 = vrsqrt.f32 %v1344_v2  ;;  %v1297_v48 = vpop.xlane.xlu0 %1296 }
 0x1ed   :  { %1859 = vst.msk [vmem:[%s3896_s5 + $0x54] sm:$0xf] %vm997_vm1, %v2194_v25  ;;  %v1571_v58 = vmul.f32 %v3505_v12, %v1500_v4  ;;  %2501 = vrsqrt.f32 %v1343_v18  ;;  %v1300_v34 = vpop.xlane.xlu1 %1299  ;;  %v1375_v52 = vadd.f32 1e-10, %v1297_v48 }
 0x1ee   :  { %v2492_v16 = vpop.eup %2491  ;;  %1858 = vst.msk [vmem:[%s3896_s5 + $0x50] sm:$0xf] %vm997_vm1, %v2193_v17  ;;  %v1570_v9 = vmul.f32 %v3505_v12, %v1499_v49  ;;  %v1376_v62 = vadd.f32 1e-10, %v1300_v34 }
 0x1ef   :  { %v2494_v26 = vpop.eup %2493  ;;  %v2226_v51 = vpack.c.bf16 %v1571_v58, %v1571_v58  ;;  %v1474_v59 = vmul.f32 %v2492_v16, %v3267_v44 }
 0x1f0   :  { %v2225_v38 = vpack.c.bf16 %v1570_v9, %v1570_v9  ;;  %v1473_v43 = vmul.f32 %v2494_v26, %v3233_v20  ;;  %2503 = vrsqrt.f32 %v1376_v62  ;;  %v1219_v1 = vpop.xlane.xlu0 %1218  ;;  %v3946_v62 = vld [vmem:[#allocation15_spill] sm:$0xff] }
 0x1f1   :  { %1891 = vst.msk [vmem:[%s3896_s5 + $0xd4] sm:$0xf] %vm997_vm1, %v2226_v51  ;;  %v1545_v19 = vmul.f32 %v3505_v12, %v1474_v59  ;;  %2505 = vrsqrt.f32 %v1375_v52  ;;  %v1222_v60 = vpop.xlane.xlu1 %1221  ;;  %v1349_v46 = vadd.f32 1e-10, %v1219_v1  ;;  %v3948_v1 = vld [vmem:[#allocation17_spill] sm:$0xff] }
 0x1f2   :  { %v2496_v0 = vpop.eup %2495  ;;  %1890 = vst.msk [vmem:[%s3896_s5 + $0xd0] sm:$0xf] %vm997_vm1, %v2225_v38  ;;  %v1544_v44 = vmul.f32 %v3505_v12, %v1473_v43  ;;  %v1350_v20 = vadd.f32 1e-10, %v1222_v60  ;;  %v3947_v43 = vld [vmem:[#allocation19_spill] sm:$0xff] }
 0x1f3   :  { %v2498_v10 = vpop.eup %2497  ;;  %v2200_v54 = vpack.c.bf16 %v1545_v19, %v1545_v19  ;;  %v1506_v15 = vmul.f32 %v2496_v0, %v3295_v3 }
 0x1f4   :  { %v2199_v11 = vpack.c.bf16 %v1544_v44, %v1544_v44  ;;  %v1505_v8 = vmul.f32 %v2498_v10, %v3271_v50  ;;  %2507 = vrsqrt.f32 %v1350_v20  ;;  %v1213_v22 = vpop.xlane.xlu0 %1212 }
 0x1f5   :  { %1865 = vst.msk [vmem:[%s3896_s5 + $0x6c] sm:$0xf] %vm997_vm1, %v2200_v54  ;;  %v1577_v30 = vmul.f32 %v3505_v12, %v1506_v15  ;;  %2509 = vrsqrt.f32 %v1349_v46  ;;  %v1216_v6 = vpop.xlane.xlu1 %1215  ;;  %v1347_v29 = vadd.f32 1e-10, %v1213_v22  ;;  %v3949_v15 = vld [vmem:[#allocation18_spill] sm:$0xff] }
 0x1f6   :  { %v2500_v39 = vpop.eup %2499  ;;  %1864 = vst.msk [vmem:[%s3896_s5 + $0x68] sm:$0xf] %vm997_vm1, %v2199_v11  ;;  %v1576_v3 = vmul.f32 %v3505_v12, %v1505_v8  ;;  %v1348_v50 = vadd.f32 1e-10, %v1216_v6 }
 0x1f7   :  { %v2502_v36 = vpop.eup %2501  ;;  %v2232_v24 = vpack.c.bf16 %v1577_v30, %v1577_v30  ;;  %v1472_v7 = vmul.f32 %v2500_v39, %v3269_v27  ;;  %v3950_v30 = vld [vmem:[#allocation16_spill] sm:$0xff] }
 0x1f8   :  { %v2231_v41 = vpack.c.bf16 %v1576_v3, %v1576_v3  ;;  %v1471_v32 = vmul.f32 %v2502_v36, %v3245_v33  ;;  %2511 = vrsqrt.f32 %v1348_v50  ;;  %v1309_v56 = vpop.xlane.xlu0 %1308 }
 0x1f9   :  { %1897 = vst.msk [vmem:[%s3896_s5 + $0xec] sm:$0xf] %vm997_vm1, %v2232_v24  ;;  %v1543_v47 = vmul.f32 %v3505_v12, %v1472_v7  ;;  %2513 = vrsqrt.f32 %v1347_v29  ;;  %v1312_v42 = vpop.xlane.xlu1 %1311  ;;  %v1379_v35 = vadd.f32 1e-10, %v1309_v56 }
 0x1fa   :  { %v2504_v40 = vpop.eup %2503  ;;  %1896 = vst.msk [vmem:[%s3896_s5 + $0xe8] sm:$0xf] %vm997_vm1, %v2231_v41  ;;  %v1542_v27 = vmul.f32 %v3505_v12, %v1471_v32  ;;  %v1380_v33 = vadd.f32 1e-10, %v1312_v42 }
 0x1fb   :  { %v2506_v23 = vpop.eup %2505  ;;  %v2198_v37 = vpack.c.bf16 %v1543_v47, %v1543_v47  ;;  %v1504_v61 = vmul.f32 %v2504_v40, %v3297_v45 }
 0x1fc   :  { %v2197_v55 = vpack.c.bf16 %v1542_v27, %v1542_v27  ;;  %v1503_v53 = vmul.f32 %v2506_v23, %v3279_v13  ;;  %2515 = vrsqrt.f32 %v1380_v33  ;;  %v1315_v21 = vpop.xlane.xlu0 %1314 }
 0x1fd   :  { %1863 = vst.msk [vmem:[%s3896_s5 + $0x64] sm:$0xf] %vm997_vm1, %v2198_v37  ;;  %v1575_v31 = vmul.f32 %v3505_v12, %v1504_v61  ;;  %2517 = vrsqrt.f32 %v1379_v35  ;;  %v1318_v57 = vpop.xlane.xlu1 %1317  ;;  %v1381_v18 = vadd.f32 1e-10, %v1315_v21 }
 0x1fe   :  { %v2508_v2 = vpop.eup %2507  ;;  %1862 = vst.msk [vmem:[%s3896_s5 + $0x60] sm:$0xf] %vm997_vm1, %v2197_v55  ;;  %v1574_v45 = vmul.f32 %v3505_v12, %v1503_v53  ;;  %v1382_v13 = vadd.f32 1e-10, %v1318_v57 }
 0x1ff   :  { %v2510_v14 = vpop.eup %2509  ;;  %v2230_v25 = vpack.c.bf16 %v1575_v31, %v1575_v31  ;;  %v1478_v4 = vmul.f32 %v2508_v2, %v3352_v5 }
 0x200   :  { %v2229_v17 = vpack.c.bf16 %v1574_v45, %v1574_v45  ;;  %v1477_v49 = vmul.f32 %v2510_v14, %v3336_v63  ;;  %2519 = vrsqrt.f32 %v1382_v13 }
 0x201   :  { %1895 = vst.msk [vmem:[%s3896_s5 + $0xe4] sm:$0xf] %vm997_vm1, %v2230_v25  ;;  %v1549_v58 = vmul.f32 %v3505_v12, %v1478_v4  ;;  %2521 = vrsqrt.f32 %v1381_v18 }
 0x202   :  { %v2512_v34 = vpop.eup %2511  ;;  %1894 = vst.msk [vmem:[%s3896_s5 + $0xe0] sm:$0xf] %vm997_vm1, %v2229_v17  ;;  %v1548_v5 = vmul.f32 %v3505_v12, %v1477_v49 }
 0x203   :  { %v2514_v48 = vpop.eup %2513  ;;  %v2204_v16 = vpack.c.bf16 %v1549_v58, %v1549_v58  ;;  %v1476_v63 = vmul.f32 %v2512_v34, %v3354_v28 }
 0x204   :  { %v2203_v9 = vpack.c.bf16 %v1548_v5, %v1548_v5  ;;  %v1475_v52 = vmul.f32 %v2514_v48, %v3946_v62 }
 0x205   :  { %1869 = vst.msk [vmem:[%s3896_s5 + $0x7c] sm:$0xf] %vm997_vm1, %v2204_v16  ;;  %v1547_v26 = vmul.f32 %v3505_v12, %v1476_v63 }
 0x206   :  { %v2516_v51 = vpop.eup %2515  ;;  %1868 = vst.msk [vmem:[%s3896_s5 + $0x78] sm:$0xf] %vm997_vm1, %v2203_v9  ;;  %v1546_v59 = vmul.f32 %v3505_v12, %v1475_v52 }
 0x207   :  { %v2518_v38 = vpop.eup %2517  ;;  %v2202_v28 = vpack.c.bf16 %v1547_v26, %v1547_v26  ;;  %v1508_v19 = vmul.f32 %v2516_v51, %v3947_v43 }
 0x208   :  { %v2201_v60 = vpack.c.bf16 %v1546_v59, %v1546_v59  ;;  %v1507_v0 = vmul.f32 %v2518_v38, %v3948_v1 }
 0x209   :  { %1867 = vst.msk [vmem:[%s3896_s5 + $0x74] sm:$0xf] %vm997_vm1, %v2202_v28  ;;  %v1579_v44 = vmul.f32 %v3505_v12, %v1508_v19 }
 0x20a   :  { %v2520_v20 = vpop.eup %2519  ;;  %1866 = vst.msk [vmem:[%s3896_s5 + $0x70] sm:$0xf] %vm997_vm1, %v2201_v60  ;;  %v1578_v46 = vmul.f32 %v3505_v12, %v1507_v0 }
 0x20b   :  { %v2522_v10 = vpop.eup %2521  ;;  %v2234_v54 = vpack.c.bf16 %v1579_v44, %v1579_v44  ;;  %v1510_v11 = vmul.f32 %v2520_v20, %v3949_v15 }
 0x20c   :  { %v2233_v8 = vpack.c.bf16 %v1578_v46, %v1578_v46  ;;  %v1509_v6 = vmul.f32 %v2522_v10, %v3950_v30 }
 0x20d   :  { %1899 = vst.msk [vmem:[%s3896_s5 + $0xf4] sm:$0xf] %vm997_vm1, %v2234_v54  ;;  %v1581_v22 = vmul.f32 %v3505_v12, %v1510_v11 }
 0x20e   :  { %1898 = vst.msk [vmem:[%s3896_s5 + $0xf0] sm:$0xf] %vm997_vm1, %v2233_v8  ;;  %v1580_v39 = vmul.f32 %v3505_v12, %v1509_v6 }
 0x20f   :  { %v2236_v3 = vpack.c.bf16 %v1581_v22, %v1581_v22 }
 0x210   :  { %v2235_v50 = vpack.c.bf16 %v1580_v39, %v1580_v39 }
 0x211   :  { %1901 = vst.msk [vmem:[%s3896_s5 + $0xfc] sm:$0xf] %vm997_vm1, %v2236_v3 }
 0x212   :  { %1900 = vst.msk [vmem:[%s3896_s5 + $0xf8] sm:$0xf] %vm997_vm1, %v2235_v50 }

// kernel: _lambda_.12
= control target key start
LH: loop header
LB: loop body
LE: loop exit
PB: predicated region body
PF: predicated region fallthrough
CT: control target
= control target key end

     0   :  { %v1131_v0 = vmov 0   ;;  %vm446_vm0 = vcmask 130048   ;;  %vm832_vm1 = vcmask 293888   ;;  %s1728_s1 = inlined_call_operand.vmem [shape: bf16[144,36], index: 1, kind: input, shape index: {}]   ;;  %s1729_s0 = inlined_call_operand.vmem [shape: bf16[512,144], index: 0, kind: input, shape index: {}]   ;;  %s1730_s2 = inlined_call_operand.vmem [shape: f32[1,36], index: 2, kind: input, shape index: {}]   ;;  %s1731_s3 = inlined_call_operand.vmem [shape: f32[512,36], index: 3, kind: output, shape index: {}]  }
   0x1   :  { %543 = vmatprep.subr.bf16.mxu0 %v1131_v0  ;;  %1007 = vmatprep.subr.bf16.mxu1 %v1131_v0  ;;  %v1026_v1 = vld [vmem:[%s1728_s1] sm:$0xff]   ;;  %v1027_v2 = vld [vmem:[%s1728_s1 + $0x8] sm:$0xff]   ;;  %v1028_v3 = vld [vmem:[%s1728_s1 + $0x10] sm:$0xff]  }
   0x2   :  { %544 = vmatpush1.bf16.msra.mxu0 %v1026_v1  ;;  %1016 = vmatpush1.bf16.msra.mxu1 %v1026_v1  ;;  %v1029_v4 = vld [vmem:[%s1728_s1 + $0x18] sm:$0xff]   ;;  %v1037_v5 = vld [vmem:[%s1729_s0 + $0x4] ss:$8 sps:$4 sm:$0xff]   ;;  %v1032_v9 = vld [vmem:[%s1728_s1 + $0x30] sm:$0xff]  }
   0x3   :  { %545 = vmatprep.subr.bf16.mxu0 %v1131_v0  ;;  %1008 = vmatprep.subr.bf16.mxu1 %v1131_v0  ;;  %v1040_v6 = vld [vmem:[%s1729_s0 + $0x104] ss:$8 sps:$4 sm:$0xff]   ;;  %v1033_v10 = vld [vmem:[%s1728_s1 + $0x38] sm:$0xff]   ;;  %v1035_v12 = vld [vmem:[%s1729_s0] ss:$8 sps:$4 sm:$0xff]  }
   0x4   :  { %975 = vmatprep.mubr.msk.bf16.mxu0 %vm446_vm0, %v1037_v5  ;;  %991 = vmatprep.mubr.msk.bf16.mxu1 %vm446_vm0, %v1040_v6  ;;  %v1030_v7 = vld [vmem:[%s1728_s1 + $0x20] sm:$0xff]   ;;  %v1031_v8 = vld [vmem:[%s1728_s1 + $0x28] sm:$0xff]   ;;  %v1041_v14 = vld [vmem:[%s1729_s0 + $0x14] ss:$8 sps:$4 sm:$0xff]  }
   0x5   :  { %v1034_v11 = vld [vmem:[%s1728_s1 + $0x40] sm:$0xff]   ;;  %v1043_v15 = vld [vmem:[%s1729_s0 + $0x114] ss:$8 sps:$4 sm:$0xff]   ;;  %v1045_v16 = vld [vmem:[%s1729_s0 + $0x10] ss:$8 sps:$4 sm:$0xff]  }
   0x6   :  { %546 = vmatpush1.bf16.msra.mxu0 %v1027_v2  ;;  %1017 = vmatpush1.bf16.msra.mxu1 %v1027_v2  ;;  %v1038_v13 = vld [vmem:[%s1729_s0 + $0x100] ss:$8 sps:$4 sm:$0xff]   ;;  %v1046_v17 = vld [vmem:[%s1729_s0 + $0x110] ss:$8 sps:$4 sm:$0xff]   ;;  %v1047_v18 = vld [vmem:[%s1729_s0 + $0x24] ss:$8 sps:$4 sm:$0xff]  }
   0x7   :  { %547 = vmatprep.subr.bf16.mxu0 %v1131_v0  ;;  %1009 = vmatprep.subr.bf16.mxu1 %v1131_v0  ;;  %v1049_v19 = vld [vmem:[%s1729_s0 + $0x124] ss:$8 sps:$4 sm:$0xff]   ;;  %v1051_v20 = vld [vmem:[%s1729_s0 + $0x20] ss:$8 sps:$4 sm:$0xff]   ;;  %v1053_v22 = vld [vmem:[%s1729_s0 + $0x34] ss:$8 sps:$4 sm:$0xff]  }
   0x8   :  { %v1052_v21 = vld [vmem:[%s1729_s0 + $0x120] ss:$8 sps:$4 sm:$0xff]   ;;  %v1055_v23 = vld [vmem:[%s1729_s0 + $0x134] ss:$8 sps:$4 sm:$0xff]   ;;  %v1057_v24 = vld [vmem:[%s1729_s0 + $0x30] ss:$8 sps:$4 sm:$0xff]  }
   0x9   :  { %v1058_v25 = vld [vmem:[%s1729_s0 + $0x130] ss:$8 sps:$4 sm:$0xff]   ;;  %v1059_v26 = vld [vmem:[%s1729_s0 + $0x44] ss:$8 sps:$4 sm:$0xff]   ;;  %v1063_v28 = vld [vmem:[%s1729_s0 + $0x40] ss:$8 sps:$4 sm:$0xff]  }
   0xa   :  { %548 = vmatpush1.bf16.msra.mxu0 %v1028_v3  ;;  %1018 = vmatpush1.bf16.msra.mxu1 %v1028_v3  ;;  %v1061_v27 = vld [vmem:[%s1729_s0 + $0x144] ss:$8 sps:$4 sm:$0xff]   ;;  %v1064_v29 = vld [vmem:[%s1729_s0 + $0x140] ss:$8 sps:$4 sm:$0xff]   ;;  %v1065_v30 = vld [vmem:[%s1729_s0 + $0x54] ss:$8 sps:$4 sm:$0xff]  }
   0xb   :  { %549 = vmatprep.subr.bf16.mxu0 %v1131_v0  ;;  %1010 = vmatprep.subr.bf16.mxu1 %v1131_v0  ;;  %v1067_v31 = vld [vmem:[%s1729_s0 + $0x154] ss:$8 sps:$4 sm:$0xff]   ;;  %v1069_v32 = vld [vmem:[%s1729_s0 + $0x50] ss:$8 sps:$4 sm:$0xff]   ;;  %v1071_v34 = vld [vmem:[%s1729_s0 + $0x64] ss:$8 sps:$4 sm:$0xff]  }
   0xc   :  { %v1070_v33 = vld [vmem:[%s1729_s0 + $0x150] ss:$8 sps:$4 sm:$0xff]   ;;  %v1073_v35 = vld [vmem:[%s1729_s0 + $0x164] ss:$8 sps:$4 sm:$0xff]   ;;  %v1075_v36 = vld [vmem:[%s1729_s0 + $0x60] ss:$8 sps:$4 sm:$0xff]  }
   0xd   :  { %v1076_v37 = vld [vmem:[%s1729_s0 + $0x160] ss:$8 sps:$4 sm:$0xff]   ;;  %v1077_v38 = vld [vmem:[%s1729_s0 + $0x74] ss:$8 sps:$4 sm:$0xff]   ;;  %v1081_v40 = vld [vmem:[%s1729_s0 + $0x70] ss:$8 sps:$4 sm:$0xff]  }
   0xe   :  { %550 = vmatpush1.bf16.msra.mxu0 %v1029_v4  ;;  %1019 = vmatpush1.bf16.msra.mxu1 %v1029_v4  ;;  %v1079_v39 = vld [vmem:[%s1729_s0 + $0x174] ss:$8 sps:$4 sm:$0xff]   ;;  %v1082_v41 = vld [vmem:[%s1729_s0 + $0x170] ss:$8 sps:$4 sm:$0xff]   ;;  %v1083_v42 = vld [vmem:[%s1729_s0 + $0x84] ss:$8 sps:$4 sm:$0xff]  }
   0xf   :  { %551 = vmatprep.subr.bf16.mxu0 %v1131_v0  ;;  %1011 = vmatprep.subr.bf16.mxu1 %v1131_v0  ;;  %v1085_v43 = vld [vmem:[%s1729_s0 + $0x184] ss:$8 sps:$4 sm:$0xff]   ;;  %v1087_v44 = vld [vmem:[%s1729_s0 + $0x80] ss:$8 sps:$4 sm:$0xff]   ;;  %v1089_v46 = vld [vmem:[%s1729_s0 + $0x94] ss:$8 sps:$4 sm:$0xff]  }
  0x10   :  { %v1088_v45 = vld [vmem:[%s1729_s0 + $0x180] ss:$8 sps:$4 sm:$0xff]   ;;  %v1091_v47 = vld [vmem:[%s1729_s0 + $0x194] ss:$8 sps:$4 sm:$0xff]   ;;  %v1093_v48 = vld [vmem:[%s1729_s0 + $0x90] ss:$8 sps:$4 sm:$0xff]  }
  0x11   :  { %v1094_v49 = vld [vmem:[%s1729_s0 + $0x190] ss:$8 sps:$4 sm:$0xff]   ;;  %v1095_v50 = vld [vmem:[%s1729_s0 + $0xa4] ss:$8 sps:$4 sm:$0xff]   ;;  %v1099_v52 = vld [vmem:[%s1729_s0 + $0xa0] ss:$8 sps:$4 sm:$0xff]  }
  0x12   :  { %552 = vmatpush1.bf16.msra.mxu0 %v1030_v7  ;;  %1020 = vmatpush1.bf16.msra.mxu1 %v1030_v7  ;;  %v1097_v51 = vld [vmem:[%s1729_s0 + $0x1a4] ss:$8 sps:$4 sm:$0xff]   ;;  %v1100_v53 = vld [vmem:[%s1729_s0 + $0x1a0] ss:$8 sps:$4 sm:$0xff]   ;;  %v1101_v54 = vld [vmem:[%s1729_s0 + $0xb4] ss:$8 sps:$4 sm:$0xff]  }
  0x13   :  { %553 = vmatprep.subr.bf16.mxu0 %v1131_v0  ;;  %1012 = vmatprep.subr.bf16.mxu1 %v1131_v0  ;;  %v1103_v55 = vld [vmem:[%s1729_s0 + $0x1b4] ss:$8 sps:$4 sm:$0xff]   ;;  %v1105_v56 = vld [vmem:[%s1729_s0 + $0xb0] ss:$8 sps:$4 sm:$0xff]   ;;  %v1107_v58 = vld [vmem:[%s1729_s0 + $0xc4] ss:$8 sps:$4 sm:$0xff]  }
  0x14   :  { %v1106_v57 = vld [vmem:[%s1729_s0 + $0x1b0] ss:$8 sps:$4 sm:$0xff]   ;;  %v1109_v59 = vld [vmem:[%s1729_s0 + $0x1c4] ss:$8 sps:$4 sm:$0xff]   ;;  %v1111_v60 = vld [vmem:[%s1729_s0 + $0xc0] ss:$8 sps:$4 sm:$0xff]  }
  0x15   :  { %v1112_v61 = vld [vmem:[%s1729_s0 + $0x1c0] ss:$8 sps:$4 sm:$0xff]   ;;  %v1113_v62 = vld [vmem:[%s1729_s0 + $0xd4] ss:$8 sps:$4 sm:$0xff]   ;;  %v1118_v1 = vld [vmem:[%s1729_s0 + $0x1d0] ss:$8 sps:$4 sm:$0xff]  }
  0x16   :  { %554 = vmatpush1.bf16.msra.mxu0 %v1031_v8  ;;  %1021 = vmatpush1.bf16.msra.mxu1 %v1031_v8  ;;  %v1115_v63 = vld [vmem:[%s1729_s0 + $0x1d4] ss:$8 sps:$4 sm:$0xff]   ;;  %v1119_v2 = vld [vmem:[%s1729_s0 + $0xe4] ss:$8 sps:$4 sm:$0xff]   ;;  %v1123_v4 = vld [vmem:[%s1729_s0 + $0xe0] ss:$8 sps:$4 sm:$0xff]  }
  0x17   :  { %555 = vmatprep.subr.bf16.mxu0 %v1131_v0  ;;  %1013 = vmatprep.subr.bf16.mxu1 %v1131_v0  ;;  %v1121_v3 = vld [vmem:[%s1729_s0 + $0x1e4] ss:$8 sps:$4 sm:$0xff]   ;;  %v1124_v5 = vld [vmem:[%s1729_s0 + $0x1e0] ss:$8 sps:$4 sm:$0xff]   ;;  %v1125_v6 = vld [vmem:[%s1729_s0 + $0xf4] ss:$8 sps:$4 sm:$0xff]  }
  0x18   :  { %v1127_v7 = vld [vmem:[%s1729_s0 + $0x1f4] ss:$8 sps:$4 sm:$0xff]   ;;  %v1129_v8 = vld [vmem:[%s1729_s0 + $0xf0] ss:$8 sps:$4 sm:$0xff]  }
  0x1a   :  { %556 = vmatpush1.bf16.msra.mxu0 %v1032_v9  ;;  %1022 = vmatpush1.bf16.msra.mxu1 %v1032_v9  ;;  %v1130_v9 = vld [vmem:[%s1729_s0 + $0x1f0] ss:$8 sps:$4 sm:$0xff]  }
  0x1b   :  { %557 = vmatprep.subr.bf16.mxu0 %v1131_v0  ;;  %1014 = vmatprep.subr.bf16.mxu1 %v1131_v0 }
  0x1e   :  { %558 = vmatpush1.bf16.msra.mxu0 %v1033_v10  ;;  %1023 = vmatpush1.bf16.msra.mxu1 %v1033_v10  ;;  %v1406_v10 = vld [vmem:[%s1730_s2] ss:$0 sm:$0xff] }
  0x1f   :  { %559 = vmatprep.subr.bf16.mxu0 %v1131_v0  ;;  %1015 = vmatprep.subr.bf16.mxu1 %v1131_v0  ;;  %v1117_v0 = vld [vmem:[%s1729_s0 + $0xd0] ss:$8 sps:$4 sm:$0xff]  }
  0x22   :  { %560 = vmatpush1.bf16.msra.mxu0 %v1034_v11  ;;  %1024 = vmatpush1.bf16.msra.mxu1 %v1034_v11 }
  0x25   :  { %576 = vmatmul.mubr.bf16.vlgmr.msra.gmra.mrb[0].mxu0 %v1035_v12  ;;  %704 = vmatmul.mubr.bf16.vlgmr.msra.gmra.mrb[0].mxu1 %v1038_v13 }
  0x26   :  { %976 = vmatprep.mubr.msk.bf16.mxu0 %vm446_vm0, %v1041_v14  ;;  %992 = vmatprep.mubr.msk.bf16.mxu1 %vm446_vm0, %v1043_v15 }
  0x2d   :  { %584 = vmatmul.mubr.bf16.gmra.mrb[4].mxu0 %v1045_v16  ;;  %712 = vmatmul.mubr.bf16.gmra.mrb[4].mxu1 %v1046_v17 }
  0x2e   :  { %977 = vmatprep.mubr.msk.bf16.mxu0 %vm446_vm0, %v1047_v18  ;;  %993 = vmatprep.mubr.msk.bf16.mxu1 %vm446_vm0, %v1049_v19 }
  0x35   :  { %592 = vmatmul.mubr.bf16.gmra.mrb[8].mxu0 %v1051_v20  ;;  %720 = vmatmul.mubr.bf16.gmra.mrb[8].mxu1 %v1052_v21 }
  0x36   :  { %978 = vmatprep.mubr.msk.bf16.mxu0 %vm446_vm0, %v1053_v22  ;;  %994 = vmatprep.mubr.msk.bf16.mxu1 %vm446_vm0, %v1055_v23 }
  0x3d   :  { %600 = vmatmul.mubr.bf16.gmra.mrb[12].mxu0 %v1057_v24  ;;  %728 = vmatmul.mubr.bf16.gmra.mrb[12].mxu1 %v1058_v25 }
  0x3e   :  { %979 = vmatprep.mubr.msk.bf16.mxu0 %vm446_vm0, %v1059_v26  ;;  %995 = vmatprep.mubr.msk.bf16.mxu1 %vm446_vm0, %v1061_v27 }
  0x45   :  { %608 = vmatmul.mubr.bf16.gmra.mrb[16].mxu0 %v1063_v28  ;;  %736 = vmatmul.mubr.bf16.gmra.mrb[16].mxu1 %v1064_v29 }
  0x46   :  { %980 = vmatprep.mubr.msk.bf16.mxu0 %vm446_vm0, %v1065_v30  ;;  %996 = vmatprep.mubr.msk.bf16.mxu1 %vm446_vm0, %v1067_v31 }
  0x4d   :  { %616 = vmatmul.mubr.bf16.gmra.mrb[20].mxu0 %v1069_v32  ;;  %744 = vmatmul.mubr.bf16.gmra.mrb[20].mxu1 %v1070_v33 }
  0x4e   :  { %981 = vmatprep.mubr.msk.bf16.mxu0 %vm446_vm0, %v1071_v34  ;;  %997 = vmatprep.mubr.msk.bf16.mxu1 %vm446_vm0, %v1073_v35 }
  0x55   :  { %624 = vmatmul.mubr.bf16.gmra.mrb[24].mxu0 %v1075_v36  ;;  %752 = vmatmul.mubr.bf16.gmra.mrb[24].mxu1 %v1076_v37 }
  0x56   :  { %982 = vmatprep.mubr.msk.bf16.mxu0 %vm446_vm0, %v1077_v38  ;;  %998 = vmatprep.mubr.msk.bf16.mxu1 %vm446_vm0, %v1079_v39 }
  0x5d   :  { %632 = vmatmul.mubr.bf16.gmra.mrb[28].mxu0 %v1081_v40  ;;  %760 = vmatmul.mubr.bf16.gmra.mrb[28].mxu1 %v1082_v41 }
  0x5e   :  { %983 = vmatprep.mubr.msk.bf16.mxu0 %vm446_vm0, %v1083_v42  ;;  %999 = vmatprep.mubr.msk.bf16.mxu1 %vm446_vm0, %v1085_v43 }
  0x65   :  { %640 = vmatmul.mubr.bf16.gmra.mrb[32].mxu0 %v1087_v44  ;;  %768 = vmatmul.mubr.bf16.gmra.mrb[32].mxu1 %v1088_v45 }
  0x66   :  { %984 = vmatprep.mubr.msk.bf16.mxu0 %vm446_vm0, %v1089_v46  ;;  %1000 = vmatprep.mubr.msk.bf16.mxu1 %vm446_vm0, %v1091_v47 }
  0x6d   :  { %648 = vmatmul.mubr.bf16.gmra.mrb[36].mxu0 %v1093_v48  ;;  %776 = vmatmul.mubr.bf16.gmra.mrb[36].mxu1 %v1094_v49 }
  0x6e   :  { %985 = vmatprep.mubr.msk.bf16.mxu0 %vm446_vm0, %v1095_v50  ;;  %1001 = vmatprep.mubr.msk.bf16.mxu1 %vm446_vm0, %v1097_v51 }
  0x75   :  { %656 = vmatmul.mubr.bf16.gmra.mrb[40].mxu0 %v1099_v52  ;;  %784 = vmatmul.mubr.bf16.gmra.mrb[40].mxu1 %v1100_v53 }
  0x76   :  { %986 = vmatprep.mubr.msk.bf16.mxu0 %vm446_vm0, %v1101_v54  ;;  %1002 = vmatprep.mubr.msk.bf16.mxu1 %vm446_vm0, %v1103_v55 }
  0x7d   :  { %664 = vmatmul.mubr.bf16.gmra.mrb[44].mxu0 %v1105_v56  ;;  %792 = vmatmul.mubr.bf16.gmra.mrb[44].mxu1 %v1106_v57 }
  0x7e   :  { %987 = vmatprep.mubr.msk.bf16.mxu0 %vm446_vm0, %v1107_v58  ;;  %1003 = vmatprep.mubr.msk.bf16.mxu1 %vm446_vm0, %v1109_v59 }
  0x85   :  { %672 = vmatmul.mubr.bf16.gmra.mrb[48].mxu0 %v1111_v60  ;;  %800 = vmatmul.mubr.bf16.gmra.mrb[48].mxu1 %v1112_v61 }
  0x86   :  { %988 = vmatprep.mubr.msk.bf16.mxu0 %vm446_vm0, %v1113_v62  ;;  %1004 = vmatprep.mubr.msk.bf16.mxu1 %vm446_vm0, %v1115_v63 }
  0x8d   :  { %680 = vmatmul.mubr.bf16.gmra.mrb[52].mxu0 %v1117_v0  ;;  %808 = vmatmul.mubr.bf16.gmra.mrb[52].mxu1 %v1118_v1 }
  0x8e   :  { %989 = vmatprep.mubr.msk.bf16.mxu0 %vm446_vm0, %v1119_v2  ;;  %1005 = vmatprep.mubr.msk.bf16.mxu1 %vm446_vm0, %v1121_v3 }
  0x95   :  { %688 = vmatmul.mubr.bf16.gmra.mrb[56].mxu0 %v1123_v4  ;;  %816 = vmatmul.mubr.bf16.gmra.mrb[56].mxu1 %v1124_v5 }
  0x96   :  { %990 = vmatprep.mubr.msk.bf16.mxu0 %vm446_vm0, %v1125_v6  ;;  %1006 = vmatprep.mubr.msk.bf16.mxu1 %vm446_vm0, %v1127_v7 }
  0x9d   :  { %696 = vmatmul.mubr.bf16.gmra.mrb[60].mxu0 %v1129_v8  ;;  %824 = vmatmul.mubr.bf16.gmra.mrb[60].mxu1 %v1130_v9 }
  0xf8   :  { %v577_v11 = vpop.f32.mrb[0].mxu0  ;;  %v705_v12 = vpop.f32.mrb[0].mxu1 }
  0xf9   :  { %v578_v13 = vadd.f32 %v1406_v10, %v577_v11  ;;  %v706_v14 = vadd.f32 %v1406_v10, %v705_v12  ;;  %v579_v15 = vpop.f32.mrb[1].mxu0  ;;  %v707_v16 = vpop.f32.mrb[1].mxu1 }
  0xfa   :  { %v580_v17 = vpop.f32.mrb[2].mxu0  ;;  %v708_v18 = vpop.f32.mrb[2].mxu1 }
  0xfb   :  { %833 = vst.msk [vmem:[%s1731_s3] sm:$0xff] %vm832_vm1, %v578_v13  ;;  %865 = vst.msk [vmem:[%s1731_s3 + $0x100] sm:$0xff] %vm832_vm1, %v706_v14  ;;  %v581_v19 = vadd.f32 %v1406_v10, %v580_v17  ;;  %v709_v20 = vadd.f32 %v1406_v10, %v708_v18  ;;  %v582_v21 = vpop.f32.mrb[3].mxu0  ;;  %v710_v22 = vpop.f32.mrb[3].mxu1 }
  0xfd   :  { %834 = vst.msk [vmem:[%s1731_s3 + $0x8] sm:$0xff] %vm832_vm1, %v581_v19  ;;  %866 = vst.msk [vmem:[%s1731_s3 + $0x108] sm:$0xff] %vm832_vm1, %v709_v20 }
 0x100   :  { %v585_v23 = vpop.f32.mrb[4].mxu0  ;;  %v713_v24 = vpop.f32.mrb[4].mxu1 }
 0x101   :  { %v586_v25 = vadd.f32 %v1406_v10, %v585_v23  ;;  %v714_v26 = vadd.f32 %v1406_v10, %v713_v24  ;;  %v587_v27 = vpop.f32.mrb[5].mxu0  ;;  %v715_v28 = vpop.f32.mrb[5].mxu1 }
 0x102   :  { %v588_v29 = vpop.f32.mrb[6].mxu0  ;;  %v716_v30 = vpop.f32.mrb[6].mxu1 }
 0x103   :  { %835 = vst.msk [vmem:[%s1731_s3 + $0x10] sm:$0xff] %vm832_vm1, %v586_v25  ;;  %867 = vst.msk [vmem:[%s1731_s3 + $0x110] sm:$0xff] %vm832_vm1, %v714_v26  ;;  %v589_v31 = vadd.f32 %v1406_v10, %v588_v29  ;;  %v717_v32 = vadd.f32 %v1406_v10, %v716_v30  ;;  %v590_v33 = vpop.f32.mrb[7].mxu0  ;;  %v718_v34 = vpop.f32.mrb[7].mxu1 }
 0x105   :  { %836 = vst.msk [vmem:[%s1731_s3 + $0x18] sm:$0xff] %vm832_vm1, %v589_v31  ;;  %868 = vst.msk [vmem:[%s1731_s3 + $0x118] sm:$0xff] %vm832_vm1, %v717_v32 }
 0x108   :  { %v593_v35 = vpop.f32.mrb[8].mxu0  ;;  %v721_v36 = vpop.f32.mrb[8].mxu1 }
 0x109   :  { %v594_v37 = vadd.f32 %v1406_v10, %v593_v35  ;;  %v722_v38 = vadd.f32 %v1406_v10, %v721_v36  ;;  %v595_v39 = vpop.f32.mrb[9].mxu0  ;;  %v723_v40 = vpop.f32.mrb[9].mxu1 }
 0x10a   :  { %v596_v41 = vpop.f32.mrb[10].mxu0  ;;  %v724_v42 = vpop.f32.mrb[10].mxu1 }
 0x10b   :  { %837 = vst.msk [vmem:[%s1731_s3 + $0x20] sm:$0xff] %vm832_vm1, %v594_v37  ;;  %869 = vst.msk [vmem:[%s1731_s3 + $0x120] sm:$0xff] %vm832_vm1, %v722_v38  ;;  %v597_v43 = vadd.f32 %v1406_v10, %v596_v41  ;;  %v725_v44 = vadd.f32 %v1406_v10, %v724_v42  ;;  %v598_v45 = vpop.f32.mrb[11].mxu0  ;;  %v726_v46 = vpop.f32.mrb[11].mxu1 }
 0x10d   :  { %838 = vst.msk [vmem:[%s1731_s3 + $0x28] sm:$0xff] %vm832_vm1, %v597_v43  ;;  %870 = vst.msk [vmem:[%s1731_s3 + $0x128] sm:$0xff] %vm832_vm1, %v725_v44 }
 0x110   :  { %v601_v47 = vpop.f32.mrb[12].mxu0  ;;  %v729_v48 = vpop.f32.mrb[12].mxu1 }
 0x111   :  { %v602_v49 = vadd.f32 %v1406_v10, %v601_v47  ;;  %v730_v50 = vadd.f32 %v1406_v10, %v729_v48  ;;  %v603_v51 = vpop.f32.mrb[13].mxu0  ;;  %v731_v52 = vpop.f32.mrb[13].mxu1 }
 0x112   :  { %v604_v53 = vpop.f32.mrb[14].mxu0  ;;  %v732_v54 = vpop.f32.mrb[14].mxu1 }
 0x113   :  { %839 = vst.msk [vmem:[%s1731_s3 + $0x30] sm:$0xff] %vm832_vm1, %v602_v49  ;;  %871 = vst.msk [vmem:[%s1731_s3 + $0x130] sm:$0xff] %vm832_vm1, %v730_v50  ;;  %v605_v55 = vadd.f32 %v1406_v10, %v604_v53  ;;  %v733_v56 = vadd.f32 %v1406_v10, %v732_v54  ;;  %v606_v57 = vpop.f32.mrb[15].mxu0  ;;  %v734_v58 = vpop.f32.mrb[15].mxu1 }
 0x115   :  { %840 = vst.msk [vmem:[%s1731_s3 + $0x38] sm:$0xff] %vm832_vm1, %v605_v55  ;;  %872 = vst.msk [vmem:[%s1731_s3 + $0x138] sm:$0xff] %vm832_vm1, %v733_v56 }
 0x118   :  { %v609_v59 = vpop.f32.mrb[16].mxu0  ;;  %v737_v60 = vpop.f32.mrb[16].mxu1 }
 0x119   :  { %v610_v61 = vadd.f32 %v1406_v10, %v609_v59  ;;  %v738_v62 = vadd.f32 %v1406_v10, %v737_v60  ;;  %v611_v63 = vpop.f32.mrb[17].mxu0  ;;  %v739_v0 = vpop.f32.mrb[17].mxu1 }
 0x11a   :  { %v612_v1 = vpop.f32.mrb[18].mxu0  ;;  %v740_v2 = vpop.f32.mrb[18].mxu1 }
 0x11b   :  { %841 = vst.msk [vmem:[%s1731_s3 + $0x40] sm:$0xff] %vm832_vm1, %v610_v61  ;;  %873 = vst.msk [vmem:[%s1731_s3 + $0x140] sm:$0xff] %vm832_vm1, %v738_v62  ;;  %v613_v3 = vadd.f32 %v1406_v10, %v612_v1  ;;  %v741_v4 = vadd.f32 %v1406_v10, %v740_v2  ;;  %v614_v5 = vpop.f32.mrb[19].mxu0  ;;  %v742_v6 = vpop.f32.mrb[19].mxu1 }
 0x11d   :  { %842 = vst.msk [vmem:[%s1731_s3 + $0x48] sm:$0xff] %vm832_vm1, %v613_v3  ;;  %874 = vst.msk [vmem:[%s1731_s3 + $0x148] sm:$0xff] %vm832_vm1, %v741_v4 }
 0x120   :  { %v617_v7 = vpop.f32.mrb[20].mxu0  ;;  %v745_v8 = vpop.f32.mrb[20].mxu1 }
 0x121   :  { %v618_v9 = vadd.f32 %v1406_v10, %v617_v7  ;;  %v746_v11 = vadd.f32 %v1406_v10, %v745_v8  ;;  %v619_v12 = vpop.f32.mrb[21].mxu0  ;;  %v747_v13 = vpop.f32.mrb[21].mxu1 }
 0x122   :  { %v620_v14 = vpop.f32.mrb[22].mxu0  ;;  %v748_v15 = vpop.f32.mrb[22].mxu1 }
 0x123   :  { %843 = vst.msk [vmem:[%s1731_s3 + $0x50] sm:$0xff] %vm832_vm1, %v618_v9  ;;  %875 = vst.msk [vmem:[%s1731_s3 + $0x150] sm:$0xff] %vm832_vm1, %v746_v11  ;;  %v621_v16 = vadd.f32 %v1406_v10, %v620_v14  ;;  %v749_v17 = vadd.f32 %v1406_v10, %v748_v15  ;;  %v622_v18 = vpop.f32.mrb[23].mxu0  ;;  %v750_v19 = vpop.f32.mrb[23].mxu1 }
 0x125   :  { %844 = vst.msk [vmem:[%s1731_s3 + $0x58] sm:$0xff] %vm832_vm1, %v621_v16  ;;  %876 = vst.msk [vmem:[%s1731_s3 + $0x158] sm:$0xff] %vm832_vm1, %v749_v17 }
 0x128   :  { %v625_v20 = vpop.f32.mrb[24].mxu0  ;;  %v753_v21 = vpop.f32.mrb[24].mxu1 }
 0x129   :  { %v626_v22 = vadd.f32 %v1406_v10, %v625_v20  ;;  %v754_v23 = vadd.f32 %v1406_v10, %v753_v21  ;;  %v627_v24 = vpop.f32.mrb[25].mxu0  ;;  %v755_v25 = vpop.f32.mrb[25].mxu1 }
 0x12a   :  { %v628_v26 = vpop.f32.mrb[26].mxu0  ;;  %v756_v27 = vpop.f32.mrb[26].mxu1 }
 0x12b   :  { %845 = vst.msk [vmem:[%s1731_s3 + $0x60] sm:$0xff] %vm832_vm1, %v626_v22  ;;  %877 = vst.msk [vmem:[%s1731_s3 + $0x160] sm:$0xff] %vm832_vm1, %v754_v23  ;;  %v629_v28 = vadd.f32 %v1406_v10, %v628_v26  ;;  %v757_v29 = vadd.f32 %v1406_v10, %v756_v27  ;;  %v630_v30 = vpop.f32.mrb[27].mxu0  ;;  %v758_v31 = vpop.f32.mrb[27].mxu1 }
 0x12d   :  { %846 = vst.msk [vmem:[%s1731_s3 + $0x68] sm:$0xff] %vm832_vm1, %v629_v28  ;;  %878 = vst.msk [vmem:[%s1731_s3 + $0x168] sm:$0xff] %vm832_vm1, %v757_v29 }
 0x130   :  { %v633_v32 = vpop.f32.mrb[28].mxu0  ;;  %v761_v33 = vpop.f32.mrb[28].mxu1 }
 0x131   :  { %v634_v34 = vadd.f32 %v1406_v10, %v633_v32  ;;  %v762_v35 = vadd.f32 %v1406_v10, %v761_v33  ;;  %v635_v36 = vpop.f32.mrb[29].mxu0  ;;  %v763_v37 = vpop.f32.mrb[29].mxu1 }
 0x132   :  { %v636_v38 = vpop.f32.mrb[30].mxu0  ;;  %v764_v39 = vpop.f32.mrb[30].mxu1 }
 0x133   :  { %847 = vst.msk [vmem:[%s1731_s3 + $0x70] sm:$0xff] %vm832_vm1, %v634_v34  ;;  %879 = vst.msk [vmem:[%s1731_s3 + $0x170] sm:$0xff] %vm832_vm1, %v762_v35  ;;  %v637_v40 = vadd.f32 %v1406_v10, %v636_v38  ;;  %v765_v41 = vadd.f32 %v1406_v10, %v764_v39  ;;  %v638_v42 = vpop.f32.mrb[31].mxu0  ;;  %v766_v43 = vpop.f32.mrb[31].mxu1 }
 0x135   :  { %848 = vst.msk [vmem:[%s1731_s3 + $0x78] sm:$0xff] %vm832_vm1, %v637_v40  ;;  %880 = vst.msk [vmem:[%s1731_s3 + $0x178] sm:$0xff] %vm832_vm1, %v765_v41 }
 0x138   :  { %v641_v44 = vpop.f32.mrb[32].mxu0  ;;  %v769_v45 = vpop.f32.mrb[32].mxu1 }
 0x139   :  { %v642_v46 = vadd.f32 %v1406_v10, %v641_v44  ;;  %v770_v47 = vadd.f32 %v1406_v10, %v769_v45  ;;  %v643_v48 = vpop.f32.mrb[33].mxu0  ;;  %v771_v49 = vpop.f32.mrb[33].mxu1 }
 0x13a   :  { %v644_v50 = vpop.f32.mrb[34].mxu0  ;;  %v772_v51 = vpop.f32.mrb[34].mxu1 }
 0x13b   :  { %849 = vst.msk [vmem:[%s1731_s3 + $0x80] sm:$0xff] %vm832_vm1, %v642_v46  ;;  %881 = vst.msk [vmem:[%s1731_s3 + $0x180] sm:$0xff] %vm832_vm1, %v770_v47  ;;  %v645_v52 = vadd.f32 %v1406_v10, %v644_v50  ;;  %v773_v53 = vadd.f32 %v1406_v10, %v772_v51  ;;  %v646_v54 = vpop.f32.mrb[35].mxu0  ;;  %v774_v55 = vpop.f32.mrb[35].mxu1 }
 0x13d   :  { %850 = vst.msk [vmem:[%s1731_s3 + $0x88] sm:$0xff] %vm832_vm1, %v645_v52  ;;  %882 = vst.msk [vmem:[%s1731_s3 + $0x188] sm:$0xff] %vm832_vm1, %v773_v53 }
 0x140   :  { %v649_v56 = vpop.f32.mrb[36].mxu0  ;;  %v777_v57 = vpop.f32.mrb[36].mxu1 }
 0x141   :  { %v650_v58 = vadd.f32 %v1406_v10, %v649_v56  ;;  %v778_v59 = vadd.f32 %v1406_v10, %v777_v57  ;;  %v651_v60 = vpop.f32.mrb[37].mxu0  ;;  %v779_v61 = vpop.f32.mrb[37].mxu1 }
 0x142   :  { %v652_v62 = vpop.f32.mrb[38].mxu0  ;;  %v780_v63 = vpop.f32.mrb[38].mxu1 }
 0x143   :  { %851 = vst.msk [vmem:[%s1731_s3 + $0x90] sm:$0xff] %vm832_vm1, %v650_v58  ;;  %883 = vst.msk [vmem:[%s1731_s3 + $0x190] sm:$0xff] %vm832_vm1, %v778_v59  ;;  %v653_v0 = vadd.f32 %v1406_v10, %v652_v62  ;;  %v781_v1 = vadd.f32 %v1406_v10, %v780_v63  ;;  %v654_v2 = vpop.f32.mrb[39].mxu0  ;;  %v782_v3 = vpop.f32.mrb[39].mxu1 }
 0x145   :  { %852 = vst.msk [vmem:[%s1731_s3 + $0x98] sm:$0xff] %vm832_vm1, %v653_v0  ;;  %884 = vst.msk [vmem:[%s1731_s3 + $0x198] sm:$0xff] %vm832_vm1, %v781_v1 }
 0x148   :  { %v657_v4 = vpop.f32.mrb[40].mxu0  ;;  %v785_v5 = vpop.f32.mrb[40].mxu1 }
 0x149   :  { %v658_v6 = vadd.f32 %v1406_v10, %v657_v4  ;;  %v786_v7 = vadd.f32 %v1406_v10, %v785_v5  ;;  %v659_v8 = vpop.f32.mrb[41].mxu0  ;;  %v787_v9 = vpop.f32.mrb[41].mxu1 }
 0x14a   :  { %v660_v11 = vpop.f32.mrb[42].mxu0  ;;  %v788_v12 = vpop.f32.mrb[42].mxu1 }
 0x14b   :  { %853 = vst.msk [vmem:[%s1731_s3 + $0xa0] sm:$0xff] %vm832_vm1, %v658_v6  ;;  %885 = vst.msk [vmem:[%s1731_s3 + $0x1a0] sm:$0xff] %vm832_vm1, %v786_v7  ;;  %v661_v13 = vadd.f32 %v1406_v10, %v660_v11  ;;  %v789_v14 = vadd.f32 %v1406_v10, %v788_v12  ;;  %v662_v15 = vpop.f32.mrb[43].mxu0  ;;  %v790_v16 = vpop.f32.mrb[43].mxu1 }
 0x14d   :  { %854 = vst.msk [vmem:[%s1731_s3 + $0xa8] sm:$0xff] %vm832_vm1, %v661_v13  ;;  %886 = vst.msk [vmem:[%s1731_s3 + $0x1a8] sm:$0xff] %vm832_vm1, %v789_v14 }
 0x150   :  { %v665_v17 = vpop.f32.mrb[44].mxu0  ;;  %v793_v18 = vpop.f32.mrb[44].mxu1 }
 0x151   :  { %v666_v19 = vadd.f32 %v1406_v10, %v665_v17  ;;  %v794_v20 = vadd.f32 %v1406_v10, %v793_v18  ;;  %v667_v21 = vpop.f32.mrb[45].mxu0  ;;  %v795_v22 = vpop.f32.mrb[45].mxu1 }
 0x152   :  { %v668_v23 = vpop.f32.mrb[46].mxu0  ;;  %v796_v24 = vpop.f32.mrb[46].mxu1 }
 0x153   :  { %855 = vst.msk [vmem:[%s1731_s3 + $0xb0] sm:$0xff] %vm832_vm1, %v666_v19  ;;  %887 = vst.msk [vmem:[%s1731_s3 + $0x1b0] sm:$0xff] %vm832_vm1, %v794_v20  ;;  %v669_v25 = vadd.f32 %v1406_v10, %v668_v23  ;;  %v797_v26 = vadd.f32 %v1406_v10, %v796_v24  ;;  %v670_v27 = vpop.f32.mrb[47].mxu0  ;;  %v798_v28 = vpop.f32.mrb[47].mxu1 }
 0x155   :  { %856 = vst.msk [vmem:[%s1731_s3 + $0xb8] sm:$0xff] %vm832_vm1, %v669_v25  ;;  %888 = vst.msk [vmem:[%s1731_s3 + $0x1b8] sm:$0xff] %vm832_vm1, %v797_v26 }
 0x158   :  { %v673_v29 = vpop.f32.mrb[48].mxu0  ;;  %v801_v30 = vpop.f32.mrb[48].mxu1 }
 0x159   :  { %v674_v31 = vadd.f32 %v1406_v10, %v673_v29  ;;  %v802_v32 = vadd.f32 %v1406_v10, %v801_v30  ;;  %v675_v33 = vpop.f32.mrb[49].mxu0  ;;  %v803_v34 = vpop.f32.mrb[49].mxu1 }
 0x15a   :  { %v676_v35 = vpop.f32.mrb[50].mxu0  ;;  %v804_v36 = vpop.f32.mrb[50].mxu1 }
 0x15b   :  { %857 = vst.msk [vmem:[%s1731_s3 + $0xc0] sm:$0xff] %vm832_vm1, %v674_v31  ;;  %889 = vst.msk [vmem:[%s1731_s3 + $0x1c0] sm:$0xff] %vm832_vm1, %v802_v32  ;;  %v677_v37 = vadd.f32 %v1406_v10, %v676_v35  ;;  %v805_v38 = vadd.f32 %v1406_v10, %v804_v36  ;;  %v678_v39 = vpop.f32.mrb[51].mxu0  ;;  %v806_v40 = vpop.f32.mrb[51].mxu1 }
 0x15d   :  { %858 = vst.msk [vmem:[%s1731_s3 + $0xc8] sm:$0xff] %vm832_vm1, %v677_v37  ;;  %890 = vst.msk [vmem:[%s1731_s3 + $0x1c8] sm:$0xff] %vm832_vm1, %v805_v38 }
 0x160   :  { %v681_v41 = vpop.f32.mrb[52].mxu0  ;;  %v809_v42 = vpop.f32.mrb[52].mxu1 }
 0x161   :  { %v682_v43 = vadd.f32 %v1406_v10, %v681_v41  ;;  %v810_v44 = vadd.f32 %v1406_v10, %v809_v42  ;;  %v683_v45 = vpop.f32.mrb[53].mxu0  ;;  %v811_v46 = vpop.f32.mrb[53].mxu1 }
 0x162   :  { %v684_v47 = vpop.f32.mrb[54].mxu0  ;;  %v812_v48 = vpop.f32.mrb[54].mxu1 }
 0x163   :  { %859 = vst.msk [vmem:[%s1731_s3 + $0xd0] sm:$0xff] %vm832_vm1, %v682_v43  ;;  %891 = vst.msk [vmem:[%s1731_s3 + $0x1d0] sm:$0xff] %vm832_vm1, %v810_v44  ;;  %v685_v49 = vadd.f32 %v1406_v10, %v684_v47  ;;  %v813_v50 = vadd.f32 %v1406_v10, %v812_v48  ;;  %v686_v51 = vpop.f32.mrb[55].mxu0  ;;  %v814_v52 = vpop.f32.mrb[55].mxu1 }
 0x165   :  { %860 = vst.msk [vmem:[%s1731_s3 + $0xd8] sm:$0xff] %vm832_vm1, %v685_v49  ;;  %892 = vst.msk [vmem:[%s1731_s3 + $0x1d8] sm:$0xff] %vm832_vm1, %v813_v50 }
 0x168   :  { %v689_v53 = vpop.f32.mrb[56].mxu0  ;;  %v817_v54 = vpop.f32.mrb[56].mxu1 }
 0x169   :  { %v690_v55 = vadd.f32 %v1406_v10, %v689_v53  ;;  %v818_v56 = vadd.f32 %v1406_v10, %v817_v54  ;;  %v691_v57 = vpop.f32.mrb[57].mxu0  ;;  %v819_v58 = vpop.f32.mrb[57].mxu1 }
 0x16a   :  { %v692_v59 = vpop.f32.mrb[58].mxu0  ;;  %v820_v60 = vpop.f32.mrb[58].mxu1 }
 0x16b   :  { %861 = vst.msk [vmem:[%s1731_s3 + $0xe0] sm:$0xff] %vm832_vm1, %v690_v55  ;;  %893 = vst.msk [vmem:[%s1731_s3 + $0x1e0] sm:$0xff] %vm832_vm1, %v818_v56  ;;  %v693_v61 = vadd.f32 %v1406_v10, %v692_v59  ;;  %v821_v62 = vadd.f32 %v1406_v10, %v820_v60  ;;  %v694_v63 = vpop.f32.mrb[59].mxu0  ;;  %v822_v0 = vpop.f32.mrb[59].mxu1 }
 0x16d   :  { %862 = vst.msk [vmem:[%s1731_s3 + $0xe8] sm:$0xff] %vm832_vm1, %v693_v61  ;;  %894 = vst.msk [vmem:[%s1731_s3 + $0x1e8] sm:$0xff] %vm832_vm1, %v821_v62 }
 0x170   :  { %v697_v1 = vpop.f32.mrb[60].mxu0  ;;  %v825_v2 = vpop.f32.mrb[60].mxu1 }
 0x171   :  { %v698_v3 = vadd.f32 %v1406_v10, %v697_v1  ;;  %v826_v4 = vadd.f32 %v1406_v10, %v825_v2  ;;  %v699_v5 = vpop.f32.mrb[61].mxu0  ;;  %v827_v6 = vpop.f32.mrb[61].mxu1 }
 0x172   :  { %v700_v7 = vpop.f32.mrb[62].mxu0  ;;  %v828_v8 = vpop.f32.mrb[62].mxu1 }
 0x173   :  { %863 = vst.msk [vmem:[%s1731_s3 + $0xf0] sm:$0xff] %vm832_vm1, %v698_v3  ;;  %895 = vst.msk [vmem:[%s1731_s3 + $0x1f0] sm:$0xff] %vm832_vm1, %v826_v4  ;;  %v701_v9 = vadd.f32 %v1406_v10, %v700_v7  ;;  %v829_v11 = vadd.f32 %v1406_v10, %v828_v8  ;;  %v702_v12 = vpop.f32.mrb[63].mxu0  ;;  %v830_v13 = vpop.f32.mrb[63].mxu1 }
 0x175   :  { %864 = vst.msk [vmem:[%s1731_s3 + $0xf8] sm:$0xff] %vm832_vm1, %v701_v9  ;;  %896 = vst.msk [vmem:[%s1731_s3 + $0x1f8] sm:$0xff] %vm832_vm1, %v829_v11 }

// kernel: _lambda_.9
= control target key start
LH: loop header
LB: loop body
LE: loop exit
PB: predicated region body
PF: predicated region fallthrough
CT: control target
= control target key end

     0   :  { %v852_v0 = vmov 0   ;;  %vm190_vm0 = vcmask 130048   ;;  %vm392_vm1 = vcmask 257024   ;;  %vm432_vm2 = vcmask 261120   ;;  %s1178_s1 = inlined_call_operand.vmem [shape: bf16[144,32], index: 1, kind: input, shape index: {}]   ;;  %s1179_s0 = inlined_call_operand.vmem [shape: bf16[128,144], index: 0, kind: input, shape index: {}]   ;;  %s1180_s3 = inlined_call_operand.vmem [shape: bf16[32,16], index: 3, kind: input, shape index: {}]   ;;  %s1181_s2 = inlined_call_operand.vmem [shape: f32[1,32], index: 2, kind: input, shape index: {}]   ;;  %s1182_s5 = inlined_call_operand.vmem [shape: bf16[128,32], index: 5, kind: output, shape index: {0}]   ;;  %s1183_s4 = inlined_call_operand.vmem [shape: f32[1,16], index: 4, kind: input, shape index: {}]   ;;  %s1184_s6 = inlined_call_operand.vmem [shape: bf16[128,16], index: 6, kind: output, shape index: {1}]  }
   0x1   :  { %215 = vmatprep.subr.bf16.mxu0 %v852_v0  ;;  %v817_v1 = vld [vmem:[%s1178_s1] sm:$0xff]   ;;  %798 = vmatprep.subr.bf16.mxu1 %v852_v0  ;;  %v818_v2 = vld [vmem:[%s1178_s1 + $0x8] sm:$0xff]   ;;  %v819_v3 = vld [vmem:[%s1178_s1 + $0x10] sm:$0xff]   ;;  %vm634_vm3 = vcmask 125952  }
   0x2   :  { %216 = vmatpush1.bf16.msra.mxu0 %v817_v1  ;;  %807 = vmatpush1.bf16.msra.mxu1 %v817_v1  ;;  %v820_v4 = vld [vmem:[%s1178_s1 + $0x18] sm:$0xff]   ;;  %v828_v5 = vld [vmem:[%s1179_s0 + $0x4] ss:$8 sps:$4 sm:$0xff]   ;;  %v823_v9 = vld [vmem:[%s1178_s1 + $0x30] sm:$0xff]  }
   0x3   :  { %217 = vmatprep.subr.bf16.mxu0 %v852_v0  ;;  %799 = vmatprep.subr.bf16.mxu1 %v852_v0  ;;  %v821_v6 = vld [vmem:[%s1178_s1 + $0x20] sm:$0xff]   ;;  %v822_v8 = vld [vmem:[%s1178_s1 + $0x28] sm:$0xff]   ;;  %v824_v10 = vld [vmem:[%s1178_s1 + $0x38] sm:$0xff]  }
   0x4   :  { %685 = vmatprep.mubr.msk.bf16.mxu0 %vm190_vm0, %v828_v5  ;;  %v843_v7 = vld [vmem:[%s1179_s0 + $0x64] ss:$8 sps:$4 sm:$0xff]   ;;  %v826_v12 = vld [vmem:[%s1179_s0] ss:$8 sps:$4 sm:$0xff]   ;;  %v829_v14 = vld [vmem:[%s1179_s0 + $0x14] ss:$8 sps:$4 sm:$0xff]  }
   0x5   :  { %691 = vmatprep.mubr.msk.bf16.mxu1 %vm190_vm0, %v843_v7  ;;  %v825_v11 = vld [vmem:[%s1178_s1 + $0x40] sm:$0xff]   ;;  %v847_v15 = vld [vmem:[%s1179_s0 + $0x74] ss:$8 sps:$4 sm:$0xff]   ;;  %v831_v16 = vld [vmem:[%s1179_s0 + $0x10] ss:$8 sps:$4 sm:$0xff]  }
   0x6   :  { %218 = vmatpush1.bf16.msra.mxu0 %v818_v2  ;;  %808 = vmatpush1.bf16.msra.mxu1 %v818_v2  ;;  %v841_v13 = vld [vmem:[%s1179_s0 + $0x60] ss:$8 sps:$4 sm:$0xff]   ;;  %v849_v17 = vld [vmem:[%s1179_s0 + $0x70] ss:$8 sps:$4 sm:$0xff]   ;;  %v832_v18 = vld [vmem:[%s1179_s0 + $0x24] ss:$8 sps:$4 sm:$0xff]  }
   0x7   :  { %219 = vmatprep.subr.bf16.mxu0 %v852_v0  ;;  %800 = vmatprep.subr.bf16.mxu1 %v852_v0  ;;  %v834_v19 = vld [vmem:[%s1179_s0 + $0x20] ss:$8 sps:$4 sm:$0xff]   ;;  %v835_v20 = vld [vmem:[%s1179_s0 + $0x34] ss:$8 sps:$4 sm:$0xff]   ;;  %v837_v21 = vld [vmem:[%s1179_s0 + $0x30] ss:$8 sps:$4 sm:$0xff]  }
   0x8   :  { %v838_v22 = vld [vmem:[%s1179_s0 + $0x44] ss:$8 sps:$4 sm:$0xff]   ;;  %v840_v23 = vld [vmem:[%s1179_s0 + $0x40] ss:$8 sps:$4 sm:$0xff]   ;;  %v844_v24 = vld [vmem:[%s1179_s0 + $0x54] ss:$8 sps:$4 sm:$0xff]  }
   0x9   :  { %v846_v25 = vld [vmem:[%s1179_s0 + $0x50] ss:$8 sps:$4 sm:$0xff]   ;;  %v850_v26 = vld [vmem:[%s1180_s3] sm:$0xff]   ;;  %v851_v27 = vld [vmem:[%s1180_s3 + $0x8] sm:$0xff]  }
   0xa   :  { %220 = vmatpush1.bf16.msra.mxu0 %v819_v3  ;;  %809 = vmatpush1.bf16.msra.mxu1 %v819_v3  ;;  %v980_v28 = vld [vmem:[%s1181_s2] ss:$0 sm:$0xff] }
   0xb   :  { %221 = vmatprep.subr.bf16.mxu0 %v852_v0  ;;  %801 = vmatprep.subr.bf16.mxu1 %v852_v0 }
   0xe   :  { %222 = vmatpush1.bf16.msra.mxu0 %v820_v4  ;;  %810 = vmatpush1.bf16.msra.mxu1 %v820_v4 }
   0xf   :  { %223 = vmatprep.subr.bf16.mxu0 %v852_v0  ;;  %802 = vmatprep.subr.bf16.mxu1 %v852_v0 }
  0x12   :  { %224 = vmatpush1.bf16.msra.mxu0 %v821_v6  ;;  %811 = vmatpush1.bf16.msra.mxu1 %v821_v6 }
  0x13   :  { %225 = vmatprep.subr.bf16.mxu0 %v852_v0  ;;  %803 = vmatprep.subr.bf16.mxu1 %v852_v0 }
  0x16   :  { %226 = vmatpush1.bf16.msra.mxu0 %v822_v8  ;;  %812 = vmatpush1.bf16.msra.mxu1 %v822_v8 }
  0x17   :  { %227 = vmatprep.subr.bf16.mxu0 %v852_v0  ;;  %804 = vmatprep.subr.bf16.mxu1 %v852_v0 }
  0x1a   :  { %228 = vmatpush1.bf16.msra.mxu0 %v823_v9  ;;  %813 = vmatpush1.bf16.msra.mxu1 %v823_v9 }
  0x1b   :  { %229 = vmatprep.subr.bf16.mxu0 %v852_v0  ;;  %805 = vmatprep.subr.bf16.mxu1 %v852_v0 }
  0x1e   :  { %230 = vmatpush1.bf16.msra.mxu0 %v824_v10  ;;  %814 = vmatpush1.bf16.msra.mxu1 %v824_v10 }
  0x1f   :  { %231 = vmatprep.subr.bf16.mxu0 %v852_v0  ;;  %806 = vmatprep.subr.bf16.mxu1 %v852_v0 }
  0x22   :  { %232 = vmatpush1.bf16.msra.mxu0 %v825_v11  ;;  %815 = vmatpush1.bf16.msra.mxu1 %v825_v11 }
  0x23   :  { %778 = vmatprep.subr.bf16.mxu1 %v850_v26 }
  0x25   :  { %248 = vmatmul.mubr.bf16.vlgmr.msra.gmra.mrb[0].mxu0 %v826_v12  ;;  %296 = vmatmul.mubr.bf16.vlgmr.msra.gmra.mrb[0].mxu1 %v841_v13 }
  0x26   :  { %686 = vmatprep.mubr.msk.bf16.mxu0 %vm190_vm0, %v829_v14  ;;  %692 = vmatprep.mubr.msk.bf16.mxu1 %vm190_vm0, %v847_v15 }
  0x27   :  { %779 = vmatpush3.bf16.msra.mxu1 %v850_v26 }
  0x28   :  { %780 = vmatprep.subr.bf16.mxu1 %v851_v27 }
  0x2b   :  { %781 = vmatpush3.bf16.msra.mxu1 %v851_v27 }
  0x2d   :  { %256 = vmatmul.mubr.bf16.gmra.mrb[4].mxu0 %v831_v16  ;;  %304 = vmatmul.mubr.bf16.gmra.mrb[4].mxu1 %v849_v17 }
  0x2e   :  { %687 = vmatprep.mubr.msk.bf16.mxu0 %vm190_vm0, %v832_v18 }
  0x35   :  { %264 = vmatmul.mubr.bf16.gmra.mrb[8].mxu0 %v834_v19 }
  0x36   :  { %688 = vmatprep.mubr.msk.bf16.mxu0 %vm190_vm0, %v835_v20 }
  0x3d   :  { %272 = vmatmul.mubr.bf16.gmra.mrb[12].mxu0 %v837_v21 }
  0x3e   :  { %689 = vmatprep.mubr.msk.bf16.mxu0 %vm190_vm0, %v838_v22 }
  0x45   :  { %280 = vmatmul.mubr.bf16.gmra.mrb[16].mxu0 %v840_v23 }
  0x46   :  { %690 = vmatprep.mubr.msk.bf16.mxu0 %vm190_vm0, %v844_v24 }
  0x4d   :  { %288 = vmatmul.mubr.bf16.gmra.mrb[20].mxu0 %v846_v25 }
  0xf8   :  { %v249_v29 = vpop.f32.mrb[0].mxu0  ;;  %v297_v30 = vpop.f32.mrb[0].mxu1 }
  0xf9   :  { %v250_v31 = vadd.f32 %v980_v28, %v249_v29  ;;  %v251_v32 = vpop.f32.mrb[1].mxu0  ;;  %v298_v33 = vadd.f32 %v980_v28, %v297_v30  ;;  %v299_v34 = vpop.f32.mrb[1].mxu1 }
  0xfa   :  { %v252_v35 = vpop.f32.mrb[2].mxu0  ;;  %v300_v36 = vpop.f32.mrb[2].mxu1 }
  0xfb   :  { %v312_v37 = vmax.f32 %v250_v31, 0.0  ;;  %v253_v38 = vadd.f32 %v980_v28, %v252_v35  ;;  %v254_v39 = vpop.f32.mrb[3].mxu0  ;;  %v985_v40 = vmax.f32 %v298_v33, 0.0  ;;  %v301_v41 = vadd.f32 %v980_v28, %v300_v36  ;;  %v302_v42 = vpop.f32.mrb[3].mxu1 }
  0xfd   :  { %v736_v43 = vpack.c.bf16 %v312_v37, %v312_v37  ;;  %v313_v44 = vmax.f32 %v253_v38, 0.0  ;;  %v748_v45 = vpack.c.bf16 %v985_v40, %v985_v40  ;;  %v990_v46 = vmax.f32 %v301_v41, 0.0 }
  0xff   :  { %393 = vst.msk [vmem:[%s1182_s5] sm:$0xf] %vm392_vm1, %v736_v43  ;;  %v328_v47 = vpack.c.bf16 %v313_v44, %v312_v37  ;;  %v737_v48 = vpack.c.bf16 %v313_v44, %v313_v44  ;;  %405 = vst.msk [vmem:[%s1182_s5 + $0x30] sm:$0xf] %vm392_vm1, %v748_v45  ;;  %v334_v49 = vpack.c.bf16 %v990_v46, %v985_v40 }
 0x100   :  { %v749_v50 = vpack.c.bf16 %v990_v46, %v990_v46  ;;  %v257_v51 = vpop.f32.mrb[4].mxu0  ;;  %v305_v52 = vpop.f32.mrb[4].mxu1 }
 0x101   :  { %394 = vst.msk [vmem:[%s1182_s5 + $0x4] sm:$0xf] %vm392_vm1, %v737_v48  ;;  %v258_v53 = vadd.f32 %v980_v28, %v257_v51  ;;  %v259_v54 = vpop.f32.mrb[5].mxu0  ;;  %782 = vmatprep.mubr.msk.bf16.mxu1 %vm432_vm2, %v328_v47  ;;  %v306_v55 = vadd.f32 %v980_v28, %v305_v52  ;;  %v307_v56 = vpop.f32.mrb[5].mxu1 }
 0x102   :  { %406 = vst.msk [vmem:[%s1182_s5 + $0x34] sm:$0xf] %vm392_vm1, %v749_v50  ;;  %v260_v57 = vpop.f32.mrb[6].mxu0  ;;  %v308_v58 = vpop.f32.mrb[6].mxu1 }
 0x103   :  { %v314_v59 = vmax.f32 %v258_v53, 0.0  ;;  %v261_v60 = vadd.f32 %v980_v28, %v260_v57  ;;  %v262_v61 = vpop.f32.mrb[7].mxu0  ;;  %v1016_v62 = vmax.f32 %v306_v55, 0.0  ;;  %v309_v63 = vadd.f32 %v980_v28, %v308_v58  ;;  %v310_v0 = vpop.f32.mrb[7].mxu1 }
 0x105   :  { %v738_v1 = vpack.c.bf16 %v314_v59, %v314_v59  ;;  %v315_v2 = vmax.f32 %v261_v60, 0.0  ;;  %v750_v3 = vpack.c.bf16 %v1016_v62, %v1016_v62  ;;  %v1021_v4 = vmax.f32 %v309_v63, 0.0 }
 0x107   :  { %395 = vst.msk [vmem:[%s1182_s5 + $0x8] sm:$0xf] %vm392_vm1, %v738_v1  ;;  %v329_v5 = vpack.c.bf16 %v315_v2, %v314_v59  ;;  %v739_v6 = vpack.c.bf16 %v315_v2, %v315_v2  ;;  %407 = vst.msk [vmem:[%s1182_s5 + $0x38] sm:$0xf] %vm392_vm1, %v750_v3  ;;  %v335_v7 = vpack.c.bf16 %v1021_v4, %v1016_v62 }
 0x108   :  { %v751_v8 = vpack.c.bf16 %v1021_v4, %v1021_v4  ;;  %v265_v9 = vpop.f32.mrb[8].mxu0 }
 0x109   :  { %396 = vst.msk [vmem:[%s1182_s5 + $0xc] sm:$0xf] %vm392_vm1, %v739_v6  ;;  %v266_v10 = vadd.f32 %v980_v28, %v265_v9  ;;  %v267_v11 = vpop.f32.mrb[9].mxu0  ;;  %783 = vmatmul.mubr.msk.bf16.vlgmr.msra.gmra.mrb[8].mxu1 %vm432_vm2, %v329_v5 }
 0x10a   :  { %408 = vst.msk [vmem:[%s1182_s5 + $0x3c] sm:$0xf] %vm392_vm1, %v751_v8  ;;  %v268_v12 = vpop.f32.mrb[10].mxu0 }
 0x10b   :  { %v316_v13 = vmax.f32 %v266_v10, 0.0  ;;  %v269_v14 = vadd.f32 %v980_v28, %v268_v12  ;;  %v270_v15 = vpop.f32.mrb[11].mxu0 }
 0x10d   :  { %v740_v16 = vpack.c.bf16 %v316_v13, %v316_v13  ;;  %v317_v17 = vmax.f32 %v269_v14, 0.0 }
 0x10f   :  { %397 = vst.msk [vmem:[%s1182_s5 + $0x10] sm:$0xf] %vm392_vm1, %v740_v16  ;;  %v330_v18 = vpack.c.bf16 %v317_v17, %v316_v13  ;;  %v741_v19 = vpack.c.bf16 %v317_v17, %v317_v17 }
 0x110   :  { %v273_v20 = vpop.f32.mrb[12].mxu0 }
 0x111   :  { %398 = vst.msk [vmem:[%s1182_s5 + $0x14] sm:$0xf] %vm392_vm1, %v741_v19  ;;  %v274_v21 = vadd.f32 %v980_v28, %v273_v20  ;;  %v275_v22 = vpop.f32.mrb[13].mxu0  ;;  %786 = vmatprep.mubr.msk.bf16.mxu1 %vm432_vm2, %v330_v18 }
 0x112   :  { %v276_v23 = vpop.f32.mrb[14].mxu0 }
 0x113   :  { %v318_v24 = vmax.f32 %v274_v21, 0.0  ;;  %v277_v25 = vadd.f32 %v980_v28, %v276_v23  ;;  %v278_v26 = vpop.f32.mrb[15].mxu0 }
 0x115   :  { %v742_v27 = vpack.c.bf16 %v318_v24, %v318_v24  ;;  %v319_v29 = vmax.f32 %v277_v25, 0.0 }
 0x117   :  { %399 = vst.msk [vmem:[%s1182_s5 + $0x18] sm:$0xf] %vm392_vm1, %v742_v27  ;;  %v331_v30 = vpack.c.bf16 %v319_v29, %v318_v24  ;;  %v743_v31 = vpack.c.bf16 %v319_v29, %v319_v29 }
 0x118   :  { %v281_v32 = vpop.f32.mrb[16].mxu0 }
 0x119   :  { %400 = vst.msk [vmem:[%s1182_s5 + $0x1c] sm:$0xf] %vm392_vm1, %v743_v31  ;;  %v282_v33 = vadd.f32 %v980_v28, %v281_v32  ;;  %v283_v34 = vpop.f32.mrb[17].mxu0  ;;  %787 = vmatmul.mubr.msk.bf16.gmra.mrb[12].mxu1 %vm432_vm2, %v331_v30 }
 0x11a   :  { %v284_v35 = vpop.f32.mrb[18].mxu0 }
 0x11b   :  { %v320_v36 = vmax.f32 %v282_v33, 0.0  ;;  %v285_v37 = vadd.f32 %v980_v28, %v284_v35  ;;  %v286_v38 = vpop.f32.mrb[19].mxu0 }
 0x11d   :  { %v744_v39 = vpack.c.bf16 %v320_v36, %v320_v36  ;;  %v321_v41 = vmax.f32 %v285_v37, 0.0 }
 0x11f   :  { %401 = vst.msk [vmem:[%s1182_s5 + $0x20] sm:$0xf] %vm392_vm1, %v744_v39  ;;  %v332_v42 = vpack.c.bf16 %v321_v41, %v320_v36  ;;  %v745_v43 = vpack.c.bf16 %v321_v41, %v321_v41 }
 0x120   :  { %v289_v44 = vpop.f32.mrb[20].mxu0 }
 0x121   :  { %402 = vst.msk [vmem:[%s1182_s5 + $0x24] sm:$0xf] %vm392_vm1, %v745_v43  ;;  %v290_v45 = vadd.f32 %v980_v28, %v289_v44  ;;  %v291_v47 = vpop.f32.mrb[21].mxu0  ;;  %790 = vmatprep.mubr.msk.bf16.mxu1 %vm432_vm2, %v332_v42 }
 0x122   :  { %v292_v48 = vpop.f32.mrb[22].mxu0 }
 0x123   :  { %v322_v50 = vmax.f32 %v290_v45, 0.0  ;;  %v293_v51 = vadd.f32 %v980_v28, %v292_v48  ;;  %v294_v52 = vpop.f32.mrb[23].mxu0  ;;  %v1096_v28 = vld [vmem:[%s1183_s4] ss:$0 sm:$0xff] }
 0x125   :  { %v746_v53 = vpack.c.bf16 %v322_v50, %v322_v50  ;;  %v323_v54 = vmax.f32 %v293_v51, 0.0 }
 0x127   :  { %403 = vst.msk [vmem:[%s1182_s5 + $0x28] sm:$0xf] %vm392_vm1, %v746_v53  ;;  %v333_v55 = vpack.c.bf16 %v323_v54, %v322_v50  ;;  %v747_v56 = vpack.c.bf16 %v323_v54, %v323_v54 }
 0x129   :  { %404 = vst.msk [vmem:[%s1182_s5 + $0x2c] sm:$0xf] %vm392_vm1, %v747_v56  ;;  %791 = vmatmul.mubr.msk.bf16.gmra.mrb[16].mxu1 %vm432_vm2, %v333_v55 }
 0x12a   :  { %794 = vmatprep.mubr.msk.bf16.mxu1 %vm432_vm2, %v334_v49 }
 0x131   :  { %795 = vmatmul.mubr.msk.bf16.gmra.mrb[20].mxu1 %vm432_vm2, %v335_v7 }
 0x1dc   :  { %v784_v57 = vpop.f32.mrb[8].mxu1 }
 0x1dd   :  { %v500_v58 = vadd.f32 %v784_v57, %v1096_v28  ;;  %v491_v59 = vpop.f32.mrb[9].mxu1 }
 0x1de   :  { %v492_v60 = vadd.f32 %v1096_v28, %v491_v59  ;;  %v785_v61 = vpop.f32.mrb[10].mxu1 }
 0x1df   :  { %v556_v62 = vmax.f32 %v500_v58, 0.0  ;;  %v503_v63 = vadd.f32 %v785_v61, %v1096_v28  ;;  %v494_v40 = vpop.f32.mrb[11].mxu1 }
 0x1e0   :  { %v554_v46 = vmax.f32 %v492_v60, 0.0  ;;  %v495_v49 = vadd.f32 %v1096_v28, %v494_v40 }
 0x1e1   :  { %v754_v0 = vpack.c.bf16 %v556_v62, %v556_v62  ;;  %v557_v1 = vmax.f32 %v503_v63, 0.0 }
 0x1e2   :  { %v752_v2 = vpack.c.bf16 %v554_v46, %v554_v46  ;;  %v555_v3 = vmax.f32 %v495_v49, 0.0 }
 0x1e3   :  { %637 = vst.msk [vmem:[%s1184_s6 + $0x8] sm:$0xf] %vm634_vm3, %v754_v0  ;;  %v755_v4 = vpack.c.bf16 %v557_v1, %v557_v1 }
 0x1e4   :  { %635 = vst.msk [vmem:[%s1184_s6] sm:$0xf] %vm634_vm3, %v752_v2  ;;  %v753_v5 = vpack.c.bf16 %v555_v3, %v555_v3 }
 0x1e5   :  { %638 = vst.msk [vmem:[%s1184_s6 + $0xc] sm:$0xf] %vm634_vm3, %v755_v4 }
 0x1e6   :  { %636 = vst.msk [vmem:[%s1184_s6 + $0x4] sm:$0xf] %vm634_vm3, %v753_v5 }
 0x1ec   :  { %v788_v6 = vpop.f32.mrb[12].mxu1 }
 0x1ed   :  { %v516_v7 = vadd.f32 %v788_v6, %v1096_v28  ;;  %v507_v8 = vpop.f32.mrb[13].mxu1 }
 0x1ee   :  { %v508_v9 = vadd.f32 %v1096_v28, %v507_v8  ;;  %v789_v10 = vpop.f32.mrb[14].mxu1 }
 0x1ef   :  { %v560_v11 = vmax.f32 %v516_v7, 0.0  ;;  %v519_v12 = vadd.f32 %v789_v10, %v1096_v28  ;;  %v510_v13 = vpop.f32.mrb[15].mxu1 }
 0x1f0   :  { %v558_v14 = vmax.f32 %v508_v9, 0.0  ;;  %v511_v15 = vadd.f32 %v1096_v28, %v510_v13 }
 0x1f1   :  { %v758_v16 = vpack.c.bf16 %v560_v11, %v560_v11  ;;  %v561_v17 = vmax.f32 %v519_v12, 0.0 }
 0x1f2   :  { %v756_v18 = vpack.c.bf16 %v558_v14, %v558_v14  ;;  %v559_v19 = vmax.f32 %v511_v15, 0.0 }
 0x1f3   :  { %641 = vst.msk [vmem:[%s1184_s6 + $0x18] sm:$0xf] %vm634_vm3, %v758_v16  ;;  %v759_v20 = vpack.c.bf16 %v561_v17, %v561_v17 }
 0x1f4   :  { %639 = vst.msk [vmem:[%s1184_s6 + $0x10] sm:$0xf] %vm634_vm3, %v756_v18  ;;  %v757_v21 = vpack.c.bf16 %v559_v19, %v559_v19 }
 0x1f5   :  { %642 = vst.msk [vmem:[%s1184_s6 + $0x1c] sm:$0xf] %vm634_vm3, %v759_v20 }
 0x1f6   :  { %640 = vst.msk [vmem:[%s1184_s6 + $0x14] sm:$0xf] %vm634_vm3, %v757_v21 }
 0x1fc   :  { %v792_v22 = vpop.f32.mrb[16].mxu1 }
 0x1fd   :  { %v532_v23 = vadd.f32 %v792_v22, %v1096_v28  ;;  %v523_v24 = vpop.f32.mrb[17].mxu1 }
 0x1fe   :  { %v524_v25 = vadd.f32 %v1096_v28, %v523_v24  ;;  %v793_v26 = vpop.f32.mrb[18].mxu1 }
 0x1ff   :  { %v564_v27 = vmax.f32 %v532_v23, 0.0  ;;  %v535_v29 = vadd.f32 %v793_v26, %v1096_v28  ;;  %v526_v30 = vpop.f32.mrb[19].mxu1 }
 0x200   :  { %v562_v31 = vmax.f32 %v524_v25, 0.0  ;;  %v527_v32 = vadd.f32 %v1096_v28, %v526_v30 }
 0x201   :  { %v762_v33 = vpack.c.bf16 %v564_v27, %v564_v27  ;;  %v565_v34 = vmax.f32 %v535_v29, 0.0 }
 0x202   :  { %v760_v35 = vpack.c.bf16 %v562_v31, %v562_v31  ;;  %v563_v36 = vmax.f32 %v527_v32, 0.0 }
 0x203   :  { %645 = vst.msk [vmem:[%s1184_s6 + $0x28] sm:$0xf] %vm634_vm3, %v762_v33  ;;  %v763_v37 = vpack.c.bf16 %v565_v34, %v565_v34 }
 0x204   :  { %643 = vst.msk [vmem:[%s1184_s6 + $0x20] sm:$0xf] %vm634_vm3, %v760_v35  ;;  %v761_v38 = vpack.c.bf16 %v563_v36, %v563_v36  ;;  %v796_v39 = vpop.f32.mrb[20].mxu1 }
 0x205   :  { %646 = vst.msk [vmem:[%s1184_s6 + $0x2c] sm:$0xf] %vm634_vm3, %v763_v37  ;;  %v548_v41 = vadd.f32 %v796_v39, %v1096_v28  ;;  %v539_v42 = vpop.f32.mrb[21].mxu1 }
 0x206   :  { %644 = vst.msk [vmem:[%s1184_s6 + $0x24] sm:$0xf] %vm634_vm3, %v761_v38  ;;  %v540_v43 = vadd.f32 %v1096_v28, %v539_v42  ;;  %v797_v44 = vpop.f32.mrb[22].mxu1 }
 0x207   :  { %v568_v45 = vmax.f32 %v548_v41, 0.0  ;;  %v551_v47 = vadd.f32 %v797_v44, %v1096_v28  ;;  %v542_v48 = vpop.f32.mrb[23].mxu1 }
 0x208   :  { %v566_v50 = vmax.f32 %v540_v43, 0.0  ;;  %v543_v51 = vadd.f32 %v1096_v28, %v542_v48 }
 0x209   :  { %v766_v52 = vpack.c.bf16 %v568_v45, %v568_v45  ;;  %v569_v53 = vmax.f32 %v551_v47, 0.0 }
 0x20a   :  { %v764_v54 = vpack.c.bf16 %v566_v50, %v566_v50  ;;  %v567_v55 = vmax.f32 %v543_v51, 0.0 }
 0x20b   :  { %649 = vst.msk [vmem:[%s1184_s6 + $0x38] sm:$0xf] %vm634_vm3, %v766_v52  ;;  %v767_v56 = vpack.c.bf16 %v569_v53, %v569_v53 }
 0x20c   :  { %647 = vst.msk [vmem:[%s1184_s6 + $0x30] sm:$0xf] %vm634_vm3, %v764_v54  ;;  %v765_v57 = vpack.c.bf16 %v567_v55, %v567_v55 }
 0x20d   :  { %650 = vst.msk [vmem:[%s1184_s6 + $0x3c] sm:$0xf] %vm634_vm3, %v767_v56 }
 0x20e   :  { %648 = vst.msk [vmem:[%s1184_s6 + $0x34] sm:$0xf] %vm634_vm3, %v765_v57 }

// kernel: _lambda_.10
= control target key start
LH: loop header
LB: loop body
LE: loop exit
PB: predicated region body
PF: predicated region fallthrough
CT: control target
= control target key end

     0   :  { %v384_v0 = vmov 0   ;;  %vm124_vm0 = vcmask 130048   ;;  %vm200_vm1 = vcmask 257024   ;;  %vm228_vm2 = vcmask 261120   ;;  %s503_s1 = inlined_call_operand.vmem [shape: bf16[144,32], index: 1, kind: input, shape index: {}]   ;;  %s504_s0 = inlined_call_operand.vmem [shape: bf16[32,144], index: 0, kind: input, shape index: {}]   ;;  %s505_s3 = inlined_call_operand.vmem [shape: bf16[32,16], index: 3, kind: input, shape index: {}]   ;;  %s506_s2 = inlined_call_operand.vmem [shape: f32[1,32], index: 2, kind: input, shape index: {}]   ;;  %s507_s5 = inlined_call_operand.vmem [shape: bf16[32,32], index: 5, kind: output, shape index: {0}]   ;;  %s508_s4 = inlined_call_operand.vmem [shape: f32[1,16], index: 4, kind: input, shape index: {}]   ;;  %s509_s6 = inlined_call_operand.vmem [shape: bf16[32,16], index: 6, kind: output, shape index: {1}]  }
   0x1   :  { %131 = vmatprep.subr.bf16.mxu0 %v384_v0  ;;  %v367_v1 = vld [vmem:[%s503_s1] sm:$0xff]   ;;  %v368_v2 = vld [vmem:[%s503_s1 + $0x8] sm:$0xff]   ;;  %v369_v3 = vld [vmem:[%s503_s1 + $0x10] sm:$0xff]   ;;  %vm304_vm3 = vcmask 125952  }
   0x2   :  { %132 = vmatpush1.bf16.msra.mxu0 %v367_v1  ;;  %v370_v4 = vld [vmem:[%s503_s1 + $0x18] sm:$0xff]   ;;  %v378_v5 = vld [vmem:[%s504_s0 + $0x4] ss:$8 sps:$4 sm:$0xff]   ;;  %v373_v8 = vld [vmem:[%s503_s1 + $0x30] sm:$0xff]  }
   0x3   :  { %133 = vmatprep.subr.bf16.mxu0 %v384_v0  ;;  %331 = vmatprep.mubr.msk.bf16.mxu0 %vm124_vm0, %v378_v5  ;;  %v371_v6 = vld [vmem:[%s503_s1 + $0x20] sm:$0xff]   ;;  %v372_v7 = vld [vmem:[%s503_s1 + $0x28] sm:$0xff]   ;;  %v374_v9 = vld [vmem:[%s503_s1 + $0x38] sm:$0xff]  }
   0x4   :  { %v375_v10 = vld [vmem:[%s503_s1 + $0x40] sm:$0xff]   ;;  %v379_v12 = vld [vmem:[%s504_s0 + $0x14] ss:$8 sps:$4 sm:$0xff]   ;;  %v381_v13 = vld [vmem:[%s504_s0 + $0x10] ss:$8 sps:$4 sm:$0xff]  }
   0x5   :  { %v376_v11 = vld [vmem:[%s504_s0] ss:$8 sps:$4 sm:$0xff]  }
   0x6   :  { %134 = vmatpush1.bf16.msra.mxu0 %v368_v2  ;;  %v382_v14 = vld [vmem:[%s505_s3] sm:$0xff]   ;;  %v383_v15 = vld [vmem:[%s505_s3 + $0x8] sm:$0xff]  }
   0x7   :  { %135 = vmatprep.subr.bf16.mxu0 %v384_v0  ;;  %358 = vmatprep.subr.bf16.mxu1 %v382_v14  ;;  %v317_v16 = vld [vmem:[%s506_s2] ss:$0 sm:$0xff] }
   0x8   :  { %359 = vmatpush3.bf16.msra.mxu1 %v382_v14  ;;  %v337_v39 = vld [vmem:[%s508_s4] ss:$0 sm:$0xff] }
   0x9   :  { %360 = vmatprep.subr.bf16.mxu1 %v383_v15 }
   0xa   :  { %136 = vmatpush1.bf16.msra.mxu0 %v369_v3 }
   0xb   :  { %137 = vmatprep.subr.bf16.mxu0 %v384_v0 }
   0xc   :  { %361 = vmatpush3.bf16.msra.mxu1 %v383_v15 }
   0xe   :  { %138 = vmatpush1.bf16.msra.mxu0 %v370_v4 }
   0xf   :  { %139 = vmatprep.subr.bf16.mxu0 %v384_v0 }
  0x12   :  { %140 = vmatpush1.bf16.msra.mxu0 %v371_v6 }
  0x13   :  { %141 = vmatprep.subr.bf16.mxu0 %v384_v0 }
  0x16   :  { %142 = vmatpush1.bf16.msra.mxu0 %v372_v7 }
  0x17   :  { %143 = vmatprep.subr.bf16.mxu0 %v384_v0 }
  0x1a   :  { %144 = vmatpush1.bf16.msra.mxu0 %v373_v8 }
  0x1b   :  { %145 = vmatprep.subr.bf16.mxu0 %v384_v0 }
  0x1e   :  { %146 = vmatpush1.bf16.msra.mxu0 %v374_v9 }
  0x1f   :  { %147 = vmatprep.subr.bf16.mxu0 %v384_v0 }
  0x22   :  { %148 = vmatpush1.bf16.msra.mxu0 %v375_v10 }
  0x25   :  { %164 = vmatmul.mubr.bf16.vlgmr.msra.gmra.mrb[0].mxu0 %v376_v11 }
  0x26   :  { %332 = vmatprep.mubr.msk.bf16.mxu0 %vm124_vm0, %v379_v12 }
  0x2d   :  { %172 = vmatmul.mubr.bf16.gmra.mrb[4].mxu0 %v381_v13 }
  0xf8   :  { %v165_v17 = vpop.f32.mrb[0].mxu0 }
  0xf9   :  { %v166_v18 = vadd.f32 %v317_v16, %v165_v17  ;;  %v167_v19 = vpop.f32.mrb[1].mxu0 }
  0xfa   :  { %v168_v20 = vpop.f32.mrb[2].mxu0 }
  0xfb   :  { %v180_v21 = vmax.f32 %v166_v18, 0.0  ;;  %v169_v22 = vadd.f32 %v317_v16, %v168_v20  ;;  %v170_v23 = vpop.f32.mrb[3].mxu0 }
  0xfd   :  { %v346_v24 = vpack.c.bf16 %v180_v21, %v180_v21  ;;  %v181_v25 = vmax.f32 %v169_v22, 0.0 }
  0xff   :  { %201 = vst.msk [vmem:[%s507_s5] sm:$0xf] %vm200_vm1, %v346_v24  ;;  %v347_v26 = vpack.c.bf16 %v181_v25, %v181_v25  ;;  %v184_v27 = vpack.c.bf16 %v181_v25, %v180_v21 }
 0x100   :  { %v173_v28 = vpop.f32.mrb[4].mxu0 }
 0x101   :  { %202 = vst.msk [vmem:[%s507_s5 + $0x4] sm:$0xf] %vm200_vm1, %v347_v26  ;;  %v174_v29 = vadd.f32 %v317_v16, %v173_v28  ;;  %v175_v30 = vpop.f32.mrb[5].mxu0  ;;  %362 = vmatprep.mubr.msk.bf16.mxu1 %vm228_vm2, %v184_v27 }
 0x102   :  { %v176_v31 = vpop.f32.mrb[6].mxu0 }
 0x103   :  { %v182_v32 = vmax.f32 %v174_v29, 0.0  ;;  %v177_v33 = vadd.f32 %v317_v16, %v176_v31  ;;  %v178_v34 = vpop.f32.mrb[7].mxu0 }
 0x105   :  { %v348_v35 = vpack.c.bf16 %v182_v32, %v182_v32  ;;  %v183_v36 = vmax.f32 %v177_v33, 0.0 }
 0x107   :  { %203 = vst.msk [vmem:[%s507_s5 + $0x8] sm:$0xf] %vm200_vm1, %v348_v35  ;;  %v185_v37 = vpack.c.bf16 %v183_v36, %v182_v32  ;;  %v349_v38 = vpack.c.bf16 %v183_v36, %v183_v36 }
 0x109   :  { %204 = vst.msk [vmem:[%s507_s5 + $0xc] sm:$0xf] %vm200_vm1, %v349_v38  ;;  %363 = vmatmul.mubr.msk.bf16.vlgmr.msra.gmra.mrb[0].mxu1 %vm228_vm2, %v185_v37 }
 0x1dc   :  { %v364_v40 = vpop.f32.mrb[0].mxu1 }
 0x1dd   :  { %v278_v41 = vadd.f32 %v364_v40, %v337_v39  ;;  %v269_v42 = vpop.f32.mrb[1].mxu1 }
 0x1de   :  { %v270_v43 = vadd.f32 %v337_v39, %v269_v42  ;;  %v365_v44 = vpop.f32.mrb[2].mxu1 }
 0x1df   :  { %v286_v45 = vmax.f32 %v278_v41, 0.0  ;;  %v281_v46 = vadd.f32 %v365_v44, %v337_v39  ;;  %v272_v47 = vpop.f32.mrb[3].mxu1 }
 0x1e0   :  { %v284_v48 = vmax.f32 %v270_v43, 0.0  ;;  %v273_v49 = vadd.f32 %v337_v39, %v272_v47 }
 0x1e1   :  { %v352_v50 = vpack.c.bf16 %v286_v45, %v286_v45  ;;  %v287_v51 = vmax.f32 %v281_v46, 0.0 }
 0x1e2   :  { %v350_v52 = vpack.c.bf16 %v284_v48, %v284_v48  ;;  %v285_v53 = vmax.f32 %v273_v49, 0.0 }
 0x1e3   :  { %307 = vst.msk [vmem:[%s509_s6 + $0x8] sm:$0xf] %vm304_vm3, %v352_v50  ;;  %v353_v54 = vpack.c.bf16 %v287_v51, %v287_v51 }
 0x1e4   :  { %305 = vst.msk [vmem:[%s509_s6] sm:$0xf] %vm304_vm3, %v350_v52  ;;  %v351_v55 = vpack.c.bf16 %v285_v53, %v285_v53 }
 0x1e5   :  { %308 = vst.msk [vmem:[%s509_s6 + $0xc] sm:$0xf] %vm304_vm3, %v353_v54 }
 0x1e6   :  { %306 = vst.msk [vmem:[%s509_s6 + $0x4] sm:$0xf] %vm304_vm3, %v351_v55 }

// kernel: _lambda_.11
= control target key start
LH: loop header
LB: loop body
LE: loop exit
PB: predicated region body
PF: predicated region fallthrough
CT: control target
= control target key end

     0   :  { %v178_v0 = vmov 0   ;;  %vm101_vm0 = vcmask 130048   ;;  %vm147_vm1 = vcmask 257024   ;;  %s235_s1 = inlined_call_operand.vmem [shape: bf16[144,32], index: 1, kind: input, shape index: {}]   ;;  %s236_s0 = inlined_call_operand.vmem [shape: bf16[8,144], index: 0, kind: input, shape index: {}]   ;;  %s237_s2 = inlined_call_operand.vmem [shape: f32[1,32], index: 2, kind: input, shape index: {}]   ;;  %s238_s3 = inlined_call_operand.vmem [shape: bf16[8,32], index: 3, kind: output, shape index: {}]  }
   0x1   :  { %105 = vmatprep.subr.bf16.mxu0 %v178_v0  ;;  %v167_v1 = vld [vmem:[%s235_s1] sm:$0xff]   ;;  %v168_v2 = vld [vmem:[%s235_s1 + $0x8] sm:$0xff]   ;;  %v169_v3 = vld [vmem:[%s235_s1 + $0x10] sm:$0xff]  }
   0x2   :  { %106 = vmatpush1.bf16.msra.mxu0 %v167_v1  ;;  %v15_v4 = vld [vmem:[%s236_s0] sm:$0xff]  ;;  %v170_v5 = vld [vmem:[%s235_s1 + $0x18] sm:$0xff]   ;;  %v172_v8 = vld [vmem:[%s235_s1 + $0x28] sm:$0xff]  }
   0x3   :  { %107 = vmatprep.subr.bf16.mxu0 %v178_v0  ;;  %v155_v6 = vcombine.high %v15_v4, %v15_v4  ;;  %v171_v7 = vld [vmem:[%s235_s1 + $0x20] sm:$0xff]   ;;  %v173_v9 = vld [vmem:[%s235_s1 + $0x30] sm:$0xff]   ;;  %v174_v10 = vld [vmem:[%s235_s1 + $0x38] sm:$0xff]   ;;  %v154_v12 = vcombine.low %v15_v4, %v15_v4 }
   0x4   :  { %v175_v11 = vld [vmem:[%s235_s1 + $0x40] sm:$0xff]  }
   0x5   :  { %165 = vmatprep.mubr.msk.bf16.mxu0 %vm101_vm0, %v155_v6  ;;  %v153_v13 = vld [vmem:[%s237_s2] ss:$0 sm:$0xff] }
   0x6   :  { %108 = vmatpush1.bf16.msra.mxu0 %v168_v2 }
   0x7   :  { %109 = vmatprep.subr.bf16.mxu0 %v178_v0 }
   0xa   :  { %110 = vmatpush1.bf16.msra.mxu0 %v169_v3 }
   0xb   :  { %111 = vmatprep.subr.bf16.mxu0 %v178_v0 }
   0xe   :  { %112 = vmatpush1.bf16.msra.mxu0 %v170_v5 }
   0xf   :  { %113 = vmatprep.subr.bf16.mxu0 %v178_v0 }
  0x12   :  { %114 = vmatpush1.bf16.msra.mxu0 %v171_v7 }
  0x13   :  { %115 = vmatprep.subr.bf16.mxu0 %v178_v0 }
  0x16   :  { %116 = vmatpush1.bf16.msra.mxu0 %v172_v8 }
  0x17   :  { %117 = vmatprep.subr.bf16.mxu0 %v178_v0 }
  0x1a   :  { %118 = vmatpush1.bf16.msra.mxu0 %v173_v9 }
  0x1b   :  { %119 = vmatprep.subr.bf16.mxu0 %v178_v0 }
  0x1e   :  { %120 = vmatpush1.bf16.msra.mxu0 %v174_v10 }
  0x1f   :  { %121 = vmatprep.subr.bf16.mxu0 %v178_v0 }
  0x22   :  { %122 = vmatpush1.bf16.msra.mxu0 %v175_v11 }
  0x25   :  { %138 = vmatmul.mubr.bf16.vlgmr.msra.gmra.mrb[0].mxu0 %v154_v12 }
  0xf8   :  { %v139_v14 = vpop.f32.mrb[0].mxu0 }
  0xf9   :  { %v140_v15 = vadd.f32 %v153_v13, %v139_v14  ;;  %v141_v16 = vpop.f32.mrb[1].mxu0 }
  0xfa   :  { %v142_v17 = vpop.f32.mrb[2].mxu0 }
  0xfb   :  { %v145_v18 = vmax.f32 %v140_v15, 0.0  ;;  %v143_v19 = vpop.f32.mrb[3].mxu0 }
  0xfd   :  { %v146_v20 = vpack.c.bf16 %v145_v18, %v145_v18 }
  0xff   :  { %148 = vst.msk [vmem:[%s238_s3] sm:$0xf] %vm147_vm1, %v146_v20 }

// kernel: _lambda_.13
= control target key start
LH: loop header
LB: loop body
LE: loop exit
PB: predicated region body
PF: predicated region fallthrough
CT: control target
= control target key end

     0   :  { %v937_v1 = vmov 0.0   ;;  %vm938_vm0 = vmmov 0   ;;  %vm368_vm1 = vcmask 261120   ;;  %vm642_vm2 = vcmask 883712   ;;  %s1254_s1 = inlined_call_operand.vmem [shape: bf16[288,108], index: 1, kind: input, shape index: {}]   ;;  %s1255_s0 = inlined_call_operand.vmem [shape: bf16[168,288], index: 0, kind: input, shape index: {}]   ;;  %s1256_s2 = inlined_call_operand.vmem [shape: f32[1,108], index: 2, kind: input, shape index: {}]   ;;  %s1257_s3 = inlined_call_operand.vmem [shape: f32[168,108], index: 3, kind: output, shape index: {}]  }
   0x1   :  { %v876_v0 = vld [vmem:[%s1254_s1 + $0x40] sm:$0xff]   ;;  %826 = vmatprep.subr.bf16.mxu1 %v937_v1  ;;  %830 = vmatprep.mubr.msk.bf16.mxu1 %vm938_vm0, %v937_v1  ;;  %v878_v3 = vld [vmem:[%s1254_s1 + $0x48] sm:$0xff]   ;;  %v880_v5 = vld [vmem:[%s1254_s1 + $0x50] sm:$0xff]  }
   0x2   :  { %v877_v2 = vld [vmem:[%s1254_s1] sm:$0xff]   ;;  %731 = vmatprep.subr.bf16.mxu0 %v876_v0  ;;  %v879_v4 = vld [vmem:[%s1254_s1 + $0x8] sm:$0xff]   ;;  %v881_v6 = vld [vmem:[%s1254_s1 + $0x10] sm:$0xff]  }
   0x3   :  { %732 = vmatpush3.bf16.msra.mxu0 %v877_v2  ;;  %v882_v7 = vld [vmem:[%s1254_s1 + $0x58] sm:$0xff]   ;;  %v884_v9 = vld [vmem:[%s1254_s1 + $0x60] sm:$0xff]   ;;  %v886_v12 = vld [vmem:[%s1254_s1 + $0x68] sm:$0xff]  }
   0x4   :  { %733 = vmatprep.subr.bf16.mxu0 %v878_v3  ;;  %v883_v8 = vld [vmem:[%s1254_s1 + $0x18] sm:$0xff]   ;;  %v890_v10 = vld [vmem:[%s1254_s1 + $0x80] sm:$0xff]   ;;  %v887_v13 = vld [vmem:[%s1254_s1 + $0x28] sm:$0xff]  }
   0x5   :  { %v885_v11 = vld [vmem:[%s1254_s1 + $0x20] sm:$0xff]   ;;  %827 = vmatpush3.bf16.msra.mxu1 %v890_v10  ;;  %v888_v14 = vld [vmem:[%s1254_s1 + $0x70] sm:$0xff]   ;;  %v896_v16 = vld [vmem:[%s1254_s1 + $0x88] sm:$0xff]  }
   0x6   :  { %828 = vmatprep.subr.bf16.mxu1 %v937_v1  ;;  %v895_v15 = vld [vmem:[%s1255_s0 + $0x4] ss:$12 sps:$4 sm:$0xff]   ;;  %v897_v17 = vld [vmem:[%s1255_s0 + $0x8] ss:$12 sps:$4 sm:$0xff]   ;;  %v891_v19 = vld [vmem:[%s1254_s1 + $0x78] sm:$0xff]  }
   0x7   :  { %734 = vmatpush3.bf16.msra.mxu0 %v879_v4  ;;  %434 = vmatprep.mubr.bf16.mxu0 %v895_v15  ;;  %v889_v18 = vld [vmem:[%s1254_s1 + $0x30] sm:$0xff]   ;;  %v892_v20 = vld [vmem:[%s1254_s1 + $0x38] sm:$0xff]   ;;  %v901_v21 = vld [vmem:[%s1255_s0 + $0x20] ss:$12 sps:$4 sm:$0xff]  }
   0x8   :  { %735 = vmatprep.subr.bf16.mxu0 %v880_v5  ;;  %v893_v22 = vld [vmem:[%s1255_s0] ss:$12 sps:$4 sm:$0xff]   ;;  %v898_v23 = vld [vmem:[%s1255_s0 + $0x1c] ss:$12 sps:$4 sm:$0xff]   ;;  %v905_v24 = vld [vmem:[%s1255_s0 + $0x38] ss:$12 sps:$4 sm:$0xff]  }
   0x9   :  { %829 = vmatpush3.bf16.msra.mxu1 %v896_v16  ;;  %v900_v25 = vld [vmem:[%s1255_s0 + $0x18] ss:$12 sps:$4 sm:$0xff]   ;;  %v902_v26 = vld [vmem:[%s1255_s0 + $0x34] ss:$12 sps:$4 sm:$0xff]   ;;  %v909_v27 = vld [vmem:[%s1255_s0 + $0x50] ss:$12 sps:$4 sm:$0xff]  }
   0xa   :  { %v904_v28 = vld [vmem:[%s1255_s0 + $0x30] ss:$12 sps:$4 sm:$0xff]   ;;  %v906_v29 = vld [vmem:[%s1255_s0 + $0x4c] ss:$12 sps:$4 sm:$0xff]   ;;  %v913_v30 = vld [vmem:[%s1255_s0 + $0x68] ss:$12 sps:$4 sm:$0xff]  }
   0xb   :  { %736 = vmatpush3.bf16.msra.mxu0 %v881_v6  ;;  %v908_v31 = vld [vmem:[%s1255_s0 + $0x48] ss:$12 sps:$4 sm:$0xff]   ;;  %v910_v32 = vld [vmem:[%s1255_s0 + $0x64] ss:$12 sps:$4 sm:$0xff]   ;;  %v917_v33 = vld [vmem:[%s1255_s0 + $0x80] ss:$12 sps:$4 sm:$0xff]  }
   0xc   :  { %737 = vmatprep.subr.bf16.mxu0 %v882_v7  ;;  %831 = vmatmul.mubr.msk.bf16.vlgmr.msra.gmra.mrb[0].mxu1 %vm368_vm1, %v897_v17  ;;  %v912_v34 = vld [vmem:[%s1255_s0 + $0x60] ss:$12 sps:$4 sm:$0xff]   ;;  %v914_v35 = vld [vmem:[%s1255_s0 + $0x7c] ss:$12 sps:$4 sm:$0xff]   ;;  %v921_v36 = vld [vmem:[%s1255_s0 + $0x98] ss:$12 sps:$4 sm:$0xff]  }
   0xd   :  { %834 = vmatprep.mubr.msk.bf16.mxu1 %vm938_vm0, %v937_v1  ;;  %v916_v37 = vld [vmem:[%s1255_s0 + $0x78] ss:$12 sps:$4 sm:$0xff]   ;;  %v918_v38 = vld [vmem:[%s1255_s0 + $0x94] ss:$12 sps:$4 sm:$0xff]   ;;  %v925_v39 = vld [vmem:[%s1255_s0 + $0xb0] ss:$12 sps:$4 sm:$0xff]  }
   0xe   :  { %v920_v40 = vld [vmem:[%s1255_s0 + $0x90] ss:$12 sps:$4 sm:$0xff]   ;;  %v922_v41 = vld [vmem:[%s1255_s0 + $0xac] ss:$12 sps:$4 sm:$0xff]   ;;  %v929_v42 = vld [vmem:[%s1255_s0 + $0xc8] ss:$12 sps:$4 sm:$0xff]  }
   0xf   :  { %738 = vmatpush3.bf16.msra.mxu0 %v883_v8  ;;  %v924_v43 = vld [vmem:[%s1255_s0 + $0xa8] ss:$12 sps:$4 sm:$0xff]   ;;  %v926_v44 = vld [vmem:[%s1255_s0 + $0xc4] ss:$12 sps:$4 sm:$0xff]   ;;  %v933_v45 = vld [vmem:[%s1255_s0 + $0xe0] ss:$12 sps:$4 sm:$0xff]  }
  0x10   :  { %739 = vmatprep.subr.bf16.mxu0 %v884_v9  ;;  %v928_v46 = vld [vmem:[%s1255_s0 + $0xc0] ss:$12 sps:$4 sm:$0xff]   ;;  %v930_v47 = vld [vmem:[%s1255_s0 + $0xdc] ss:$12 sps:$4 sm:$0xff]   ;;  %v55_v48 = vld [vmem:[%s1255_s0 + $0xf0] sm:$0xff] }
  0x11   :  { %v936_v49 = vld [vmem:[%s1255_s0 + $0xf8] ss:$0 sps:$4 sm:$0xff]   ;;  %v700_v51 = vcombine.high %v55_v48, %v55_v48  ;;  %v699_v52 = vcombine.low %v55_v48, %v55_v48  ;;  %v1147_v62 = vld [vmem:[%s1256_s2] ss:$0 sm:$0xff] }
  0x12   :  { %v932_v50 = vld [vmem:[%s1255_s0 + $0xd8] ss:$12 sps:$4 sm:$0xff]  }
  0x13   :  { %740 = vmatpush3.bf16.msra.mxu0 %v885_v11 }
  0x14   :  { %741 = vmatprep.subr.bf16.mxu0 %v886_v12  ;;  %835 = vmatmul.mubr.msk.bf16.gmra.mrb[4].mxu1 %vm368_vm1, %v901_v21 }
  0x15   :  { %838 = vmatprep.mubr.msk.bf16.mxu1 %vm938_vm0, %v937_v1 }
  0x17   :  { %742 = vmatpush3.bf16.msra.mxu0 %v887_v13 }
  0x18   :  { %743 = vmatprep.subr.bf16.mxu0 %v888_v14 }
  0x1b   :  { %744 = vmatpush3.bf16.msra.mxu0 %v889_v18 }
  0x1c   :  { %745 = vmatprep.subr.bf16.mxu0 %v891_v19  ;;  %839 = vmatmul.mubr.msk.bf16.gmra.mrb[8].mxu1 %vm368_vm1, %v905_v24 }
  0x1d   :  { %842 = vmatprep.mubr.msk.bf16.mxu1 %vm938_vm0, %v937_v1 }
  0x1f   :  { %746 = vmatpush3.bf16.msra.mxu0 %v892_v20 }
  0x22   :  { %435 = vmatmul.mubr.bf16.vlgmr.msra.gmra.mrb[0].mxu0 %v893_v22 }
  0x23   :  { %442 = vmatprep.mubr.bf16.mxu0 %v898_v23 }
  0x24   :  { %843 = vmatmul.mubr.msk.bf16.gmra.mrb[12].mxu1 %vm368_vm1, %v909_v27 }
  0x25   :  { %846 = vmatprep.mubr.msk.bf16.mxu1 %vm938_vm0, %v937_v1 }
  0x2a   :  { %443 = vmatmul.mubr.bf16.gmra.mrb[4].mxu0 %v900_v25 }
  0x2b   :  { %450 = vmatprep.mubr.bf16.mxu0 %v902_v26 }
  0x2c   :  { %847 = vmatmul.mubr.msk.bf16.gmra.mrb[16].mxu1 %vm368_vm1, %v913_v30 }
  0x2d   :  { %850 = vmatprep.mubr.msk.bf16.mxu1 %vm938_vm0, %v937_v1 }
  0x32   :  { %451 = vmatmul.mubr.bf16.gmra.mrb[8].mxu0 %v904_v28 }
  0x33   :  { %458 = vmatprep.mubr.bf16.mxu0 %v906_v29 }
  0x34   :  { %851 = vmatmul.mubr.msk.bf16.gmra.mrb[20].mxu1 %vm368_vm1, %v917_v33 }
  0x35   :  { %854 = vmatprep.mubr.msk.bf16.mxu1 %vm938_vm0, %v937_v1 }
  0x3a   :  { %459 = vmatmul.mubr.bf16.gmra.mrb[12].mxu0 %v908_v31 }
  0x3b   :  { %466 = vmatprep.mubr.bf16.mxu0 %v910_v32 }
  0x3c   :  { %855 = vmatmul.mubr.msk.bf16.gmra.mrb[24].mxu1 %vm368_vm1, %v921_v36 }
  0x3d   :  { %858 = vmatprep.mubr.msk.bf16.mxu1 %vm938_vm0, %v937_v1 }
  0x42   :  { %467 = vmatmul.mubr.bf16.gmra.mrb[16].mxu0 %v912_v34 }
  0x43   :  { %474 = vmatprep.mubr.bf16.mxu0 %v914_v35 }
  0x44   :  { %859 = vmatmul.mubr.msk.bf16.gmra.mrb[28].mxu1 %vm368_vm1, %v925_v39 }
  0x45   :  { %862 = vmatprep.mubr.msk.bf16.mxu1 %vm938_vm0, %v937_v1 }
  0x4a   :  { %475 = vmatmul.mubr.bf16.gmra.mrb[20].mxu0 %v916_v37 }
  0x4b   :  { %482 = vmatprep.mubr.bf16.mxu0 %v918_v38 }
  0x4c   :  { %863 = vmatmul.mubr.msk.bf16.gmra.mrb[32].mxu1 %vm368_vm1, %v929_v42 }
  0x4d   :  { %866 = vmatprep.mubr.msk.bf16.mxu1 %vm938_vm0, %v937_v1 }
  0x52   :  { %483 = vmatmul.mubr.bf16.gmra.mrb[24].mxu0 %v920_v40 }
  0x53   :  { %490 = vmatprep.mubr.bf16.mxu0 %v922_v41 }
  0x54   :  { %867 = vmatmul.mubr.msk.bf16.gmra.mrb[36].mxu1 %vm368_vm1, %v933_v45 }
  0x55   :  { %870 = vmatprep.mubr.msk.bf16.mxu1 %vm938_vm0, %v937_v1 }
  0x5a   :  { %491 = vmatmul.mubr.bf16.gmra.mrb[28].mxu0 %v924_v43 }
  0x5b   :  { %498 = vmatprep.mubr.bf16.mxu0 %v926_v44 }
  0x5c   :  { %871 = vmatmul.mubr.msk.bf16.gmra.mrb[40].mxu1 %vm368_vm1, %v936_v49 }
  0x62   :  { %499 = vmatmul.mubr.bf16.gmra.mrb[32].mxu0 %v928_v46 }
  0x63   :  { %506 = vmatprep.mubr.bf16.mxu0 %v930_v47 }
  0x6a   :  { %507 = vmatmul.mubr.bf16.gmra.mrb[36].mxu0 %v932_v50 }
  0x6b   :  { %514 = vmatprep.mubr.bf16.mxu0 %v700_v51 }
  0x72   :  { %515 = vmatmul.mubr.bf16.gmra.mrb[40].mxu0 %v699_v52 }
  0xdf   :  { %v556_v53 = vpop.f32.mrb[0].mxu1 }
  0xe0   :  { %v832_v54 = vpop.f32.mrb[1].mxu1 }
  0xe1   :  { %v559_v55 = vpop.f32.mrb[2].mxu1 }
  0xe2   :  { %v833_v56 = vpop.f32.mrb[3].mxu1 }
  0xe7   :  { %v564_v57 = vpop.f32.mrb[4].mxu1 }
  0xe8   :  { %v836_v58 = vpop.f32.mrb[5].mxu1 }
  0xe9   :  { %v567_v60 = vpop.f32.mrb[6].mxu1 }
  0xea   :  { %v837_v63 = vpop.f32.mrb[7].mxu1 }
  0xef   :  { %v572_v7 = vpop.f32.mrb[8].mxu1 }
  0xf0   :  { %v840_v8 = vpop.f32.mrb[9].mxu1 }
  0xf1   :  { %v575_v11 = vpop.f32.mrb[10].mxu1 }
  0xf2   :  { %v841_v13 = vpop.f32.mrb[11].mxu1 }
  0xf5   :  { %v747_v59 = vpop.f32.mrb[0].mxu0 }
  0xf6   :  { %v748_v61 = vpop.f32.mrb[1].mxu0 }
  0xf7   :  { %v749_v0 = vadd.f32 %v748_v61, %v747_v59  ;;  %v750_v1 = vpop.f32.mrb[2].mxu0  ;;  %v580_v21 = vpop.f32.mrb[12].mxu1 }
  0xf8   :  { %v751_v2 = vpop.f32.mrb[3].mxu0  ;;  %v844_v22 = vpop.f32.mrb[13].mxu1 }
  0xf9   :  { %v437_v3 = vadd.f32 %v749_v0, %v1147_v62  ;;  %v752_v4 = vadd.f32 %v751_v2, %v750_v1  ;;  %v583_v25 = vpop.f32.mrb[14].mxu1 }
  0xfa   :  { %v845_v27 = vpop.f32.mrb[15].mxu1 }
  0xfb   :  { %v557_v5 = vadd.f32 %v556_v53, %v437_v3  ;;  %v440_v6 = vadd.f32 %v752_v4, %v1147_v62 }
  0xfd   :  { %643 = vst.msk [vmem:[%s1257_s3] sm:$0xff] %vm642_vm2, %v557_v5  ;;  %v560_v9 = vadd.f32 %v559_v55, %v440_v6  ;;  %v753_v10 = vpop.f32.mrb[4].mxu0 }
  0xfe   :  { %v754_v12 = vpop.f32.mrb[5].mxu0 }
  0xff   :  { %644 = vst.msk [vmem:[%s1257_s3 + $0x8] sm:$0xff] %vm642_vm2, %v560_v9  ;;  %v755_v14 = vadd.f32 %v754_v12, %v753_v10  ;;  %v756_v15 = vpop.f32.mrb[6].mxu0  ;;  %v588_v35 = vpop.f32.mrb[16].mxu1 }
 0x100   :  { %v757_v16 = vpop.f32.mrb[7].mxu0  ;;  %v848_v36 = vpop.f32.mrb[17].mxu1 }
 0x101   :  { %v445_v17 = vadd.f32 %v755_v14, %v1147_v62  ;;  %v758_v18 = vadd.f32 %v757_v16, %v756_v15  ;;  %v591_v39 = vpop.f32.mrb[18].mxu1 }
 0x102   :  { %v849_v41 = vpop.f32.mrb[19].mxu1 }
 0x103   :  { %v565_v19 = vadd.f32 %v564_v57, %v445_v17  ;;  %v448_v20 = vadd.f32 %v758_v18, %v1147_v62 }
 0x105   :  { %645 = vst.msk [vmem:[%s1257_s3 + $0x10] sm:$0xff] %vm642_vm2, %v565_v19  ;;  %v568_v23 = vadd.f32 %v567_v60, %v448_v20  ;;  %v759_v24 = vpop.f32.mrb[8].mxu0 }
 0x106   :  { %v760_v26 = vpop.f32.mrb[9].mxu0 }
 0x107   :  { %646 = vst.msk [vmem:[%s1257_s3 + $0x18] sm:$0xff] %vm642_vm2, %v568_v23  ;;  %v761_v28 = vadd.f32 %v760_v26, %v759_v24  ;;  %v762_v29 = vpop.f32.mrb[10].mxu0  ;;  %v596_v49 = vpop.f32.mrb[20].mxu1 }
 0x108   :  { %v763_v30 = vpop.f32.mrb[11].mxu0  ;;  %v852_v50 = vpop.f32.mrb[21].mxu1 }
 0x109   :  { %v453_v31 = vadd.f32 %v761_v28, %v1147_v62  ;;  %v764_v32 = vadd.f32 %v763_v30, %v762_v29  ;;  %v599_v53 = vpop.f32.mrb[22].mxu1 }
 0x10a   :  { %v853_v55 = vpop.f32.mrb[23].mxu1 }
 0x10b   :  { %v573_v33 = vadd.f32 %v572_v7, %v453_v31  ;;  %v456_v34 = vadd.f32 %v764_v32, %v1147_v62 }
 0x10d   :  { %647 = vst.msk [vmem:[%s1257_s3 + $0x20] sm:$0xff] %vm642_vm2, %v573_v33  ;;  %v576_v37 = vadd.f32 %v575_v11, %v456_v34  ;;  %v765_v38 = vpop.f32.mrb[12].mxu0 }
 0x10e   :  { %v766_v40 = vpop.f32.mrb[13].mxu0 }
 0x10f   :  { %648 = vst.msk [vmem:[%s1257_s3 + $0x28] sm:$0xff] %vm642_vm2, %v576_v37  ;;  %v767_v42 = vadd.f32 %v766_v40, %v765_v38  ;;  %v768_v43 = vpop.f32.mrb[14].mxu0  ;;  %v604_v0 = vpop.f32.mrb[24].mxu1 }
 0x110   :  { %v769_v44 = vpop.f32.mrb[15].mxu0  ;;  %v856_v1 = vpop.f32.mrb[25].mxu1 }
 0x111   :  { %v461_v45 = vadd.f32 %v767_v42, %v1147_v62  ;;  %v770_v46 = vadd.f32 %v769_v44, %v768_v43  ;;  %v607_v4 = vpop.f32.mrb[26].mxu1 }
 0x112   :  { %v857_v6 = vpop.f32.mrb[27].mxu1 }
 0x113   :  { %v581_v47 = vadd.f32 %v580_v21, %v461_v45  ;;  %v464_v48 = vadd.f32 %v770_v46, %v1147_v62 }
 0x115   :  { %649 = vst.msk [vmem:[%s1257_s3 + $0x30] sm:$0xff] %vm642_vm2, %v581_v47  ;;  %v584_v51 = vadd.f32 %v583_v25, %v464_v48  ;;  %v771_v52 = vpop.f32.mrb[16].mxu0 }
 0x116   :  { %v772_v54 = vpop.f32.mrb[17].mxu0 }
 0x117   :  { %650 = vst.msk [vmem:[%s1257_s3 + $0x38] sm:$0xff] %vm642_vm2, %v584_v51  ;;  %v773_v56 = vadd.f32 %v772_v54, %v771_v52  ;;  %v774_v57 = vpop.f32.mrb[18].mxu0  ;;  %v612_v14 = vpop.f32.mrb[28].mxu1 }
 0x118   :  { %v775_v58 = vpop.f32.mrb[19].mxu0  ;;  %v860_v15 = vpop.f32.mrb[29].mxu1 }
 0x119   :  { %v469_v59 = vadd.f32 %v773_v56, %v1147_v62  ;;  %v776_v60 = vadd.f32 %v775_v58, %v774_v57  ;;  %v615_v18 = vpop.f32.mrb[30].mxu1 }
 0x11a   :  { %v861_v20 = vpop.f32.mrb[31].mxu1 }
 0x11b   :  { %v589_v61 = vadd.f32 %v588_v35, %v469_v59  ;;  %v472_v63 = vadd.f32 %v776_v60, %v1147_v62 }
 0x11d   :  { %651 = vst.msk [vmem:[%s1257_s3 + $0x40] sm:$0xff] %vm642_vm2, %v589_v61  ;;  %v592_v2 = vadd.f32 %v591_v39, %v472_v63  ;;  %v777_v3 = vpop.f32.mrb[20].mxu0 }
 0x11e   :  { %v778_v5 = vpop.f32.mrb[21].mxu0 }
 0x11f   :  { %652 = vst.msk [vmem:[%s1257_s3 + $0x48] sm:$0xff] %vm642_vm2, %v592_v2  ;;  %v779_v7 = vadd.f32 %v778_v5, %v777_v3  ;;  %v780_v8 = vpop.f32.mrb[22].mxu0  ;;  %v620_v28 = vpop.f32.mrb[32].mxu1 }
 0x120   :  { %v781_v9 = vpop.f32.mrb[23].mxu0  ;;  %v864_v29 = vpop.f32.mrb[33].mxu1 }
 0x121   :  { %v477_v10 = vadd.f32 %v779_v7, %v1147_v62  ;;  %v782_v11 = vadd.f32 %v781_v9, %v780_v8  ;;  %v623_v32 = vpop.f32.mrb[34].mxu1 }
 0x122   :  { %v865_v34 = vpop.f32.mrb[35].mxu1 }
 0x123   :  { %v597_v12 = vadd.f32 %v596_v49, %v477_v10  ;;  %v480_v13 = vadd.f32 %v782_v11, %v1147_v62 }
 0x125   :  { %653 = vst.msk [vmem:[%s1257_s3 + $0x50] sm:$0xff] %vm642_vm2, %v597_v12  ;;  %v600_v16 = vadd.f32 %v599_v53, %v480_v13  ;;  %v783_v17 = vpop.f32.mrb[24].mxu0 }
 0x126   :  { %v784_v19 = vpop.f32.mrb[25].mxu0 }
 0x127   :  { %654 = vst.msk [vmem:[%s1257_s3 + $0x58] sm:$0xff] %vm642_vm2, %v600_v16  ;;  %v785_v21 = vadd.f32 %v784_v19, %v783_v17  ;;  %v786_v22 = vpop.f32.mrb[26].mxu0  ;;  %v628_v42 = vpop.f32.mrb[36].mxu1 }
 0x128   :  { %v787_v23 = vpop.f32.mrb[27].mxu0  ;;  %v868_v43 = vpop.f32.mrb[37].mxu1 }
 0x129   :  { %v485_v24 = vadd.f32 %v785_v21, %v1147_v62  ;;  %v788_v25 = vadd.f32 %v787_v23, %v786_v22  ;;  %v631_v46 = vpop.f32.mrb[38].mxu1 }
 0x12a   :  { %v869_v48 = vpop.f32.mrb[39].mxu1 }
 0x12b   :  { %v605_v26 = vadd.f32 %v604_v0, %v485_v24  ;;  %v488_v27 = vadd.f32 %v788_v25, %v1147_v62 }
 0x12d   :  { %655 = vst.msk [vmem:[%s1257_s3 + $0x60] sm:$0xff] %vm642_vm2, %v605_v26  ;;  %v608_v30 = vadd.f32 %v607_v4, %v488_v27  ;;  %v789_v31 = vpop.f32.mrb[28].mxu0 }
 0x12e   :  { %v790_v33 = vpop.f32.mrb[29].mxu0 }
 0x12f   :  { %656 = vst.msk [vmem:[%s1257_s3 + $0x68] sm:$0xff] %vm642_vm2, %v608_v30  ;;  %v791_v35 = vadd.f32 %v790_v33, %v789_v31  ;;  %v792_v36 = vpop.f32.mrb[30].mxu0  ;;  %v636_v56 = vpop.f32.mrb[40].mxu1 }
 0x130   :  { %v793_v37 = vpop.f32.mrb[31].mxu0  ;;  %v872_v57 = vpop.f32.mrb[41].mxu1 }
 0x131   :  { %v493_v38 = vadd.f32 %v791_v35, %v1147_v62  ;;  %v794_v39 = vadd.f32 %v793_v37, %v792_v36  ;;  %v639_v60 = vpop.f32.mrb[42].mxu1 }
 0x132   :  { %v873_v63 = vpop.f32.mrb[43].mxu1 }
 0x133   :  { %v613_v40 = vadd.f32 %v612_v14, %v493_v38  ;;  %v496_v41 = vadd.f32 %v794_v39, %v1147_v62 }
 0x135   :  { %657 = vst.msk [vmem:[%s1257_s3 + $0x70] sm:$0xff] %vm642_vm2, %v613_v40  ;;  %v616_v44 = vadd.f32 %v615_v18, %v496_v41  ;;  %v795_v45 = vpop.f32.mrb[32].mxu0 }
 0x136   :  { %v796_v47 = vpop.f32.mrb[33].mxu0 }
 0x137   :  { %658 = vst.msk [vmem:[%s1257_s3 + $0x78] sm:$0xff] %vm642_vm2, %v616_v44  ;;  %v797_v49 = vadd.f32 %v796_v47, %v795_v45  ;;  %v798_v50 = vpop.f32.mrb[34].mxu0 }
 0x138   :  { %v799_v51 = vpop.f32.mrb[35].mxu0 }
 0x139   :  { %v501_v52 = vadd.f32 %v797_v49, %v1147_v62  ;;  %v800_v53 = vadd.f32 %v799_v51, %v798_v50 }
 0x13b   :  { %v621_v54 = vadd.f32 %v620_v28, %v501_v52  ;;  %v504_v55 = vadd.f32 %v800_v53, %v1147_v62 }
 0x13d   :  { %659 = vst.msk [vmem:[%s1257_s3 + $0x80] sm:$0xff] %vm642_vm2, %v621_v54  ;;  %v624_v58 = vadd.f32 %v623_v32, %v504_v55  ;;  %v801_v59 = vpop.f32.mrb[36].mxu0 }
 0x13e   :  { %v802_v61 = vpop.f32.mrb[37].mxu0 }
 0x13f   :  { %660 = vst.msk [vmem:[%s1257_s3 + $0x88] sm:$0xff] %vm642_vm2, %v624_v58  ;;  %v803_v0 = vadd.f32 %v802_v61, %v801_v59  ;;  %v804_v1 = vpop.f32.mrb[38].mxu0 }
 0x140   :  { %v805_v2 = vpop.f32.mrb[39].mxu0 }
 0x141   :  { %v509_v3 = vadd.f32 %v803_v0, %v1147_v62  ;;  %v806_v4 = vadd.f32 %v805_v2, %v804_v1 }
 0x143   :  { %v629_v5 = vadd.f32 %v628_v42, %v509_v3  ;;  %v512_v6 = vadd.f32 %v806_v4, %v1147_v62 }
 0x145   :  { %661 = vst.msk [vmem:[%s1257_s3 + $0x90] sm:$0xff] %vm642_vm2, %v629_v5  ;;  %v632_v7 = vadd.f32 %v631_v46, %v512_v6  ;;  %v807_v8 = vpop.f32.mrb[40].mxu0 }
 0x146   :  { %v808_v9 = vpop.f32.mrb[41].mxu0 }
 0x147   :  { %662 = vst.msk [vmem:[%s1257_s3 + $0x98] sm:$0xff] %vm642_vm2, %v632_v7  ;;  %v809_v10 = vadd.f32 %v808_v9, %v807_v8  ;;  %v810_v11 = vpop.f32.mrb[42].mxu0 }
 0x148   :  { %v811_v12 = vpop.f32.mrb[43].mxu0 }
 0x149   :  { %v517_v13 = vadd.f32 %v809_v10, %v1147_v62 }
 0x14b   :  { %v637_v14 = vadd.f32 %v636_v56, %v517_v13 }
 0x14d   :  { %663 = vst.msk [vmem:[%s1257_s3 + $0xa0] sm:$0xff] %vm642_vm2, %v637_v14 }

</bundles_post_ra>
